<compile_context>
chip_gen: v6e
topology: v6e:2x2x1
jax: 0.10.0
libtpu: 0.0.40
codegen_flags: <defaults>
</compile_context>

<pallas_src>
import functools
import math

import numpy as np
import jax
import jax.numpy as jnp
from jax.experimental import pallas as pl
from jax.experimental.pallas import tpu as pltpu


# ----------------------------------------------------------------------------
# helpers
# ----------------------------------------------------------------------------
def _erf_poly(x):
    # Abramowitz & Stegun 7.1.26, |err| <= 1.5e-7; keeps nn.GELU (exact) semantics.
    a1, a2, a3, a4, a5 = 0.254829592, -0.284496736, 1.421413741, -1.453152027, 1.061405429
    p = 0.3275911
    sgn = jnp.where(x >= 0.0, 1.0, -1.0)
    z = jnp.abs(x)
    t = 1.0 / (1.0 + p * z)
    poly = ((((a5 * t + a4) * t + a3) * t + a2) * t + a1) * t
    return sgn * (1.0 - poly * jnp.exp(-z * z))


def _gelu_exact(x):
    return 0.5 * x * (1.0 + _erf_poly(x * 0.7071067811865476))


def _parallel_params():
    return pltpu.CompilerParams(dimension_semantics=("parallel",))


# ----------------------------------------------------------------------------
# Kernel 1: patch embedding (Conv2d k=p, s=p) as a per-batch fused matmul
# ----------------------------------------------------------------------------
def _patch_embed_kernel(x_ref, w_ref, b_ref, o_ref):
    o_ref[0] = jnp.dot(x_ref[0].astype(jnp.bfloat16), w_ref[...],
                       preferred_element_type=jnp.float32) + b_ref[...]


def patch_embed_matmul(patches, w, b):
    """patches: (B, N, K) f32 ; w: (K, D) ; b: (D,) -> (B, N, D) f32."""
    B, N, K = patches.shape
    D = w.shape[1]
    return pl.pallas_call(
        _patch_embed_kernel,
        out_shape=jax.ShapeDtypeStruct((B, N, D), jnp.float32),
        grid=(B,),
        in_specs=[pl.BlockSpec((1, N, K), lambda i: (i, 0, 0)),
                  pl.BlockSpec((K, D), lambda i: (0, 0)),
                  pl.BlockSpec((1, D), lambda i: (0, 0))],
        out_specs=pl.BlockSpec((1, N, D), lambda i: (i, 0, 0)),
        compiler_params=_parallel_params(),
    )(patches.astype(jnp.float32), w.astype(jnp.bfloat16),
      b.reshape(1, D).astype(jnp.float32))


# ----------------------------------------------------------------------------
# Kernel 2: fully fused ViT block (pre-norm attention + MLP, residuals inside)
# ----------------------------------------------------------------------------
def _vit_block_kernel(x_ref, ln1_g_ref, ln1_b_ref, wqkv_ref, bqkv_ref,
                      wproj_ref, bproj_ref, ln2_g_ref, ln2_b_ref,
                      wfc1_ref, bfc1_ref, wfc2_ref, bfc2_ref,
                      o_ref, qkv_scratch, *, num_heads, head_dim):
    f32 = jnp.float32
    bf16 = jnp.bfloat16
    x = x_ref[0]                                            # (T, D) f32
    D = num_heads * head_dim

    def layer_norm(v, g_ref, b_ref):
        mu = jnp.mean(v, axis=-1, keepdims=True)
        c = v - mu
        var = jnp.mean(c * c, axis=-1, keepdims=True)
        return c * jax.lax.rsqrt(var + 1e-5) * g_ref[...] + b_ref[...]

    # ---- attention: LN1 -> qkv -> per-head SDPA -> summed per-head projections ----
    h1 = layer_norm(x, ln1_g_ref, ln1_b_ref)
    qkv_scratch[...] = jnp.dot(h1.astype(bf16), wqkv_ref[...],
                               preferred_element_type=f32) + bqkv_ref[...]
    scale = head_dim ** -0.5
    attn_out = jnp.zeros_like(x)
    for h in range(num_heads):
        off = h * head_dim
        q = qkv_scratch[:, off:off + head_dim].astype(bf16)          # (T, hd)
        k = qkv_scratch[:, D + off:D + off + head_dim].astype(bf16)  # (T, hd)
        v = qkv_scratch[:, 2 * D + off:2 * D + off + head_dim].astype(bf16)
        s = jax.lax.dot_general(q, k, (((1,), (1,)), ((), ())),
                                preferred_element_type=f32) * scale   # (T, T)
        s = s - jnp.max(s, axis=-1, keepdims=True)
        p = jnp.exp(s)
        p = p * pl.reciprocal(jnp.sum(p, axis=-1, keepdims=True), approx=True)
        oh = jnp.dot(p.astype(bf16), v, preferred_element_type=f32)   # (T, hd)
        # proj(concat_h oh) == sum_h oh @ Wproj[rows of head h]  (avoids a concat)
        attn_out = attn_out + jnp.dot(oh.astype(bf16),
                                      wproj_ref[off:off + head_dim, :],
                                      preferred_element_type=f32)
    x = x + attn_out + bproj_ref[...]

    # ---- MLP: LN2 -> fc1 -> GELU -> fc2 (+ residual) ----
    h2 = layer_norm(x, ln2_g_ref, ln2_b_ref)
    z = jnp.dot(h2.astype(bf16), wfc1_ref[...], preferred_element_type=f32) + bfc1_ref[...]
    z = _gelu_exact(z)
    x = x + jnp.dot(z.astype(bf16), wfc2_ref[...],
                    preferred_element_type=f32) + bfc2_ref[...]
    o_ref[0] = x


def vit_block(x, p, num_heads):
    B, T, D = x.shape
    hd = D // num_heads
    hidden = p["fc1_w"].shape[0]

    def row(a):
        return a.reshape(1, -1).astype(jnp.float32)

    def full(shape):
        return pl.BlockSpec(shape, lambda i, _n=len(shape): (0,) * _n)

    wqkv = p["qkv_w"].T.astype(jnp.bfloat16)       # (D, 3D)
    wproj = p["proj_w"].T.astype(jnp.bfloat16)     # (D, D)
    wfc1 = p["fc1_w"].T.astype(jnp.bfloat16)       # (D, hidden)
    wfc2 = p["fc2_w"].T.astype(jnp.bfloat16)       # (hidden, D)

    return pl.pallas_call(
        functools.partial(_vit_block_kernel, num_heads=num_heads, head_dim=hd),
        out_shape=jax.ShapeDtypeStruct((B, T, D), jnp.float32),
        grid=(B,),
        in_specs=[pl.BlockSpec((1, T, D), lambda i: (i, 0, 0)),
                  full((1, D)), full((1, D)),
                  full((D, 3 * D)), full((1, 3 * D)),
                  full((D, D)), full((1, D)),
                  full((1, D)), full((1, D)),
                  full((D, hidden)), full((1, hidden)),
                  full((hidden, D)), full((1, D))],
        out_specs=pl.BlockSpec((1, T, D), lambda i: (i, 0, 0)),
        scratch_shapes=[pltpu.VMEM((T, 3 * D), jnp.float32)],
        compiler_params=_parallel_params(),
    )(x.astype(jnp.float32),
      row(p["ln1_g"]), row(p["ln1_b"]), wqkv, row(p["qkv_b"]),
      wproj, row(p["proj_b"]), row(p["ln2_g"]), row(p["ln2_b"]),
      wfc1, row(p["fc1_b"]), wfc2, row(p["fc2_b"]))


# ----------------------------------------------------------------------------
# Kernel 3: channel-major fused 3x3 conv chain (+BN+ReLU per stage, opt. 1x1 head)
#           im2col happens inside the kernel via shifted ref slices of the padded
#           flat-pixel axis; a fused double-conv keeps the intermediate in VMEM.
# ----------------------------------------------------------------------------
def _conv_chain_kernel(*refs, H, W, n_stages, has_head, out_dtype):
    P = H * W
    lpad = W + 1
    bf16 = jnp.bfloat16
    f32 = jnp.float32

    idx = 0
    x_ref = refs[idx]; idx += 1          # (1, Cin0, P + 2*lpad) bf16
    mask_ref = refs[idx]; idx += 1       # (9, 1, P) bf16  (column-edge validity)
    stage_refs = []
    for _ in range(n_stages):
        stage_refs.append((refs[idx], refs[idx + 1], refs[idx + 2]))
        idx += 3
    if has_head:
        wh_ref, bh_ref = refs[idx], refs[idx + 1]
        idx += 2
    o_ref = refs[idx]; idx += 1
    mid_ref = refs[idx] if n_stages > 1 else None   # VMEM (C_mid, P + 2*lpad) bf16

    offsets = [(dy, dx) for dy in (-1, 0, 1) for dx in (-1, 0, 1)]

    out_val = None
    for si, (w_ref, s_ref, t_ref) in enumerate(stage_refs):
        acc = None
        for t, (dy, dx) in enumerate(offsets):
            start = (dy + 1) * W + (dx + 1)
            if si == 0:
                tap = x_ref[0, :, start:start + P]          # (Cin, P) bf16
            else:
                tap = mid_ref[:, start:start + P]
            if dx != 0:  # y-boundary handled by the zero pads; mask only column wrap
                tap = tap * mask_ref[t]
            contrib = jnp.dot(w_ref[t], tap, preferred_element_type=f32)
            acc = contrib if acc is None else acc + contrib
        # folded inference BatchNorm + conv bias, then ReLU
        y = jnp.maximum(acc * s_ref[...] + t_ref[...], 0.0)
        if si < n_stages - 1:
            mid_ref[...] = jnp.zeros(mid_ref.shape, bf16)
            mid_ref[:, lpad:lpad + P] = y.astype(bf16)
        else:
            out_val = y

    if has_head:  # fused 1x1 prediction head (+ bias)
        out_val = jnp.dot(wh_ref[...], out_val.astype(bf16),
                          preferred_element_type=f32) + bh_ref[...]
    o_ref[0] = out_val.astype(out_dtype)


def _make_tap_masks(H, W):
    ys, xs = np.meshgrid(np.arange(H), np.arange(W), indexing="ij")
    ms = []
    for dy in (-1, 0, 1):
        for dx in (-1, 0, 1):
            valid = ((ys + dy >= 0) & (ys + dy < H) &
                     (xs + dx >= 0) & (xs + dx < W))
            ms.append(valid.reshape(-1))
    return jnp.asarray(np.stack(ms)[:, None, :], dtype=jnp.bfloat16)   # (9, 1, P)


def conv3x3_chain(x_cm, H, W, stages, head=None, out_dtype=jnp.bfloat16):
    """x_cm: (B, Cin, H*W) channel-major.
    stages: list of dicts {w: (Cout, Cin, 3, 3), scale: (Cout,), shift: (Cout,)},
    each stage = conv(k=3,'same') -> folded BN affine -> ReLU.
    head: optional (w1x1 (Co, Ci), bias (Co,)) fused 1x1 conv at the end."""
    B, Cin, P = x_cm.shape
    assert P == H * W
    lpad = W + 1
    x_pad = jnp.pad(x_cm.astype(jnp.bfloat16), ((0, 0), (0, 0), (lpad, lpad)))
    masks = _make_tap_masks(H, W)

    inputs = [x_pad, masks]
    in_specs = [pl.BlockSpec((1, Cin, P + 2 * lpad), lambda i: (i, 0, 0)),
                pl.BlockSpec((9, 1, P), lambda i: (0, 0, 0))]

    n_stages = len(stages)
    c_prev, mid_c = Cin, None
    for si, st in enumerate(stages):
        w = st["w"]
        Cout = w.shape[0]
        w9 = jnp.transpose(w, (2, 3, 0, 1)).reshape(9, Cout, c_prev).astype(jnp.bfloat16)
        inputs += [w9,
                   st["scale"].reshape(Cout, 1).astype(jnp.float32),
                   st["shift"].reshape(Cout, 1).astype(jnp.float32)]
        in_specs += [pl.BlockSpec((9, Cout, c_prev), lambda i: (0, 0, 0)),
                     pl.BlockSpec((Cout, 1), lambda i: (0, 0)),
                     pl.BlockSpec((Cout, 1), lambda i: (0, 0))]
        if si < n_stages - 1:
            mid_c = Cout
        c_prev = Cout

    c_out = c_prev
    if head is not None:
        wh, bh = head
        c_out = wh.shape[0]
        inputs += [wh.reshape(c_out, c_prev).astype(jnp.bfloat16),
                   bh.reshape(c_out, 1).astype(jnp.float32)]
        in_specs += [pl.BlockSpec((c_out, c_prev), lambda i: (0, 0)),
                     pl.BlockSpec((c_out, 1), lambda i: (0, 0))]

    scratch = []
    if n_stages > 1:
        scratch = [pltpu.VMEM((mid_c, P + 2 * lpad), jnp.bfloat16)]

    return pl.pallas_call(
        functools.partial(_conv_chain_kernel, H=H, W=W, n_stages=n_stages,
                          has_head=head is not None, out_dtype=out_dtype),
        out_shape=jax.ShapeDtypeStruct((B, c_out, P), out_dtype),
        grid=(B,),
        in_specs=in_specs,
        out_specs=pl.BlockSpec((1, c_out, P), lambda i: (i, 0, 0)),
        scratch_shapes=scratch,
        compiler_params=_parallel_params(),
    )(*inputs)


# ----------------------------------------------------------------------------
# Kernel 4: channel-major ConvTranspose2d(k=2, s=2, bias=False)
# ----------------------------------------------------------------------------
def _conv_transpose2x2_kernel(x_ref, w_ref, o_ref):
    x = x_ref[0]                                            # (Cin, P) bf16
    for ab in range(4):
        o_ref[0, ab] = jnp.dot(w_ref[ab], x,
                               preferred_element_type=jnp.float32).astype(jnp.bfloat16)


def conv_transpose2x2(x_cm, w, H, W):
    """x_cm: (B, Cin, H*W); w: (Cin, Cout, 2, 2) PyTorch layout.
    Returns (B, Cout, (2H)*(2W)) channel-major bf16."""
    B, Cin, P = x_cm.shape
    Cout = w.shape[1]
    w4 = jnp.transpose(w, (2, 3, 1, 0)).reshape(4, Cout, Cin).astype(jnp.bfloat16)
    out = pl.pallas_call(
        _conv_transpose2x2_kernel,
        out_shape=jax.ShapeDtypeStruct((B, 4, Cout, P), jnp.bfloat16),
        grid=(B,),
        in_specs=[pl.BlockSpec((1, Cin, P), lambda i: (i, 0, 0)),
                  pl.BlockSpec((4, Cout, Cin), lambda i: (0, 0, 0))],
        out_specs=pl.BlockSpec((1, 4, Cout, P), lambda i: (i, 0, 0, 0)),
        compiler_params=_parallel_params(),
    )(x_cm.astype(jnp.bfloat16), w4)
    # pixel shuffle (XLA glue): (B, 2(a), 2(b), Cout, H, W) -> (B, Cout, 2H, 2W)
    out = out.reshape(B, 2, 2, Cout, H, W).transpose(0, 3, 4, 1, 5, 2)
    return out.reshape(B, Cout, 4 * P)


# ----------------------------------------------------------------------------
# inference-mode BatchNorm folding for a ConvBlock (conv bias + BN -> affine)
# ----------------------------------------------------------------------------
def fold_bn(cb):
    eps = 1e-5
    inv = 1.0 / jnp.sqrt(cb["bn_var"] + eps)
    scale = cb["bn_g"] * inv
    shift = cb["bn_b"] + (cb["b"] - cb["bn_mean"]) * scale
    return dict(w=cb["w"], scale=scale, shift=shift)


# ----------------------------------------------------------------------------
# UNETR config / parameters / forward
# ----------------------------------------------------------------------------
class Cfg:
    input_shape = (16, 16, 1)     # (y, x, channels)
    patch_size = 4
    embed_dim = 32
    depth = 3
    num_heads = 4
    mlp_ratio = 4.0
    num_filters = 8
    output_channels = (1,)
    ViT_hidd_mult = 3
    k_size = 3

    @property
    def tuf(self):                # total_upscale_factor
        return int(math.log2(self.patch_size))


def init_unetr_params(key, cfg):
    ks = iter(jax.random.split(key, 256))

    def nxt():
        return next(ks)

    def xavier(shape, fan_in, fan_out):
        bound = math.sqrt(6.0 / (fan_in + fan_out))
        return jax.random.uniform(nxt(), shape, jnp.float32, -bound, bound)

    def dense(out_f, in_f):
        return xavier((out_f, in_f), in_f, out_f)

    def conv_w(out_c, in_c, k):
        return xavier((out_c, in_c, k, k), in_c * k * k, out_c * k * k)

    def convT_w(in_c, out_c, k=2):
        return xavier((in_c, out_c, k, k), in_c * k * k, out_c * k * k)

    def bn(c):  # deterministic, non-trivial inference-mode BN stats
        return dict(g=1.0 + 0.1 * jax.random.normal(nxt(), (c,), jnp.float32),
                    b=0.1 * jax.random.normal(nxt(), (c,), jnp.float32),
                    mean=0.1 * jax.random.normal(nxt(), (c,), jnp.float32),
                    var=1.0 + 0.1 * jnp.abs(jax.random.normal(nxt(), (c,), jnp.float32)))

    def conv_blk(out_c, in_c, k):
        bnp = bn(out_c)
        return dict(w=conv_w(out_c, in_c, k), b=jnp.zeros((out_c,), jnp.float32),
                    bn_g=bnp["g"], bn_b=bnp["b"], bn_mean=bnp["mean"], bn_var=bnp["var"])

    def double_blk(in_c, out_c, k):
        return dict(c1=conv_blk(out_c, in_c, k), c2=conv_blk(out_c, out_c, k))

    D, C, p, nf, k = cfg.embed_dim, cfg.input_shape[-1], cfg.patch_size, cfg.num_filters, cfg.k_size
    num_patches = (cfg.input_shape[0] // p) * (cfg.input_shape[1] // p)
    hidden = int(D * cfg.mlp_ratio)
    tuf = cfg.tuf

    def vit_blk():
        return dict(
            ln1_g=jnp.ones((D,), jnp.float32), ln1_b=jnp.zeros((D,), jnp.float32),
            qkv_w=dense(3 * D, D), qkv_b=jnp.zeros((3 * D,), jnp.float32),
            proj_w=dense(D, D), proj_b=jnp.zeros((D,), jnp.float32),
            ln2_g=jnp.ones((D,), jnp.float32), ln2_b=jnp.zeros((D,), jnp.float32),
            fc1_w=dense(hidden, D), fc1_b=jnp.zeros((hidden,), jnp.float32),
            fc2_w=dense(D, hidden), fc2_b=jnp.zeros((D,), jnp.float32),
        )

    blue, yellow, green = [], [], []
    for layer in reversed(range(1, tuf)):
        stage = []
        in_size = D
        for _ in range(tuf - layer):
            oc = nf * 2 ** layer
            stage.append(dict(ct_w=convT_w(in_size, oc), cb=conv_blk(oc, oc, k)))
            in_size = oc
        blue.append(stage)
        yellow.append(double_blk(in_size * 2, in_size, k))
        green.append(convT_w(in_size, nf * 2 ** (layer - 1)))

    params = dict(
        patch_embed=dict(w=conv_w(D, C, p), b=jnp.zeros((D,), jnp.float32)),
        cls_token=jnp.zeros((1, 1, D), jnp.float32),
        pos_embed=jnp.zeros((1, num_patches + 1, D), jnp.float32),
        blocks=[vit_blk() for _ in range(cfg.depth)],
        bottleneck_w=convT_w(D, nf * 2 ** (tuf - 1)),
        blue=blue, yellow=yellow, green=green,
        yellow_first=double_blk(C, nf, k),
        yellow_last=double_blk(nf * 2, nf, k),
        last_w=conv_w(cfg.output_channels[0], nf, 1),
        last_b=jnp.zeros((cfg.output_channels[0],), jnp.float32),
    )
    return params


def unetr_forward(params, x_nchw, cfg):
    B, C, H, W = x_nchw.shape
    p, D = cfg.patch_size, cfg.embed_dim
    hp, wp = H // p, W // p
    nf = cfg.num_filters

    # ---- patch embedding (Conv2d k=p, s=p) as a fused per-batch matmul ----
    patches = x_nchw.reshape(B, C, hp, p, wp, p).transpose(0, 2, 4, 1, 3, 5)
    patches = patches.reshape(B, hp * wp, C * p * p)
    w_pe = params["patch_embed"]["w"].reshape(D, C * p * p).T
    tok = patch_embed_matmul(patches, w_pe, params["patch_embed"]["b"])   # (B, N, D)

    cls = jnp.broadcast_to(params["cls_token"], (B, 1, D))
    x = jnp.concatenate([cls, tok], axis=1) + params["pos_embed"]

    # ---- ViT encoder: one fused Pallas kernel per block ----
    skip_idx = [cfg.ViT_hidd_mult * l for l in range(1, cfg.tuf)]
    skips = []
    for i, blk in enumerate(params["blocks"]):
        x = vit_block(x, blk, cfg.num_heads)
        if i + 1 in skip_idx:
            skips.insert(0, x[:, 1:, :])
    # (NOTE: self.norm is defined in the module but never used in forward)

    def to_cm(tokens):  # (B, num_patches, D) -> (B, D, hp*wp)  channel-major
        return jnp.transpose(tokens, (0, 2, 1))

    # ---- decoder (channel-major bf16 activations) ----
    xs = conv_transpose2x2(to_cm(x[:, 1:, :]), params["bottleneck_w"], hp, wp)
    cur_h, cur_w = 2 * hp, 2 * wp

    for i in range(len(params["green"])):
        z = to_cm(skips[i])
        zh, zw = hp, wp
        for pair in params["blue"][i]:
            z = conv_transpose2x2(z, pair["ct_w"], zh, zw)
            zh, zw = 2 * zh, 2 * zw
            z = conv3x3_chain(z, zh, zw, [fold_bn(pair["cb"])])
        xs = jnp.concatenate([xs, z], axis=1)
        xs = conv3x3_chain(xs, cur_h, cur_w,
                           [fold_bn(params["yellow"][i]["c1"]),
                            fold_bn(params["yellow"][i]["c2"])])
        xs = conv_transpose2x2(xs, params["green"][i], cur_h, cur_w)
        cur_h, cur_w = 2 * cur_h, 2 * cur_w

    first_skip = conv3x3_chain(x_nchw.reshape(B, C, H * W), H, W,
                               [fold_bn(params["yellow_first"]["c1"]),
                                fold_bn(params["yellow_first"]["c2"])])
    xs = jnp.concatenate([first_skip, xs], axis=1)
    # final double conv with the 1x1 prediction head fused into the same kernel
    out = conv3x3_chain(xs, H, W,
                        [fold_bn(params["yellow_last"]["c1"]),
                         fold_bn(params["yellow_last"]["c2"])],
                        head=(params["last_w"].reshape(cfg.output_channels[0], nf),
                              params["last_b"]),
                        out_dtype=jnp.float32)
    return out.reshape(B, cfg.output_channels[0], H, W)     # NCHW ('pred')


# ----------------------------------------------------------------------------
if __name__ == "__main__":
    cfg = Cfg()
    key = jax.random.PRNGKey(0)
    pkey, xkey = jax.random.split(key)
    params = init_unetr_params(pkey, cfg)

    B = 2
    x = jax.random.normal(xkey, (B, cfg.input_shape[-1],
                                 cfg.input_shape[0], cfg.input_shape[1]), jnp.float32)

    fwd = jax.jit(lambda prm, inp: unetr_forward(prm, inp, cfg))
    out = jax.block_until_ready(fwd(params, x))
    assert out.shape == (B, cfg.output_channels[0], cfg.input_shape[0], cfg.input_shape[1])
    assert bool(jnp.isfinite(out).all())
    print("KERNEL_OK")
</pallas_src>

<mosaic_0001>
module attributes {stable_mosaic.version = 11 : i64} {
  func.func @_patch_embed_kernel(%arg0: i32, %arg1: memref<1x16x16xf32, #tpu.memory_space<vmem>>, %arg2: memref<16x32xbf16, #tpu.memory_space<vmem>>, %arg3: memref<1x32xf32, #tpu.memory_space<vmem>>, %arg4: memref<1x16x32xf32, #tpu.memory_space<vmem>>) attributes {dimension_semantics = [#tpu.dimension_semantics<parallel>], iteration_bounds = array<i64: 2>, scalar_prefetch = 0 : i64, scratch_operands = 0 : i64, tpu.core_type = #tpu.core_type<tc>, window_params = [{transform_indices = @transform_0, window_bounds = array<i64: 1, 16, 16>}, {pipeline_mode = #tpu.pipeline_mode<synchronous>, transform_indices = @transform_1, window_bounds = array<i64: 16, 32>}, {pipeline_mode = #tpu.pipeline_mode<synchronous>, transform_indices = @transform_2, window_bounds = array<i64: 1, 32>}, {transform_indices = @transform_3, window_bounds = array<i64: 1, 16, 32>}]} {
    %c0 = arith.constant 0 : index
    %c0_0 = arith.constant 0 : index
    %c0_1 = arith.constant 0 : index
    %0 = vector.load %arg1[%c0, %c0_0, %c0_1] : memref<1x16x16xf32, #tpu.memory_space<vmem>>, vector<1x16x16xf32>
    %1 = vector.shape_cast %0 : vector<1x16x16xf32> to vector<16x16xf32>
    %2 = arith.truncf %1 : vector<16x16xf32> to vector<16x16xbf16>
    %c0_2 = arith.constant 0 : index
    %c0_3 = arith.constant 0 : index
    %3 = vector.load %arg2[%c0_2, %c0_3] : memref<16x32xbf16, #tpu.memory_space<vmem>>, vector<16x32xbf16>
    %cst = arith.constant dense<0.000000e+00> : vector<16x32xf32>
    %4 = tpu.matmul %2, %3, %cst {dimension_numbers = #tpu.dot_dimension_numbers<[1], [0], [0], [1], [0, 0, 1, 1], [], []>} : vector<16x16xbf16>, vector<16x32xbf16>, vector<16x32xf32> -> vector<16x32xf32>
    %c0_4 = arith.constant 0 : index
    %c0_5 = arith.constant 0 : index
    %5 = vector.load %arg3[%c0_4, %c0_5] : memref<1x32xf32, #tpu.memory_space<vmem>>, vector<1x32xf32>
    %6 = vector.broadcast %5 : vector<1x32xf32> to vector<16x32xf32>
    %7 = arith.addf %4, %6 : vector<16x32xf32>
    %c0_6 = arith.constant 0 : index
    %c0_7 = arith.constant 0 : index
    %c0_8 = arith.constant 0 : index
    %8 = vector.load %arg4[%c0_6, %c0_7, %c0_8] : memref<1x16x32xf32, #tpu.memory_space<vmem>>, vector<1x16x32xf32>
    %9 = vector.shape_cast %8 : vector<1x16x32xf32> to vector<16x32xf32>
    %10 = vector.shape_cast %7 : vector<16x32xf32> to vector<1x16x32xf32>
    tpu.vector_store %arg4[%c0_6, %c0_7, %c0_8], %10 {strides = array<i32>} : memref<1x16x32xf32, #tpu.memory_space<vmem>>, vector<1x16x32xf32>,
    return
  }
  func.func @transform_0(%arg0: i32) -> (i32, i32, i32) {
    %c0_i32 = arith.constant 0 : i32
    %c0_i32_0 = arith.constant 0 : i32
    %c0_i32_1 = arith.constant 0 : i32
    return %arg0, %c0_i32, %c0_i32_0 : i32, i32, i32
  }
  func.func @transform_1(%arg0: i32) -> (i32, i32) {
    %c0_i32 = arith.constant 0 : i32
    %c0_i32_0 = arith.constant 0 : i32
    %c0_i32_1 = arith.constant 0 : i32
    return %c0_i32, %c0_i32_0 : i32, i32
  }
  func.func @transform_2(%arg0: i32) -> (i32, i32) {
    %c0_i32 = arith.constant 0 : i32
    %c0_i32_0 = arith.constant 0 : i32
    %c0_i32_1 = arith.constant 0 : i32
    return %c0_i32, %c0_i32_0 : i32, i32
  }
  func.func @transform_3(%arg0: i32) -> (i32, i32, i32) {
    %c0_i32 = arith.constant 0 : i32
    %c0_i32_0 = arith.constant 0 : i32
    %c0_i32_1 = arith.constant 0 : i32
    return %arg0, %c0_i32, %c0_i32_0 : i32, i32, i32
  }
}

module attributes {stable_mosaic.version = 11 : i64} {
  func.func @_vit_block_kernel(%arg0: i32, %arg1: memref<1x17x32xf32, #tpu.memory_space<vmem>>, %arg2: memref<1x32xf32, #tpu.memory_space<vmem>>, %arg3: memref<1x32xf32, #tpu.memory_space<vmem>>, %arg4: memref<32x96xbf16, #tpu.memory_space<vmem>>, %arg5: memref<1x96xf32, #tpu.memory_space<vmem>>, %arg6: memref<32x32xbf16, #tpu.memory_space<vmem>>, %arg7: memref<1x32xf32, #tpu.memory_space<vmem>>, %arg8: memref<1x32xf32, #tpu.memory_space<vmem>>, %arg9: memref<1x32xf32, #tpu.memory_space<vmem>>, %arg10: memref<32x128xbf16, #tpu.memory_space<vmem>>, %arg11: memref<1x128xf32, #tpu.memory_space<vmem>>, %arg12: memref<128x32xbf16, #tpu.memory_space<vmem>>, %arg13: memref<1x32xf32, #tpu.memory_space<vmem>>, %arg14: memref<1x17x32xf32, #tpu.memory_space<vmem>>, %arg15: memref<17x96xf32, #tpu.memory_space<vmem>>) attributes {dimension_semantics = [#tpu.dimension_semantics<parallel>], iteration_bounds = array<i64: 2>, scalar_prefetch = 0 : i64, scratch_operands = 1 : i64, tpu.core_type = #tpu.core_type<tc>, window_params = [{transform_indices = @transform_0, window_bounds = array<i64: 1, 17, 32>}, {pipeline_mode = #tpu.pipeline_mode<synchronous>, transform_indices = @transform_1, window_bounds = array<i64: 1, 32>}, {pipeline_mode = #tpu.pipeline_mode<synchronous>, transform_indices = @transform_2, window_bounds = array<i64: 1, 32>}, {pipeline_mode = #tpu.pipeline_mode<synchronous>, transform_indices = @transform_3, window_bounds = array<i64: 32, 96>}, {pipeline_mode = #tpu.pipeline_mode<synchronous>, transform_indices = @transform_4, window_bounds = array<i64: 1, 96>}, {pipeline_mode = #tpu.pipeline_mode<synchronous>, transform_indices = @transform_5, window_bounds = array<i64: 32, 32>}, {pipeline_mode = #tpu.pipeline_mode<synchronous>, transform_indices = @transform_6, window_bounds = array<i64: 1, 32>}, {pipeline_mode = #tpu.pipeline_mode<synchronous>, transform_indices = @transform_7, window_bounds = array<i64: 1, 32>}, {pipeline_mode = #tpu.pipeline_mode<synchronous>, transform_indices = @transform_8, window_bounds = array<i64: 1, 32>}, {pipeline_mode = #tpu.pipeline_mode<synchronous>, transform_indices = @transform_9, window_bounds = array<i64: 32, 128>}, {pipeline_mode = #tpu.pipeline_mode<synchronous>, transform_indices = @transform_10, window_bounds = array<i64: 1, 128>}, {pipeline_mode = #tpu.pipeline_mode<synchronous>, transform_indices = @transform_11, window_bounds = array<i64: 128, 32>}, {pipeline_mode = #tpu.pipeline_mode<synchronous>, transform_indices = @transform_12, window_bounds = array<i64: 1, 32>}, {transform_indices = @transform_13, window_bounds = array<i64: 1, 17, 32>}]} {
    %c0 = arith.constant 0 : index
    %c0_0 = arith.constant 0 : index
    %c0_1 = arith.constant 0 : index
    %0 = vector.load %arg1[%c0, %c0_0, %c0_1] : memref<1x17x32xf32, #tpu.memory_space<vmem>>, vector<1x17x32xf32>
    %1 = vector.shape_cast %0 : vector<1x17x32xf32> to vector<17x32xf32>
    %cst = arith.constant dense<0.000000e+00> : vector<17xf32>
    %2 = vector.multi_reduction <add>, %1, %cst [1] : vector<17x32xf32> to vector<17xf32>
    %3 = vector.shape_cast %2 : vector<17xf32> to vector<17x1xf32>
    %cst_2 = arith.constant 3.200000e+01 : f32
    %4 = vector.broadcast %cst_2 : f32 to vector<17x1xf32>
    %5 = arith.divf %3, %4 : vector<17x1xf32>
    %6 = vector.broadcast %5 : vector<17x1xf32> to vector<17x32xf32>
    %7 = arith.subf %1, %6 : vector<17x32xf32>
    %8 = arith.mulf %7, %7 : vector<17x32xf32>
    %cst_3 = arith.constant dense<0.000000e+00> : vector<17xf32>
    %9 = vector.multi_reduction <add>, %8, %cst_3 [1] : vector<17x32xf32> to vector<17xf32>
    %10 = vector.shape_cast %9 : vector<17xf32> to vector<17x1xf32>
    %cst_4 = arith.constant 3.200000e+01 : f32
    %11 = vector.broadcast %cst_4 : f32 to vector<17x1xf32>
    %12 = arith.divf %10, %11 : vector<17x1xf32>
    %cst_5 = arith.constant 9.99999974E-6 : f32
    %13 = vector.broadcast %cst_5 : f32 to vector<17x1xf32>
    %14 = arith.addf %12, %13 : vector<17x1xf32>
    %15 = math.rsqrt %14 : vector<17x1xf32>
    %16 = vector.broadcast %15 : vector<17x1xf32> to vector<17x32xf32>
    %17 = arith.mulf %7, %16 : vector<17x32xf32>
    %c0_6 = arith.constant 0 : index
    %c0_7 = arith.constant 0 : index
    %18 = vector.load %arg2[%c0_6, %c0_7] : memref<1x32xf32, #tpu.memory_space<vmem>>, vector<1x32xf32>
    %19 = vector.broadcast %18 : vector<1x32xf32> to vector<17x32xf32>
    %20 = arith.mulf %17, %19 : vector<17x32xf32>
    %c0_8 = arith.constant 0 : index
    %c0_9 = arith.constant 0 : index
    %21 = vector.load %arg3[%c0_8, %c0_9] : memref<1x32xf32, #tpu.memory_space<vmem>>, vector<1x32xf32>
    %22 = vector.broadcast %21 : vector<1x32xf32> to vector<17x32xf32>
    %23 = arith.addf %20, %22 : vector<17x32xf32>
    %24 = arith.truncf %23 : vector<17x32xf32> to vector<17x32xbf16>
    %c0_10 = arith.constant 0 : index
    %c0_11 = arith.constant 0 : index
    %25 = vector.load %arg4[%c0_10, %c0_11] : memref<32x96xbf16, #tpu.memory_space<vmem>>, vector<32x96xbf16>
    %cst_12 = arith.constant dense<0.000000e+00> : vector<17x96xf32>
    %26 = tpu.matmul %24, %25, %cst_12 {dimension_numbers = #tpu.dot_dimension_numbers<[1], [0], [0], [1], [0, 0, 1, 1], [], []>} : vector<17x32xbf16>, vector<32x96xbf16>, vector<17x96xf32> -> vector<17x96xf32>
    %c0_13 = arith.constant 0 : index
    %c0_14 = arith.constant 0 : index
    %27 = vector.load %arg5[%c0_13, %c0_14] : memref<1x96xf32, #tpu.memory_space<vmem>>, vector<1x96xf32>
    %28 = vector.broadcast %27 : vector<1x96xf32> to vector<17x96xf32>
    %29 = arith.addf %26, %28 : vector<17x96xf32>
    %c0_15 = arith.constant 0 : index
    %c0_16 = arith.constant 0 : index
    %30 = vector.load %arg15[%c0_15, %c0_16] : memref<17x96xf32, #tpu.memory_space<vmem>>, vector<17x96xf32>
    tpu.vector_store %arg15[%c0_15, %c0_16], %29 {strides = array<i32>} : memref<17x96xf32, #tpu.memory_space<vmem>>, vector<17x96xf32>,
    %cst_17 = arith.constant 0.000000e+00 : f32
    %31 = vector.broadcast %cst_17 : f32 to vector<17x32xf32>
    %c0_18 = arith.constant 0 : index
    %c0_19 = arith.constant 0 : index
    %32 = vector.load %arg15[%c0_18, %c0_19] : memref<17x96xf32, #tpu.memory_space<vmem>>, vector<17x8xf32>
    %33 = arith.truncf %32 : vector<17x8xf32> to vector<17x8xbf16>
    %c0_20 = arith.constant 0 : index
    %c32 = arith.constant 32 : index
    %34 = vector.load %arg15[%c0_20, %c32] : memref<17x96xf32, #tpu.memory_space<vmem>>, vector<17x8xf32>
    %35 = arith.truncf %34 : vector<17x8xf32> to vector<17x8xbf16>
    %c0_21 = arith.constant 0 : index
    %c64 = arith.constant 64 : index
    %36 = vector.load %arg15[%c0_21, %c64] : memref<17x96xf32, #tpu.memory_space<vmem>>, vector<17x8xf32>
    %37 = arith.truncf %36 : vector<17x8xf32> to vector<17x8xbf16>
    %cst_22 = arith.constant dense<0.000000e+00> : vector<17x17xf32>
    %38 = tpu.matmul %33, %35, %cst_22 {dimension_numbers = #tpu.dot_dimension_numbers<[1], [1], [0], [0], [0, 0, 1, 0], [], []>} : vector<17x8xbf16>, vector<17x8xbf16>, vector<17x17xf32> -> vector<17x17xf32>
    %cst_23 = arith.constant 0.353553385 : f32
    %39 = vector.broadcast %cst_23 : f32 to vector<17x17xf32>
    %40 = arith.mulf %38, %39 : vector<17x17xf32>
    %cst_24 = arith.constant dense<0xFF800000> : vector<17xf32>
    %41 = vector.multi_reduction <maximumf>, %40, %cst_24 [1] : vector<17x17xf32> to vector<17xf32>
    %42 = vector.shape_cast %41 : vector<17xf32> to vector<17x1xf32>
    %43 = vector.broadcast %42 : vector<17x1xf32> to vector<17x17xf32>
    %44 = arith.subf %40, %43 : vector<17x17xf32>
    %45 = math.exp %44 : vector<17x17xf32>
    %cst_25 = arith.constant dense<0.000000e+00> : vector<17xf32>
    %46 = vector.multi_reduction <add>, %45, %cst_25 [1] : vector<17x17xf32> to vector<17xf32>
    %47 = vector.shape_cast %46 : vector<17xf32> to vector<17x1xf32>
    %48 = tpu.reciprocal %47 {approx = true} : vector<17x1xf32> -> vector<17x1xf32>
    %49 = vector.broadcast %48 : vector<17x1xf32> to vector<17x17xf32>
    %50 = arith.mulf %45, %49 : vector<17x17xf32>
    %51 = arith.truncf %50 : vector<17x17xf32> to vector<17x17xbf16>
    %cst_26 = arith.constant dense<0.000000e+00> : vector<17x8xf32>
    %52 = tpu.matmul %51, %37, %cst_26 {dimension_numbers = #tpu.dot_dimension_numbers<[1], [0], [0], [1], [0, 0, 1, 1], [], []>} : vector<17x17xbf16>, vector<17x8xbf16>, vector<17x8xf32> -> vector<17x8xf32>
    %53 = arith.truncf %52 : vector<17x8xf32> to vector<17x8xbf16>
    %c0_27 = arith.constant 0 : index
    %c0_28 = arith.constant 0 : index
    %54 = vector.load %arg6[%c0_27, %c0_28] : memref<32x32xbf16, #tpu.memory_space<vmem>>, vector<8x32xbf16>
    %cst_29 = arith.constant dense<0.000000e+00> : vector<17x32xf32>
    %55 = tpu.matmul %53, %54, %cst_29 {dimension_numbers = #tpu.dot_dimension_numbers<[1], [0], [0], [1], [0, 0, 1, 1], [], []>} : vector<17x8xbf16>, vector<8x32xbf16>, vector<17x32xf32> -> vector<17x32xf32>
    %56 = arith.addf %31, %55 : vector<17x32xf32>
    %c0_30 = arith.constant 0 : index
    %c8 = arith.constant 8 : index
    %57 = vector.load %arg15[%c0_30, %c8] : memref<17x96xf32, #tpu.memory_space<vmem>>, vector<17x8xf32>
    %58 = arith.truncf %57 : vector<17x8xf32> to vector<17x8xbf16>
    %c0_31 = arith.constant 0 : index
    %c40 = arith.constant 40 : index
    %59 = vector.load %arg15[%c0_31, %c40] : memref<17x96xf32, #tpu.memory_space<vmem>>, vector<17x8xf32>
    %60 = arith.truncf %59 : vector<17x8xf32> to vector<17x8xbf16>
    %c0_32 = arith.constant 0 : index
    %c72 = arith.constant 72 : index
    %61 = vector.load %arg15[%c0_32, %c72] : memref<17x96xf32, #tpu.memory_space<vmem>>, vector<17x8xf32>
    %62 = arith.truncf %61 : vector<17x8xf32> to vector<17x8xbf16>
    %cst_33 = arith.constant dense<0.000000e+00> : vector<17x17xf32>
    %63 = tpu.matmul %58, %60, %cst_33 {dimension_numbers = #tpu.dot_dimension_numbers<[1], [1], [0], [0], [0, 0, 1, 0], [], []>} : vector<17x8xbf16>, vector<17x8xbf16>, vector<17x17xf32> -> vector<17x17xf32>
    %cst_34 = arith.constant 0.353553385 : f32
    %64 = vector.broadcast %cst_34 : f32 to vector<17x17xf32>
    %65 = arith.mulf %63, %64 : vector<17x17xf32>
    %cst_35 = arith.constant dense<0xFF800000> : vector<17xf32>
    %66 = vector.multi_reduction <maximumf>, %65, %cst_35 [1] : vector<17x17xf32> to vector<17xf32>
    %67 = vector.shape_cast %66 : vector<17xf32> to vector<17x1xf32>
    %68 = vector.broadcast %67 : vector<17x1xf32> to vector<17x17xf32>
    %69 = arith.subf %65, %68 : vector<17x17xf32>
    %70 = math.exp %69 : vector<17x17xf32>
    %cst_36 = arith.constant dense<0.000000e+00> : vector<17xf32>
    %71 = vector.multi_reduction <add>, %70, %cst_36 [1] : vector<17x17xf32> to vector<17xf32>
    %72 = vector.shape_cast %71 : vector<17xf32> to vector<17x1xf32>
    %73 = tpu.reciprocal %72 {approx = true} : vector<17x1xf32> -> vector<17x1xf32>
    %74 = vector.broadcast %73 : vector<17x1xf32> to vector<17x17xf32>
    %75 = arith.mulf %70, %74 : vector<17x17xf32>
    %76 = arith.truncf %75 : vector<17x17xf32> to vector<17x17xbf16>
    %cst_37 = arith.constant dense<0.000000e+00> : vector<17x8xf32>
    %77 = tpu.matmul %76, %62, %cst_37 {dimension_numbers = #tpu.dot_dimension_numbers<[1], [0], [0], [1], [0, 0, 1, 1], [], []>} : vector<17x17xbf16>, vector<17x8xbf16>, vector<17x8xf32> -> vector<17x8xf32>
    %78 = arith.truncf %77 : vector<17x8xf32> to vector<17x8xbf16>
    %c8_38 = arith.constant 8 : index
    %c0_39 = arith.constant 0 : index
    %79 = vector.load %arg6[%c8_38, %c0_39] : memref<32x32xbf16, #tpu.memory_space<vmem>>, vector<8x32xbf16>
    %cst_40 = arith.constant dense<0.000000e+00> : vector<17x32xf32>
    %80 = tpu.matmul %78, %79, %cst_40 {dimension_numbers = #tpu.dot_dimension_numbers<[1], [0], [0], [1], [0, 0, 1, 1], [], []>} : vector<17x8xbf16>, vector<8x32xbf16>, vector<17x32xf32> -> vector<17x32xf32>
    %81 = arith.addf %56, %80 : vector<17x32xf32>
    %c0_41 = arith.constant 0 : index
    %c16 = arith.constant 16 : index
    %82 = vector.load %arg15[%c0_41, %c16] : memref<17x96xf32, #tpu.memory_space<vmem>>, vector<17x8xf32>
    %83 = arith.truncf %82 : vector<17x8xf32> to vector<17x8xbf16>
    %c0_42 = arith.constant 0 : index
    %c48 = arith.constant 48 : index
    %84 = vector.load %arg15[%c0_42, %c48] : memref<17x96xf32, #tpu.memory_space<vmem>>, vector<17x8xf32>
    %85 = arith.truncf %84 : vector<17x8xf32> to vector<17x8xbf16>
    %c0_43 = arith.constant 0 : index
    %c80 = arith.constant 80 : index
    %86 = vector.load %arg15[%c0_43, %c80] : memref<17x96xf32, #tpu.memory_space<vmem>>, vector<17x8xf32>
    %87 = arith.truncf %86 : vector<17x8xf32> to vector<17x8xbf16>
    %cst_44 = arith.constant dense<0.000000e+00> : vector<17x17xf32>
    %88 = tpu.matmul %83, %85, %cst_44 {dimension_numbers = #tpu.dot_dimension_numbers<[1], [1], [0], [0], [0, 0, 1, 0], [], []>} : vector<17x8xbf16>, vector<17x8xbf16>, vector<17x17xf32> -> vector<17x17xf32>
    %cst_45 = arith.constant 0.353553385 : f32
    %89 = vector.broadcast %cst_45 : f32 to vector<17x17xf32>
    %90 = arith.mulf %88, %89 : vector<17x17xf32>
    %cst_46 = arith.constant dense<0xFF800000> : vector<17xf32>
    %91 = vector.multi_reduction <maximumf>, %90, %cst_46 [1] : vector<17x17xf32> to vector<17xf32>
    %92 = vector.shape_cast %91 : vector<17xf32> to vector<17x1xf32>
    %93 = vector.broadcast %92 : vector<17x1xf32> to vector<17x17xf32>
    %94 = arith.subf %90, %93 : vector<17x17xf32>
    %95 = math.exp %94 : vector<17x17xf32>
    %cst_47 = arith.constant dense<0.000000e+00> : vector<17xf32>
    %96 = vector.multi_reduction <add>, %95, %cst_47 [1] : vector<17x17xf32> to vector<17xf32>
    %97 = vector.shape_cast %96 : vector<17xf32> to vector<17x1xf32>
    %98 = tpu.reciprocal %97 {approx = true} : vector<17x1xf32> -> vector<17x1xf32>
    %99 = vector.broadcast %98 : vector<17x1xf32> to vector<17x17xf32>
    %100 = arith.mulf %95, %99 : vector<17x17xf32>
    %101 = arith.truncf %100 : vector<17x17xf32> to vector<17x17xbf16>
    %cst_48 = arith.constant dense<0.000000e+00> : vector<17x8xf32>
    %102 = tpu.matmul %101, %87, %cst_48 {dimension_numbers = #tpu.dot_dimension_numbers<[1], [0], [0], [1], [0, 0, 1, 1], [], []>} : vector<17x17xbf16>, vector<17x8xbf16>, vector<17x8xf32> -> vector<17x8xf32>
    %103 = arith.truncf %102 : vector<17x8xf32> to vector<17x8xbf16>
    %c16_49 = arith.constant 16 : index
    %c0_50 = arith.constant 0 : index
    %104 = vector.load %arg6[%c16_49, %c0_50] : memref<32x32xbf16, #tpu.memory_space<vmem>>, vector<8x32xbf16>
    %cst_51 = arith.constant dense<0.000000e+00> : vector<17x32xf32>
    %105 = tpu.matmul %103, %104, %cst_51 {dimension_numbers = #tpu.dot_dimension_numbers<[1], [0], [0], [1], [0, 0, 1, 1], [], []>} : vector<17x8xbf16>, vector<8x32xbf16>, vector<17x32xf32> -> vector<17x32xf32>
    %106 = arith.addf %81, %105 : vector<17x32xf32>
    %c0_52 = arith.constant 0 : index
    %c24 = arith.constant 24 : index
    %107 = vector.load %arg15[%c0_52, %c24] : memref<17x96xf32, #tpu.memory_space<vmem>>, vector<17x8xf32>
    %108 = arith.truncf %107 : vector<17x8xf32> to vector<17x8xbf16>
    %c0_53 = arith.constant 0 : index
    %c56 = arith.constant 56 : index
    %109 = vector.load %arg15[%c0_53, %c56] : memref<17x96xf32, #tpu.memory_space<vmem>>, vector<17x8xf32>
    %110 = arith.truncf %109 : vector<17x8xf32> to vector<17x8xbf16>
    %c0_54 = arith.constant 0 : index
    %c88 = arith.constant 88 : index
    %111 = vector.load %arg15[%c0_54, %c88] : memref<17x96xf32, #tpu.memory_space<vmem>>, vector<17x8xf32>
    %112 = arith.truncf %111 : vector<17x8xf32> to vector<17x8xbf16>
    %cst_55 = arith.constant dense<0.000000e+00> : vector<17x17xf32>
    %113 = tpu.matmul %108, %110, %cst_55 {dimension_numbers = #tpu.dot_dimension_numbers<[1], [1], [0], [0], [0, 0, 1, 0], [], []>} : vector<17x8xbf16>, vector<17x8xbf16>, vector<17x17xf32> -> vector<17x17xf32>
    %cst_56 = arith.constant 0.353553385 : f32
    %114 = vector.broadcast %cst_56 : f32 to vector<17x17xf32>
    %115 = arith.mulf %113, %114 : vector<17x17xf32>
    %cst_57 = arith.constant dense<0xFF800000> : vector<17xf32>
    %116 = vector.multi_reduction <maximumf>, %115, %cst_57 [1] : vector<17x17xf32> to vector<17xf32>
    %117 = vector.shape_cast %116 : vector<17xf32> to vector<17x1xf32>
    %118 = vector.broadcast %117 : vector<17x1xf32> to vector<17x17xf32>
    %119 = arith.subf %115, %118 : vector<17x17xf32>
    %120 = math.exp %119 : vector<17x17xf32>
    %cst_58 = arith.constant dense<0.000000e+00> : vector<17xf32>
    %121 = vector.multi_reduction <add>, %120, %cst_58 [1] : vector<17x17xf32> to vector<17xf32>
    %122 = vector.shape_cast %121 : vector<17xf32> to vector<17x1xf32>
    %123 = tpu.reciprocal %122 {approx = true} : vector<17x1xf32> -> vector<17x1xf32>
    %124 = vector.broadcast %123 : vector<17x1xf32> to vector<17x17xf32>
    %125 = arith.mulf %120, %124 : vector<17x17xf32>
    %126 = arith.truncf %125 : vector<17x17xf32> to vector<17x17xbf16>
    %cst_59 = arith.constant dense<0.000000e+00> : vector<17x8xf32>
    %127 = tpu.matmul %126, %112, %cst_59 {dimension_numbers = #tpu.dot_dimension_numbers<[1], [0], [0], [1], [0, 0, 1, 1], [], []>} : vector<17x17xbf16>, vector<17x8xbf16>, vector<17x8xf32> -> vector<17x8xf32>
    %128 = arith.truncf %127 : vector<17x8xf32> to vector<17x8xbf16>
    %c24_60 = arith.constant 24 : index
    %c0_61 = arith.constant 0 : index
    %129 = vector.load %arg6[%c24_60, %c0_61] : memref<32x32xbf16, #tpu.memory_space<vmem>>, vector<8x32xbf16>
    %cst_62 = arith.constant dense<0.000000e+00> : vector<17x32xf32>
    %130 = tpu.matmul %128, %129, %cst_62 {dimension_numbers = #tpu.dot_dimension_numbers<[1], [0], [0], [1], [0, 0, 1, 1], [], []>} : vector<17x8xbf16>, vector<8x32xbf16>, vector<17x32xf32> -> vector<17x32xf32>
    %131 = arith.addf %106, %130 : vector<17x32xf32>
    %132 = arith.addf %1, %131 : vector<17x32xf32>
    %c0_63 = arith.constant 0 : index
    %c0_64 = arith.constant 0 : index
    %133 = vector.load %arg7[%c0_63, %c0_64] : memref<1x32xf32, #tpu.memory_space<vmem>>, vector<1x32xf32>
    %134 = vector.broadcast %133 : vector<1x32xf32> to vector<17x32xf32>
    %135 = arith.addf %132, %134 : vector<17x32xf32>
    %cst_65 = arith.constant dense<0.000000e+00> : vector<17xf32>
    %136 = vector.multi_reduction <add>, %135, %cst_65 [1] : vector<17x32xf32> to vector<17xf32>
    %137 = vector.shape_cast %136 : vector<17xf32> to vector<17x1xf32>
    %cst_66 = arith.constant 3.200000e+01 : f32
    %138 = vector.broadcast %cst_66 : f32 to vector<17x1xf32>
    %139 = arith.divf %137, %138 : vector<17x1xf32>
    %140 = vector.broadcast %139 : vector<17x1xf32> to vector<17x32xf32>
    %141 = arith.subf %135, %140 : vector<17x32xf32>
    %142 = arith.mulf %141, %141 : vector<17x32xf32>
    %cst_67 = arith.constant dense<0.000000e+00> : vector<17xf32>
    %143 = vector.multi_reduction <add>, %142, %cst_67 [1] : vector<17x32xf32> to vector<17xf32>
    %144 = vector.shape_cast %143 : vector<17xf32> to vector<17x1xf32>
    %cst_68 = arith.constant 3.200000e+01 : f32
    %145 = vector.broadcast %cst_68 : f32 to vector<17x1xf32>
    %146 = arith.divf %144, %145 : vector<17x1xf32>
    %cst_69 = arith.constant 9.99999974E-6 : f32
    %147 = vector.broadcast %cst_69 : f32 to vector<17x1xf32>
    %148 = arith.addf %146, %147 : vector<17x1xf32>
    %149 = math.rsqrt %148 : vector<17x1xf32>
    %150 = vector.broadcast %149 : vector<17x1xf32> to vector<17x32xf32>
    %151 = arith.mulf %141, %150 : vector<17x32xf32>
    %c0_70 = arith.constant 0 : index
    %c0_71 = arith.constant 0 : index
    %152 = vector.load %arg8[%c0_70, %c0_71] : memref<1x32xf32, #tpu.memory_space<vmem>>, vector<1x32xf32>
    %153 = vector.broadcast %152 : vector<1x32xf32> to vector<17x32xf32>
    %154 = arith.mulf %151, %153 : vector<17x32xf32>
    %c0_72 = arith.constant 0 : index
    %c0_73 = arith.constant 0 : index
    %155 = vector.load %arg9[%c0_72, %c0_73] : memref<1x32xf32, #tpu.memory_space<vmem>>, vector<1x32xf32>
    %156 = vector.broadcast %155 : vector<1x32xf32> to vector<17x32xf32>
    %157 = arith.addf %154, %156 : vector<17x32xf32>
    %158 = arith.truncf %157 : vector<17x32xf32> to vector<17x32xbf16>
    %c0_74 = arith.constant 0 : index
    %c0_75 = arith.constant 0 : index
    %159 = vector.load %arg10[%c0_74, %c0_75] : memref<32x128xbf16, #tpu.memory_space<vmem>>, vector<32x128xbf16>
    %cst_76 = arith.constant dense<0.000000e+00> : vector<17x128xf32>
    %160 = tpu.matmul %158, %159, %cst_76 {dimension_numbers = #tpu.dot_dimension_numbers<[1], [0], [0], [1], [0, 0, 1, 1], [], []>} : vector<17x32xbf16>, vector<32x128xbf16>, vector<17x128xf32> -> vector<17x128xf32>
    %c0_77 = arith.constant 0 : index
    %c0_78 = arith.constant 0 : index
    %161 = vector.load %arg11[%c0_77, %c0_78] : memref<1x128xf32, #tpu.memory_space<vmem>>, vector<1x128xf32>
    %162 = vector.broadcast %161 : vector<1x128xf32> to vector<17x128xf32>
    %163 = arith.addf %160, %162 : vector<17x128xf32>
    %cst_79 = arith.constant 5.000000e-01 : f32
    %164 = vector.broadcast %cst_79 : f32 to vector<17x128xf32>
    %165 = arith.mulf %164, %163 : vector<17x128xf32>
    %cst_80 = arith.constant 0.707106769 : f32
    %166 = vector.broadcast %cst_80 : f32 to vector<17x128xf32>
    %167 = arith.mulf %163, %166 : vector<17x128xf32>
    %cst_81 = arith.constant 0.000000e+00 : f32
    %168 = vector.broadcast %cst_81 : f32 to vector<17x128xf32>
    %169 = arith.cmpf oge, %167, %168 : vector<17x128xf32>
    %cst_82 = arith.constant 1.000000e+00 : f32
    %cst_83 = arith.constant -1.000000e+00 : f32
    %170 = vector.broadcast %cst_82 : f32 to vector<17x128xf32>
    %171 = vector.broadcast %cst_83 : f32 to vector<17x128xf32>
    %172 = arith.select %169, %170, %171 : vector<17x128xi1>, vector<17x128xf32>
    %173 = math.absf %167 : vector<17x128xf32>
    %cst_84 = arith.constant 0.327591091 : f32
    %174 = vector.broadcast %cst_84 : f32 to vector<17x128xf32>
    %175 = arith.mulf %174, %173 : vector<17x128xf32>
    %cst_85 = arith.constant 1.000000e+00 : f32
    %176 = vector.broadcast %cst_85 : f32 to vector<17x128xf32>
    %177 = arith.addf %176, %175 : vector<17x128xf32>
    %cst_86 = arith.constant 1.000000e+00 : f32
    %178 = vector.broadcast %cst_86 : f32 to vector<17x128xf32>
    %179 = arith.divf %178, %177 : vector<17x128xf32>
    %cst_87 = arith.constant 1.06140542 : f32
    %180 = vector.broadcast %cst_87 : f32 to vector<17x128xf32>
    %181 = arith.mulf %180, %179 : vector<17x128xf32>
    %cst_88 = arith.constant -1.45315206 : f32
    %182 = vector.broadcast %cst_88 : f32 to vector<17x128xf32>
    %183 = arith.addf %181, %182 : vector<17x128xf32>
    %184 = arith.mulf %183, %179 : vector<17x128xf32>
    %cst_89 = arith.constant 1.42141378 : f32
    %185 = vector.broadcast %cst_89 : f32 to vector<17x128xf32>
    %186 = arith.addf %184, %185 : vector<17x128xf32>
    %187 = arith.mulf %186, %179 : vector<17x128xf32>
    %cst_90 = arith.constant -0.284496725 : f32
    %188 = vector.broadcast %cst_90 : f32 to vector<17x128xf32>
    %189 = arith.addf %187, %188 : vector<17x128xf32>
    %190 = arith.mulf %189, %179 : vector<17x128xf32>
    %cst_91 = arith.constant 0.254829586 : f32
    %191 = vector.broadcast %cst_91 : f32 to vector<17x128xf32>
    %192 = arith.addf %190, %191 : vector<17x128xf32>
    %193 = arith.mulf %192, %179 : vector<17x128xf32>
    %cst_92 = arith.constant 0.000000e+00 : f32
    %194 = vector.broadcast %cst_92 : f32 to vector<17x128xf32>
    %195 = arith.subf %194, %173 : vector<17x128xf32>
    %196 = arith.mulf %195, %173 : vector<17x128xf32>
    %197 = math.exp %196 : vector<17x128xf32>
    %198 = arith.mulf %193, %197 : vector<17x128xf32>
    %cst_93 = arith.constant 1.000000e+00 : f32
    %199 = vector.broadcast %cst_93 : f32 to vector<17x128xf32>
    %200 = arith.subf %199, %198 : vector<17x128xf32>
    %201 = arith.mulf %172, %200 : vector<17x128xf32>
    %cst_94 = arith.constant 1.000000e+00 : f32
    %202 = vector.broadcast %cst_94 : f32 to vector<17x128xf32>
    %203 = arith.addf %202, %201 : vector<17x128xf32>
    %204 = arith.mulf %165, %203 : vector<17x128xf32>
    %205 = arith.truncf %204 : vector<17x128xf32> to vector<17x128xbf16>
    %c0_95 = arith.constant 0 : index
    %c0_96 = arith.constant 0 : index
    %206 = vector.load %arg12[%c0_95, %c0_96] : memref<128x32xbf16, #tpu.memory_space<vmem>>, vector<128x32xbf16>
    %cst_97 = arith.constant dense<0.000000e+00> : vector<17x32xf32>
    %207 = tpu.matmul %205, %206, %cst_97 {dimension_numbers = #tpu.dot_dimension_numbers<[1], [0], [0], [1], [0, 0, 1, 1], [], []>} : vector<17x128xbf16>, vector<128x32xbf16>, vector<17x32xf32> -> vector<17x32xf32>
    %208 = arith.addf %135, %207 : vector<17x32xf32>
    %c0_98 = arith.constant 0 : index
    %c0_99 = arith.constant 0 : index
    %209 = vector.load %arg13[%c0_98, %c0_99] : memref<1x32xf32, #tpu.memory_space<vmem>>, vector<1x32xf32>
    %210 = vector.broadcast %209 : vector<1x32xf32> to vector<17x32xf32>
    %211 = arith.addf %208, %210 : vector<17x32xf32>
    %c0_100 = arith.constant 0 : index
    %c0_101 = arith.constant 0 : index
    %c0_102 = arith.constant 0 : index
    %212 = vector.load %arg14[%c0_100, %c0_101, %c0_102] : memref<1x17x32xf32, #tpu.memory_space<vmem>>, vector<1x17x32xf32>
    %213 = vector.shape_cast %212 : vector<1x17x32xf32> to vector<17x32xf32>
    %214 = vector.shape_cast %211 : vector<17x32xf32> to vector<1x17x32xf32>
    tpu.vector_store %arg14[%c0_100, %c0_101, %c0_102], %214 {strides = array<i32>} : memref<1x17x32xf32, #tpu.memory_space<vmem>>, vector<1x17x32xf32>,
    return
  }
  func.func @transform_0(%arg0: i32) -> (i32, i32, i32) {
    %c0_i32 = arith.constant 0 : i32
    %c0_i32_0 = arith.constant 0 : i32
    %c0_i32_1 = arith.constant 0 : i32
    return %arg0, %c0_i32, %c0_i32_0 : i32, i32, i32
  }
  func.func @transform_1(%arg0: i32) -> (i32, i32) {
    %c0_i32 = arith.constant 0 : i32
    %c0_i32_0 = arith.constant 0 : i32
    %c0_i32_1 = arith.constant 0 : i32
    return %c0_i32, %c0_i32_0 : i32, i32
  }
  func.func @transform_2(%arg0: i32) -> (i32, i32) {
    %c0_i32 = arith.constant 0 : i32
    %c0_i32_0 = arith.constant 0 : i32
    %c0_i32_1 = arith.constant 0 : i32
    return %c0_i32, %c0_i32_0 : i32, i32
  }
  func.func @transform_3(%arg0: i32) -> (i32, i32) {
    %c0_i32 = arith.constant 0 : i32
    %c0_i32_0 = arith.constant 0 : i32
    %c0_i32_1 = arith.constant 0 : i32
    return %c0_i32, %c0_i32_0 : i32, i32
  }
  func.func @transform_4(%arg0: i32) -> (i32, i32) {
    %c0_i32 = arith.constant 0 : i32
    %c0_i32_0 = arith.constant 0 : i32
    %c0_i32_1 = arith.constant 0 : i32
    return %c0_i32, %c0_i32_0 : i32, i32
  }
  func.func @transform_5(%arg0: i32) -> (i32, i32) {
    %c0_i32 = arith.constant 0 : i32
    %c0_i32_0 = arith.constant 0 : i32
    %c0_i32_1 = arith.constant 0 : i32
    return %c0_i32, %c0_i32_0 : i32, i32
  }
  func.func @transform_6(%arg0: i32) -> (i32, i32) {
    %c0_i32 = arith.constant 0 : i32
    %c0_i32_0 = arith.constant 0 : i32
    %c0_i32_1 = arith.constant 0 : i32
    return %c0_i32, %c0_i32_0 : i32, i32
  }
  func.func @transform_7(%arg0: i32) -> (i32, i32) {
    %c0_i32 = arith.constant 0 : i32
    %c0_i32_0 = arith.constant 0 : i32
    %c0_i32_1 = arith.constant 0 : i32
    return %c0_i32, %c0_i32_0 : i32, i32
  }
  func.func @transform_8(%arg0: i32) -> (i32, i32) {
    %c0_i32 = arith.constant 0 : i32
    %c0_i32_0 = arith.constant 0 : i32
    %c0_i32_1 = arith.constant 0 : i32
    return %c0_i32, %c0_i32_0 : i32, i32
  }
  func.func @transform_9(%arg0: i32) -> (i32, i32) {
    %c0_i32 = arith.constant 0 : i32
    %c0_i32_0 = arith.constant 0 : i32
    %c0_i32_1 = arith.constant 0 : i32
    return %c0_i32, %c0_i32_0 : i32, i32
  }
  func.func @transform_10(%arg0: i32) -> (i32, i32) {
    %c0_i32 = arith.constant 0 : i32
    %c0_i32_0 = arith.constant 0 : i32
    %c0_i32_1 = arith.constant 0 : i32
    return %c0_i32, %c0_i32_0 : i32, i32
  }
  func.func @transform_11(%arg0: i32) -> (i32, i32) {
    %c0_i32 = arith.constant 0 : i32
    %c0_i32_0 = arith.constant 0 : i32
    %c0_i32_1 = arith.constant 0 : i32
    return %c0_i32, %c0_i32_0 : i32, i32
  }
  func.func @transform_12(%arg0: i32) -> (i32, i32) {
    %c0_i32 = arith.constant 0 : i32
    %c0_i32_0 = arith.constant 0 : i32
    %c0_i32_1 = arith.constant 0 : i32
    return %c0_i32, %c0_i32_0 : i32, i32
  }
  func.func @transform_13(%arg0: i32) -> (i32, i32, i32) {
    %c0_i32 = arith.constant 0 : i32
    %c0_i32_0 = arith.constant 0 : i32
    %c0_i32_1 = arith.constant 0 : i32
    return %arg0, %c0_i32, %c0_i32_0 : i32, i32, i32
  }
}

module attributes {stable_mosaic.version = 11 : i64} {
  func.func @_conv_transpose2x2_kernel(%arg0: i32, %arg1: memref<1x32x16xbf16, #tpu.memory_space<vmem>>, %arg2: memref<4x16x32xbf16, #tpu.memory_space<vmem>>, %arg3: memref<1x4x16x16xbf16, #tpu.memory_space<vmem>>) attributes {dimension_semantics = [#tpu.dimension_semantics<parallel>], iteration_bounds = array<i64: 2>, scalar_prefetch = 0 : i64, scratch_operands = 0 : i64, tpu.core_type = #tpu.core_type<tc>, window_params = [{transform_indices = @transform_0, window_bounds = array<i64: 1, 32, 16>}, {pipeline_mode = #tpu.pipeline_mode<synchronous>, transform_indices = @transform_1, window_bounds = array<i64: 4, 16, 32>}, {transform_indices = @transform_2, window_bounds = array<i64: 1, 4, 16, 16>}]} {
    %c0 = arith.constant 0 : index
    %c0_0 = arith.constant 0 : index
    %c0_1 = arith.constant 0 : index
    %0 = vector.load %arg1[%c0, %c0_0, %c0_1] : memref<1x32x16xbf16, #tpu.memory_space<vmem>>, vector<1x32x16xbf16>
    %1 = vector.shape_cast %0 : vector<1x32x16xbf16> to vector<32x16xbf16>
    %c0_2 = arith.constant 0 : index
    %c0_3 = arith.constant 0 : index
    %c0_4 = arith.constant 0 : index
    %2 = vector.load %arg2[%c0_2, %c0_3, %c0_4] : memref<4x16x32xbf16, #tpu.memory_space<vmem>>, vector<1x16x32xbf16>
    %3 = vector.shape_cast %2 : vector<1x16x32xbf16> to vector<16x32xbf16>
    %cst = arith.constant dense<0.000000e+00> : vector<16x16xf32>
    %4 = tpu.matmul %3, %1, %cst {dimension_numbers = #tpu.dot_dimension_numbers<[1], [0], [0], [1], [0, 0, 1, 1], [], []>} : vector<16x32xbf16>, vector<32x16xbf16>, vector<16x16xf32> -> vector<16x16xf32>
    %5 = arith.truncf %4 : vector<16x16xf32> to vector<16x16xbf16>
    %c0_5 = arith.constant 0 : index
    %c0_6 = arith.constant 0 : index
    %c0_7 = arith.constant 0 : index
    %c0_8 = arith.constant 0 : index
    %6 = vector.load %arg3[%c0_5, %c0_6, %c0_7, %c0_8] : memref<1x4x16x16xbf16, #tpu.memory_space<vmem>>, vector<1x1x16x16xbf16>
    %7 = vector.shape_cast %6 : vector<1x1x16x16xbf16> to vector<16x16xbf16>
    %8 = vector.shape_cast %5 : vector<16x16xbf16> to vector<1x1x16x16xbf16>
    tpu.vector_store %arg3[%c0_5, %c0_6, %c0_7, %c0_8], %8 {strides = array<i32>} : memref<1x4x16x16xbf16, #tpu.memory_space<vmem>>, vector<1x1x16x16xbf16>,
    %c1 = arith.constant 1 : index
    %c0_9 = arith.constant 0 : index
    %c0_10 = arith.constant 0 : index
    %9 = vector.load %arg2[%c1, %c0_9, %c0_10] : memref<4x16x32xbf16, #tpu.memory_space<vmem>>, vector<1x16x32xbf16>
    %10 = vector.shape_cast %9 : vector<1x16x32xbf16> to vector<16x32xbf16>
    %cst_11 = arith.constant dense<0.000000e+00> : vector<16x16xf32>
    %11 = tpu.matmul %10, %1, %cst_11 {dimension_numbers = #tpu.dot_dimension_numbers<[1], [0], [0], [1], [0, 0, 1, 1], [], []>} : vector<16x32xbf16>, vector<32x16xbf16>, vector<16x16xf32> -> vector<16x16xf32>
    %12 = arith.truncf %11 : vector<16x16xf32> to vector<16x16xbf16>
    %c0_12 = arith.constant 0 : index
    %c1_13 = arith.constant 1 : index
    %c0_14 = arith.constant 0 : index
    %c0_15 = arith.constant 0 : index
    %13 = vector.load %arg3[%c0_12, %c1_13, %c0_14, %c0_15] : memref<1x4x16x16xbf16, #tpu.memory_space<vmem>>, vector<1x1x16x16xbf16>
    %14 = vector.shape_cast %13 : vector<1x1x16x16xbf16> to vector<16x16xbf16>
    %15 = vector.shape_cast %12 : vector<16x16xbf16> to vector<1x1x16x16xbf16>
    tpu.vector_store %arg3[%c0_12, %c1_13, %c0_14, %c0_15], %15 {strides = array<i32>} : memref<1x4x16x16xbf16, #tpu.memory_space<vmem>>, vector<1x1x16x16xbf16>,
    %c2 = arith.constant 2 : index
    %c0_16 = arith.constant 0 : index
    %c0_17 = arith.constant 0 : index
    %16 = vector.load %arg2[%c2, %c0_16, %c0_17] : memref<4x16x32xbf16, #tpu.memory_space<vmem>>, vector<1x16x32xbf16>
    %17 = vector.shape_cast %16 : vector<1x16x32xbf16> to vector<16x32xbf16>
    %cst_18 = arith.constant dense<0.000000e+00> : vector<16x16xf32>
    %18 = tpu.matmul %17, %1, %cst_18 {dimension_numbers = #tpu.dot_dimension_numbers<[1], [0], [0], [1], [0, 0, 1, 1], [], []>} : vector<16x32xbf16>, vector<32x16xbf16>, vector<16x16xf32> -> vector<16x16xf32>
    %19 = arith.truncf %18 : vector<16x16xf32> to vector<16x16xbf16>
    %c0_19 = arith.constant 0 : index
    %c2_20 = arith.constant 2 : index
    %c0_21 = arith.constant 0 : index
    %c0_22 = arith.constant 0 : index
    %20 = vector.load %arg3[%c0_19, %c2_20, %c0_21, %c0_22] : memref<1x4x16x16xbf16, #tpu.memory_space<vmem>>, vector<1x1x16x16xbf16>
    %21 = vector.shape_cast %20 : vector<1x1x16x16xbf16> to vector<16x16xbf16>
    %22 = vector.shape_cast %19 : vector<16x16xbf16> to vector<1x1x16x16xbf16>
    tpu.vector_store %arg3[%c0_19, %c2_20, %c0_21, %c0_22], %22 {strides = array<i32>} : memref<1x4x16x16xbf16, #tpu.memory_space<vmem>>, vector<1x1x16x16xbf16>,
    %c3 = arith.constant 3 : index
    %c0_23 = arith.constant 0 : index
    %c0_24 = arith.constant 0 : index
    %23 = vector.load %arg2[%c3, %c0_23, %c0_24] : memref<4x16x32xbf16, #tpu.memory_space<vmem>>, vector<1x16x32xbf16>
    %24 = vector.shape_cast %23 : vector<1x16x32xbf16> to vector<16x32xbf16>
    %cst_25 = arith.constant dense<0.000000e+00> : vector<16x16xf32>
    %25 = tpu.matmul %24, %1, %cst_25 {dimension_numbers = #tpu.dot_dimension_numbers<[1], [0], [0], [1], [0, 0, 1, 1], [], []>} : vector<16x32xbf16>, vector<32x16xbf16>, vector<16x16xf32> -> vector<16x16xf32>
    %26 = arith.truncf %25 : vector<16x16xf32> to vector<16x16xbf16>
    %c0_26 = arith.constant 0 : index
    %c3_27 = arith.constant 3 : index
    %c0_28 = arith.constant 0 : index
    %c0_29 = arith.constant 0 : index
    %27 = vector.load %arg3[%c0_26, %c3_27, %c0_28, %c0_29] : memref<1x4x16x16xbf16, #tpu.memory_space<vmem>>, vector<1x1x16x16xbf16>
    %28 = vector.shape_cast %27 : vector<1x1x16x16xbf16> to vector<16x16xbf16>
    %29 = vector.shape_cast %26 : vector<16x16xbf16> to vector<1x1x16x16xbf16>
    tpu.vector_store %arg3[%c0_26, %c3_27, %c0_28, %c0_29], %29 {strides = array<i32>} : memref<1x4x16x16xbf16, #tpu.memory_space<vmem>>, vector<1x1x16x16xbf16>,
    return
  }
  func.func @transform_0(%arg0: i32) -> (i32, i32, i32) {
    %c0_i32 = arith.constant 0 : i32
    %c0_i32_0 = arith.constant 0 : i32
    %c0_i32_1 = arith.constant 0 : i32
    return %arg0, %c0_i32, %c0_i32_0 : i32, i32, i32
  }
  func.func @transform_1(%arg0: i32) -> (i32, i32, i32) {
    %c0_i32 = arith.constant 0 : i32
    %c0_i32_0 = arith.constant 0 : i32
    %c0_i32_1 = arith.constant 0 : i32
    %c0_i32_2 = arith.constant 0 : i32
    return %c0_i32, %c0_i32_0, %c0_i32_1 : i32, i32, i32
  }
  func.func @transform_2(%arg0: i32) -> (i32, i32, i32, i32) {
    %c0_i32 = arith.constant 0 : i32
    %c0_i32_0 = arith.constant 0 : i32
    %c0_i32_1 = arith.constant 0 : i32
    %c0_i32_2 = arith.constant 0 : i32
    return %arg0, %c0_i32, %c0_i32_0, %c0_i32_1 : i32, i32, i32, i32
  }
}

module attributes {stable_mosaic.version = 11 : i64} {
  func.func @_conv_chain_kernel(%arg0: i32, %arg1: memref<1x16x82xbf16, #tpu.memory_space<vmem>>, %arg2: memref<9x1x64xbf16, #tpu.memory_space<vmem>>, %arg3: memref<9x16x16xbf16, #tpu.memory_space<vmem>>, %arg4: memref<16x1xf32, #tpu.memory_space<vmem>>, %arg5: memref<16x1xf32, #tpu.memory_space<vmem>>, %arg6: memref<1x16x64xbf16, #tpu.memory_space<vmem>>) attributes {dimension_semantics = [#tpu.dimension_semantics<parallel>], iteration_bounds = array<i64: 2>, scalar_prefetch = 0 : i64, scratch_operands = 0 : i64, tpu.core_type = #tpu.core_type<tc>, window_params = [{transform_indices = @transform_0, window_bounds = array<i64: 1, 16, 82>}, {pipeline_mode = #tpu.pipeline_mode<synchronous>, transform_indices = @transform_1, window_bounds = array<i64: 9, 1, 64>}, {pipeline_mode = #tpu.pipeline_mode<synchronous>, transform_indices = @transform_2, window_bounds = array<i64: 9, 16, 16>}, {pipeline_mode = #tpu.pipeline_mode<synchronous>, transform_indices = @transform_3, window_bounds = array<i64: 16, 1>}, {pipeline_mode = #tpu.pipeline_mode<synchronous>, transform_indices = @transform_4, window_bounds = array<i64: 16, 1>}, {transform_indices = @transform_5, window_bounds = array<i64: 1, 16, 64>}]} {
    %c0 = arith.constant 0 : index
    %c0_0 = arith.constant 0 : index
    %c0_1 = arith.constant 0 : index
    %0 = vector.load %arg1[%c0, %c0_0, %c0_1] : memref<1x16x82xbf16, #tpu.memory_space<vmem>>, vector<1x16x64xbf16>
    %1 = vector.shape_cast %0 : vector<1x16x64xbf16> to vector<16x64xbf16>
    %c0_2 = arith.constant 0 : index
    %c0_3 = arith.constant 0 : index
    %c0_4 = arith.constant 0 : index
    %2 = vector.load %arg2[%c0_2, %c0_3, %c0_4] : memref<9x1x64xbf16, #tpu.memory_space<vmem>>, vector<1x1x64xbf16>
    %3 = vector.shape_cast %2 : vector<1x1x64xbf16> to vector<1x64xbf16>
    %4 = vector.broadcast %3 : vector<1x64xbf16> to vector<16x64xbf16>
    %5 = arith.mulf %1, %4 : vector<16x64xbf16>
    %c0_5 = arith.constant 0 : index
    %c0_6 = arith.constant 0 : index
    %c0_7 = arith.constant 0 : index
    %6 = vector.load %arg3[%c0_5, %c0_6, %c0_7] : memref<9x16x16xbf16, #tpu.memory_space<vmem>>, vector<1x16x16xbf16>
    %7 = vector.shape_cast %6 : vector<1x16x16xbf16> to vector<16x16xbf16>
    %cst = arith.constant dense<0.000000e+00> : vector<16x64xf32>
    %8 = tpu.matmul %7, %5, %cst {dimension_numbers = #tpu.dot_dimension_numbers<[1], [0], [0], [1], [0, 0, 1, 1], [], []>} : vector<16x16xbf16>, vector<16x64xbf16>, vector<16x64xf32> -> vector<16x64xf32>
    %c0_8 = arith.constant 0 : index
    %c0_9 = arith.constant 0 : index
    %c1 = arith.constant 1 : index
    %9 = vector.load %arg1[%c0_8, %c0_9, %c1] : memref<1x16x82xbf16, #tpu.memory_space<vmem>>, vector<1x16x64xbf16>
    %10 = vector.shape_cast %9 : vector<1x16x64xbf16> to vector<16x64xbf16>
    %c1_10 = arith.constant 1 : index
    %c0_11 = arith.constant 0 : index
    %c0_12 = arith.constant 0 : index
    %11 = vector.load %arg3[%c1_10, %c0_11, %c0_12] : memref<9x16x16xbf16, #tpu.memory_space<vmem>>, vector<1x16x16xbf16>
    %12 = vector.shape_cast %11 : vector<1x16x16xbf16> to vector<16x16xbf16>
    %cst_13 = arith.constant dense<0.000000e+00> : vector<16x64xf32>
    %13 = tpu.matmul %12, %10, %cst_13 {dimension_numbers = #tpu.dot_dimension_numbers<[1], [0], [0], [1], [0, 0, 1, 1], [], []>} : vector<16x16xbf16>, vector<16x64xbf16>, vector<16x64xf32> -> vector<16x64xf32>
    %14 = arith.addf %8, %13 : vector<16x64xf32>
    %c0_14 = arith.constant 0 : index
    %c0_15 = arith.constant 0 : index
    %c2 = arith.constant 2 : index
    %15 = vector.load %arg1[%c0_14, %c0_15, %c2] : memref<1x16x82xbf16, #tpu.memory_space<vmem>>, vector<1x16x64xbf16>
    %16 = vector.shape_cast %15 : vector<1x16x64xbf16> to vector<16x64xbf16>
    %c2_16 = arith.constant 2 : index
    %c0_17 = arith.constant 0 : index
    %c0_18 = arith.constant 0 : index
    %17 = vector.load %arg2[%c2_16, %c0_17, %c0_18] : memref<9x1x64xbf16, #tpu.memory_space<vmem>>, vector<1x1x64xbf16>
    %18 = vector.shape_cast %17 : vector<1x1x64xbf16> to vector<1x64xbf16>
    %19 = vector.broadcast %18 : vector<1x64xbf16> to vector<16x64xbf16>
    %20 = arith.mulf %16, %19 : vector<16x64xbf16>
    %c2_19 = arith.constant 2 : index
    %c0_20 = arith.constant 0 : index
    %c0_21 = arith.constant 0 : index
    %21 = vector.load %arg3[%c2_19, %c0_20, %c0_21] : memref<9x16x16xbf16, #tpu.memory_space<vmem>>, vector<1x16x16xbf16>
    %22 = vector.shape_cast %21 : vector<1x16x16xbf16> to vector<16x16xbf16>
    %cst_22 = arith.constant dense<0.000000e+00> : vector<16x64xf32>
    %23 = tpu.matmul %22, %20, %cst_22 {dimension_numbers = #tpu.dot_dimension_numbers<[1], [0], [0], [1], [0, 0, 1, 1], [], []>} : vector<16x16xbf16>, vector<16x64xbf16>, vector<16x64xf32> -> vector<16x64xf32>
    %24 = arith.addf %14, %23 : vector<16x64xf32>
    %c0_23 = arith.constant 0 : index
    %c0_24 = arith.constant 0 : index
    %c8 = arith.constant 8 : index
    %25 = vector.load %arg1[%c0_23, %c0_24, %c8] : memref<1x16x82xbf16, #tpu.memory_space<vmem>>, vector<1x16x64xbf16>
    %26 = vector.shape_cast %25 : vector<1x16x64xbf16> to vector<16x64xbf16>
    %c3 = arith.constant 3 : index
    %c0_25 = arith.constant 0 : index
    %c0_26 = arith.constant 0 : index
    %27 = vector.load %arg2[%c3, %c0_25, %c0_26] : memref<9x1x64xbf16, #tpu.memory_space<vmem>>, vector<1x1x64xbf16>
    %28 = vector.shape_cast %27 : vector<1x1x64xbf16> to vector<1x64xbf16>
    %29 = vector.broadcast %28 : vector<1x64xbf16> to vector<16x64xbf16>
    %30 = arith.mulf %26, %29 : vector<16x64xbf16>
    %c3_27 = arith.constant 3 : index
    %c0_28 = arith.constant 0 : index
    %c0_29 = arith.constant 0 : index
    %31 = vector.load %arg3[%c3_27, %c0_28, %c0_29] : memref<9x16x16xbf16, #tpu.memory_space<vmem>>, vector<1x16x16xbf16>
    %32 = vector.shape_cast %31 : vector<1x16x16xbf16> to vector<16x16xbf16>
    %cst_30 = arith.constant dense<0.000000e+00> : vector<16x64xf32>
    %33 = tpu.matmul %32, %30, %cst_30 {dimension_numbers = #tpu.dot_dimension_numbers<[1], [0], [0], [1], [0, 0, 1, 1], [], []>} : vector<16x16xbf16>, vector<16x64xbf16>, vector<16x64xf32> -> vector<16x64xf32>
    %34 = arith.addf %24, %33 : vector<16x64xf32>
    %c0_31 = arith.constant 0 : index
    %c0_32 = arith.constant 0 : index
    %c9 = arith.constant 9 : index
    %35 = vector.load %arg1[%c0_31, %c0_32, %c9] : memref<1x16x82xbf16, #tpu.memory_space<vmem>>, vector<1x16x64xbf16>
    %36 = vector.shape_cast %35 : vector<1x16x64xbf16> to vector<16x64xbf16>
    %c4 = arith.constant 4 : index
    %c0_33 = arith.constant 0 : index
    %c0_34 = arith.constant 0 : index
    %37 = vector.load %arg3[%c4, %c0_33, %c0_34] : memref<9x16x16xbf16, #tpu.memory_space<vmem>>, vector<1x16x16xbf16>
    %38 = vector.shape_cast %37 : vector<1x16x16xbf16> to vector<16x16xbf16>
    %cst_35 = arith.constant dense<0.000000e+00> : vector<16x64xf32>
    %39 = tpu.matmul %38, %36, %cst_35 {dimension_numbers = #tpu.dot_dimension_numbers<[1], [0], [0], [1], [0, 0, 1, 1], [], []>} : vector<16x16xbf16>, vector<16x64xbf16>, vector<16x64xf32> -> vector<16x64xf32>
    %40 = arith.addf %34, %39 : vector<16x64xf32>
    %c0_36 = arith.constant 0 : index
    %c0_37 = arith.constant 0 : index
    %c10 = arith.constant 10 : index
    %41 = vector.load %arg1[%c0_36, %c0_37, %c10] : memref<1x16x82xbf16, #tpu.memory_space<vmem>>, vector<1x16x64xbf16>
    %42 = vector.shape_cast %41 : vector<1x16x64xbf16> to vector<16x64xbf16>
    %c5 = arith.constant 5 : index
    %c0_38 = arith.constant 0 : index
    %c0_39 = arith.constant 0 : index
    %43 = vector.load %arg2[%c5, %c0_38, %c0_39] : memref<9x1x64xbf16, #tpu.memory_space<vmem>>, vector<1x1x64xbf16>
    %44 = vector.shape_cast %43 : vector<1x1x64xbf16> to vector<1x64xbf16>
    %45 = vector.broadcast %44 : vector<1x64xbf16> to vector<16x64xbf16>
    %46 = arith.mulf %42, %45 : vector<16x64xbf16>
    %c5_40 = arith.constant 5 : index
    %c0_41 = arith.constant 0 : index
    %c0_42 = arith.constant 0 : index
    %47 = vector.load %arg3[%c5_40, %c0_41, %c0_42] : memref<9x16x16xbf16, #tpu.memory_space<vmem>>, vector<1x16x16xbf16>
    %48 = vector.shape_cast %47 : vector<1x16x16xbf16> to vector<16x16xbf16>
    %cst_43 = arith.constant dense<0.000000e+00> : vector<16x64xf32>
    %49 = tpu.matmul %48, %46, %cst_43 {dimension_numbers = #tpu.dot_dimension_numbers<[1], [0], [0], [1], [0, 0, 1, 1], [], []>} : vector<16x16xbf16>, vector<16x64xbf16>, vector<16x64xf32> -> vector<16x64xf32>
    %50 = arith.addf %40, %49 : vector<16x64xf32>
    %c0_44 = arith.constant 0 : index
    %c0_45 = arith.constant 0 : index
    %c16 = arith.constant 16 : index
    %51 = vector.load %arg1[%c0_44, %c0_45, %c16] : memref<1x16x82xbf16, #tpu.memory_space<vmem>>, vector<1x16x64xbf16>
    %52 = vector.shape_cast %51 : vector<1x16x64xbf16> to vector<16x64xbf16>
    %c6 = arith.constant 6 : index
    %c0_46 = arith.constant 0 : index
    %c0_47 = arith.constant 0 : index
    %53 = vector.load %arg2[%c6, %c0_46, %c0_47] : memref<9x1x64xbf16, #tpu.memory_space<vmem>>, vector<1x1x64xbf16>
    %54 = vector.shape_cast %53 : vector<1x1x64xbf16> to vector<1x64xbf16>
    %55 = vector.broadcast %54 : vector<1x64xbf16> to vector<16x64xbf16>
    %56 = arith.mulf %52, %55 : vector<16x64xbf16>
    %c6_48 = arith.constant 6 : index
    %c0_49 = arith.constant 0 : index
    %c0_50 = arith.constant 0 : index
    %57 = vector.load %arg3[%c6_48, %c0_49, %c0_50] : memref<9x16x16xbf16, #tpu.memory_space<vmem>>, vector<1x16x16xbf16>
    %58 = vector.shape_cast %57 : vector<1x16x16xbf16> to vector<16x16xbf16>
    %cst_51 = arith.constant dense<0.000000e+00> : vector<16x64xf32>
    %59 = tpu.matmul %58, %56, %cst_51 {dimension_numbers = #tpu.dot_dimension_numbers<[1], [0], [0], [1], [0, 0, 1, 1], [], []>} : vector<16x16xbf16>, vector<16x64xbf16>, vector<16x64xf32> -> vector<16x64xf32>
    %60 = arith.addf %50, %59 : vector<16x64xf32>
    %c0_52 = arith.constant 0 : index
    %c0_53 = arith.constant 0 : index
    %c17 = arith.constant 17 : index
    %61 = vector.load %arg1[%c0_52, %c0_53, %c17] : memref<1x16x82xbf16, #tpu.memory_space<vmem>>, vector<1x16x64xbf16>
    %62 = vector.shape_cast %61 : vector<1x16x64xbf16> to vector<16x64xbf16>
    %c7 = arith.constant 7 : index
    %c0_54 = arith.constant 0 : index
    %c0_55 = arith.constant 0 : index
    %63 = vector.load %arg3[%c7, %c0_54, %c0_55] : memref<9x16x16xbf16, #tpu.memory_space<vmem>>, vector<1x16x16xbf16>
    %64 = vector.shape_cast %63 : vector<1x16x16xbf16> to vector<16x16xbf16>
    %cst_56 = arith.constant dense<0.000000e+00> : vector<16x64xf32>
    %65 = tpu.matmul %64, %62, %cst_56 {dimension_numbers = #tpu.dot_dimension_numbers<[1], [0], [0], [1], [0, 0, 1, 1], [], []>} : vector<16x16xbf16>, vector<16x64xbf16>, vector<16x64xf32> -> vector<16x64xf32>
    %66 = arith.addf %60, %65 : vector<16x64xf32>
    %c0_57 = arith.constant 0 : index
    %c0_58 = arith.constant 0 : index
    %c18 = arith.constant 18 : index
    %67 = vector.load %arg1[%c0_57, %c0_58, %c18] : memref<1x16x82xbf16, #tpu.memory_space<vmem>>, vector<1x16x64xbf16>
    %68 = vector.shape_cast %67 : vector<1x16x64xbf16> to vector<16x64xbf16>
    %c8_59 = arith.constant 8 : index
    %c0_60 = arith.constant 0 : index
    %c0_61 = arith.constant 0 : index
    %69 = vector.load %arg2[%c8_59, %c0_60, %c0_61] : memref<9x1x64xbf16, #tpu.memory_space<vmem>>, vector<1x1x64xbf16>
    %70 = vector.shape_cast %69 : vector<1x1x64xbf16> to vector<1x64xbf16>
    %71 = vector.broadcast %70 : vector<1x64xbf16> to vector<16x64xbf16>
    %72 = arith.mulf %68, %71 : vector<16x64xbf16>
    %c8_62 = arith.constant 8 : index
    %c0_63 = arith.constant 0 : index
    %c0_64 = arith.constant 0 : index
    %73 = vector.load %arg3[%c8_62, %c0_63, %c0_64] : memref<9x16x16xbf16, #tpu.memory_space<vmem>>, vector<1x16x16xbf16>
    %74 = vector.shape_cast %73 : vector<1x16x16xbf16> to vector<16x16xbf16>
    %cst_65 = arith.constant dense<0.000000e+00> : vector<16x64xf32>
    %75 = tpu.matmul %74, %72, %cst_65 {dimension_numbers = #tpu.dot_dimension_numbers<[1], [0], [0], [1], [0, 0, 1, 1], [], []>} : vector<16x16xbf16>, vector<16x64xbf16>, vector<16x64xf32> -> vector<16x64xf32>
    %76 = arith.addf %66, %75 : vector<16x64xf32>
    %c0_66 = arith.constant 0 : index
    %c0_67 = arith.constant 0 : index
    %77 = vector.load %arg4[%c0_66, %c0_67] : memref<16x1xf32, #tpu.memory_space<vmem>>, vector<16x1xf32>
    %78 = vector.broadcast %77 : vector<16x1xf32> to vector<16x64xf32>
    %79 = arith.mulf %76, %78 : vector<16x64xf32>
    %c0_68 = arith.constant 0 : index
    %c0_69 = arith.constant 0 : index
    %80 = vector.load %arg5[%c0_68, %c0_69] : memref<16x1xf32, #tpu.memory_space<vmem>>, vector<16x1xf32>
    %81 = vector.broadcast %80 : vector<16x1xf32> to vector<16x64xf32>
    %82 = arith.addf %79, %81 : vector<16x64xf32>
    %cst_70 = arith.constant 0.000000e+00 : f32
    %83 = vector.broadcast %cst_70 : f32 to vector<16x64xf32>
    %84 = arith.maximumf %82, %83 : vector<16x64xf32>
    %85 = arith.truncf %84 : vector<16x64xf32> to vector<16x64xbf16>
    %c0_71 = arith.constant 0 : index
    %c0_72 = arith.constant 0 : index
    %c0_73 = arith.constant 0 : index
    %86 = vector.load %arg6[%c0_71, %c0_72, %c0_73] : memref<1x16x64xbf16, #tpu.memory_space<vmem>>, vector<1x16x64xbf16>
    %87 = vector.shape_cast %86 : vector<1x16x64xbf16> to vector<16x64xbf16>
    %88 = vector.shape_cast %85 : vector<16x64xbf16> to vector<1x16x64xbf16>
    tpu.vector_store %arg6[%c0_71, %c0_72, %c0_73], %88 {strides = array<i32>} : memref<1x16x64xbf16, #tpu.memory_space<vmem>>, vector<1x16x64xbf16>,
    return
  }
  func.func @transform_0(%arg0: i32) -> (i32, i32, i32) {
    %c0_i32 = arith.constant 0 : i32
    %c0_i32_0 = arith.constant 0 : i32
    %c0_i32_1 = arith.constant 0 : i32
    return %arg0, %c0_i32, %c0_i32_0 : i32, i32, i32
  }
  func.func @transform_1(%arg0: i32) -> (i32, i32, i32) {
    %c0_i32 = arith.constant 0 : i32
    %c0_i32_0 = arith.constant 0 : i32
    %c0_i32_1 = arith.constant 0 : i32
    %c0_i32_2 = arith.constant 0 : i32
    return %c0_i32, %c0_i32_0, %c0_i32_1 : i32, i32, i32
  }
  func.func @transform_2(%arg0: i32) -> (i32, i32, i32) {
    %c0_i32 = arith.constant 0 : i32
    %c0_i32_0 = arith.constant 0 : i32
    %c0_i32_1 = arith.constant 0 : i32
    %c0_i32_2 = arith.constant 0 : i32
    return %c0_i32, %c0_i32_0, %c0_i32_1 : i32, i32, i32
  }
  func.func @transform_3(%arg0: i32) -> (i32, i32) {
    %c0_i32 = arith.constant 0 : i32
    %c0_i32_0 = arith.constant 0 : i32
    %c0_i32_1 = arith.constant 0 : i32
    return %c0_i32, %c0_i32_0 : i32, i32
  }
  func.func @transform_4(%arg0: i32) -> (i32, i32) {
    %c0_i32 = arith.constant 0 : i32
    %c0_i32_0 = arith.constant 0 : i32
    %c0_i32_1 = arith.constant 0 : i32
    return %c0_i32, %c0_i32_0 : i32, i32
  }
  func.func @transform_5(%arg0: i32) -> (i32, i32, i32) {
    %c0_i32 = arith.constant 0 : i32
    %c0_i32_0 = arith.constant 0 : i32
    %c0_i32_1 = arith.constant 0 : i32
    return %arg0, %c0_i32, %c0_i32_0 : i32, i32, i32
  }
}

module attributes {stable_mosaic.version = 11 : i64} {
  func.func @_conv_chain_kernel(%arg0: i32, %arg1: memref<1x32x82xbf16, #tpu.memory_space<vmem>>, %arg2: memref<9x1x64xbf16, #tpu.memory_space<vmem>>, %arg3: memref<9x16x32xbf16, #tpu.memory_space<vmem>>, %arg4: memref<16x1xf32, #tpu.memory_space<vmem>>, %arg5: memref<16x1xf32, #tpu.memory_space<vmem>>, %arg6: memref<9x16x16xbf16, #tpu.memory_space<vmem>>, %arg7: memref<16x1xf32, #tpu.memory_space<vmem>>, %arg8: memref<16x1xf32, #tpu.memory_space<vmem>>, %arg9: memref<1x16x64xbf16, #tpu.memory_space<vmem>>, %arg10: memref<16x82xbf16, #tpu.memory_space<vmem>>) attributes {dimension_semantics = [#tpu.dimension_semantics<parallel>], iteration_bounds = array<i64: 2>, scalar_prefetch = 0 : i64, scratch_operands = 1 : i64, tpu.core_type = #tpu.core_type<tc>, window_params = [{transform_indices = @transform_0, window_bounds = array<i64: 1, 32, 82>}, {pipeline_mode = #tpu.pipeline_mode<synchronous>, transform_indices = @transform_1, window_bounds = array<i64: 9, 1, 64>}, {pipeline_mode = #tpu.pipeline_mode<synchronous>, transform_indices = @transform_2, window_bounds = array<i64: 9, 16, 32>}, {pipeline_mode = #tpu.pipeline_mode<synchronous>, transform_indices = @transform_3, window_bounds = array<i64: 16, 1>}, {pipeline_mode = #tpu.pipeline_mode<synchronous>, transform_indices = @transform_4, window_bounds = array<i64: 16, 1>}, {pipeline_mode = #tpu.pipeline_mode<synchronous>, transform_indices = @transform_5, window_bounds = array<i64: 9, 16, 16>}, {pipeline_mode = #tpu.pipeline_mode<synchronous>, transform_indices = @transform_6, window_bounds = array<i64: 16, 1>}, {pipeline_mode = #tpu.pipeline_mode<synchronous>, transform_indices = @transform_7, window_bounds = array<i64: 16, 1>}, {transform_indices = @transform_8, window_bounds = array<i64: 1, 16, 64>}]} {
    %c0 = arith.constant 0 : index
    %c0_0 = arith.constant 0 : index
    %c0_1 = arith.constant 0 : index
    %0 = vector.load %arg1[%c0, %c0_0, %c0_1] : memref<1x32x82xbf16, #tpu.memory_space<vmem>>, vector<1x32x64xbf16>
    %1 = vector.shape_cast %0 : vector<1x32x64xbf16> to vector<32x64xbf16>
    %c0_2 = arith.constant 0 : index
    %c0_3 = arith.constant 0 : index
    %c0_4 = arith.constant 0 : index
    %2 = vector.load %arg2[%c0_2, %c0_3, %c0_4] : memref<9x1x64xbf16, #tpu.memory_space<vmem>>, vector<1x1x64xbf16>
    %3 = vector.shape_cast %2 : vector<1x1x64xbf16> to vector<1x64xbf16>
    %4 = vector.broadcast %3 : vector<1x64xbf16> to vector<32x64xbf16>
    %5 = arith.mulf %1, %4 : vector<32x64xbf16>
    %c0_5 = arith.constant 0 : index
    %c0_6 = arith.constant 0 : index
    %c0_7 = arith.constant 0 : index
    %6 = vector.load %arg3[%c0_5, %c0_6, %c0_7] : memref<9x16x32xbf16, #tpu.memory_space<vmem>>, vector<1x16x32xbf16>
    %7 = vector.shape_cast %6 : vector<1x16x32xbf16> to vector<16x32xbf16>
    %cst = arith.constant dense<0.000000e+00> : vector<16x64xf32>
    %8 = tpu.matmul %7, %5, %cst {dimension_numbers = #tpu.dot_dimension_numbers<[1], [0], [0], [1], [0, 0, 1, 1], [], []>} : vector<16x32xbf16>, vector<32x64xbf16>, vector<16x64xf32> -> vector<16x64xf32>
    %c0_8 = arith.constant 0 : index
    %c0_9 = arith.constant 0 : index
    %c1 = arith.constant 1 : index
    %9 = vector.load %arg1[%c0_8, %c0_9, %c1] : memref<1x32x82xbf16, #tpu.memory_space<vmem>>, vector<1x32x64xbf16>
    %10 = vector.shape_cast %9 : vector<1x32x64xbf16> to vector<32x64xbf16>
    %c1_10 = arith.constant 1 : index
    %c0_11 = arith.constant 0 : index
    %c0_12 = arith.constant 0 : index
    %11 = vector.load %arg3[%c1_10, %c0_11, %c0_12] : memref<9x16x32xbf16, #tpu.memory_space<vmem>>, vector<1x16x32xbf16>
    %12 = vector.shape_cast %11 : vector<1x16x32xbf16> to vector<16x32xbf16>
    %cst_13 = arith.constant dense<0.000000e+00> : vector<16x64xf32>
    %13 = tpu.matmul %12, %10, %cst_13 {dimension_numbers = #tpu.dot_dimension_numbers<[1], [0], [0], [1], [0, 0, 1, 1], [], []>} : vector<16x32xbf16>, vector<32x64xbf16>, vector<16x64xf32> -> vector<16x64xf32>
    %14 = arith.addf %8, %13 : vector<16x64xf32>
    %c0_14 = arith.constant 0 : index
    %c0_15 = arith.constant 0 : index
    %c2 = arith.constant 2 : index
    %15 = vector.load %arg1[%c0_14, %c0_15, %c2] : memref<1x32x82xbf16, #tpu.memory_space<vmem>>, vector<1x32x64xbf16>
    %16 = vector.shape_cast %15 : vector<1x32x64xbf16> to vector<32x64xbf16>
    %c2_16 = arith.constant 2 : index
    %c0_17 = arith.constant 0 : index
    %c0_18 = arith.constant 0 : index
    %17 = vector.load %arg2[%c2_16, %c0_17, %c0_18] : memref<9x1x64xbf16, #tpu.memory_space<vmem>>, vector<1x1x64xbf16>
    %18 = vector.shape_cast %17 : vector<1x1x64xbf16> to vector<1x64xbf16>
    %19 = vector.broadcast %18 : vector<1x64xbf16> to vector<32x64xbf16>
    %20 = arith.mulf %16, %19 : vector<32x64xbf16>
    %c2_19 = arith.constant 2 : index
    %c0_20 = arith.constant 0 : index
    %c0_21 = arith.constant 0 : index
    %21 = vector.load %arg3[%c2_19, %c0_20, %c0_21] : memref<9x16x32xbf16, #tpu.memory_space<vmem>>, vector<1x16x32xbf16>
    %22 = vector.shape_cast %21 : vector<1x16x32xbf16> to vector<16x32xbf16>
    %cst_22 = arith.constant dense<0.000000e+00> : vector<16x64xf32>
    %23 = tpu.matmul %22, %20, %cst_22 {dimension_numbers = #tpu.dot_dimension_numbers<[1], [0], [0], [1], [0, 0, 1, 1], [], []>} : vector<16x32xbf16>, vector<32x64xbf16>, vector<16x64xf32> -> vector<16x64xf32>
    %24 = arith.addf %14, %23 : vector<16x64xf32>
    %c0_23 = arith.constant 0 : index
    %c0_24 = arith.constant 0 : index
    %c8 = arith.constant 8 : index
    %25 = vector.load %arg1[%c0_23, %c0_24, %c8] : memref<1x32x82xbf16, #tpu.memory_space<vmem>>, vector<1x32x64xbf16>
    %26 = vector.shape_cast %25 : vector<1x32x64xbf16> to vector<32x64xbf16>
    %c3 = arith.constant 3 : index
    %c0_25 = arith.constant 0 : index
    %c0_26 = arith.constant 0 : index
    %27 = vector.load %arg2[%c3, %c0_25, %c0_26] : memref<9x1x64xbf16, #tpu.memory_space<vmem>>, vector<1x1x64xbf16>
    %28 = vector.shape_cast %27 : vector<1x1x64xbf16> to vector<1x64xbf16>
    %29 = vector.broadcast %28 : vector<1x64xbf16> to vector<32x64xbf16>
    %30 = arith.mulf %26, %29 : vector<32x64xbf16>
    %c3_27 = arith.constant 3 : index
    %c0_28 = arith.constant 0 : index
    %c0_29 = arith.constant 0 : index
    %31 = vector.load %arg3[%c3_27, %c0_28, %c0_29] : memref<9x16x32xbf16, #tpu.memory_space<vmem>>, vector<1x16x32xbf16>
    %32 = vector.shape_cast %31 : vector<1x16x32xbf16> to vector<16x32xbf16>
    %cst_30 = arith.constant dense<0.000000e+00> : vector<16x64xf32>
    %33 = tpu.matmul %32, %30, %cst_30 {dimension_numbers = #tpu.dot_dimension_numbers<[1], [0], [0], [1], [0, 0, 1, 1], [], []>} : vector<16x32xbf16>, vector<32x64xbf16>, vector<16x64xf32> -> vector<16x64xf32>
    %34 = arith.addf %24, %33 : vector<16x64xf32>
    %c0_31 = arith.constant 0 : index
    %c0_32 = arith.constant 0 : index
    %c9 = arith.constant 9 : index
    %35 = vector.load %arg1[%c0_31, %c0_32, %c9] : memref<1x32x82xbf16, #tpu.memory_space<vmem>>, vector<1x32x64xbf16>
    %36 = vector.shape_cast %35 : vector<1x32x64xbf16> to vector<32x64xbf16>
    %c4 = arith.constant 4 : index
    %c0_33 = arith.constant 0 : index
    %c0_34 = arith.constant 0 : index
    %37 = vector.load %arg3[%c4, %c0_33, %c0_34] : memref<9x16x32xbf16, #tpu.memory_space<vmem>>, vector<1x16x32xbf16>
    %38 = vector.shape_cast %37 : vector<1x16x32xbf16> to vector<16x32xbf16>
    %cst_35 = arith.constant dense<0.000000e+00> : vector<16x64xf32>
    %39 = tpu.matmul %38, %36, %cst_35 {dimension_numbers = #tpu.dot_dimension_numbers<[1], [0], [0], [1], [0, 0, 1, 1], [], []>} : vector<16x32xbf16>, vector<32x64xbf16>, vector<16x64xf32> -> vector<16x64xf32>
    %40 = arith.addf %34, %39 : vector<16x64xf32>
    %c0_36 = arith.constant 0 : index
    %c0_37 = arith.constant 0 : index
    %c10 = arith.constant 10 : index
    %41 = vector.load %arg1[%c0_36, %c0_37, %c10] : memref<1x32x82xbf16, #tpu.memory_space<vmem>>, vector<1x32x64xbf16>
    %42 = vector.shape_cast %41 : vector<1x32x64xbf16> to vector<32x64xbf16>
    %c5 = arith.constant 5 : index
    %c0_38 = arith.constant 0 : index
    %c0_39 = arith.constant 0 : index
    %43 = vector.load %arg2[%c5, %c0_38, %c0_39] : memref<9x1x64xbf16, #tpu.memory_space<vmem>>, vector<1x1x64xbf16>
    %44 = vector.shape_cast %43 : vector<1x1x64xbf16> to vector<1x64xbf16>
    %45 = vector.broadcast %44 : vector<1x64xbf16> to vector<32x64xbf16>
    %46 = arith.mulf %42, %45 : vector<32x64xbf16>
    %c5_40 = arith.constant 5 : index
    %c0_41 = arith.constant 0 : index
    %c0_42 = arith.constant 0 : index
    %47 = vector.load %arg3[%c5_40, %c0_41, %c0_42] : memref<9x16x32xbf16, #tpu.memory_space<vmem>>, vector<1x16x32xbf16>
    %48 = vector.shape_cast %47 : vector<1x16x32xbf16> to vector<16x32xbf16>
    %cst_43 = arith.constant dense<0.000000e+00> : vector<16x64xf32>
    %49 = tpu.matmul %48, %46, %cst_43 {dimension_numbers = #tpu.dot_dimension_numbers<[1], [0], [0], [1], [0, 0, 1, 1], [], []>} : vector<16x32xbf16>, vector<32x64xbf16>, vector<16x64xf32> -> vector<16x64xf32>
    %50 = arith.addf %40, %49 : vector<16x64xf32>
    %c0_44 = arith.constant 0 : index
    %c0_45 = arith.constant 0 : index
    %c16 = arith.constant 16 : index
    %51 = vector.load %arg1[%c0_44, %c0_45, %c16] : memref<1x32x82xbf16, #tpu.memory_space<vmem>>, vector<1x32x64xbf16>
    %52 = vector.shape_cast %51 : vector<1x32x64xbf16> to vector<32x64xbf16>
    %c6 = arith.constant 6 : index
    %c0_46 = arith.constant 0 : index
    %c0_47 = arith.constant 0 : index
    %53 = vector.load %arg2[%c6, %c0_46, %c0_47] : memref<9x1x64xbf16, #tpu.memory_space<vmem>>, vector<1x1x64xbf16>
    %54 = vector.shape_cast %53 : vector<1x1x64xbf16> to vector<1x64xbf16>
    %55 = vector.broadcast %54 : vector<1x64xbf16> to vector<32x64xbf16>
    %56 = arith.mulf %52, %55 : vector<32x64xbf16>
    %c6_48 = arith.constant 6 : index
    %c0_49 = arith.constant 0 : index
    %c0_50 = arith.constant 0 : index
    %57 = vector.load %arg3[%c6_48, %c0_49, %c0_50] : memref<9x16x32xbf16, #tpu.memory_space<vmem>>, vector<1x16x32xbf16>
    %58 = vector.shape_cast %57 : vector<1x16x32xbf16> to vector<16x32xbf16>
    %cst_51 = arith.constant dense<0.000000e+00> : vector<16x64xf32>
    %59 = tpu.matmul %58, %56, %cst_51 {dimension_numbers = #tpu.dot_dimension_numbers<[1], [0], [0], [1], [0, 0, 1, 1], [], []>} : vector<16x32xbf16>, vector<32x64xbf16>, vector<16x64xf32> -> vector<16x64xf32>
    %60 = arith.addf %50, %59 : vector<16x64xf32>
    %c0_52 = arith.constant 0 : index
    %c0_53 = arith.constant 0 : index
    %c17 = arith.constant 17 : index
    %61 = vector.load %arg1[%c0_52, %c0_53, %c17] : memref<1x32x82xbf16, #tpu.memory_space<vmem>>, vector<1x32x64xbf16>
    %62 = vector.shape_cast %61 : vector<1x32x64xbf16> to vector<32x64xbf16>
    %c7 = arith.constant 7 : index
    %c0_54 = arith.constant 0 : index
    %c0_55 = arith.constant 0 : index
    %63 = vector.load %arg3[%c7, %c0_54, %c0_55] : memref<9x16x32xbf16, #tpu.memory_space<vmem>>, vector<1x16x32xbf16>
    %64 = vector.shape_cast %63 : vector<1x16x32xbf16> to vector<16x32xbf16>
    %cst_56 = arith.constant dense<0.000000e+00> : vector<16x64xf32>
    %65 = tpu.matmul %64, %62, %cst_56 {dimension_numbers = #tpu.dot_dimension_numbers<[1], [0], [0], [1], [0, 0, 1, 1], [], []>} : vector<16x32xbf16>, vector<32x64xbf16>, vector<16x64xf32> -> vector<16x64xf32>
    %66 = arith.addf %60, %65 : vector<16x64xf32>
    %c0_57 = arith.constant 0 : index
    %c0_58 = arith.constant 0 : index
    %c18 = arith.constant 18 : index
    %67 = vector.load %arg1[%c0_57, %c0_58, %c18] : memref<1x32x82xbf16, #tpu.memory_space<vmem>>, vector<1x32x64xbf16>
    %68 = vector.shape_cast %67 : vector<1x32x64xbf16> to vector<32x64xbf16>
    %c8_59 = arith.constant 8 : index
    %c0_60 = arith.constant 0 : index
    %c0_61 = arith.constant 0 : index
    %69 = vector.load %arg2[%c8_59, %c0_60, %c0_61] : memref<9x1x64xbf16, #tpu.memory_space<vmem>>, vector<1x1x64xbf16>
    %70 = vector.shape_cast %69 : vector<1x1x64xbf16> to vector<1x64xbf16>
    %71 = vector.broadcast %70 : vector<1x64xbf16> to vector<32x64xbf16>
    %72 = arith.mulf %68, %71 : vector<32x64xbf16>
    %c8_62 = arith.constant 8 : index
    %c0_63 = arith.constant 0 : index
    %c0_64 = arith.constant 0 : index
    %73 = vector.load %arg3[%c8_62, %c0_63, %c0_64] : memref<9x16x32xbf16, #tpu.memory_space<vmem>>, vector<1x16x32xbf16>
    %74 = vector.shape_cast %73 : vector<1x16x32xbf16> to vector<16x32xbf16>
    %cst_65 = arith.constant dense<0.000000e+00> : vector<16x64xf32>
    %75 = tpu.matmul %74, %72, %cst_65 {dimension_numbers = #tpu.dot_dimension_numbers<[1], [0], [0], [1], [0, 0, 1, 1], [], []>} : vector<16x32xbf16>, vector<32x64xbf16>, vector<16x64xf32> -> vector<16x64xf32>
    %76 = arith.addf %66, %75 : vector<16x64xf32>
    %c0_66 = arith.constant 0 : index
    %c0_67 = arith.constant 0 : index
    %77 = vector.load %arg4[%c0_66, %c0_67] : memref<16x1xf32, #tpu.memory_space<vmem>>, vector<16x1xf32>
    %78 = vector.broadcast %77 : vector<16x1xf32> to vector<16x64xf32>
    %79 = arith.mulf %76, %78 : vector<16x64xf32>
    %c0_68 = arith.constant 0 : index
    %c0_69 = arith.constant 0 : index
    %80 = vector.load %arg5[%c0_68, %c0_69] : memref<16x1xf32, #tpu.memory_space<vmem>>, vector<16x1xf32>
    %81 = vector.broadcast %80 : vector<16x1xf32> to vector<16x64xf32>
    %82 = arith.addf %79, %81 : vector<16x64xf32>
    %cst_70 = arith.constant 0.000000e+00 : f32
    %83 = vector.broadcast %cst_70 : f32 to vector<16x64xf32>
    %84 = arith.maximumf %82, %83 : vector<16x64xf32>
    %cst_71 = arith.constant 0.000000e+00 : bf16
    %85 = vector.broadcast %cst_71 : bf16 to vector<16x82xbf16>
    %c0_72 = arith.constant 0 : index
    %c0_73 = arith.constant 0 : index
    %86 = vector.load %arg10[%c0_72, %c0_73] : memref<16x82xbf16, #tpu.memory_space<vmem>>, vector<16x82xbf16>
    tpu.vector_store %arg10[%c0_72, %c0_73], %85 {strides = array<i32>} : memref<16x82xbf16, #tpu.memory_space<vmem>>, vector<16x82xbf16>,
    %87 = arith.truncf %84 : vector<16x64xf32> to vector<16x64xbf16>
    %c0_74 = arith.constant 0 : index
    %c9_75 = arith.constant 9 : index
    %88 = vector.load %arg10[%c0_74, %c9_75] : memref<16x82xbf16, #tpu.memory_space<vmem>>, vector<16x64xbf16>
    tpu.vector_store %arg10[%c0_74, %c9_75], %87 {strides = array<i32>} : memref<16x82xbf16, #tpu.memory_space<vmem>>, vector<16x64xbf16>,
    %c0_76 = arith.constant 0 : index
    %c0_77 = arith.constant 0 : index
    %89 = vector.load %arg10[%c0_76, %c0_77] : memref<16x82xbf16, #tpu.memory_space<vmem>>, vector<16x64xbf16>
    %c0_78 = arith.constant 0 : index
    %c0_79 = arith.constant 0 : index
    %c0_80 = arith.constant 0 : index
    %90 = vector.load %arg2[%c0_78, %c0_79, %c0_80] : memref<9x1x64xbf16, #tpu.memory_space<vmem>>, vector<1x1x64xbf16>
    %91 = vector.shape_cast %90 : vector<1x1x64xbf16> to vector<1x64xbf16>
    %92 = vector.broadcast %91 : vector<1x64xbf16> to vector<16x64xbf16>
    %93 = arith.mulf %89, %92 : vector<16x64xbf16>
    %c0_81 = arith.constant 0 : index
    %c0_82 = arith.constant 0 : index
    %c0_83 = arith.constant 0 : index
    %94 = vector.load %arg6[%c0_81, %c0_82, %c0_83] : memref<9x16x16xbf16, #tpu.memory_space<vmem>>, vector<1x16x16xbf16>
    %95 = vector.shape_cast %94 : vector<1x16x16xbf16> to vector<16x16xbf16>
    %cst_84 = arith.constant dense<0.000000e+00> : vector<16x64xf32>
    %96 = tpu.matmul %95, %93, %cst_84 {dimension_numbers = #tpu.dot_dimension_numbers<[1], [0], [0], [1], [0, 0, 1, 1], [], []>} : vector<16x16xbf16>, vector<16x64xbf16>, vector<16x64xf32> -> vector<16x64xf32>
    %c0_85 = arith.constant 0 : index
    %c1_86 = arith.constant 1 : index
    %97 = vector.load %arg10[%c0_85, %c1_86] : memref<16x82xbf16, #tpu.memory_space<vmem>>, vector<16x64xbf16>
    %c1_87 = arith.constant 1 : index
    %c0_88 = arith.constant 0 : index
    %c0_89 = arith.constant 0 : index
    %98 = vector.load %arg6[%c1_87, %c0_88, %c0_89] : memref<9x16x16xbf16, #tpu.memory_space<vmem>>, vector<1x16x16xbf16>
    %99 = vector.shape_cast %98 : vector<1x16x16xbf16> to vector<16x16xbf16>
    %cst_90 = arith.constant dense<0.000000e+00> : vector<16x64xf32>
    %100 = tpu.matmul %99, %97, %cst_90 {dimension_numbers = #tpu.dot_dimension_numbers<[1], [0], [0], [1], [0, 0, 1, 1], [], []>} : vector<16x16xbf16>, vector<16x64xbf16>, vector<16x64xf32> -> vector<16x64xf32>
    %101 = arith.addf %96, %100 : vector<16x64xf32>
    %c0_91 = arith.constant 0 : index
    %c2_92 = arith.constant 2 : index
    %102 = vector.load %arg10[%c0_91, %c2_92] : memref<16x82xbf16, #tpu.memory_space<vmem>>, vector<16x64xbf16>
    %c2_93 = arith.constant 2 : index
    %c0_94 = arith.constant 0 : index
    %c0_95 = arith.constant 0 : index
    %103 = vector.load %arg2[%c2_93, %c0_94, %c0_95] : memref<9x1x64xbf16, #tpu.memory_space<vmem>>, vector<1x1x64xbf16>
    %104 = vector.shape_cast %103 : vector<1x1x64xbf16> to vector<1x64xbf16>
    %105 = vector.broadcast %104 : vector<1x64xbf16> to vector<16x64xbf16>
    %106 = arith.mulf %102, %105 : vector<16x64xbf16>
    %c2_96 = arith.constant 2 : index
    %c0_97 = arith.constant 0 : index
    %c0_98 = arith.constant 0 : index
    %107 = vector.load %arg6[%c2_96, %c0_97, %c0_98] : memref<9x16x16xbf16, #tpu.memory_space<vmem>>, vector<1x16x16xbf16>
    %108 = vector.shape_cast %107 : vector<1x16x16xbf16> to vector<16x16xbf16>
    %cst_99 = arith.constant dense<0.000000e+00> : vector<16x64xf32>
    %109 = tpu.matmul %108, %106, %cst_99 {dimension_numbers = #tpu.dot_dimension_numbers<[1], [0], [0], [1], [0, 0, 1, 1], [], []>} : vector<16x16xbf16>, vector<16x64xbf16>, vector<16x64xf32> -> vector<16x64xf32>
    %110 = arith.addf %101, %109 : vector<16x64xf32>
    %c0_100 = arith.constant 0 : index
    %c8_101 = arith.constant 8 : index
    %111 = vector.load %arg10[%c0_100, %c8_101] : memref<16x82xbf16, #tpu.memory_space<vmem>>, vector<16x64xbf16>
    %c3_102 = arith.constant 3 : index
    %c0_103 = arith.constant 0 : index
    %c0_104 = arith.constant 0 : index
    %112 = vector.load %arg2[%c3_102, %c0_103, %c0_104] : memref<9x1x64xbf16, #tpu.memory_space<vmem>>, vector<1x1x64xbf16>
    %113 = vector.shape_cast %112 : vector<1x1x64xbf16> to vector<1x64xbf16>
    %114 = vector.broadcast %113 : vector<1x64xbf16> to vector<16x64xbf16>
    %115 = arith.mulf %111, %114 : vector<16x64xbf16>
    %c3_105 = arith.constant 3 : index
    %c0_106 = arith.constant 0 : index
    %c0_107 = arith.constant 0 : index
    %116 = vector.load %arg6[%c3_105, %c0_106, %c0_107] : memref<9x16x16xbf16, #tpu.memory_space<vmem>>, vector<1x16x16xbf16>
    %117 = vector.shape_cast %116 : vector<1x16x16xbf16> to vector<16x16xbf16>
    %cst_108 = arith.constant dense<0.000000e+00> : vector<16x64xf32>
    %118 = tpu.matmul %117, %115, %cst_108 {dimension_numbers = #tpu.dot_dimension_numbers<[1], [0], [0], [1], [0, 0, 1, 1], [], []>} : vector<16x16xbf16>, vector<16x64xbf16>, vector<16x64xf32> -> vector<16x64xf32>
    %119 = arith.addf %110, %118 : vector<16x64xf32>
    %c0_109 = arith.constant 0 : index
    %c9_110 = arith.constant 9 : index
    %120 = vector.load %arg10[%c0_109, %c9_110] : memref<16x82xbf16, #tpu.memory_space<vmem>>, vector<16x64xbf16>
    %c4_111 = arith.constant 4 : index
    %c0_112 = arith.constant 0 : index
    %c0_113 = arith.constant 0 : index
    %121 = vector.load %arg6[%c4_111, %c0_112, %c0_113] : memref<9x16x16xbf16, #tpu.memory_space<vmem>>, vector<1x16x16xbf16>
    %122 = vector.shape_cast %121 : vector<1x16x16xbf16> to vector<16x16xbf16>
    %cst_114 = arith.constant dense<0.000000e+00> : vector<16x64xf32>
    %123 = tpu.matmul %122, %120, %cst_114 {dimension_numbers = #tpu.dot_dimension_numbers<[1], [0], [0], [1], [0, 0, 1, 1], [], []>} : vector<16x16xbf16>, vector<16x64xbf16>, vector<16x64xf32> -> vector<16x64xf32>
    %124 = arith.addf %119, %123 : vector<16x64xf32>
    %c0_115 = arith.constant 0 : index
    %c10_116 = arith.constant 10 : index
    %125 = vector.load %arg10[%c0_115, %c10_116] : memref<16x82xbf16, #tpu.memory_space<vmem>>, vector<16x64xbf16>
    %c5_117 = arith.constant 5 : index
    %c0_118 = arith.constant 0 : index
    %c0_119 = arith.constant 0 : index
    %126 = vector.load %arg2[%c5_117, %c0_118, %c0_119] : memref<9x1x64xbf16, #tpu.memory_space<vmem>>, vector<1x1x64xbf16>
    %127 = vector.shape_cast %126 : vector<1x1x64xbf16> to vector<1x64xbf16>
    %128 = vector.broadcast %127 : vector<1x64xbf16> to vector<16x64xbf16>
    %129 = arith.mulf %125, %128 : vector<16x64xbf16>
    %c5_120 = arith.constant 5 : index
    %c0_121 = arith.constant 0 : index
    %c0_122 = arith.constant 0 : index
    %130 = vector.load %arg6[%c5_120, %c0_121, %c0_122] : memref<9x16x16xbf16, #tpu.memory_space<vmem>>, vector<1x16x16xbf16>
    %131 = vector.shape_cast %130 : vector<1x16x16xbf16> to vector<16x16xbf16>
    %cst_123 = arith.constant dense<0.000000e+00> : vector<16x64xf32>
    %132 = tpu.matmul %131, %129, %cst_123 {dimension_numbers = #tpu.dot_dimension_numbers<[1], [0], [0], [1], [0, 0, 1, 1], [], []>} : vector<16x16xbf16>, vector<16x64xbf16>, vector<16x64xf32> -> vector<16x64xf32>
    %133 = arith.addf %124, %132 : vector<16x64xf32>
    %c0_124 = arith.constant 0 : index
    %c16_125 = arith.constant 16 : index
    %134 = vector.load %arg10[%c0_124, %c16_125] : memref<16x82xbf16, #tpu.memory_space<vmem>>, vector<16x64xbf16>
    %c6_126 = arith.constant 6 : index
    %c0_127 = arith.constant 0 : index
    %c0_128 = arith.constant 0 : index
    %135 = vector.load %arg2[%c6_126, %c0_127, %c0_128] : memref<9x1x64xbf16, #tpu.memory_space<vmem>>, vector<1x1x64xbf16>
    %136 = vector.shape_cast %135 : vector<1x1x64xbf16> to vector<1x64xbf16>
    %137 = vector.broadcast %136 : vector<1x64xbf16> to vector<16x64xbf16>
    %138 = arith.mulf %134, %137 : vector<16x64xbf16>
    %c6_129 = arith.constant 6 : index
    %c0_130 = arith.constant 0 : index
    %c0_131 = arith.constant 0 : index
    %139 = vector.load %arg6[%c6_129, %c0_130, %c0_131] : memref<9x16x16xbf16, #tpu.memory_space<vmem>>, vector<1x16x16xbf16>
    %140 = vector.shape_cast %139 : vector<1x16x16xbf16> to vector<16x16xbf16>
    %cst_132 = arith.constant dense<0.000000e+00> : vector<16x64xf32>
    %141 = tpu.matmul %140, %138, %cst_132 {dimension_numbers = #tpu.dot_dimension_numbers<[1], [0], [0], [1], [0, 0, 1, 1], [], []>} : vector<16x16xbf16>, vector<16x64xbf16>, vector<16x64xf32> -> vector<16x64xf32>
    %142 = arith.addf %133, %141 : vector<16x64xf32>
    %c0_133 = arith.constant 0 : index
    %c17_134 = arith.constant 17 : index
    %143 = vector.load %arg10[%c0_133, %c17_134] : memref<16x82xbf16, #tpu.memory_space<vmem>>, vector<16x64xbf16>
    %c7_135 = arith.constant 7 : index
    %c0_136 = arith.constant 0 : index
    %c0_137 = arith.constant 0 : index
    %144 = vector.load %arg6[%c7_135, %c0_136, %c0_137] : memref<9x16x16xbf16, #tpu.memory_space<vmem>>, vector<1x16x16xbf16>
    %145 = vector.shape_cast %144 : vector<1x16x16xbf16> to vector<16x16xbf16>
    %cst_138 = arith.constant dense<0.000000e+00> : vector<16x64xf32>
    %146 = tpu.matmul %145, %143, %cst_138 {dimension_numbers = #tpu.dot_dimension_numbers<[1], [0], [0], [1], [0, 0, 1, 1], [], []>} : vector<16x16xbf16>, vector<16x64xbf16>, vector<16x64xf32> -> vector<16x64xf32>
    %147 = arith.addf %142, %146 : vector<16x64xf32>
    %c0_139 = arith.constant 0 : index
    %c18_140 = arith.constant 18 : index
    %148 = vector.load %arg10[%c0_139, %c18_140] : memref<16x82xbf16, #tpu.memory_space<vmem>>, vector<16x64xbf16>
    %c8_141 = arith.constant 8 : index
    %c0_142 = arith.constant 0 : index
    %c0_143 = arith.constant 0 : index
    %149 = vector.load %arg2[%c8_141, %c0_142, %c0_143] : memref<9x1x64xbf16, #tpu.memory_space<vmem>>, vector<1x1x64xbf16>
    %150 = vector.shape_cast %149 : vector<1x1x64xbf16> to vector<1x64xbf16>
    %151 = vector.broadcast %150 : vector<1x64xbf16> to vector<16x64xbf16>
    %152 = arith.mulf %148, %151 : vector<16x64xbf16>
    %c8_144 = arith.constant 8 : index
    %c0_145 = arith.constant 0 : index
    %c0_146 = arith.constant 0 : index
    %153 = vector.load %arg6[%c8_144, %c0_145, %c0_146] : memref<9x16x16xbf16, #tpu.memory_space<vmem>>, vector<1x16x16xbf16>
    %154 = vector.shape_cast %153 : vector<1x16x16xbf16> to vector<16x16xbf16>
    %cst_147 = arith.constant dense<0.000000e+00> : vector<16x64xf32>
    %155 = tpu.matmul %154, %152, %cst_147 {dimension_numbers = #tpu.dot_dimension_numbers<[1], [0], [0], [1], [0, 0, 1, 1], [], []>} : vector<16x16xbf16>, vector<16x64xbf16>, vector<16x64xf32> -> vector<16x64xf32>
    %156 = arith.addf %147, %155 : vector<16x64xf32>
    %c0_148 = arith.constant 0 : index
    %c0_149 = arith.constant 0 : index
    %157 = vector.load %arg7[%c0_148, %c0_149] : memref<16x1xf32, #tpu.memory_space<vmem>>, vector<16x1xf32>
    %158 = vector.broadcast %157 : vector<16x1xf32> to vector<16x64xf32>
    %159 = arith.mulf %156, %158 : vector<16x64xf32>
    %c0_150 = arith.constant 0 : index
    %c0_151 = arith.constant 0 : index
    %160 = vector.load %arg8[%c0_150, %c0_151] : memref<16x1xf32, #tpu.memory_space<vmem>>, vector<16x1xf32>
    %161 = vector.broadcast %160 : vector<16x1xf32> to vector<16x64xf32>
    %162 = arith.addf %159, %161 : vector<16x64xf32>
    %cst_152 = arith.constant 0.000000e+00 : f32
    %163 = vector.broadcast %cst_152 : f32 to vector<16x64xf32>
    %164 = arith.maximumf %162, %163 : vector<16x64xf32>
    %165 = arith.truncf %164 : vector<16x64xf32> to vector<16x64xbf16>
    %c0_153 = arith.constant 0 : index
    %c0_154 = arith.constant 0 : index
    %c0_155 = arith.constant 0 : index
    %166 = vector.load %arg9[%c0_153, %c0_154, %c0_155] : memref<1x16x64xbf16, #tpu.memory_space<vmem>>, vector<1x16x64xbf16>
    %167 = vector.shape_cast %166 : vector<1x16x64xbf16> to vector<16x64xbf16>
    %168 = vector.shape_cast %165 : vector<16x64xbf16> to vector<1x16x64xbf16>
    tpu.vector_store %arg9[%c0_153, %c0_154, %c0_155], %168 {strides = array<i32>} : memref<1x16x64xbf16, #tpu.memory_space<vmem>>, vector<1x16x64xbf16>,
    return
  }
  func.func @transform_0(%arg0: i32) -> (i32, i32, i32) {
    %c0_i32 = arith.constant 0 : i32
    %c0_i32_0 = arith.constant 0 : i32
    %c0_i32_1 = arith.constant 0 : i32
    return %arg0, %c0_i32, %c0_i32_0 : i32, i32, i32
  }
  func.func @transform_1(%arg0: i32) -> (i32, i32, i32) {
    %c0_i32 = arith.constant 0 : i32
    %c0_i32_0 = arith.constant 0 : i32
    %c0_i32_1 = arith.constant 0 : i32
    %c0_i32_2 = arith.constant 0 : i32
    return %c0_i32, %c0_i32_0, %c0_i32_1 : i32, i32, i32
  }
  func.func @transform_2(%arg0: i32) -> (i32, i32, i32) {
    %c0_i32 = arith.constant 0 : i32
    %c0_i32_0 = arith.constant 0 : i32
    %c0_i32_1 = arith.constant 0 : i32
    %c0_i32_2 = arith.constant 0 : i32
    return %c0_i32, %c0_i32_0, %c0_i32_1 : i32, i32, i32
  }
  func.func @transform_3(%arg0: i32) -> (i32, i32) {
    %c0_i32 = arith.constant 0 : i32
    %c0_i32_0 = arith.constant 0 : i32
    %c0_i32_1 = arith.constant 0 : i32
    return %c0_i32, %c0_i32_0 : i32, i32
  }
  func.func @transform_4(%arg0: i32) -> (i32, i32) {
    %c0_i32 = arith.constant 0 : i32
    %c0_i32_0 = arith.constant 0 : i32
    %c0_i32_1 = arith.constant 0 : i32
    return %c0_i32, %c0_i32_0 : i32, i32
  }
  func.func @transform_5(%arg0: i32) -> (i32, i32, i32) {
    %c0_i32 = arith.constant 0 : i32
    %c0_i32_0 = arith.constant 0 : i32
    %c0_i32_1 = arith.constant 0 : i32
    %c0_i32_2 = arith.constant 0 : i32
    return %c0_i32, %c0_i32_0, %c0_i32_1 : i32, i32, i32
  }
  func.func @transform_6(%arg0: i32) -> (i32, i32) {
    %c0_i32 = arith.constant 0 : i32
    %c0_i32_0 = arith.constant 0 : i32
    %c0_i32_1 = arith.constant 0 : i32
    return %c0_i32, %c0_i32_0 : i32, i32
  }
  func.func @transform_7(%arg0: i32) -> (i32, i32) {
    %c0_i32 = arith.constant 0 : i32
    %c0_i32_0 = arith.constant 0 : i32
    %c0_i32_1 = arith.constant 0 : i32
    return %c0_i32, %c0_i32_0 : i32, i32
  }
  func.func @transform_8(%arg0: i32) -> (i32, i32, i32) {
    %c0_i32 = arith.constant 0 : i32
    %c0_i32_0 = arith.constant 0 : i32
    %c0_i32_1 = arith.constant 0 : i32
    return %arg0, %c0_i32, %c0_i32_0 : i32, i32, i32
  }
}

module attributes {stable_mosaic.version = 11 : i64} {
  func.func @_conv_transpose2x2_kernel(%arg0: i32, %arg1: memref<1x16x64xbf16, #tpu.memory_space<vmem>>, %arg2: memref<4x8x16xbf16, #tpu.memory_space<vmem>>, %arg3: memref<1x4x8x64xbf16, #tpu.memory_space<vmem>>) attributes {dimension_semantics = [#tpu.dimension_semantics<parallel>], iteration_bounds = array<i64: 2>, scalar_prefetch = 0 : i64, scratch_operands = 0 : i64, tpu.core_type = #tpu.core_type<tc>, window_params = [{transform_indices = @transform_0, window_bounds = array<i64: 1, 16, 64>}, {pipeline_mode = #tpu.pipeline_mode<synchronous>, transform_indices = @transform_1, window_bounds = array<i64: 4, 8, 16>}, {transform_indices = @transform_2, window_bounds = array<i64: 1, 4, 8, 64>}]} {
    %c0 = arith.constant 0 : index
    %c0_0 = arith.constant 0 : index
    %c0_1 = arith.constant 0 : index
    %0 = vector.load %arg1[%c0, %c0_0, %c0_1] : memref<1x16x64xbf16, #tpu.memory_space<vmem>>, vector<1x16x64xbf16>
    %1 = vector.shape_cast %0 : vector<1x16x64xbf16> to vector<16x64xbf16>
    %c0_2 = arith.constant 0 : index
    %c0_3 = arith.constant 0 : index
    %c0_4 = arith.constant 0 : index
    %2 = vector.load %arg2[%c0_2, %c0_3, %c0_4] : memref<4x8x16xbf16, #tpu.memory_space<vmem>>, vector<1x8x16xbf16>
    %3 = vector.shape_cast %2 : vector<1x8x16xbf16> to vector<8x16xbf16>
    %cst = arith.constant dense<0.000000e+00> : vector<8x64xf32>
    %4 = tpu.matmul %3, %1, %cst {dimension_numbers = #tpu.dot_dimension_numbers<[1], [0], [0], [1], [0, 0, 1, 1], [], []>} : vector<8x16xbf16>, vector<16x64xbf16>, vector<8x64xf32> -> vector<8x64xf32>
    %5 = arith.truncf %4 : vector<8x64xf32> to vector<8x64xbf16>
    %c0_5 = arith.constant 0 : index
    %c0_6 = arith.constant 0 : index
    %c0_7 = arith.constant 0 : index
    %c0_8 = arith.constant 0 : index
    %6 = vector.load %arg3[%c0_5, %c0_6, %c0_7, %c0_8] : memref<1x4x8x64xbf16, #tpu.memory_space<vmem>>, vector<1x1x8x64xbf16>
    %7 = vector.shape_cast %6 : vector<1x1x8x64xbf16> to vector<8x64xbf16>
    %8 = vector.shape_cast %5 : vector<8x64xbf16> to vector<1x1x8x64xbf16>
    tpu.vector_store %arg3[%c0_5, %c0_6, %c0_7, %c0_8], %8 {strides = array<i32>} : memref<1x4x8x64xbf16, #tpu.memory_space<vmem>>, vector<1x1x8x64xbf16>,
    %c1 = arith.constant 1 : index
    %c0_9 = arith.constant 0 : index
    %c0_10 = arith.constant 0 : index
    %9 = vector.load %arg2[%c1, %c0_9, %c0_10] : memref<4x8x16xbf16, #tpu.memory_space<vmem>>, vector<1x8x16xbf16>
    %10 = vector.shape_cast %9 : vector<1x8x16xbf16> to vector<8x16xbf16>
    %cst_11 = arith.constant dense<0.000000e+00> : vector<8x64xf32>
    %11 = tpu.matmul %10, %1, %cst_11 {dimension_numbers = #tpu.dot_dimension_numbers<[1], [0], [0], [1], [0, 0, 1, 1], [], []>} : vector<8x16xbf16>, vector<16x64xbf16>, vector<8x64xf32> -> vector<8x64xf32>
    %12 = arith.truncf %11 : vector<8x64xf32> to vector<8x64xbf16>
    %c0_12 = arith.constant 0 : index
    %c1_13 = arith.constant 1 : index
    %c0_14 = arith.constant 0 : index
    %c0_15 = arith.constant 0 : index
    %13 = vector.load %arg3[%c0_12, %c1_13, %c0_14, %c0_15] : memref<1x4x8x64xbf16, #tpu.memory_space<vmem>>, vector<1x1x8x64xbf16>
    %14 = vector.shape_cast %13 : vector<1x1x8x64xbf16> to vector<8x64xbf16>
    %15 = vector.shape_cast %12 : vector<8x64xbf16> to vector<1x1x8x64xbf16>
    tpu.vector_store %arg3[%c0_12, %c1_13, %c0_14, %c0_15], %15 {strides = array<i32>} : memref<1x4x8x64xbf16, #tpu.memory_space<vmem>>, vector<1x1x8x64xbf16>,
    %c2 = arith.constant 2 : index
    %c0_16 = arith.constant 0 : index
    %c0_17 = arith.constant 0 : index
    %16 = vector.load %arg2[%c2, %c0_16, %c0_17] : memref<4x8x16xbf16, #tpu.memory_space<vmem>>, vector<1x8x16xbf16>
    %17 = vector.shape_cast %16 : vector<1x8x16xbf16> to vector<8x16xbf16>
    %cst_18 = arith.constant dense<0.000000e+00> : vector<8x64xf32>
    %18 = tpu.matmul %17, %1, %cst_18 {dimension_numbers = #tpu.dot_dimension_numbers<[1], [0], [0], [1], [0, 0, 1, 1], [], []>} : vector<8x16xbf16>, vector<16x64xbf16>, vector<8x64xf32> -> vector<8x64xf32>
    %19 = arith.truncf %18 : vector<8x64xf32> to vector<8x64xbf16>
    %c0_19 = arith.constant 0 : index
    %c2_20 = arith.constant 2 : index
    %c0_21 = arith.constant 0 : index
    %c0_22 = arith.constant 0 : index
    %20 = vector.load %arg3[%c0_19, %c2_20, %c0_21, %c0_22] : memref<1x4x8x64xbf16, #tpu.memory_space<vmem>>, vector<1x1x8x64xbf16>
    %21 = vector.shape_cast %20 : vector<1x1x8x64xbf16> to vector<8x64xbf16>
    %22 = vector.shape_cast %19 : vector<8x64xbf16> to vector<1x1x8x64xbf16>
    tpu.vector_store %arg3[%c0_19, %c2_20, %c0_21, %c0_22], %22 {strides = array<i32>} : memref<1x4x8x64xbf16, #tpu.memory_space<vmem>>, vector<1x1x8x64xbf16>,
    %c3 = arith.constant 3 : index
    %c0_23 = arith.constant 0 : index
    %c0_24 = arith.constant 0 : index
    %23 = vector.load %arg2[%c3, %c0_23, %c0_24] : memref<4x8x16xbf16, #tpu.memory_space<vmem>>, vector<1x8x16xbf16>
    %24 = vector.shape_cast %23 : vector<1x8x16xbf16> to vector<8x16xbf16>
    %cst_25 = arith.constant dense<0.000000e+00> : vector<8x64xf32>
    %25 = tpu.matmul %24, %1, %cst_25 {dimension_numbers = #tpu.dot_dimension_numbers<[1], [0], [0], [1], [0, 0, 1, 1], [], []>} : vector<8x16xbf16>, vector<16x64xbf16>, vector<8x64xf32> -> vector<8x64xf32>
    %26 = arith.truncf %25 : vector<8x64xf32> to vector<8x64xbf16>
    %c0_26 = arith.constant 0 : index
    %c3_27 = arith.constant 3 : index
    %c0_28 = arith.constant 0 : index
    %c0_29 = arith.constant 0 : index
    %27 = vector.load %arg3[%c0_26, %c3_27, %c0_28, %c0_29] : memref<1x4x8x64xbf16, #tpu.memory_space<vmem>>, vector<1x1x8x64xbf16>
    %28 = vector.shape_cast %27 : vector<1x1x8x64xbf16> to vector<8x64xbf16>
    %29 = vector.shape_cast %26 : vector<8x64xbf16> to vector<1x1x8x64xbf16>
    tpu.vector_store %arg3[%c0_26, %c3_27, %c0_28, %c0_29], %29 {strides = array<i32>} : memref<1x4x8x64xbf16, #tpu.memory_space<vmem>>, vector<1x1x8x64xbf16>,
    return
  }
  func.func @transform_0(%arg0: i32) -> (i32, i32, i32) {
    %c0_i32 = arith.constant 0 : i32
    %c0_i32_0 = arith.constant 0 : i32
    %c0_i32_1 = arith.constant 0 : i32
    return %arg0, %c0_i32, %c0_i32_0 : i32, i32, i32
  }
  func.func @transform_1(%arg0: i32) -> (i32, i32, i32) {
    %c0_i32 = arith.constant 0 : i32
    %c0_i32_0 = arith.constant 0 : i32
    %c0_i32_1 = arith.constant 0 : i32
    %c0_i32_2 = arith.constant 0 : i32
    return %c0_i32, %c0_i32_0, %c0_i32_1 : i32, i32, i32
  }
  func.func @transform_2(%arg0: i32) -> (i32, i32, i32, i32) {
    %c0_i32 = arith.constant 0 : i32
    %c0_i32_0 = arith.constant 0 : i32
    %c0_i32_1 = arith.constant 0 : i32
    %c0_i32_2 = arith.constant 0 : i32
    return %arg0, %c0_i32, %c0_i32_0, %c0_i32_1 : i32, i32, i32, i32
  }
}

module attributes {stable_mosaic.version = 11 : i64} {
  func.func @_conv_chain_kernel(%arg0: i32, %arg1: memref<1x1x290xbf16, #tpu.memory_space<vmem>>, %arg2: memref<9x1x256xbf16, #tpu.memory_space<vmem>>, %arg3: memref<9x8x1xbf16, #tpu.memory_space<vmem>>, %arg4: memref<8x1xf32, #tpu.memory_space<vmem>>, %arg5: memref<8x1xf32, #tpu.memory_space<vmem>>, %arg6: memref<9x8x8xbf16, #tpu.memory_space<vmem>>, %arg7: memref<8x1xf32, #tpu.memory_space<vmem>>, %arg8: memref<8x1xf32, #tpu.memory_space<vmem>>, %arg9: memref<1x8x256xbf16, #tpu.memory_space<vmem>>, %arg10: memref<8x290xbf16, #tpu.memory_space<vmem>>) attributes {dimension_semantics = [#tpu.dimension_semantics<parallel>], iteration_bounds = array<i64: 2>, scalar_prefetch = 0 : i64, scratch_operands = 1 : i64, tpu.core_type = #tpu.core_type<tc>, window_params = [{transform_indices = @transform_0, window_bounds = array<i64: 1, 1, 290>}, {pipeline_mode = #tpu.pipeline_mode<synchronous>, transform_indices = @transform_1, window_bounds = array<i64: 9, 1, 256>}, {pipeline_mode = #tpu.pipeline_mode<synchronous>, transform_indices = @transform_2, window_bounds = array<i64: 9, 8, 1>}, {pipeline_mode = #tpu.pipeline_mode<synchronous>, transform_indices = @transform_3, window_bounds = array<i64: 8, 1>}, {pipeline_mode = #tpu.pipeline_mode<synchronous>, transform_indices = @transform_4, window_bounds = array<i64: 8, 1>}, {pipeline_mode = #tpu.pipeline_mode<synchronous>, transform_indices = @transform_5, window_bounds = array<i64: 9, 8, 8>}, {pipeline_mode = #tpu.pipeline_mode<synchronous>, transform_indices = @transform_6, window_bounds = array<i64: 8, 1>}, {pipeline_mode = #tpu.pipeline_mode<synchronous>, transform_indices = @transform_7, window_bounds = array<i64: 8, 1>}, {transform_indices = @transform_8, window_bounds = array<i64: 1, 8, 256>}]} {
    %c0 = arith.constant 0 : index
    %c0_0 = arith.constant 0 : index
    %c0_1 = arith.constant 0 : index
    %0 = vector.load %arg1[%c0, %c0_0, %c0_1] : memref<1x1x290xbf16, #tpu.memory_space<vmem>>, vector<1x1x256xbf16>
    %1 = vector.shape_cast %0 : vector<1x1x256xbf16> to vector<1x256xbf16>
    %c0_2 = arith.constant 0 : index
    %c0_3 = arith.constant 0 : index
    %c0_4 = arith.constant 0 : index
    %2 = vector.load %arg2[%c0_2, %c0_3, %c0_4] : memref<9x1x256xbf16, #tpu.memory_space<vmem>>, vector<1x1x256xbf16>
    %3 = vector.shape_cast %2 : vector<1x1x256xbf16> to vector<1x256xbf16>
    %4 = arith.mulf %1, %3 : vector<1x256xbf16>
    %c0_5 = arith.constant 0 : index
    %c0_6 = arith.constant 0 : index
    %c0_7 = arith.constant 0 : index
    %5 = vector.load %arg3[%c0_5, %c0_6, %c0_7] : memref<9x8x1xbf16, #tpu.memory_space<vmem>>, vector<1x8x1xbf16>
    %6 = vector.shape_cast %5 : vector<1x8x1xbf16> to vector<8x1xbf16>
    %cst = arith.constant dense<0.000000e+00> : vector<8x256xf32>
    %7 = tpu.matmul %6, %4, %cst {dimension_numbers = #tpu.dot_dimension_numbers<[1], [0], [0], [1], [0, 0, 1, 1], [], []>} : vector<8x1xbf16>, vector<1x256xbf16>, vector<8x256xf32> -> vector<8x256xf32>
    %c0_8 = arith.constant 0 : index
    %c0_9 = arith.constant 0 : index
    %c1 = arith.constant 1 : index
    %8 = vector.load %arg1[%c0_8, %c0_9, %c1] : memref<1x1x290xbf16, #tpu.memory_space<vmem>>, vector<1x1x256xbf16>
    %9 = vector.shape_cast %8 : vector<1x1x256xbf16> to vector<1x256xbf16>
    %c1_10 = arith.constant 1 : index
    %c0_11 = arith.constant 0 : index
    %c0_12 = arith.constant 0 : index
    %10 = vector.load %arg3[%c1_10, %c0_11, %c0_12] : memref<9x8x1xbf16, #tpu.memory_space<vmem>>, vector<1x8x1xbf16>
    %11 = vector.shape_cast %10 : vector<1x8x1xbf16> to vector<8x1xbf16>
    %cst_13 = arith.constant dense<0.000000e+00> : vector<8x256xf32>
    %12 = tpu.matmul %11, %9, %cst_13 {dimension_numbers = #tpu.dot_dimension_numbers<[1], [0], [0], [1], [0, 0, 1, 1], [], []>} : vector<8x1xbf16>, vector<1x256xbf16>, vector<8x256xf32> -> vector<8x256xf32>
    %13 = arith.addf %7, %12 : vector<8x256xf32>
    %c0_14 = arith.constant 0 : index
    %c0_15 = arith.constant 0 : index
    %c2 = arith.constant 2 : index
    %14 = vector.load %arg1[%c0_14, %c0_15, %c2] : memref<1x1x290xbf16, #tpu.memory_space<vmem>>, vector<1x1x256xbf16>
    %15 = vector.shape_cast %14 : vector<1x1x256xbf16> to vector<1x256xbf16>
    %c2_16 = arith.constant 2 : index
    %c0_17 = arith.constant 0 : index
    %c0_18 = arith.constant 0 : index
    %16 = vector.load %arg2[%c2_16, %c0_17, %c0_18] : memref<9x1x256xbf16, #tpu.memory_space<vmem>>, vector<1x1x256xbf16>
    %17 = vector.shape_cast %16 : vector<1x1x256xbf16> to vector<1x256xbf16>
    %18 = arith.mulf %15, %17 : vector<1x256xbf16>
    %c2_19 = arith.constant 2 : index
    %c0_20 = arith.constant 0 : index
    %c0_21 = arith.constant 0 : index
    %19 = vector.load %arg3[%c2_19, %c0_20, %c0_21] : memref<9x8x1xbf16, #tpu.memory_space<vmem>>, vector<1x8x1xbf16>
    %20 = vector.shape_cast %19 : vector<1x8x1xbf16> to vector<8x1xbf16>
    %cst_22 = arith.constant dense<0.000000e+00> : vector<8x256xf32>
    %21 = tpu.matmul %20, %18, %cst_22 {dimension_numbers = #tpu.dot_dimension_numbers<[1], [0], [0], [1], [0, 0, 1, 1], [], []>} : vector<8x1xbf16>, vector<1x256xbf16>, vector<8x256xf32> -> vector<8x256xf32>
    %22 = arith.addf %13, %21 : vector<8x256xf32>
    %c0_23 = arith.constant 0 : index
    %c0_24 = arith.constant 0 : index
    %c16 = arith.constant 16 : index
    %23 = vector.load %arg1[%c0_23, %c0_24, %c16] : memref<1x1x290xbf16, #tpu.memory_space<vmem>>, vector<1x1x256xbf16>
    %24 = vector.shape_cast %23 : vector<1x1x256xbf16> to vector<1x256xbf16>
    %c3 = arith.constant 3 : index
    %c0_25 = arith.constant 0 : index
    %c0_26 = arith.constant 0 : index
    %25 = vector.load %arg2[%c3, %c0_25, %c0_26] : memref<9x1x256xbf16, #tpu.memory_space<vmem>>, vector<1x1x256xbf16>
    %26 = vector.shape_cast %25 : vector<1x1x256xbf16> to vector<1x256xbf16>
    %27 = arith.mulf %24, %26 : vector<1x256xbf16>
    %c3_27 = arith.constant 3 : index
    %c0_28 = arith.constant 0 : index
    %c0_29 = arith.constant 0 : index
    %28 = vector.load %arg3[%c3_27, %c0_28, %c0_29] : memref<9x8x1xbf16, #tpu.memory_space<vmem>>, vector<1x8x1xbf16>
    %29 = vector.shape_cast %28 : vector<1x8x1xbf16> to vector<8x1xbf16>
    %cst_30 = arith.constant dense<0.000000e+00> : vector<8x256xf32>
    %30 = tpu.matmul %29, %27, %cst_30 {dimension_numbers = #tpu.dot_dimension_numbers<[1], [0], [0], [1], [0, 0, 1, 1], [], []>} : vector<8x1xbf16>, vector<1x256xbf16>, vector<8x256xf32> -> vector<8x256xf32>
    %31 = arith.addf %22, %30 : vector<8x256xf32>
    %c0_31 = arith.constant 0 : index
    %c0_32 = arith.constant 0 : index
    %c17 = arith.constant 17 : index
    %32 = vector.load %arg1[%c0_31, %c0_32, %c17] : memref<1x1x290xbf16, #tpu.memory_space<vmem>>, vector<1x1x256xbf16>
    %33 = vector.shape_cast %32 : vector<1x1x256xbf16> to vector<1x256xbf16>
    %c4 = arith.constant 4 : index
    %c0_33 = arith.constant 0 : index
    %c0_34 = arith.constant 0 : index
    %34 = vector.load %arg3[%c4, %c0_33, %c0_34] : memref<9x8x1xbf16, #tpu.memory_space<vmem>>, vector<1x8x1xbf16>
    %35 = vector.shape_cast %34 : vector<1x8x1xbf16> to vector<8x1xbf16>
    %cst_35 = arith.constant dense<0.000000e+00> : vector<8x256xf32>
    %36 = tpu.matmul %35, %33, %cst_35 {dimension_numbers = #tpu.dot_dimension_numbers<[1], [0], [0], [1], [0, 0, 1, 1], [], []>} : vector<8x1xbf16>, vector<1x256xbf16>, vector<8x256xf32> -> vector<8x256xf32>
    %37 = arith.addf %31, %36 : vector<8x256xf32>
    %c0_36 = arith.constant 0 : index
    %c0_37 = arith.constant 0 : index
    %c18 = arith.constant 18 : index
    %38 = vector.load %arg1[%c0_36, %c0_37, %c18] : memref<1x1x290xbf16, #tpu.memory_space<vmem>>, vector<1x1x256xbf16>
    %39 = vector.shape_cast %38 : vector<1x1x256xbf16> to vector<1x256xbf16>
    %c5 = arith.constant 5 : index
    %c0_38 = arith.constant 0 : index
    %c0_39 = arith.constant 0 : index
    %40 = vector.load %arg2[%c5, %c0_38, %c0_39] : memref<9x1x256xbf16, #tpu.memory_space<vmem>>, vector<1x1x256xbf16>
    %41 = vector.shape_cast %40 : vector<1x1x256xbf16> to vector<1x256xbf16>
    %42 = arith.mulf %39, %41 : vector<1x256xbf16>
    %c5_40 = arith.constant 5 : index
    %c0_41 = arith.constant 0 : index
    %c0_42 = arith.constant 0 : index
    %43 = vector.load %arg3[%c5_40, %c0_41, %c0_42] : memref<9x8x1xbf16, #tpu.memory_space<vmem>>, vector<1x8x1xbf16>
    %44 = vector.shape_cast %43 : vector<1x8x1xbf16> to vector<8x1xbf16>
    %cst_43 = arith.constant dense<0.000000e+00> : vector<8x256xf32>
    %45 = tpu.matmul %44, %42, %cst_43 {dimension_numbers = #tpu.dot_dimension_numbers<[1], [0], [0], [1], [0, 0, 1, 1], [], []>} : vector<8x1xbf16>, vector<1x256xbf16>, vector<8x256xf32> -> vector<8x256xf32>
    %46 = arith.addf %37, %45 : vector<8x256xf32>
    %c0_44 = arith.constant 0 : index
    %c0_45 = arith.constant 0 : index
    %c32 = arith.constant 32 : index
    %47 = vector.load %arg1[%c0_44, %c0_45, %c32] : memref<1x1x290xbf16, #tpu.memory_space<vmem>>, vector<1x1x256xbf16>
    %48 = vector.shape_cast %47 : vector<1x1x256xbf16> to vector<1x256xbf16>
    %c6 = arith.constant 6 : index
    %c0_46 = arith.constant 0 : index
    %c0_47 = arith.constant 0 : index
    %49 = vector.load %arg2[%c6, %c0_46, %c0_47] : memref<9x1x256xbf16, #tpu.memory_space<vmem>>, vector<1x1x256xbf16>
    %50 = vector.shape_cast %49 : vector<1x1x256xbf16> to vector<1x256xbf16>
    %51 = arith.mulf %48, %50 : vector<1x256xbf16>
    %c6_48 = arith.constant 6 : index
    %c0_49 = arith.constant 0 : index
    %c0_50 = arith.constant 0 : index
    %52 = vector.load %arg3[%c6_48, %c0_49, %c0_50] : memref<9x8x1xbf16, #tpu.memory_space<vmem>>, vector<1x8x1xbf16>
    %53 = vector.shape_cast %52 : vector<1x8x1xbf16> to vector<8x1xbf16>
    %cst_51 = arith.constant dense<0.000000e+00> : vector<8x256xf32>
    %54 = tpu.matmul %53, %51, %cst_51 {dimension_numbers = #tpu.dot_dimension_numbers<[1], [0], [0], [1], [0, 0, 1, 1], [], []>} : vector<8x1xbf16>, vector<1x256xbf16>, vector<8x256xf32> -> vector<8x256xf32>
    %55 = arith.addf %46, %54 : vector<8x256xf32>
    %c0_52 = arith.constant 0 : index
    %c0_53 = arith.constant 0 : index
    %c33 = arith.constant 33 : index
    %56 = vector.load %arg1[%c0_52, %c0_53, %c33] : memref<1x1x290xbf16, #tpu.memory_space<vmem>>, vector<1x1x256xbf16>
    %57 = vector.shape_cast %56 : vector<1x1x256xbf16> to vector<1x256xbf16>
    %c7 = arith.constant 7 : index
    %c0_54 = arith.constant 0 : index
    %c0_55 = arith.constant 0 : index
    %58 = vector.load %arg3[%c7, %c0_54, %c0_55] : memref<9x8x1xbf16, #tpu.memory_space<vmem>>, vector<1x8x1xbf16>
    %59 = vector.shape_cast %58 : vector<1x8x1xbf16> to vector<8x1xbf16>
    %cst_56 = arith.constant dense<0.000000e+00> : vector<8x256xf32>
    %60 = tpu.matmul %59, %57, %cst_56 {dimension_numbers = #tpu.dot_dimension_numbers<[1], [0], [0], [1], [0, 0, 1, 1], [], []>} : vector<8x1xbf16>, vector<1x256xbf16>, vector<8x256xf32> -> vector<8x256xf32>
    %61 = arith.addf %55, %60 : vector<8x256xf32>
    %c0_57 = arith.constant 0 : index
    %c0_58 = arith.constant 0 : index
    %c34 = arith.constant 34 : index
    %62 = vector.load %arg1[%c0_57, %c0_58, %c34] : memref<1x1x290xbf16, #tpu.memory_space<vmem>>, vector<1x1x256xbf16>
    %63 = vector.shape_cast %62 : vector<1x1x256xbf16> to vector<1x256xbf16>
    %c8 = arith.constant 8 : index
    %c0_59 = arith.constant 0 : index
    %c0_60 = arith.constant 0 : index
    %64 = vector.load %arg2[%c8, %c0_59, %c0_60] : memref<9x1x256xbf16, #tpu.memory_space<vmem>>, vector<1x1x256xbf16>
    %65 = vector.shape_cast %64 : vector<1x1x256xbf16> to vector<1x256xbf16>
    %66 = arith.mulf %63, %65 : vector<1x256xbf16>
    %c8_61 = arith.constant 8 : index
    %c0_62 = arith.constant 0 : index
    %c0_63 = arith.constant 0 : index
    %67 = vector.load %arg3[%c8_61, %c0_62, %c0_63] : memref<9x8x1xbf16, #tpu.memory_space<vmem>>, vector<1x8x1xbf16>
    %68 = vector.shape_cast %67 : vector<1x8x1xbf16> to vector<8x1xbf16>
    %cst_64 = arith.constant dense<0.000000e+00> : vector<8x256xf32>
    %69 = tpu.matmul %68, %66, %cst_64 {dimension_numbers = #tpu.dot_dimension_numbers<[1], [0], [0], [1], [0, 0, 1, 1], [], []>} : vector<8x1xbf16>, vector<1x256xbf16>, vector<8x256xf32> -> vector<8x256xf32>
    %70 = arith.addf %61, %69 : vector<8x256xf32>
    %c0_65 = arith.constant 0 : index
    %c0_66 = arith.constant 0 : index
    %71 = vector.load %arg4[%c0_65, %c0_66] : memref<8x1xf32, #tpu.memory_space<vmem>>, vector<8x1xf32>
    %72 = vector.broadcast %71 : vector<8x1xf32> to vector<8x256xf32>
    %73 = arith.mulf %70, %72 : vector<8x256xf32>
    %c0_67 = arith.constant 0 : index
    %c0_68 = arith.constant 0 : index
    %74 = vector.load %arg5[%c0_67, %c0_68] : memref<8x1xf32, #tpu.memory_space<vmem>>, vector<8x1xf32>
    %75 = vector.broadcast %74 : vector<8x1xf32> to vector<8x256xf32>
    %76 = arith.addf %73, %75 : vector<8x256xf32>
    %cst_69 = arith.constant 0.000000e+00 : f32
    %77 = vector.broadcast %cst_69 : f32 to vector<8x256xf32>
    %78 = arith.maximumf %76, %77 : vector<8x256xf32>
    %cst_70 = arith.constant 0.000000e+00 : bf16
    %79 = vector.broadcast %cst_70 : bf16 to vector<8x290xbf16>
    %c0_71 = arith.constant 0 : index
    %c0_72 = arith.constant 0 : index
    %80 = vector.load %arg10[%c0_71, %c0_72] : memref<8x290xbf16, #tpu.memory_space<vmem>>, vector<8x290xbf16>
    tpu.vector_store %arg10[%c0_71, %c0_72], %79 {strides = array<i32>} : memref<8x290xbf16, #tpu.memory_space<vmem>>, vector<8x290xbf16>,
    %81 = arith.truncf %78 : vector<8x256xf32> to vector<8x256xbf16>
    %c0_73 = arith.constant 0 : index
    %c17_74 = arith.constant 17 : index
    %82 = vector.load %arg10[%c0_73, %c17_74] : memref<8x290xbf16, #tpu.memory_space<vmem>>, vector<8x256xbf16>
    tpu.vector_store %arg10[%c0_73, %c17_74], %81 {strides = array<i32>} : memref<8x290xbf16, #tpu.memory_space<vmem>>, vector<8x256xbf16>,
    %c0_75 = arith.constant 0 : index
    %c0_76 = arith.constant 0 : index
    %83 = vector.load %arg10[%c0_75, %c0_76] : memref<8x290xbf16, #tpu.memory_space<vmem>>, vector<8x256xbf16>
    %c0_77 = arith.constant 0 : index
    %c0_78 = arith.constant 0 : index
    %c0_79 = arith.constant 0 : index
    %84 = vector.load %arg2[%c0_77, %c0_78, %c0_79] : memref<9x1x256xbf16, #tpu.memory_space<vmem>>, vector<1x1x256xbf16>
    %85 = vector.shape_cast %84 : vector<1x1x256xbf16> to vector<1x256xbf16>
    %86 = vector.broadcast %85 : vector<1x256xbf16> to vector<8x256xbf16>
    %87 = arith.mulf %83, %86 : vector<8x256xbf16>
    %c0_80 = arith.constant 0 : index
    %c0_81 = arith.constant 0 : index
    %c0_82 = arith.constant 0 : index
    %88 = vector.load %arg6[%c0_80, %c0_81, %c0_82] : memref<9x8x8xbf16, #tpu.memory_space<vmem>>, vector<1x8x8xbf16>
    %89 = vector.shape_cast %88 : vector<1x8x8xbf16> to vector<8x8xbf16>
    %cst_83 = arith.constant dense<0.000000e+00> : vector<8x256xf32>
    %90 = tpu.matmul %89, %87, %cst_83 {dimension_numbers = #tpu.dot_dimension_numbers<[1], [0], [0], [1], [0, 0, 1, 1], [], []>} : vector<8x8xbf16>, vector<8x256xbf16>, vector<8x256xf32> -> vector<8x256xf32>
    %c0_84 = arith.constant 0 : index
    %c1_85 = arith.constant 1 : index
    %91 = vector.load %arg10[%c0_84, %c1_85] : memref<8x290xbf16, #tpu.memory_space<vmem>>, vector<8x256xbf16>
    %c1_86 = arith.constant 1 : index
    %c0_87 = arith.constant 0 : index
    %c0_88 = arith.constant 0 : index
    %92 = vector.load %arg6[%c1_86, %c0_87, %c0_88] : memref<9x8x8xbf16, #tpu.memory_space<vmem>>, vector<1x8x8xbf16>
    %93 = vector.shape_cast %92 : vector<1x8x8xbf16> to vector<8x8xbf16>
    %cst_89 = arith.constant dense<0.000000e+00> : vector<8x256xf32>
    %94 = tpu.matmul %93, %91, %cst_89 {dimension_numbers = #tpu.dot_dimension_numbers<[1], [0], [0], [1], [0, 0, 1, 1], [], []>} : vector<8x8xbf16>, vector<8x256xbf16>, vector<8x256xf32> -> vector<8x256xf32>
    %95 = arith.addf %90, %94 : vector<8x256xf32>
    %c0_90 = arith.constant 0 : index
    %c2_91 = arith.constant 2 : index
    %96 = vector.load %arg10[%c0_90, %c2_91] : memref<8x290xbf16, #tpu.memory_space<vmem>>, vector<8x256xbf16>
    %c2_92 = arith.constant 2 : index
    %c0_93 = arith.constant 0 : index
    %c0_94 = arith.constant 0 : index
    %97 = vector.load %arg2[%c2_92, %c0_93, %c0_94] : memref<9x1x256xbf16, #tpu.memory_space<vmem>>, vector<1x1x256xbf16>
    %98 = vector.shape_cast %97 : vector<1x1x256xbf16> to vector<1x256xbf16>
    %99 = vector.broadcast %98 : vector<1x256xbf16> to vector<8x256xbf16>
    %100 = arith.mulf %96, %99 : vector<8x256xbf16>
    %c2_95 = arith.constant 2 : index
    %c0_96 = arith.constant 0 : index
    %c0_97 = arith.constant 0 : index
    %101 = vector.load %arg6[%c2_95, %c0_96, %c0_97] : memref<9x8x8xbf16, #tpu.memory_space<vmem>>, vector<1x8x8xbf16>
    %102 = vector.shape_cast %101 : vector<1x8x8xbf16> to vector<8x8xbf16>
    %cst_98 = arith.constant dense<0.000000e+00> : vector<8x256xf32>
    %103 = tpu.matmul %102, %100, %cst_98 {dimension_numbers = #tpu.dot_dimension_numbers<[1], [0], [0], [1], [0, 0, 1, 1], [], []>} : vector<8x8xbf16>, vector<8x256xbf16>, vector<8x256xf32> -> vector<8x256xf32>
    %104 = arith.addf %95, %103 : vector<8x256xf32>
    %c0_99 = arith.constant 0 : index
    %c16_100 = arith.constant 16 : index
    %105 = vector.load %arg10[%c0_99, %c16_100] : memref<8x290xbf16, #tpu.memory_space<vmem>>, vector<8x256xbf16>
    %c3_101 = arith.constant 3 : index
    %c0_102 = arith.constant 0 : index
    %c0_103 = arith.constant 0 : index
    %106 = vector.load %arg2[%c3_101, %c0_102, %c0_103] : memref<9x1x256xbf16, #tpu.memory_space<vmem>>, vector<1x1x256xbf16>
    %107 = vector.shape_cast %106 : vector<1x1x256xbf16> to vector<1x256xbf16>
    %108 = vector.broadcast %107 : vector<1x256xbf16> to vector<8x256xbf16>
    %109 = arith.mulf %105, %108 : vector<8x256xbf16>
    %c3_104 = arith.constant 3 : index
    %c0_105 = arith.constant 0 : index
    %c0_106 = arith.constant 0 : index
    %110 = vector.load %arg6[%c3_104, %c0_105, %c0_106] : memref<9x8x8xbf16, #tpu.memory_space<vmem>>, vector<1x8x8xbf16>
    %111 = vector.shape_cast %110 : vector<1x8x8xbf16> to vector<8x8xbf16>
    %cst_107 = arith.constant dense<0.000000e+00> : vector<8x256xf32>
    %112 = tpu.matmul %111, %109, %cst_107 {dimension_numbers = #tpu.dot_dimension_numbers<[1], [0], [0], [1], [0, 0, 1, 1], [], []>} : vector<8x8xbf16>, vector<8x256xbf16>, vector<8x256xf32> -> vector<8x256xf32>
    %113 = arith.addf %104, %112 : vector<8x256xf32>
    %c0_108 = arith.constant 0 : index
    %c17_109 = arith.constant 17 : index
    %114 = vector.load %arg10[%c0_108, %c17_109] : memref<8x290xbf16, #tpu.memory_space<vmem>>, vector<8x256xbf16>
    %c4_110 = arith.constant 4 : index
    %c0_111 = arith.constant 0 : index
    %c0_112 = arith.constant 0 : index
    %115 = vector.load %arg6[%c4_110, %c0_111, %c0_112] : memref<9x8x8xbf16, #tpu.memory_space<vmem>>, vector<1x8x8xbf16>
    %116 = vector.shape_cast %115 : vector<1x8x8xbf16> to vector<8x8xbf16>
    %cst_113 = arith.constant dense<0.000000e+00> : vector<8x256xf32>
    %117 = tpu.matmul %116, %114, %cst_113 {dimension_numbers = #tpu.dot_dimension_numbers<[1], [0], [0], [1], [0, 0, 1, 1], [], []>} : vector<8x8xbf16>, vector<8x256xbf16>, vector<8x256xf32> -> vector<8x256xf32>
    %118 = arith.addf %113, %117 : vector<8x256xf32>
    %c0_114 = arith.constant 0 : index
    %c18_115 = arith.constant 18 : index
    %119 = vector.load %arg10[%c0_114, %c18_115] : memref<8x290xbf16, #tpu.memory_space<vmem>>, vector<8x256xbf16>
    %c5_116 = arith.constant 5 : index
    %c0_117 = arith.constant 0 : index
    %c0_118 = arith.constant 0 : index
    %120 = vector.load %arg2[%c5_116, %c0_117, %c0_118] : memref<9x1x256xbf16, #tpu.memory_space<vmem>>, vector<1x1x256xbf16>
    %121 = vector.shape_cast %120 : vector<1x1x256xbf16> to vector<1x256xbf16>
    %122 = vector.broadcast %121 : vector<1x256xbf16> to vector<8x256xbf16>
    %123 = arith.mulf %119, %122 : vector<8x256xbf16>
    %c5_119 = arith.constant 5 : index
    %c0_120 = arith.constant 0 : index
    %c0_121 = arith.constant 0 : index
    %124 = vector.load %arg6[%c5_119, %c0_120, %c0_121] : memref<9x8x8xbf16, #tpu.memory_space<vmem>>, vector<1x8x8xbf16>
    %125 = vector.shape_cast %124 : vector<1x8x8xbf16> to vector<8x8xbf16>
    %cst_122 = arith.constant dense<0.000000e+00> : vector<8x256xf32>
    %126 = tpu.matmul %125, %123, %cst_122 {dimension_numbers = #tpu.dot_dimension_numbers<[1], [0], [0], [1], [0, 0, 1, 1], [], []>} : vector<8x8xbf16>, vector<8x256xbf16>, vector<8x256xf32> -> vector<8x256xf32>
    %127 = arith.addf %118, %126 : vector<8x256xf32>
    %c0_123 = arith.constant 0 : index
    %c32_124 = arith.constant 32 : index
    %128 = vector.load %arg10[%c0_123, %c32_124] : memref<8x290xbf16, #tpu.memory_space<vmem>>, vector<8x256xbf16>
    %c6_125 = arith.constant 6 : index
    %c0_126 = arith.constant 0 : index
    %c0_127 = arith.constant 0 : index
    %129 = vector.load %arg2[%c6_125, %c0_126, %c0_127] : memref<9x1x256xbf16, #tpu.memory_space<vmem>>, vector<1x1x256xbf16>
    %130 = vector.shape_cast %129 : vector<1x1x256xbf16> to vector<1x256xbf16>
    %131 = vector.broadcast %130 : vector<1x256xbf16> to vector<8x256xbf16>
    %132 = arith.mulf %128, %131 : vector<8x256xbf16>
    %c6_128 = arith.constant 6 : index
    %c0_129 = arith.constant 0 : index
    %c0_130 = arith.constant 0 : index
    %133 = vector.load %arg6[%c6_128, %c0_129, %c0_130] : memref<9x8x8xbf16, #tpu.memory_space<vmem>>, vector<1x8x8xbf16>
    %134 = vector.shape_cast %133 : vector<1x8x8xbf16> to vector<8x8xbf16>
    %cst_131 = arith.constant dense<0.000000e+00> : vector<8x256xf32>
    %135 = tpu.matmul %134, %132, %cst_131 {dimension_numbers = #tpu.dot_dimension_numbers<[1], [0], [0], [1], [0, 0, 1, 1], [], []>} : vector<8x8xbf16>, vector<8x256xbf16>, vector<8x256xf32> -> vector<8x256xf32>
    %136 = arith.addf %127, %135 : vector<8x256xf32>
    %c0_132 = arith.constant 0 : index
    %c33_133 = arith.constant 33 : index
    %137 = vector.load %arg10[%c0_132, %c33_133] : memref<8x290xbf16, #tpu.memory_space<vmem>>, vector<8x256xbf16>
    %c7_134 = arith.constant 7 : index
    %c0_135 = arith.constant 0 : index
    %c0_136 = arith.constant 0 : index
    %138 = vector.load %arg6[%c7_134, %c0_135, %c0_136] : memref<9x8x8xbf16, #tpu.memory_space<vmem>>, vector<1x8x8xbf16>
    %139 = vector.shape_cast %138 : vector<1x8x8xbf16> to vector<8x8xbf16>
    %cst_137 = arith.constant dense<0.000000e+00> : vector<8x256xf32>
    %140 = tpu.matmul %139, %137, %cst_137 {dimension_numbers = #tpu.dot_dimension_numbers<[1], [0], [0], [1], [0, 0, 1, 1], [], []>} : vector<8x8xbf16>, vector<8x256xbf16>, vector<8x256xf32> -> vector<8x256xf32>
    %141 = arith.addf %136, %140 : vector<8x256xf32>
    %c0_138 = arith.constant 0 : index
    %c34_139 = arith.constant 34 : index
    %142 = vector.load %arg10[%c0_138, %c34_139] : memref<8x290xbf16, #tpu.memory_space<vmem>>, vector<8x256xbf16>
    %c8_140 = arith.constant 8 : index
    %c0_141 = arith.constant 0 : index
    %c0_142 = arith.constant 0 : index
    %143 = vector.load %arg2[%c8_140, %c0_141, %c0_142] : memref<9x1x256xbf16, #tpu.memory_space<vmem>>, vector<1x1x256xbf16>
    %144 = vector.shape_cast %143 : vector<1x1x256xbf16> to vector<1x256xbf16>
    %145 = vector.broadcast %144 : vector<1x256xbf16> to vector<8x256xbf16>
    %146 = arith.mulf %142, %145 : vector<8x256xbf16>
    %c8_143 = arith.constant 8 : index
    %c0_144 = arith.constant 0 : index
    %c0_145 = arith.constant 0 : index
    %147 = vector.load %arg6[%c8_143, %c0_144, %c0_145] : memref<9x8x8xbf16, #tpu.memory_space<vmem>>, vector<1x8x8xbf16>
    %148 = vector.shape_cast %147 : vector<1x8x8xbf16> to vector<8x8xbf16>
    %cst_146 = arith.constant dense<0.000000e+00> : vector<8x256xf32>
    %149 = tpu.matmul %148, %146, %cst_146 {dimension_numbers = #tpu.dot_dimension_numbers<[1], [0], [0], [1], [0, 0, 1, 1], [], []>} : vector<8x8xbf16>, vector<8x256xbf16>, vector<8x256xf32> -> vector<8x256xf32>
    %150 = arith.addf %141, %149 : vector<8x256xf32>
    %c0_147 = arith.constant 0 : index
    %c0_148 = arith.constant 0 : index
    %151 = vector.load %arg7[%c0_147, %c0_148] : memref<8x1xf32, #tpu.memory_space<vmem>>, vector<8x1xf32>
    %152 = vector.broadcast %151 : vector<8x1xf32> to vector<8x256xf32>
    %153 = arith.mulf %150, %152 : vector<8x256xf32>
    %c0_149 = arith.constant 0 : index
    %c0_150 = arith.constant 0 : index
    %154 = vector.load %arg8[%c0_149, %c0_150] : memref<8x1xf32, #tpu.memory_space<vmem>>, vector<8x1xf32>
    %155 = vector.broadcast %154 : vector<8x1xf32> to vector<8x256xf32>
    %156 = arith.addf %153, %155 : vector<8x256xf32>
    %cst_151 = arith.constant 0.000000e+00 : f32
    %157 = vector.broadcast %cst_151 : f32 to vector<8x256xf32>
    %158 = arith.maximumf %156, %157 : vector<8x256xf32>
    %159 = arith.truncf %158 : vector<8x256xf32> to vector<8x256xbf16>
    %c0_152 = arith.constant 0 : index
    %c0_153 = arith.constant 0 : index
    %c0_154 = arith.constant 0 : index
    %160 = vector.load %arg9[%c0_152, %c0_153, %c0_154] : memref<1x8x256xbf16, #tpu.memory_space<vmem>>, vector<1x8x256xbf16>
    %161 = vector.shape_cast %160 : vector<1x8x256xbf16> to vector<8x256xbf16>
    %162 = vector.shape_cast %159 : vector<8x256xbf16> to vector<1x8x256xbf16>
    tpu.vector_store %arg9[%c0_152, %c0_153, %c0_154], %162 {strides = array<i32>} : memref<1x8x256xbf16, #tpu.memory_space<vmem>>, vector<1x8x256xbf16>,
    return
  }
  func.func @transform_0(%arg0: i32) -> (i32, i32, i32) {
    %c0_i32 = arith.constant 0 : i32
    %c0_i32_0 = arith.constant 0 : i32
    %c0_i32_1 = arith.constant 0 : i32
    return %arg0, %c0_i32, %c0_i32_0 : i32, i32, i32
  }
  func.func @transform_1(%arg0: i32) -> (i32, i32, i32) {
    %c0_i32 = arith.constant 0 : i32
    %c0_i32_0 = arith.constant 0 : i32
    %c0_i32_1 = arith.constant 0 : i32
    %c0_i32_2 = arith.constant 0 : i32
    return %c0_i32, %c0_i32_0, %c0_i32_1 : i32, i32, i32
  }
  func.func @transform_2(%arg0: i32) -> (i32, i32, i32) {
    %c0_i32 = arith.constant 0 : i32
    %c0_i32_0 = arith.constant 0 : i32
    %c0_i32_1 = arith.constant 0 : i32
    %c0_i32_2 = arith.constant 0 : i32
    return %c0_i32, %c0_i32_0, %c0_i32_1 : i32, i32, i32
  }
  func.func @transform_3(%arg0: i32) -> (i32, i32) {
    %c0_i32 = arith.constant 0 : i32
    %c0_i32_0 = arith.constant 0 : i32
    %c0_i32_1 = arith.constant 0 : i32
    return %c0_i32, %c0_i32_0 : i32, i32
  }
  func.func @transform_4(%arg0: i32) -> (i32, i32) {
    %c0_i32 = arith.constant 0 : i32
    %c0_i32_0 = arith.constant 0 : i32
    %c0_i32_1 = arith.constant 0 : i32
    return %c0_i32, %c0_i32_0 : i32, i32
  }
  func.func @transform_5(%arg0: i32) -> (i32, i32, i32) {
    %c0_i32 = arith.constant 0 : i32
    %c0_i32_0 = arith.constant 0 : i32
    %c0_i32_1 = arith.constant 0 : i32
    %c0_i32_2 = arith.constant 0 : i32
    return %c0_i32, %c0_i32_0, %c0_i32_1 : i32, i32, i32
  }
  func.func @transform_6(%arg0: i32) -> (i32, i32) {
    %c0_i32 = arith.constant 0 : i32
    %c0_i32_0 = arith.constant 0 : i32
    %c0_i32_1 = arith.constant 0 : i32
    return %c0_i32, %c0_i32_0 : i32, i32
  }
  func.func @transform_7(%arg0: i32) -> (i32, i32) {
    %c0_i32 = arith.constant 0 : i32
    %c0_i32_0 = arith.constant 0 : i32
    %c0_i32_1 = arith.constant 0 : i32
    return %c0_i32, %c0_i32_0 : i32, i32
  }
  func.func @transform_8(%arg0: i32) -> (i32, i32, i32) {
    %c0_i32 = arith.constant 0 : i32
    %c0_i32_0 = arith.constant 0 : i32
    %c0_i32_1 = arith.constant 0 : i32
    return %arg0, %c0_i32, %c0_i32_0 : i32, i32, i32
  }
}

module attributes {stable_mosaic.version = 11 : i64} {
  func.func @_conv_chain_kernel(%arg0: i32, %arg1: memref<1x16x290xbf16, #tpu.memory_space<vmem>>, %arg2: memref<9x1x256xbf16, #tpu.memory_space<vmem>>, %arg3: memref<9x8x16xbf16, #tpu.memory_space<vmem>>, %arg4: memref<8x1xf32, #tpu.memory_space<vmem>>, %arg5: memref<8x1xf32, #tpu.memory_space<vmem>>, %arg6: memref<9x8x8xbf16, #tpu.memory_space<vmem>>, %arg7: memref<8x1xf32, #tpu.memory_space<vmem>>, %arg8: memref<8x1xf32, #tpu.memory_space<vmem>>, %arg9: memref<1x8xbf16, #tpu.memory_space<vmem>>, %arg10: memref<1x1xf32, #tpu.memory_space<vmem>>, %arg11: memref<1x1x256xf32, #tpu.memory_space<vmem>>, %arg12: memref<8x290xbf16, #tpu.memory_space<vmem>>) attributes {dimension_semantics = [#tpu.dimension_semantics<parallel>], iteration_bounds = array<i64: 2>, scalar_prefetch = 0 : i64, scratch_operands = 1 : i64, tpu.core_type = #tpu.core_type<tc>, window_params = [{transform_indices = @transform_0, window_bounds = array<i64: 1, 16, 290>}, {pipeline_mode = #tpu.pipeline_mode<synchronous>, transform_indices = @transform_1, window_bounds = array<i64: 9, 1, 256>}, {pipeline_mode = #tpu.pipeline_mode<synchronous>, transform_indices = @transform_2, window_bounds = array<i64: 9, 8, 16>}, {pipeline_mode = #tpu.pipeline_mode<synchronous>, transform_indices = @transform_3, window_bounds = array<i64: 8, 1>}, {pipeline_mode = #tpu.pipeline_mode<synchronous>, transform_indices = @transform_4, window_bounds = array<i64: 8, 1>}, {pipeline_mode = #tpu.pipeline_mode<synchronous>, transform_indices = @transform_5, window_bounds = array<i64: 9, 8, 8>}, {pipeline_mode = #tpu.pipeline_mode<synchronous>, transform_indices = @transform_6, window_bounds = array<i64: 8, 1>}, {pipeline_mode = #tpu.pipeline_mode<synchronous>, transform_indices = @transform_7, window_bounds = array<i64: 8, 1>}, {pipeline_mode = #tpu.pipeline_mode<synchronous>, transform_indices = @transform_8, window_bounds = array<i64: 1, 8>}, {pipeline_mode = #tpu.pipeline_mode<synchronous>, transform_indices = @transform_9, window_bounds = array<i64: 1, 1>}, {transform_indices = @transform_10, window_bounds = array<i64: 1, 1, 256>}]} {
    %c0 = arith.constant 0 : index
    %c0_0 = arith.constant 0 : index
    %c0_1 = arith.constant 0 : index
    %0 = vector.load %arg1[%c0, %c0_0, %c0_1] : memref<1x16x290xbf16, #tpu.memory_space<vmem>>, vector<1x16x256xbf16>
    %1 = vector.shape_cast %0 : vector<1x16x256xbf16> to vector<16x256xbf16>
    %c0_2 = arith.constant 0 : index
    %c0_3 = arith.constant 0 : index
    %c0_4 = arith.constant 0 : index
    %2 = vector.load %arg2[%c0_2, %c0_3, %c0_4] : memref<9x1x256xbf16, #tpu.memory_space<vmem>>, vector<1x1x256xbf16>
    %3 = vector.shape_cast %2 : vector<1x1x256xbf16> to vector<1x256xbf16>
    %4 = vector.broadcast %3 : vector<1x256xbf16> to vector<16x256xbf16>
    %5 = arith.mulf %1, %4 : vector<16x256xbf16>
    %c0_5 = arith.constant 0 : index
    %c0_6 = arith.constant 0 : index
    %c0_7 = arith.constant 0 : index
    %6 = vector.load %arg3[%c0_5, %c0_6, %c0_7] : memref<9x8x16xbf16, #tpu.memory_space<vmem>>, vector<1x8x16xbf16>
    %7 = vector.shape_cast %6 : vector<1x8x16xbf16> to vector<8x16xbf16>
    %cst = arith.constant dense<0.000000e+00> : vector<8x256xf32>
    %8 = tpu.matmul %7, %5, %cst {dimension_numbers = #tpu.dot_dimension_numbers<[1], [0], [0], [1], [0, 0, 1, 1], [], []>} : vector<8x16xbf16>, vector<16x256xbf16>, vector<8x256xf32> -> vector<8x256xf32>
    %c0_8 = arith.constant 0 : index
    %c0_9 = arith.constant 0 : index
    %c1 = arith.constant 1 : index
    %9 = vector.load %arg1[%c0_8, %c0_9, %c1] : memref<1x16x290xbf16, #tpu.memory_space<vmem>>, vector<1x16x256xbf16>
    %10 = vector.shape_cast %9 : vector<1x16x256xbf16> to vector<16x256xbf16>
    %c1_10 = arith.constant 1 : index
    %c0_11 = arith.constant 0 : index
    %c0_12 = arith.constant 0 : index
    %11 = vector.load %arg3[%c1_10, %c0_11, %c0_12] : memref<9x8x16xbf16, #tpu.memory_space<vmem>>, vector<1x8x16xbf16>
    %12 = vector.shape_cast %11 : vector<1x8x16xbf16> to vector<8x16xbf16>
    %cst_13 = arith.constant dense<0.000000e+00> : vector<8x256xf32>
    %13 = tpu.matmul %12, %10, %cst_13 {dimension_numbers = #tpu.dot_dimension_numbers<[1], [0], [0], [1], [0, 0, 1, 1], [], []>} : vector<8x16xbf16>, vector<16x256xbf16>, vector<8x256xf32> -> vector<8x256xf32>
    %14 = arith.addf %8, %13 : vector<8x256xf32>
    %c0_14 = arith.constant 0 : index
    %c0_15 = arith.constant 0 : index
    %c2 = arith.constant 2 : index
    %15 = vector.load %arg1[%c0_14, %c0_15, %c2] : memref<1x16x290xbf16, #tpu.memory_space<vmem>>, vector<1x16x256xbf16>
    %16 = vector.shape_cast %15 : vector<1x16x256xbf16> to vector<16x256xbf16>
    %c2_16 = arith.constant 2 : index
    %c0_17 = arith.constant 0 : index
    %c0_18 = arith.constant 0 : index
    %17 = vector.load %arg2[%c2_16, %c0_17, %c0_18] : memref<9x1x256xbf16, #tpu.memory_space<vmem>>, vector<1x1x256xbf16>
    %18 = vector.shape_cast %17 : vector<1x1x256xbf16> to vector<1x256xbf16>
    %19 = vector.broadcast %18 : vector<1x256xbf16> to vector<16x256xbf16>
    %20 = arith.mulf %16, %19 : vector<16x256xbf16>
    %c2_19 = arith.constant 2 : index
    %c0_20 = arith.constant 0 : index
    %c0_21 = arith.constant 0 : index
    %21 = vector.load %arg3[%c2_19, %c0_20, %c0_21] : memref<9x8x16xbf16, #tpu.memory_space<vmem>>, vector<1x8x16xbf16>
    %22 = vector.shape_cast %21 : vector<1x8x16xbf16> to vector<8x16xbf16>
    %cst_22 = arith.constant dense<0.000000e+00> : vector<8x256xf32>
    %23 = tpu.matmul %22, %20, %cst_22 {dimension_numbers = #tpu.dot_dimension_numbers<[1], [0], [0], [1], [0, 0, 1, 1], [], []>} : vector<8x16xbf16>, vector<16x256xbf16>, vector<8x256xf32> -> vector<8x256xf32>
    %24 = arith.addf %14, %23 : vector<8x256xf32>
    %c0_23 = arith.constant 0 : index
    %c0_24 = arith.constant 0 : index
    %c16 = arith.constant 16 : index
    %25 = vector.load %arg1[%c0_23, %c0_24, %c16] : memref<1x16x290xbf16, #tpu.memory_space<vmem>>, vector<1x16x256xbf16>
    %26 = vector.shape_cast %25 : vector<1x16x256xbf16> to vector<16x256xbf16>
    %c3 = arith.constant 3 : index
    %c0_25 = arith.constant 0 : index
    %c0_26 = arith.constant 0 : index
    %27 = vector.load %arg2[%c3, %c0_25, %c0_26] : memref<9x1x256xbf16, #tpu.memory_space<vmem>>, vector<1x1x256xbf16>
    %28 = vector.shape_cast %27 : vector<1x1x256xbf16> to vector<1x256xbf16>
    %29 = vector.broadcast %28 : vector<1x256xbf16> to vector<16x256xbf16>
    %30 = arith.mulf %26, %29 : vector<16x256xbf16>
    %c3_27 = arith.constant 3 : index
    %c0_28 = arith.constant 0 : index
    %c0_29 = arith.constant 0 : index
    %31 = vector.load %arg3[%c3_27, %c0_28, %c0_29] : memref<9x8x16xbf16, #tpu.memory_space<vmem>>, vector<1x8x16xbf16>
    %32 = vector.shape_cast %31 : vector<1x8x16xbf16> to vector<8x16xbf16>
    %cst_30 = arith.constant dense<0.000000e+00> : vector<8x256xf32>
    %33 = tpu.matmul %32, %30, %cst_30 {dimension_numbers = #tpu.dot_dimension_numbers<[1], [0], [0], [1], [0, 0, 1, 1], [], []>} : vector<8x16xbf16>, vector<16x256xbf16>, vector<8x256xf32> -> vector<8x256xf32>
    %34 = arith.addf %24, %33 : vector<8x256xf32>
    %c0_31 = arith.constant 0 : index
    %c0_32 = arith.constant 0 : index
    %c17 = arith.constant 17 : index
    %35 = vector.load %arg1[%c0_31, %c0_32, %c17] : memref<1x16x290xbf16, #tpu.memory_space<vmem>>, vector<1x16x256xbf16>
    %36 = vector.shape_cast %35 : vector<1x16x256xbf16> to vector<16x256xbf16>
    %c4 = arith.constant 4 : index
    %c0_33 = arith.constant 0 : index
    %c0_34 = arith.constant 0 : index
    %37 = vector.load %arg3[%c4, %c0_33, %c0_34] : memref<9x8x16xbf16, #tpu.memory_space<vmem>>, vector<1x8x16xbf16>
    %38 = vector.shape_cast %37 : vector<1x8x16xbf16> to vector<8x16xbf16>
    %cst_35 = arith.constant dense<0.000000e+00> : vector<8x256xf32>
    %39 = tpu.matmul %38, %36, %cst_35 {dimension_numbers = #tpu.dot_dimension_numbers<[1], [0], [0], [1], [0, 0, 1, 1], [], []>} : vector<8x16xbf16>, vector<16x256xbf16>, vector<8x256xf32> -> vector<8x256xf32>
    %40 = arith.addf %34, %39 : vector<8x256xf32>
    %c0_36 = arith.constant 0 : index
    %c0_37 = arith.constant 0 : index
    %c18 = arith.constant 18 : index
    %41 = vector.load %arg1[%c0_36, %c0_37, %c18] : memref<1x16x290xbf16, #tpu.memory_space<vmem>>, vector<1x16x256xbf16>
    %42 = vector.shape_cast %41 : vector<1x16x256xbf16> to vector<16x256xbf16>
    %c5 = arith.constant 5 : index
    %c0_38 = arith.constant 0 : index
    %c0_39 = arith.constant 0 : index
    %43 = vector.load %arg2[%c5, %c0_38, %c0_39] : memref<9x1x256xbf16, #tpu.memory_space<vmem>>, vector<1x1x256xbf16>
    %44 = vector.shape_cast %43 : vector<1x1x256xbf16> to vector<1x256xbf16>
    %45 = vector.broadcast %44 : vector<1x256xbf16> to vector<16x256xbf16>
    %46 = arith.mulf %42, %45 : vector<16x256xbf16>
    %c5_40 = arith.constant 5 : index
    %c0_41 = arith.constant 0 : index
    %c0_42 = arith.constant 0 : index
    %47 = vector.load %arg3[%c5_40, %c0_41, %c0_42] : memref<9x8x16xbf16, #tpu.memory_space<vmem>>, vector<1x8x16xbf16>
    %48 = vector.shape_cast %47 : vector<1x8x16xbf16> to vector<8x16xbf16>
    %cst_43 = arith.constant dense<0.000000e+00> : vector<8x256xf32>
    %49 = tpu.matmul %48, %46, %cst_43 {dimension_numbers = #tpu.dot_dimension_numbers<[1], [0], [0], [1], [0, 0, 1, 1], [], []>} : vector<8x16xbf16>, vector<16x256xbf16>, vector<8x256xf32> -> vector<8x256xf32>
    %50 = arith.addf %40, %49 : vector<8x256xf32>
    %c0_44 = arith.constant 0 : index
    %c0_45 = arith.constant 0 : index
    %c32 = arith.constant 32 : index
    %51 = vector.load %arg1[%c0_44, %c0_45, %c32] : memref<1x16x290xbf16, #tpu.memory_space<vmem>>, vector<1x16x256xbf16>
    %52 = vector.shape_cast %51 : vector<1x16x256xbf16> to vector<16x256xbf16>
    %c6 = arith.constant 6 : index
    %c0_46 = arith.constant 0 : index
    %c0_47 = arith.constant 0 : index
    %53 = vector.load %arg2[%c6, %c0_46, %c0_47] : memref<9x1x256xbf16, #tpu.memory_space<vmem>>, vector<1x1x256xbf16>
    %54 = vector.shape_cast %53 : vector<1x1x256xbf16> to vector<1x256xbf16>
    %55 = vector.broadcast %54 : vector<1x256xbf16> to vector<16x256xbf16>
    %56 = arith.mulf %52, %55 : vector<16x256xbf16>
    %c6_48 = arith.constant 6 : index
    %c0_49 = arith.constant 0 : index
    %c0_50 = arith.constant 0 : index
    %57 = vector.load %arg3[%c6_48, %c0_49, %c0_50] : memref<9x8x16xbf16, #tpu.memory_space<vmem>>, vector<1x8x16xbf16>
    %58 = vector.shape_cast %57 : vector<1x8x16xbf16> to vector<8x16xbf16>
    %cst_51 = arith.constant dense<0.000000e+00> : vector<8x256xf32>
    %59 = tpu.matmul %58, %56, %cst_51 {dimension_numbers = #tpu.dot_dimension_numbers<[1], [0], [0], [1], [0, 0, 1, 1], [], []>} : vector<8x16xbf16>, vector<16x256xbf16>, vector<8x256xf32> -> vector<8x256xf32>
    %60 = arith.addf %50, %59 : vector<8x256xf32>
    %c0_52 = arith.constant 0 : index
    %c0_53 = arith.constant 0 : index
    %c33 = arith.constant 33 : index
    %61 = vector.load %arg1[%c0_52, %c0_53, %c33] : memref<1x16x290xbf16, #tpu.memory_space<vmem>>, vector<1x16x256xbf16>
    %62 = vector.shape_cast %61 : vector<1x16x256xbf16> to vector<16x256xbf16>
    %c7 = arith.constant 7 : index
    %c0_54 = arith.constant 0 : index
    %c0_55 = arith.constant 0 : index
    %63 = vector.load %arg3[%c7, %c0_54, %c0_55] : memref<9x8x16xbf16, #tpu.memory_space<vmem>>, vector<1x8x16xbf16>
    %64 = vector.shape_cast %63 : vector<1x8x16xbf16> to vector<8x16xbf16>
    %cst_56 = arith.constant dense<0.000000e+00> : vector<8x256xf32>
    %65 = tpu.matmul %64, %62, %cst_56 {dimension_numbers = #tpu.dot_dimension_numbers<[1], [0], [0], [1], [0, 0, 1, 1], [], []>} : vector<8x16xbf16>, vector<16x256xbf16>, vector<8x256xf32> -> vector<8x256xf32>
    %66 = arith.addf %60, %65 : vector<8x256xf32>
    %c0_57 = arith.constant 0 : index
    %c0_58 = arith.constant 0 : index
    %c34 = arith.constant 34 : index
    %67 = vector.load %arg1[%c0_57, %c0_58, %c34] : memref<1x16x290xbf16, #tpu.memory_space<vmem>>, vector<1x16x256xbf16>
    %68 = vector.shape_cast %67 : vector<1x16x256xbf16> to vector<16x256xbf16>
    %c8 = arith.constant 8 : index
    %c0_59 = arith.constant 0 : index
    %c0_60 = arith.constant 0 : index
    %69 = vector.load %arg2[%c8, %c0_59, %c0_60] : memref<9x1x256xbf16, #tpu.memory_space<vmem>>, vector<1x1x256xbf16>
    %70 = vector.shape_cast %69 : vector<1x1x256xbf16> to vector<1x256xbf16>
    %71 = vector.broadcast %70 : vector<1x256xbf16> to vector<16x256xbf16>
    %72 = arith.mulf %68, %71 : vector<16x256xbf16>
    %c8_61 = arith.constant 8 : index
    %c0_62 = arith.constant 0 : index
    %c0_63 = arith.constant 0 : index
    %73 = vector.load %arg3[%c8_61, %c0_62, %c0_63] : memref<9x8x16xbf16, #tpu.memory_space<vmem>>, vector<1x8x16xbf16>
    %74 = vector.shape_cast %73 : vector<1x8x16xbf16> to vector<8x16xbf16>
    %cst_64 = arith.constant dense<0.000000e+00> : vector<8x256xf32>
    %75 = tpu.matmul %74, %72, %cst_64 {dimension_numbers = #tpu.dot_dimension_numbers<[1], [0], [0], [1], [0, 0, 1, 1], [], []>} : vector<8x16xbf16>, vector<16x256xbf16>, vector<8x256xf32> -> vector<8x256xf32>
    %76 = arith.addf %66, %75 : vector<8x256xf32>
    %c0_65 = arith.constant 0 : index
    %c0_66 = arith.constant 0 : index
    %77 = vector.load %arg4[%c0_65, %c0_66] : memref<8x1xf32, #tpu.memory_space<vmem>>, vector<8x1xf32>
    %78 = vector.broadcast %77 : vector<8x1xf32> to vector<8x256xf32>
    %79 = arith.mulf %76, %78 : vector<8x256xf32>
    %c0_67 = arith.constant 0 : index
    %c0_68 = arith.constant 0 : index
    %80 = vector.load %arg5[%c0_67, %c0_68] : memref<8x1xf32, #tpu.memory_space<vmem>>, vector<8x1xf32>
    %81 = vector.broadcast %80 : vector<8x1xf32> to vector<8x256xf32>
    %82 = arith.addf %79, %81 : vector<8x256xf32>
    %cst_69 = arith.constant 0.000000e+00 : f32
    %83 = vector.broadcast %cst_69 : f32 to vector<8x256xf32>
    %84 = arith.maximumf %82, %83 : vector<8x256xf32>
    %cst_70 = arith.constant 0.000000e+00 : bf16
    %85 = vector.broadcast %cst_70 : bf16 to vector<8x290xbf16>
    %c0_71 = arith.constant 0 : index
    %c0_72 = arith.constant 0 : index
    %86 = vector.load %arg12[%c0_71, %c0_72] : memref<8x290xbf16, #tpu.memory_space<vmem>>, vector<8x290xbf16>
    tpu.vector_store %arg12[%c0_71, %c0_72], %85 {strides = array<i32>} : memref<8x290xbf16, #tpu.memory_space<vmem>>, vector<8x290xbf16>,
    %87 = arith.truncf %84 : vector<8x256xf32> to vector<8x256xbf16>
    %c0_73 = arith.constant 0 : index
    %c17_74 = arith.constant 17 : index
    %88 = vector.load %arg12[%c0_73, %c17_74] : memref<8x290xbf16, #tpu.memory_space<vmem>>, vector<8x256xbf16>
    tpu.vector_store %arg12[%c0_73, %c17_74], %87 {strides = array<i32>} : memref<8x290xbf16, #tpu.memory_space<vmem>>, vector<8x256xbf16>,
    %c0_75 = arith.constant 0 : index
    %c0_76 = arith.constant 0 : index
    %89 = vector.load %arg12[%c0_75, %c0_76] : memref<8x290xbf16, #tpu.memory_space<vmem>>, vector<8x256xbf16>
    %c0_77 = arith.constant 0 : index
    %c0_78 = arith.constant 0 : index
    %c0_79 = arith.constant 0 : index
    %90 = vector.load %arg2[%c0_77, %c0_78, %c0_79] : memref<9x1x256xbf16, #tpu.memory_space<vmem>>, vector<1x1x256xbf16>
    %91 = vector.shape_cast %90 : vector<1x1x256xbf16> to vector<1x256xbf16>
    %92 = vector.broadcast %91 : vector<1x256xbf16> to vector<8x256xbf16>
    %93 = arith.mulf %89, %92 : vector<8x256xbf16>
    %c0_80 = arith.constant 0 : index
    %c0_81 = arith.constant 0 : index
    %c0_82 = arith.constant 0 : index
    %94 = vector.load %arg6[%c0_80, %c0_81, %c0_82] : memref<9x8x8xbf16, #tpu.memory_space<vmem>>, vector<1x8x8xbf16>
    %95 = vector.shape_cast %94 : vector<1x8x8xbf16> to vector<8x8xbf16>
    %cst_83 = arith.constant dense<0.000000e+00> : vector<8x256xf32>
    %96 = tpu.matmul %95, %93, %cst_83 {dimension_numbers = #tpu.dot_dimension_numbers<[1], [0], [0], [1], [0, 0, 1, 1], [], []>} : vector<8x8xbf16>, vector<8x256xbf16>, vector<8x256xf32> -> vector<8x256xf32>
    %c0_84 = arith.constant 0 : index
    %c1_85 = arith.constant 1 : index
    %97 = vector.load %arg12[%c0_84, %c1_85] : memref<8x290xbf16, #tpu.memory_space<vmem>>, vector<8x256xbf16>
    %c1_86 = arith.constant 1 : index
    %c0_87 = arith.constant 0 : index
    %c0_88 = arith.constant 0 : index
    %98 = vector.load %arg6[%c1_86, %c0_87, %c0_88] : memref<9x8x8xbf16, #tpu.memory_space<vmem>>, vector<1x8x8xbf16>
    %99 = vector.shape_cast %98 : vector<1x8x8xbf16> to vector<8x8xbf16>
    %cst_89 = arith.constant dense<0.000000e+00> : vector<8x256xf32>
    %100 = tpu.matmul %99, %97, %cst_89 {dimension_numbers = #tpu.dot_dimension_numbers<[1], [0], [0], [1], [0, 0, 1, 1], [], []>} : vector<8x8xbf16>, vector<8x256xbf16>, vector<8x256xf32> -> vector<8x256xf32>
    %101 = arith.addf %96, %100 : vector<8x256xf32>
    %c0_90 = arith.constant 0 : index
    %c2_91 = arith.constant 2 : index
    %102 = vector.load %arg12[%c0_90, %c2_91] : memref<8x290xbf16, #tpu.memory_space<vmem>>, vector<8x256xbf16>
    %c2_92 = arith.constant 2 : index
    %c0_93 = arith.constant 0 : index
    %c0_94 = arith.constant 0 : index
    %103 = vector.load %arg2[%c2_92, %c0_93, %c0_94] : memref<9x1x256xbf16, #tpu.memory_space<vmem>>, vector<1x1x256xbf16>
    %104 = vector.shape_cast %103 : vector<1x1x256xbf16> to vector<1x256xbf16>
    %105 = vector.broadcast %104 : vector<1x256xbf16> to vector<8x256xbf16>
    %106 = arith.mulf %102, %105 : vector<8x256xbf16>
    %c2_95 = arith.constant 2 : index
    %c0_96 = arith.constant 0 : index
    %c0_97 = arith.constant 0 : index
    %107 = vector.load %arg6[%c2_95, %c0_96, %c0_97] : memref<9x8x8xbf16, #tpu.memory_space<vmem>>, vector<1x8x8xbf16>
    %108 = vector.shape_cast %107 : vector<1x8x8xbf16> to vector<8x8xbf16>
    %cst_98 = arith.constant dense<0.000000e+00> : vector<8x256xf32>
    %109 = tpu.matmul %108, %106, %cst_98 {dimension_numbers = #tpu.dot_dimension_numbers<[1], [0], [0], [1], [0, 0, 1, 1], [], []>} : vector<8x8xbf16>, vector<8x256xbf16>, vector<8x256xf32> -> vector<8x256xf32>
    %110 = arith.addf %101, %109 : vector<8x256xf32>
    %c0_99 = arith.constant 0 : index
    %c16_100 = arith.constant 16 : index
    %111 = vector.load %arg12[%c0_99, %c16_100] : memref<8x290xbf16, #tpu.memory_space<vmem>>, vector<8x256xbf16>
    %c3_101 = arith.constant 3 : index
    %c0_102 = arith.constant 0 : index
    %c0_103 = arith.constant 0 : index
    %112 = vector.load %arg2[%c3_101, %c0_102, %c0_103] : memref<9x1x256xbf16, #tpu.memory_space<vmem>>, vector<1x1x256xbf16>
    %113 = vector.shape_cast %112 : vector<1x1x256xbf16> to vector<1x256xbf16>
    %114 = vector.broadcast %113 : vector<1x256xbf16> to vector<8x256xbf16>
    %115 = arith.mulf %111, %114 : vector<8x256xbf16>
    %c3_104 = arith.constant 3 : index
    %c0_105 = arith.constant 0 : index
    %c0_106 = arith.constant 0 : index
    %116 = vector.load %arg6[%c3_104, %c0_105, %c0_106] : memref<9x8x8xbf16, #tpu.memory_space<vmem>>, vector<1x8x8xbf16>
    %117 = vector.shape_cast %116 : vector<1x8x8xbf16> to vector<8x8xbf16>
    %cst_107 = arith.constant dense<0.000000e+00> : vector<8x256xf32>
    %118 = tpu.matmul %117, %115, %cst_107 {dimension_numbers = #tpu.dot_dimension_numbers<[1], [0], [0], [1], [0, 0, 1, 1], [], []>} : vector<8x8xbf16>, vector<8x256xbf16>, vector<8x256xf32> -> vector<8x256xf32>
    %119 = arith.addf %110, %118 : vector<8x256xf32>
    %c0_108 = arith.constant 0 : index
    %c17_109 = arith.constant 17 : index
    %120 = vector.load %arg12[%c0_108, %c17_109] : memref<8x290xbf16, #tpu.memory_space<vmem>>, vector<8x256xbf16>
    %c4_110 = arith.constant 4 : index
    %c0_111 = arith.constant 0 : index
    %c0_112 = arith.constant 0 : index
    %121 = vector.load %arg6[%c4_110, %c0_111, %c0_112] : memref<9x8x8xbf16, #tpu.memory_space<vmem>>, vector<1x8x8xbf16>
    %122 = vector.shape_cast %121 : vector<1x8x8xbf16> to vector<8x8xbf16>
    %cst_113 = arith.constant dense<0.000000e+00> : vector<8x256xf32>
    %123 = tpu.matmul %122, %120, %cst_113 {dimension_numbers = #tpu.dot_dimension_numbers<[1], [0], [0], [1], [0, 0, 1, 1], [], []>} : vector<8x8xbf16>, vector<8x256xbf16>, vector<8x256xf32> -> vector<8x256xf32>
    %124 = arith.addf %119, %123 : vector<8x256xf32>
    %c0_114 = arith.constant 0 : index
    %c18_115 = arith.constant 18 : index
    %125 = vector.load %arg12[%c0_114, %c18_115] : memref<8x290xbf16, #tpu.memory_space<vmem>>, vector<8x256xbf16>
    %c5_116 = arith.constant 5 : index
    %c0_117 = arith.constant 0 : index
    %c0_118 = arith.constant 0 : index
    %126 = vector.load %arg2[%c5_116, %c0_117, %c0_118] : memref<9x1x256xbf16, #tpu.memory_space<vmem>>, vector<1x1x256xbf16>
    %127 = vector.shape_cast %126 : vector<1x1x256xbf16> to vector<1x256xbf16>
    %128 = vector.broadcast %127 : vector<1x256xbf16> to vector<8x256xbf16>
    %129 = arith.mulf %125, %128 : vector<8x256xbf16>
    %c5_119 = arith.constant 5 : index
    %c0_120 = arith.constant 0 : index
    %c0_121 = arith.constant 0 : index
    %130 = vector.load %arg6[%c5_119, %c0_120, %c0_121] : memref<9x8x8xbf16, #tpu.memory_space<vmem>>, vector<1x8x8xbf16>
    %131 = vector.shape_cast %130 : vector<1x8x8xbf16> to vector<8x8xbf16>
    %cst_122 = arith.constant dense<0.000000e+00> : vector<8x256xf32>
    %132 = tpu.matmul %131, %129, %cst_122 {dimension_numbers = #tpu.dot_dimension_numbers<[1], [0], [0], [1], [0, 0, 1, 1], [], []>} : vector<8x8xbf16>, vector<8x256xbf16>, vector<8x256xf32> -> vector<8x256xf32>
    %133 = arith.addf %124, %132 : vector<8x256xf32>
    %c0_123 = arith.constant 0 : index
    %c32_124 = arith.constant 32 : index
    %134 = vector.load %arg12[%c0_123, %c32_124] : memref<8x290xbf16, #tpu.memory_space<vmem>>, vector<8x256xbf16>
    %c6_125 = arith.constant 6 : index
    %c0_126 = arith.constant 0 : index
    %c0_127 = arith.constant 0 : index
    %135 = vector.load %arg2[%c6_125, %c0_126, %c0_127] : memref<9x1x256xbf16, #tpu.memory_space<vmem>>, vector<1x1x256xbf16>
    %136 = vector.shape_cast %135 : vector<1x1x256xbf16> to vector<1x256xbf16>
    %137 = vector.broadcast %136 : vector<1x256xbf16> to vector<8x256xbf16>
    %138 = arith.mulf %134, %137 : vector<8x256xbf16>
    %c6_128 = arith.constant 6 : index
    %c0_129 = arith.constant 0 : index
    %c0_130 = arith.constant 0 : index
    %139 = vector.load %arg6[%c6_128, %c0_129, %c0_130] : memref<9x8x8xbf16, #tpu.memory_space<vmem>>, vector<1x8x8xbf16>
    %140 = vector.shape_cast %139 : vector<1x8x8xbf16> to vector<8x8xbf16>
    %cst_131 = arith.constant dense<0.000000e+00> : vector<8x256xf32>
    %141 = tpu.matmul %140, %138, %cst_131 {dimension_numbers = #tpu.dot_dimension_numbers<[1], [0], [0], [1], [0, 0, 1, 1], [], []>} : vector<8x8xbf16>, vector<8x256xbf16>, vector<8x256xf32> -> vector<8x256xf32>
    %142 = arith.addf %133, %141 : vector<8x256xf32>
    %c0_132 = arith.constant 0 : index
    %c33_133 = arith.constant 33 : index
    %143 = vector.load %arg12[%c0_132, %c33_133] : memref<8x290xbf16, #tpu.memory_space<vmem>>, vector<8x256xbf16>
    %c7_134 = arith.constant 7 : index
    %c0_135 = arith.constant 0 : index
    %c0_136 = arith.constant 0 : index
    %144 = vector.load %arg6[%c7_134, %c0_135, %c0_136] : memref<9x8x8xbf16, #tpu.memory_space<vmem>>, vector<1x8x8xbf16>
    %145 = vector.shape_cast %144 : vector<1x8x8xbf16> to vector<8x8xbf16>
    %cst_137 = arith.constant dense<0.000000e+00> : vector<8x256xf32>
    %146 = tpu.matmul %145, %143, %cst_137 {dimension_numbers = #tpu.dot_dimension_numbers<[1], [0], [0], [1], [0, 0, 1, 1], [], []>} : vector<8x8xbf16>, vector<8x256xbf16>, vector<8x256xf32> -> vector<8x256xf32>
    %147 = arith.addf %142, %146 : vector<8x256xf32>
    %c0_138 = arith.constant 0 : index
    %c34_139 = arith.constant 34 : index
    %148 = vector.load %arg12[%c0_138, %c34_139] : memref<8x290xbf16, #tpu.memory_space<vmem>>, vector<8x256xbf16>
    %c8_140 = arith.constant 8 : index
    %c0_141 = arith.constant 0 : index
    %c0_142 = arith.constant 0 : index
    %149 = vector.load %arg2[%c8_140, %c0_141, %c0_142] : memref<9x1x256xbf16, #tpu.memory_space<vmem>>, vector<1x1x256xbf16>
    %150 = vector.shape_cast %149 : vector<1x1x256xbf16> to vector<1x256xbf16>
    %151 = vector.broadcast %150 : vector<1x256xbf16> to vector<8x256xbf16>
    %152 = arith.mulf %148, %151 : vector<8x256xbf16>
    %c8_143 = arith.constant 8 : index
    %c0_144 = arith.constant 0 : index
    %c0_145 = arith.constant 0 : index
    %153 = vector.load %arg6[%c8_143, %c0_144, %c0_145] : memref<9x8x8xbf16, #tpu.memory_space<vmem>>, vector<1x8x8xbf16>
    %154 = vector.shape_cast %153 : vector<1x8x8xbf16> to vector<8x8xbf16>
    %cst_146 = arith.constant dense<0.000000e+00> : vector<8x256xf32>
    %155 = tpu.matmul %154, %152, %cst_146 {dimension_numbers = #tpu.dot_dimension_numbers<[1], [0], [0], [1], [0, 0, 1, 1], [], []>} : vector<8x8xbf16>, vector<8x256xbf16>, vector<8x256xf32> -> vector<8x256xf32>
    %156 = arith.addf %147, %155 : vector<8x256xf32>
    %c0_147 = arith.constant 0 : index
    %c0_148 = arith.constant 0 : index
    %157 = vector.load %arg7[%c0_147, %c0_148] : memref<8x1xf32, #tpu.memory_space<vmem>>, vector<8x1xf32>
    %158 = vector.broadcast %157 : vector<8x1xf32> to vector<8x256xf32>
    %159 = arith.mulf %156, %158 : vector<8x256xf32>
    %c0_149 = arith.constant 0 : index
    %c0_150 = arith.constant 0 : index
    %160 = vector.load %arg8[%c0_149, %c0_150] : memref<8x1xf32, #tpu.memory_space<vmem>>, vector<8x1xf32>
    %161 = vector.broadcast %160 : vector<8x1xf32> to vector<8x256xf32>
    %162 = arith.addf %159, %161 : vector<8x256xf32>
    %cst_151 = arith.constant 0.000000e+00 : f32
    %163 = vector.broadcast %cst_151 : f32 to vector<8x256xf32>
    %164 = arith.maximumf %162, %163 : vector<8x256xf32>
    %c0_152 = arith.constant 0 : index
    %c0_153 = arith.constant 0 : index
    %165 = vector.load %arg9[%c0_152, %c0_153] : memref<1x8xbf16, #tpu.memory_space<vmem>>, vector<1x8xbf16>
    %166 = arith.truncf %164 : vector<8x256xf32> to vector<8x256xbf16>
    %cst_154 = arith.constant dense<0.000000e+00> : vector<1x256xf32>
    %167 = tpu.matmul %165, %166, %cst_154 {dimension_numbers = #tpu.dot_dimension_numbers<[1], [0], [0], [1], [0, 0, 1, 1], [], []>} : vector<1x8xbf16>, vector<8x256xbf16>, vector<1x256xf32> -> vector<1x256xf32>
    %c0_155 = arith.constant 0 : index
    %c0_156 = arith.constant 0 : index
    %168 = vector.load %arg10[%c0_155, %c0_156] : memref<1x1xf32, #tpu.memory_space<vmem>>, vector<1x1xf32>
    %169 = vector.broadcast %168 : vector<1x1xf32> to vector<1x256xf32>
    %170 = arith.addf %167, %169 : vector<1x256xf32>
    %c0_157 = arith.constant 0 : index
    %c0_158 = arith.constant 0 : index
    %c0_159 = arith.constant 0 : index
    %171 = vector.load %arg11[%c0_157, %c0_158, %c0_159] : memref<1x1x256xf32, #tpu.memory_space<vmem>>, vector<1x1x256xf32>
    %172 = vector.shape_cast %171 : vector<1x1x256xf32> to vector<1x256xf32>
    %173 = vector.shape_cast %170 : vector<1x256xf32> to vector<1x1x256xf32>
    tpu.vector_store %arg11[%c0_157, %c0_158, %c0_159], %173 {strides = array<i32>} : memref<1x1x256xf32, #tpu.memory_space<vmem>>, vector<1x1x256xf32>,
    return
  }
  func.func @transform_0(%arg0: i32) -> (i32, i32, i32) {
    %c0_i32 = arith.constant 0 : i32
    %c0_i32_0 = arith.constant 0 : i32
    %c0_i32_1 = arith.constant 0 : i32
    return %arg0, %c0_i32, %c0_i32_0 : i32, i32, i32
  }
  func.func @transform_1(%arg0: i32) -> (i32, i32, i32) {
    %c0_i32 = arith.constant 0 : i32
    %c0_i32_0 = arith.constant 0 : i32
    %c0_i32_1 = arith.constant 0 : i32
    %c0_i32_2 = arith.constant 0 : i32
    return %c0_i32, %c0_i32_0, %c0_i32_1 : i32, i32, i32
  }
  func.func @transform_2(%arg0: i32) -> (i32, i32, i32) {
    %c0_i32 = arith.constant 0 : i32
    %c0_i32_0 = arith.constant 0 : i32
    %c0_i32_1 = arith.constant 0 : i32
    %c0_i32_2 = arith.constant 0 : i32
    return %c0_i32, %c0_i32_0, %c0_i32_1 : i32, i32, i32
  }
  func.func @transform_3(%arg0: i32) -> (i32, i32) {
    %c0_i32 = arith.constant 0 : i32
    %c0_i32_0 = arith.constant 0 : i32
    %c0_i32_1 = arith.constant 0 : i32
    return %c0_i32, %c0_i32_0 : i32, i32
  }
  func.func @transform_4(%arg0: i32) -> (i32, i32) {
    %c0_i32 = arith.constant 0 : i32
    %c0_i32_0 = arith.constant 0 : i32
    %c0_i32_1 = arith.constant 0 : i32
    return %c0_i32, %c0_i32_0 : i32, i32
  }
  func.func @transform_5(%arg0: i32) -> (i32, i32, i32) {
    %c0_i32 = arith.constant 0 : i32
    %c0_i32_0 = arith.constant 0 : i32
    %c0_i32_1 = arith.constant 0 : i32
    %c0_i32_2 = arith.constant 0 : i32
    return %c0_i32, %c0_i32_0, %c0_i32_1 : i32, i32, i32
  }
  func.func @transform_6(%arg0: i32) -> (i32, i32) {
    %c0_i32 = arith.constant 0 : i32
    %c0_i32_0 = arith.constant 0 : i32
    %c0_i32_1 = arith.constant 0 : i32
    return %c0_i32, %c0_i32_0 : i32, i32
  }
  func.func @transform_7(%arg0: i32) -> (i32, i32) {
    %c0_i32 = arith.constant 0 : i32
    %c0_i32_0 = arith.constant 0 : i32
    %c0_i32_1 = arith.constant 0 : i32
    return %c0_i32, %c0_i32_0 : i32, i32
  }
  func.func @transform_8(%arg0: i32) -> (i32, i32) {
    %c0_i32 = arith.constant 0 : i32
    %c0_i32_0 = arith.constant 0 : i32
    %c0_i32_1 = arith.constant 0 : i32
    return %c0_i32, %c0_i32_0 : i32, i32
  }
  func.func @transform_9(%arg0: i32) -> (i32, i32) {
    %c0_i32 = arith.constant 0 : i32
    %c0_i32_0 = arith.constant 0 : i32
    %c0_i32_1 = arith.constant 0 : i32
    return %c0_i32, %c0_i32_0 : i32, i32
  }
  func.func @transform_10(%arg0: i32) -> (i32, i32, i32) {
    %c0_i32 = arith.constant 0 : i32
    %c0_i32_0 = arith.constant 0 : i32
    %c0_i32_1 = arith.constant 0 : i32
    return %arg0, %c0_i32, %c0_i32_0 : i32, i32, i32
  }
}

</mosaic_0001>

<bundles_post_ra>
// kernel: _lambda_.11
= control target key start
LH: loop header
LB: loop body
LE: loop exit
PB: predicated region body
PF: predicated region fallthrough
CT: control target
= control target key end

     0   :  { %s358_s12 = smov 0   ;;  %s381_s0 = inlined_call_operand.vmem [shape: f32[2,16,16], index: 0, kind: input, shape index: {}]   ;;  %s382_s1 = inlined_call_operand.vmem [shape: bf16[16,32], index: 1, kind: input, shape index: {}]   ;;  %s383_s2 = inlined_call_operand.vmem [shape: f32[1,32], index: 2, kind: input, shape index: {}]   ;;  %s384_s3 = inlined_call_operand.vmem [shape: f32[2,16,32], index: 3, kind: output, shape index: {}]  }
   0x1 LB: > { %s293_s13 = sadd.s32 4294967295, %s334_s12   ;;  %p297_p0 = scmp.ge.s32.totalorder %s334_s12, 1  ;;  %s334_s12 = sphi %s358_s12, %s13_s12  }
   0x2   : > { %p137_p1 = scmp.lt.s32.totalorder %s334_s12, 3 }
   0x4   : > { %p138_p2 = pnand %p297_p0, %p137_p1 }
   0x5   : > { %p161_p3 = scmp.lt.s32.totalorder (!%p138_p2), %s293_s13, 1 }
   0x6   : > { %141 = sbr.rel (%p138_p2) target bundleno = 217 (0xd9), region = 32 }
   0xb   : > { %v327_v0 = vld [vmem:[%s382_s1] sm:$0xff]   ;;  %v336_v1 = vmov 0.0   ;;  %vm337_vm0 = vmmov 0   ;;  %s386_s13 = smov (!%p161_p3, %s293_s13), 1  ;;  %vm190_vm1 = vcmask 130048   ;;  %vm235_vm2 = vcmask 261120  }
   0xc   : > { %311 = vmatprep.subr.bf16.mxu0 %v336_v1  ;;  %313 = vmatprep.mubr.msk.bf16.mxu0 %vm337_vm0, %v336_v1  ;;  %s307_s16 = sshll.u32 %s386_s13, 4  ;;  %v302_v5 = vld [vmem:[%s383_s2] ss:$0 sm:$0xff] }
   0xd   : > { %312 = vmatpush3.bf16.msra.mxu0 %v327_v0  ;;  %s165_s19 = scalar_lea.vmem %s381_s0, %s307_s16  ;;  %s170_s24 = scalar_lea.vmem %s384_s3, %s307_s16 }
   0xe   : > { %v172_v2 = vld [vmem:[%s165_s19] sm:$0xff]  ;;  %v173_v3 = vld [vmem:[%s165_s19 + $0x8] sm:$0xff] }
   0xf   : > { %v174_v4 = vpack.c.bf16 %v173_v3, %v172_v2 }
  0x11   : > { %314 = vmatmul.mubr.msk.bf16.vlgmr.msra.gmra.mxu0 %vm190_vm1, %v174_v4 }
  0xd1   : > { %v228_v6 = vpop.f32.mrf.mxu0 }
  0xd2   : > { %v229_v7 = vadd.f32 %v302_v5, %v228_v6 }
  0xd3   : > { %v315_v8 = vpop.f32.mrf.mxu0 }
  0xd4   : > { %236 = vst.msk [vmem:[%s170_s24] sm:$0xff] %vm235_vm2, %v229_v7 }
  0xd5   : > { %v231_v9 = vpop.f32.mrf.mxu0 }
  0xd6   : > { %v232_v10 = vadd.f32 %v302_v5, %v231_v9 }
  0xd7   : > { %v316_v11 = vpop.f32.mrf.mxu0 }
  0xd8   : > { %237 = vst.msk [vmem:[%s170_s24 + $0x8] sm:$0xff] %vm235_vm2, %v232_v10 }
  0xd9 PF: > { %s13_s12 = sadd.s32 1, %s334_s12  }
  0xda   : > { %p10_p4 = scmp.ge.s32.totalorder %s13_s12, 4  }
  0xdc   :  { %12 = sbr.rel (!%p10_p4) target bundleno = 1 (0x1), region = 62 }

// kernel: _lambda_.16
= control target key start
LH: loop header
LB: loop body
LE: loop exit
PB: predicated region body
PF: predicated region fallthrough
CT: control target
= control target key end

     0   :  { %s604_s9 = smov 0   ;;  %s663_s0 = inlined_call_operand.vmem [shape: bf16[2,32,16], index: 0, kind: input, shape index: {}]   ;;  %s664_s1 = inlined_call_operand.vmem [shape: bf16[4,16,32], index: 1, kind: input, shape index: {}]   ;;  %s665_s2 = inlined_call_operand.vmem [shape: bf16[2,4,16,16], index: 2, kind: output, shape index: {}]  }
   0x1 LB: > { %s468_s10 = sadd.s32 4294967295, %s585_s9   ;;  %p472_p0 = scmp.ge.s32.totalorder %s585_s9, 1  ;;  %s585_s9 = sphi %s604_s9, %s12_s9  }
   0x2   : > { %p112_p1 = scmp.lt.s32.totalorder %s585_s9, 3 }
   0x4   : > { %p113_p2 = pnand %p472_p0, %p112_p1 }
   0x5   : > { %p134_p3 = scmp.lt.s32.totalorder (!%p113_p2), %s468_s10, 1 }
   0x6   : > { %116 = sbr.rel (%p113_p2) target bundleno = 230 (0xe6), region = 28 }
   0xb   : > { %v587_v0 = vmov 0.0   ;;  %s667_s10 = smov (!%p134_p3, %s468_s10), 1  ;;  %vm588_vm0 = vmmov 0   ;;  %v575_v3 = vld [vmem:[%s664_s1] sm:$0xff]   ;;  %v576_v4 = vld [vmem:[%s664_s1 + $0x8] sm:$0xff]   ;;  %vm168_vm1 = vcmask 261120  }
   0xc   : > { %531 = vmatprep.subr.bf16.mxu0 %v587_v0  ;;  %539 = vmatprep.subr.bf16.mxu1 %v587_v0  ;;  %s509_s11 = sshll.u32 %s667_s10, 4  ;;  %v577_v5 = vld [vmem:[%s664_s1 + $0x10] sm:$0xff]   ;;  %v578_v6 = vld [vmem:[%s664_s1 + $0x18] sm:$0xff]   ;;  %s510_s23 = sshll.u32 %s667_s10, 5  ;;  %vm221_vm2 = vcmask 125952  }
   0xd   : > { %535 = vmatprep.mubr.msk.bf16.mxu0 %vm588_vm0, %v587_v0  ;;  %543 = vmatprep.mubr.msk.bf16.mxu1 %vm588_vm0, %v587_v0  ;;  %s138_s14 = scalar_lea.vmem %s663_s0, %s509_s11  ;;  %s642_s26 = scalar_lea.vmem %s665_s2, %s510_s23 }
   0xe   : > { %v573_v1 = vld [vmem:[%s138_s14 + $0x8] sm:$0xff]   ;;  %v574_v2 = vld [vmem:[%s138_s14] sm:$0xff]  }
   0xf   : > { %532 = vmatpush3.bf16.msra.mxu0 %v573_v1  ;;  %540 = vmatpush3.bf16.msra.mxu1 %v573_v1 }
  0x10   : > { %533 = vmatprep.subr.bf16.mxu0 %v587_v0  ;;  %541 = vmatprep.subr.bf16.mxu1 %v587_v0 }
  0x13   : > { %534 = vmatpush3.bf16.msra.mxu0 %v574_v2  ;;  %542 = vmatpush3.bf16.msra.mxu1 %v574_v2 }
  0x14   : > { %547 = vmatprep.subr.bf16.mxu0 %v587_v0  ;;  %555 = vmatprep.subr.bf16.mxu1 %v587_v0 }
  0x16   : > { %536 = vmatmul.mubr.msk.bf16.vlgmr.msra.gmra.mxu0 %vm168_vm1, %v575_v3  ;;  %544 = vmatmul.mubr.msk.bf16.vlgmr.msra.gmra.mxu1 %vm168_vm1, %v576_v4 }
  0x17   : > { %548 = vmatpush3.bf16.msra.mxu0 %v573_v1  ;;  %556 = vmatpush3.bf16.msra.mxu1 %v573_v1 }
  0x18   : > { %549 = vmatprep.subr.bf16.mxu0 %v587_v0  ;;  %557 = vmatprep.subr.bf16.mxu1 %v587_v0 }
  0x19   : > { %551 = vmatprep.mubr.msk.bf16.mxu0 %vm588_vm0, %v587_v0  ;;  %559 = vmatprep.mubr.msk.bf16.mxu1 %vm588_vm0, %v587_v0 }
  0x1b   : > { %550 = vmatpush3.bf16.msra.mxu0 %v574_v2  ;;  %558 = vmatpush3.bf16.msra.mxu1 %v574_v2 }
  0x1e   : > { %552 = vmatmul.mubr.msk.bf16.vlgmr.msra.gmra.mxu0 %vm168_vm1, %v577_v5  ;;  %560 = vmatmul.mubr.msk.bf16.vlgmr.msra.gmra.mxu1 %vm168_vm1, %v578_v6 }
  0xd6   : > { %v206_v7 = vpop.f32.mrf.mxu0  ;;  %v269_v8 = vpop.f32.mrf.mxu1 }
  0xd7   : > { %v511_v9 = vpack.c.bf16 %v206_v7, %v206_v7  ;;  %v513_v10 = vpack.c.bf16 %v269_v8, %v269_v8 }
  0xd8   : > { %v537_v11 = vpop.f32.mrf.mxu0  ;;  %v545_v12 = vpop.f32.mrf.mxu1 }
  0xd9   : > { %222 = vst.msk [vmem:[%s642_s26] sm:$0xf] %vm221_vm2, %v511_v9  ;;  %489 = vst.msk [vmem:[%s642_s26 + $0x8] sm:$0xf] %vm221_vm2, %v513_v10 }
  0xda   : > { %v209_v13 = vpop.f32.mrf.mxu0  ;;  %v272_v14 = vpop.f32.mrf.mxu1 }
  0xdb   : > { %v512_v15 = vpack.c.bf16 %v209_v13, %v209_v13  ;;  %v514_v16 = vpack.c.bf16 %v272_v14, %v272_v14 }
  0xdc   : > { %v538_v17 = vpop.f32.mrf.mxu0  ;;  %v546_v18 = vpop.f32.mrf.mxu1 }
  0xdd   : > { %223 = vst.msk [vmem:[%s642_s26 + $0x4] sm:$0xf] %vm221_vm2, %v512_v15  ;;  %490 = vst.msk [vmem:[%s642_s26 + $0xc] sm:$0xf] %vm221_vm2, %v514_v16 }
  0xde   : > { %v332_v19 = vpop.f32.mrf.mxu0  ;;  %v395_v20 = vpop.f32.mrf.mxu1 }
  0xdf   : > { %v515_v21 = vpack.c.bf16 %v332_v19, %v332_v19  ;;  %v517_v22 = vpack.c.bf16 %v395_v20, %v395_v20 }
  0xe0   : > { %v553_v23 = vpop.f32.mrf.mxu0  ;;  %v561_v24 = vpop.f32.mrf.mxu1 }
  0xe1   : > { %497 = vst.msk [vmem:[%s642_s26 + $0x10] sm:$0xf] %vm221_vm2, %v515_v21  ;;  %505 = vst.msk [vmem:[%s642_s26 + $0x18] sm:$0xf] %vm221_vm2, %v517_v22 }
  0xe2   : > { %v335_v25 = vpop.f32.mrf.mxu0  ;;  %v398_v26 = vpop.f32.mrf.mxu1 }
  0xe3   : > { %v516_v27 = vpack.c.bf16 %v335_v25, %v335_v25  ;;  %v518_v28 = vpack.c.bf16 %v398_v26, %v398_v26 }
  0xe4   : > { %v554_v29 = vpop.f32.mrf.mxu0  ;;  %v562_v30 = vpop.f32.mrf.mxu1 }
  0xe5   : > { %498 = vst.msk [vmem:[%s642_s26 + $0x14] sm:$0xf] %vm221_vm2, %v516_v27  ;;  %506 = vst.msk [vmem:[%s642_s26 + $0x1c] sm:$0xf] %vm221_vm2, %v518_v28 }
  0xe6 PF: > { %s12_s9 = sadd.s32 1, %s585_s9  }
  0xe7   : > { %p9_p4 = scmp.ge.s32.totalorder %s12_s9, 4  }
  0xe9   :  { %11 = sbr.rel (!%p9_p4) target bundleno = 1 (0x1), region = 64 }

// kernel: _lambda_.12
= control target key start
LH: loop header
LB: loop body
LE: loop exit
PB: predicated region body
PF: predicated region fallthrough
CT: control target
= control target key end

     0   :  { %s2388_s25 = smov 0   ;;  %s2681_s0 = inlined_call_operand.vmem [shape: f32[2,17,32], index: 0, kind: input, shape index: {}]   ;;  %s2682_s1 = inlined_call_operand.vmem [shape: f32[1,32], index: 1, kind: input, shape index: {}]   ;;  %s2683_s2 = inlined_call_operand.vmem [shape: f32[1,32], index: 2, kind: input, shape index: {}]   ;;  %s2684_s3 = inlined_call_operand.vmem [shape: bf16[32,96], index: 3, kind: input, shape index: {}]   ;;  %s2685_s4 = inlined_call_operand.vmem [shape: f32[1,96], index: 4, kind: input, shape index: {}]   ;;  %s2686_s5 = inlined_call_operand.vmem [shape: bf16[32,32], index: 5, kind: input, shape index: {}]   ;;  %s2687_s6 = inlined_call_operand.vmem [shape: f32[1,32], index: 6, kind: input, shape index: {}]   ;;  %s2688_s7 = inlined_call_operand.vmem [shape: f32[1,32], index: 7, kind: input, shape index: {}]   ;;  %s2689_s8 = inlined_call_operand.vmem [shape: f32[1,32], index: 8, kind: input, shape index: {}]   ;;  %s2690_s9 = inlined_call_operand.vmem [shape: bf16[32,128], index: 9, kind: input, shape index: {}]   ;;  %s2691_s10 = inlined_call_operand.vmem [shape: f32[1,128], index: 10, kind: input, shape index: {}]   ;;  %s2692_s11 = inlined_call_operand.vmem [shape: bf16[128,32], index: 11, kind: input, shape index: {}]   ;;  %s2693_s12 = inlined_call_operand.vmem [shape: f32[1,32], index: 12, kind: input, shape index: {}]   ;;  %s2694_s13 = inlined_call_operand.vmem [shape: f32[2,17,32], index: 13, kind: output, shape index: {}]  }
   0x1 LB: > { %s1936_s26 = sadd.s32 4294967295, %s2303_s25   ;;  %p1940_p0 = scmp.ge.s32.totalorder %s2303_s25, 1  ;;  %s2303_s25 = sphi %s2388_s25, %s23_s25  }
   0x2   : > { %p387_p1 = scmp.lt.s32.totalorder %s2303_s25, 3 }
   0x4   : > { %p388_p2 = pnand %p1940_p0, %p387_p1 }
   0x5   : > { %p431_p3 = scmp.lt.s32.totalorder (!%p388_p2), %s1936_s26, 1  ;;  %s2305_s24 = smov (!%p388_p2), 96  }
   0x6   : > { %391 = sbr.rel (%p388_p2) target bundleno = 3334 (0xd06), region = 72  ;;  %s2306_s28 = smov (!%p388_p2), 120  }
   0x7   : > { %s2307_s29 = smov (!%p388_p2), 88   ;;  %s2309_s14 = smov (!%p388_p2), 80  }
   0x8   : > { %s2310_s15 = smov (!%p388_p2), 112   ;;  %s2312_s18 = smov (!%p388_p2), 64  }
   0x9   : > { %s2313_s19 = smov (!%p388_p2), 72   ;;  %s2314_s20 = smov (!%p388_p2), 104  }
   0xa   : > { %s2315_s23 = smov (!%p388_p2), 48  }
   0xb   : > { %s2696_s26 = smov (!%p431_p3, %s1936_s26), 1  ;;  %vm445_vm0 = vcmask 261120   ;;  %vm452_vm1 = vcmask 253952   ;;  %v2213_v21 = vld [vmem:[%s2684_s3 + $0x8] sm:$0xff]   ;;  %v2214_v22 = vld [vmem:[%s2684_s3] sm:$0xff]   ;;  %vm589_vm2 = vcmask 778240  }
   0xc   : > { %s2191_s27 = smul.u32 24, %s2696_s26  ;;  %2055 = vmatprep.subr.bf16.mxu0 %v2213_v21  ;;  %v1943_v34 = vld [vmem:[%s2682_s1] ss:$0 sm:$0xff]  ;;  %vm586_vm3 = vcmask 785408   ;;  %vm602_vm4 = vcmask 64512   ;;  %vm666_vm5 = vcmask 138240  }
   0xd   : > { %2056 = vmatpush3.bf16.msra.mxu0 %v2213_v21  ;;  %v1944_v40 = vld [vmem:[%s2683_s2] ss:$0 sm:$0xff]  ;;  %vm673_vm6 = vcmask 131072   ;;  %vm714_vm7 = vcmask 1040384   ;;  %vm948_vm8 = vcmask 1043456  }
   0xe   : > { %s435_s30 = scalar_lea.vmem %s2681_s0, %s2191_s27  ;;  %2057 = vmatprep.subr.bf16.mxu0 %v2214_v22  ;;  %v1945_v48 = vld [vmem:[%s2685_s4] ss:$0 sm:$0xff] }
   0xf   : > { %v2404_v0 = vld [vmem:[%s435_s30] sm:$0xff]  ;;  %v2406_v1 = vld [vmem:[%s435_s30 + $0x10] sm:$0x1]  ;;  %v2408_v2 = vld [vmem:[%s435_s30 + $0x8] sm:$0xff]  ;;  %s2308_s30 = smov 56  }
  0x10   : > { %v446_v3 = vsel %vm445_vm0, %v2404_v0, 0.0  ;;  %v453_v4 = vsel %vm452_vm1, %v2406_v1, 0.0  ;;  %v449_v5 = vsel %vm445_vm0, %v2408_v2, 0.0 }
  0x11   : > { %447 = vadd.xlane.f32.xlu0 %v446_v3  ;;  %454 = vadd.xlane.f32.xlu1 %v453_v4 }
  0x12   : > { %2058 = vmatpush3.bf16.msra.mxu0 %v2214_v22 }
  0x15   : > { %450 = vadd.xlane.f32.xlu0 %v449_v5 }
  0x9a   : > { %v448_v6 = vpop.xlane.xlu0 %447  ;;  %v455_v7 = vpop.xlane.xlu1 %454 }
  0x9b   : > { %v457_v8 = vmul.f32 0.03125, %v448_v6  ;;  %v459_v9 = vmul.f32 0.03125, %v455_v7 }
  0x9d   : > { %v460_v10 = vsub.f32 %v2404_v0, %v457_v8  ;;  %v462_v11 = vsub.f32 %v2406_v1, %v459_v9 }
  0x9e   : > { %v451_v12 = vpop.xlane.xlu0 %450 }
  0x9f   : > { %v458_v13 = vmul.f32 0.03125, %v451_v12  ;;  %v463_v14 = vmul.f32 %v460_v10, %v460_v10  ;;  %v465_v15 = vmul.f32 %v462_v11, %v462_v11 }
  0xa1   : > { %v461_v16 = vsub.f32 %v2408_v2, %v458_v13  ;;  %v466_v17 = vsel %vm445_vm0, %v463_v14, 0.0  ;;  %v472_v18 = vsel %vm452_vm1, %v465_v15, 0.0 }
  0xa2   : > { %467 = vadd.xlane.f32.xlu1 %v466_v17 }
  0xa3   : > { %v464_v19 = vmul.f32 %v461_v16, %v461_v16 }
  0xa5   : > { %v469_v20 = vsel %vm445_vm0, %v464_v19, 0.0 }
  0xa6   : > { %473 = vadd.xlane.f32.xlu1 %v472_v18  ;;  %470 = vadd.xlane.f32.xlu0 %v469_v20 }
 0x12b   : > { %v468_v23 = vpop.xlane.xlu1 %467 }
 0x12c   : > { %v475_v24 = vmul.f32 0.03125, %v468_v23 }
 0x12e   : > { %v478_v25 = vadd.f32 1e-05, %v475_v24 }
 0x12f   : > { %v474_v26 = vpop.xlane.xlu1 %473  ;;  %v471_v27 = vpop.xlane.xlu0 %470 }
 0x130   : > { %2225 = vrsqrt.f32 %v478_v25  ;;  %v477_v28 = vmul.f32 0.03125, %v474_v26  ;;  %v476_v29 = vmul.f32 0.03125, %v471_v27 }
 0x132   : > { %v480_v30 = vadd.f32 1e-05, %v477_v28  ;;  %v479_v31 = vadd.f32 1e-05, %v476_v29 }
 0x134   : > { %2227 = vrsqrt.f32 %v480_v30 }
 0x135   : > { %2229 = vrsqrt.f32 %v479_v31 }
 0x13d   : > { %v2226_v32 = vpop.eup %2225 }
 0x13e   : > { %v484_v33 = vmul.f32 %v2226_v32, %v460_v10 }
 0x140   : > { %v494_v39 = vmul.f32 %v1943_v34, %v484_v33 }
 0x141   : > { %v2228_v35 = vpop.eup %2227 }
 0x142   : > { %v2230_v36 = vpop.eup %2229  ;;  %v486_v37 = vmul.f32 %v2228_v35, %v462_v11  ;;  %v504_v44 = vadd.f32 %v1944_v40, %v494_v39 }
 0x143   : > { %v485_v38 = vmul.f32 %v2230_v36, %v461_v16 }
 0x144   : > { %v496_v41 = vmul.f32 %v1943_v34, %v486_v37 }
 0x145   : > { %v495_v42 = vmul.f32 %v1943_v34, %v485_v38 }
 0x146   : > { %v506_v43 = vadd.f32 %v1944_v40, %v496_v41 }
 0x147   : > { %v505_v45 = vadd.f32 %v1944_v40, %v495_v42 }
 0x148   : > { %v508_v46 = vpack.c.bf16 %v506_v43, %v506_v43 }
 0x149   : > { %v507_v47 = vpack.c.bf16 %v505_v45, %v504_v44 }
 0x14b   : > { %2059 = vmatprep.mubr.msk.bf16.mxu0 %vm445_vm0, %v507_v47 }
 0x14c   : > { %2060 = vmatmul.mubr.msk.bf16.vlgmr.msra.gmra.mxu0 %vm445_vm0, %v508_v46 }
 0x20c   : > { %v2061_v49 = vpop.f32.mrf.mxu0 }
 0x20d   : > { %v581_v50 = vadd.f32 %v2061_v49, %v1945_v48 }
 0x20e   : > { %v572_v51 = vpop.f32.mrf.mxu0 }
 0x20f   : > { %590 = vst.msk [vmem:[#allocation2 + $0x10] sm:$0x1] %vm589_vm2, %v581_v50  ;;  %v573_v52 = vadd.f32 %v1945_v48, %v572_v51 }
 0x210   : > { %v2062_v53 = vpop.f32.mrf.mxu0 }
 0x211   : > { %587 = vst.msk [vmem:[#allocation2] sm:$0xff] %vm586_vm3, %v573_v52  ;;  %v941_v53 = vld [vmem:[%s2686_s5 + $0x4] sm:$0xf] }
 0x212   : > { %v575_v54 = vpop.f32.mrf.mxu0 }
 0x213   : > { %v576_v55 = vadd.f32 %v1945_v48, %v575_v54  ;;  %v2311_v48 = vmov 0  }
 0x214   : > { %v2478_v49 = vsel %vm714_vm7, 65535, %v2311_v48 }
 0x215   : > { %588 = vst.msk [vmem:[#allocation2 + $0x8] sm:$0xff] %vm586_vm3, %v576_v55 }
 0x216   : > { %v593_v56 = vld [vmem:[#allocation2 + $0x10] sm:$0x1] }
 0x217   : > { %v2439_v57 = vpack.c.bf16 %v593_v56, %v593_v56 }
 0x218   : > { %v591_v58 = vld [vmem:[#allocation2] sm:$0xff] }
 0x219   : > { %600 = vrot.lane.b32.xlu0 %v2439_v57, %s2305_s24 }
 0x21c   : > { %v592_v59 = vld [vmem:[#allocation2 + $0x8] sm:$0xff] }
 0x21d   : > { %v2442_v60 = vpack.c.bf16 %v592_v59, %v591_v58 }
 0x21f   : > { %771 = vrot.lane.b32.xlu0 %v2442_v60, %s2306_s28  ;;  %598 = vrot.lane.b32.xlu1 %v2442_v60, %s2305_s24 }
 0x220   : > { %2067 = vmatprep.mubr.msk.bf16.mxu1 %vm602_vm4, %v2442_v60 }
 0x223   : > { %777 = vrot.lane.b32.xlu1 %v2439_v57, %s2307_s29 }
 0x227   : > { %775 = vrot.lane.b32.xlu1 %v2442_v60, %s2307_s29  ;;  %s2316_s29 = smov 40  }
 0x22b   : > { %773 = vrot.lane.b32.xlu1 %v2439_v57, %s2306_s28 }
 0x28b   : > { %v601_v61 = vpop.permute.xlu0 %600 }
 0x28c   : > { %2179 = vmatprep.subr.msk.bf16.mxu1 %vm602_vm4, %v601_v61  ;;  %v613_v62 = vsel %vm602_vm4, %v601_v61, 0 }
 0x28d   : > { %2064 = vmatpush3.bf16.xpose.msra.mxu1 %v613_v62 }
 0x291   : > { %v599_v63 = vpop.permute.xlu1 %598  ;;  %v772_v5 = vpop.permute.xlu0 %771 }
 0x292   : > { %2180 = vmatprep.subr.msk.bf16.mxu1 %vm602_vm4, %v599_v63  ;;  %v610_v3 = vsel %vm602_vm4, %v599_v63, 0 }
 0x295   : > { %2066 = vmatpush3.bf16.xpose.msra.mxu1 %v610_v3  ;;  %v778_v4 = vpop.permute.xlu1 %777  ;;  %v950_v3 = vsel %vm948_vm8, %v941_v53, 0 }
 0x296   : > { %2181 = vmatprep.subr.msk.bf16.mxu1 %vm602_vm4, %v778_v4  ;;  %v789_v6 = vsel %vm602_vm4, %v778_v4, 0 }
 0x299   : > { %v776_v7 = vpop.permute.xlu1 %775 }
 0x29a   : > { %v786_v8 = vsel %vm602_vm4, %v776_v7, 0 }
 0x29c   : > { %2068 = vmatmul.mubr.msk.bf16.vlgmr.msra.gmra.mxu1 %vm602_vm4, %v2439_v57 }
 0x29d   : > { %2080 = vmatpush3.bf16.xpose.msra.mxu1 %v789_v6  ;;  %2083 = vmatprep.mubr.msk.bf16.mxu1 %vm602_vm4, %v772_v5  ;;  %v774_v9 = vpop.permute.xlu1 %773 }
 0x29e   : > { %2182 = vmatprep.subr.msk.bf16.mxu1 %vm602_vm4, %v776_v7 }
 0x2a5   : > { %2082 = vmatpush3.bf16.xpose.msra.mxu1 %v786_v8 }
 0x2ac   : > { %2084 = vmatmul.mubr.msk.bf16.vlgmr.msra.gmra.mxu1 %vm602_vm4, %v774_v9 }
 0x35c   : > { %v2069_v10 = vpop.f32.mrf.mxu1 }
 0x35d   : > { %v665_v40 = vmul.f32 0.35355338, %v2069_v10 }
 0x35e   : > { %v649_v11 = vpop.f32.mrf.mxu1 }
 0x35f   : > { %v663_v39 = vmul.f32 0.35355338, %v649_v11  ;;  %v674_v43 = vsel %vm673_vm6, %v665_v40, -inf }
 0x360   : > { %v2070_v12 = vpop.f32.mrf.mxu1 }
 0x361   : > { %v667_v41 = vsel %vm666_vm5, %v663_v39, -inf }
 0x362   : > { %v652_v13 = vpop.f32.mrf.mxu1 }
 0x363   : > { %v664_v42 = vmul.f32 0.35355338, %v652_v13 }
 0x365   : > { %v670_v44 = vsel %vm666_vm5, %v664_v42, -inf }
 0x36c   : > { %v2085_v14 = vpop.f32.mrf.mxu1 }
 0x36d   : > { %v841_v18 = vmul.f32 0.35355338, %v2085_v14 }
 0x36e   : > { %v825_v15 = vpop.f32.mrf.mxu1 }
 0x36f   : > { %v839_v16 = vmul.f32 0.35355338, %v825_v15  ;;  %v848_v22 = vsel %vm673_vm6, %v841_v18, -inf }
 0x370   : > { %v2086_v17 = vpop.f32.mrf.mxu1 }
 0x371   : > { %v842_v19 = vsel %vm666_vm5, %v839_v16, -inf }
 0x372   : > { %843 = vmax.xlane.f32.xlu0 %v842_v19  ;;  %v828_v20 = vpop.f32.mrf.mxu1 }
 0x373   : > { %v840_v21 = vmul.f32 0.35355338, %v828_v20 }
 0x375   : > { %v845_v23 = vsel %vm666_vm5, %v840_v21, -inf }
 0x376   : > { %849 = vmax.xlane.f32.xlu0 %v848_v22  ;;  %846 = vmax.xlane.f32.xlu1 %v845_v23 }
 0x3fb   : > { %v844_v24 = vpop.xlane.xlu0 %843 }
 0x3fc   : > { %v851_v25 = vsub.f32 %v839_v16, %v844_v24 }
 0x3fe   : > { %v854_v26 = vmul.f32 1.442695, %v851_v25 }
 0x3ff   : > { %v850_v27 = vpop.xlane.xlu0 %849  ;;  %v847_v28 = vpop.xlane.xlu1 %846 }
 0x400   : > { %2231 = vpow2.f32 %v854_v26  ;;  %v853_v29 = vsub.f32 %v841_v18, %v850_v27  ;;  %v852_v30 = vsub.f32 %v840_v21, %v847_v28 }
 0x402   : > { %v858_v31 = vmul.f32 1.442695, %v853_v29  ;;  %v856_v32 = vmul.f32 1.442695, %v852_v30 }
 0x404   : > { %2233 = vpow2.f32 %v858_v31 }
 0x405   : > { %2235 = vpow2.f32 %v856_v32 }
 0x40d   : > { %v2232_v33 = vpop.eup %2231 }
 0x40e   : > { %v860_v34 = vsel %vm666_vm5, %v2232_v33, 0.0 }
 0x40f   : > { %861 = vadd.xlane.f32.xlu0 %v860_v34 }
 0x411   : > { %v2234_v35 = vpop.eup %2233 }
 0x412   : > { %v2236_v36 = vpop.eup %2235  ;;  %v866_v37 = vsel %vm673_vm6, %v2234_v35, 0.0 }
 0x413   : > { %867 = vadd.xlane.f32.xlu1 %v866_v37  ;;  %v863_v38 = vsel %vm666_vm5, %v2236_v36, 0.0 }
 0x414   : > { %864 = vadd.xlane.f32.xlu0 %v863_v38 }
 0x424   : > { %877 = vrot.lane.b32.xlu1 %v2442_v60, %s2308_s30 }
 0x428   : > { %1063 = vrot.lane.b32.xlu1 %v2439_v57, %s2309_s14 }
 0x42a   : > { %879 = vrot.lane.b32.xlu0 %v2439_v57, %s2308_s30 }
 0x42c   : > { %1061 = vrot.lane.b32.xlu1 %v2442_v60, %s2309_s14 }
 0x42e   : > { %1057 = vrot.lane.b32.xlu0 %v2442_v60, %s2310_s15 }
 0x430   : > { %1059 = vrot.lane.b32.xlu1 %v2439_v57, %s2310_s15 }
 0x44d   : > { %668 = vmax.xlane.f32.xlu0 %v667_v41 }
 0x451   : > { %675 = vmax.xlane.f32.xlu0 %v674_v43 }
 0x454   : > { %671 = vmax.xlane.f32.xlu1 %v670_v44 }
 0x498   : > { %v862_v45 = vpop.xlane.xlu0 %861 }
 0x499   : > { %2237 = vrcp.f32 %v862_v45 }
 0x49c   : > { %v868_v46 = vpop.xlane.xlu1 %867 }
 0x49d   : > { %v865_v47 = vpop.xlane.xlu0 %864  ;;  %2239 = vrcp.f32 %v868_v46 }
 0x49e   : > { %2241 = vrcp.f32 %v865_v47 }
 0x4a0   : > { %v878_v52 = vpop.permute.xlu1 %877 }
 0x4a1   : > { %v880_v50 = vpop.permute.xlu0 %879 }
 0x4a2   : > { %v889_v51 = vand.u32 %v880_v50, %v2478_v49 }
 0x4a4   : > { %2087 = vmatprep.subr.bf16.mxu1 %v889_v51  ;;  %v1064_v4 = vpop.permute.xlu1 %1063 }
 0x4a5   : > { %2088 = vmatpush3.bf16.msra.mxu1 %v889_v51  ;;  %v1058_v5 = vpop.permute.xlu0 %1057  ;;  %v1075_v32 = vsel %vm602_vm4, %v1064_v4, 0 }
 0x4a6   : > { %2089 = vmatprep.subr.bf16.mxu1 %v878_v52  ;;  %v2238_v54 = vpop.eup %2237 }
 0x4a7   : > { %v872_v59 = vmul.f32 %v2238_v54, %v2232_v33 }
 0x4a8   : > { %v1062_v6 = vpop.permute.xlu1 %1061 }
 0x4a9   : > { %2090 = vmatpush3.bf16.msra.mxu1 %v878_v52  ;;  %v770_v52 = vld [vmem:[%s2686_s5] sm:$0xf] }
 0x4aa   : > { %v2240_v55 = vpop.eup %2239  ;;  %2183 = vmatprep.subr.msk.bf16.mxu1 %vm948_vm8, %v941_v53  ;;  %v1007_v53 = vsel %vm948_vm8, %v770_v52, 0 }
 0x4ab   : > { %v2242_v56 = vpop.eup %2241  ;;  %v874_v58 = vmul.f32 %v2240_v55, %v2234_v35 }
 0x4ac   : > { %v873_v61 = vmul.f32 %v2242_v56, %v2236_v36  ;;  %v2489_v9 = vpop.permute.xlu1 %1059  ;;  %v1072_v36 = vsel %vm602_vm4, %v1062_v6, 0 }
 0x4ad   : > { %v876_v62 = vpack.c.bf16 %v874_v58, %v874_v58 }
 0x4ae   : > { %v875_v63 = vpack.c.bf16 %v873_v61, %v872_v59 }
 0x4b0   : > { %2091 = vmatprep.mubr.msk.bf16.mxu1 %vm666_vm5, %v875_v63 }
 0x4b1   : > { %2092 = vmatmul.mubr.msk.bf16.vlgmr.msra.gmra.mxu1 %vm666_vm5, %v876_v62 }
 0x4b2   : > { %2096 = vmatpush3.bf16.msra.mxu1 %v950_v3 }
 0x4b3   : > { %2185 = vmatprep.subr.msk.bf16.mxu1 %vm602_vm4, %v1064_v4 }
 0x4d6   : > { %v669_v7 = vpop.xlane.xlu0 %668 }
 0x4d7   : > { %v677_v8 = vsub.f32 %v663_v39, %v669_v7 }
 0x4d9   : > { %v680_v10 = vmul.f32 1.442695, %v677_v8 }
 0x4da   : > { %v676_v11 = vpop.xlane.xlu0 %675 }
 0x4db   : > { %2243 = vpow2.f32 %v680_v10  ;;  %v679_v12 = vsub.f32 %v665_v40, %v676_v11 }
 0x4dd   : > { %v684_v13 = vmul.f32 1.442695, %v679_v12  ;;  %v672_v14 = vpop.xlane.xlu1 %671 }
 0x4de   : > { %v678_v15 = vsub.f32 %v664_v42, %v672_v14 }
 0x4df   : > { %2245 = vpow2.f32 %v684_v13 }
 0x4e0   : > { %v682_v16 = vmul.f32 1.442695, %v678_v15 }
 0x4e2   : > { %2247 = vpow2.f32 %v682_v16 }
 0x4e8   : > { %v2244_v17 = vpop.eup %2243 }
 0x4e9   : > { %v686_v18 = vsel %vm666_vm5, %v2244_v17, 0.0 }
 0x4ea   : > { %687 = vadd.xlane.f32.xlu0 %v686_v18 }
 0x4ec   : > { %v2246_v19 = vpop.eup %2245 }
 0x4ed   : > { %v692_v20 = vsel %vm673_vm6, %v2246_v19, 0.0 }
 0x4ee   : > { %693 = vadd.xlane.f32.xlu1 %v692_v20 }
 0x4ef   : > { %v2248_v21 = vpop.eup %2247 }
 0x4f0   : > { %v689_v22 = vsel %vm666_vm5, %v2248_v21, 0.0 }
 0x4f1   : > { %690 = vadd.xlane.f32.xlu0 %v689_v22 }
 0x4ff   : > { %703 = vrot.lane.b32.xlu1 %v2442_v60, %s2312_s18 }
 0x503   : > { %1294 = vrot.lane.b32.xlu1 %v2439_v57, %s2313_s19 }
 0x507   : > { %1292 = vrot.lane.b32.xlu1 %v2442_v60, %s2313_s19  ;;  %705 = vrot.lane.b32.xlu0 %v2439_v57, %s2312_s18  ;;  %s440_s19 = scalar_lea.vmem %s2694_s13, %s2191_s27 }
 0x50b   : > { %1290 = vrot.lane.b32.xlu1 %v2439_v57, %s2314_s20  ;;  %1288 = vrot.lane.b32.xlu0 %v2442_v60, %s2314_s20 }
 0x571   : > { %v2093_v23 = vpop.f32.mrf.mxu1 }
 0x572   : > { %v940_v30 = vpack.c.bf16 %v2093_v23, %v2093_v23 }
 0x573   : > { %v925_v24 = vpop.f32.mrf.mxu1  ;;  %v688_v26 = vpop.xlane.xlu0 %687 }
 0x575   : > { %v2094_v25 = vpop.f32.mrf.mxu1 }
 0x577   : > { %v928_v27 = vpop.f32.mrf.mxu1  ;;  %v694_v28 = vpop.xlane.xlu1 %693 }
 0x578   : > { %v939_v29 = vpack.c.bf16 %v928_v27, %v925_v24  ;;  %2249 = vrcp.f32 %v694_v28 }
 0x579   : > { %2251 = vrcp.f32 %v688_v26 }
 0x57a   : > { %2097 = vmatprep.mubr.msk.bf16.mxu1 %vm602_vm4, %v939_v29  ;;  %v691_v31 = vpop.xlane.xlu0 %690 }
 0x57b   : > { %2098 = vmatmul.mubr.msk.bf16.vlgmr.msra.gmra.mxu1 %vm602_vm4, %v940_v30  ;;  %2253 = vrcp.f32 %v691_v31  ;;  %v704_v33 = vpop.permute.xlu1 %703 }
 0x57c   : > { %2108 = vmatpush3.bf16.xpose.msra.mxu1 %v1075_v32  ;;  %2111 = vmatprep.mubr.msk.bf16.mxu1 %vm602_vm4, %v1058_v5 }
 0x57d   : > { %2186 = vmatprep.subr.msk.bf16.mxu1 %vm602_vm4, %v1062_v6 }
 0x57e   : > { %v706_v34 = vpop.permute.xlu0 %705 }
 0x57f   : > { %v718_v35 = vand.u32 %v2478_v49, %v706_v34  ;;  %v1295_v37 = vpop.permute.xlu1 %1294 }
 0x580   : > { %v1306_v44 = vsel %vm602_vm4, %v1295_v37, 0 }
 0x581   : > { %2071 = vmatprep.subr.bf16.mxu0 %v718_v35 }
 0x582   : > { %2072 = vmatpush3.bf16.msra.mxu0 %v718_v35  ;;  %v1289_v45 = vpop.permute.xlu0 %1288 }
 0x583   : > { %2073 = vmatprep.subr.bf16.mxu0 %v704_v33  ;;  %v1293_v47 = vpop.permute.xlu1 %1292 }
 0x584   : > { %2110 = vmatpush3.bf16.xpose.msra.mxu1 %v1072_v36  ;;  %v1303_v50 = vsel %vm602_vm4, %v1293_v47, 0 }
 0x585   : > { %v2250_v38 = vpop.eup %2249  ;;  %2188 = vmatprep.subr.msk.bf16.mxu1 %vm602_vm4, %v1295_v37 }
 0x586   : > { %v2252_v39 = vpop.eup %2251  ;;  %2074 = vmatpush3.bf16.msra.mxu0 %v704_v33  ;;  %v700_v41 = vmul.f32 %v2250_v38, %v2246_v19 }
 0x587   : > { %v698_v42 = vmul.f32 %v2252_v39, %v2244_v17  ;;  %v1291_v51 = vpop.permute.xlu1 %1290  ;;  %2184 = vmatprep.subr.msk.bf16.mxu0 %vm948_vm8, %v770_v52 }
 0x588   : > { %v2254_v40 = vpop.eup %2253  ;;  %v702_v48 = vpack.c.bf16 %v700_v41, %v700_v41 }
 0x589   : > { %v699_v43 = vmul.f32 %v2254_v40, %v2248_v21 }
 0x58b   : > { %2112 = vmatmul.mubr.msk.bf16.vlgmr.msra.gmra.mxu1 %vm602_vm4, %v2489_v9  ;;  %v701_v46 = vpack.c.bf16 %v699_v43, %v698_v42 }
 0x58c   : > { %2130 = vmatpush3.bf16.xpose.msra.mxu1 %v1306_v44  ;;  %2133 = vmatprep.mubr.msk.bf16.mxu1 %vm602_vm4, %v1289_v45 }
 0x58d   : > { %2189 = vmatprep.subr.msk.bf16.mxu1 %vm602_vm4, %v1293_v47  ;;  %2075 = vmatprep.mubr.msk.bf16.mxu0 %vm666_vm5, %v701_v46 }
 0x58e   : > { %2076 = vmatmul.mubr.msk.bf16.vlgmr.msra.gmra.mxu0 %vm666_vm5, %v702_v48 }
 0x58f   : > { %2102 = vmatpush3.bf16.msra.mxu0 %v1007_v53 }
 0x594   : > { %2132 = vmatpush3.bf16.xpose.msra.mxu1 %v1303_v50 }
 0x59b   : > { %2134 = vmatmul.mubr.msk.bf16.vlgmr.msra.gmra.mxu1 %vm602_vm4, %v1291_v51 }
 0x63b   : > { %v2522_v54 = vpop.f32.mrf.mxu1 }
 0x63d   : > { %v2524_v55 = vpop.f32.mrf.mxu1 }
 0x63f   : > { %v2100_v56 = vpop.f32.mrf.mxu1 }
 0x641   : > { %v2526_v58 = vpop.f32.mrf.mxu1 }
 0x64b   : > { %v2113_v59 = vpop.f32.mrf.mxu1 }
 0x64c   : > { %v1127_v4 = vmul.f32 0.35355338, %v2113_v59 }
 0x64d   : > { %v1111_v61 = vpop.f32.mrf.mxu1 }
 0x64e   : > { %v1125_v62 = vmul.f32 0.35355338, %v1111_v61  ;;  %v2077_v63 = vpop.f32.mrf.mxu0  ;;  %v1134_v11 = vsel %vm673_vm6, %v1127_v4, -inf }
 0x64f   : > { %v2114_v3 = vpop.f32.mrf.mxu1  ;;  %v769_v14 = vpack.c.bf16 %v2077_v63, %v2077_v63 }
 0x650   : > { %v1128_v5 = vsel %vm666_vm5, %v1125_v62, -inf  ;;  %v754_v6 = vpop.f32.mrf.mxu0 }
 0x651   : > { %v1114_v7 = vpop.f32.mrf.mxu1  ;;  %1129 = vmax.xlane.f32.xlu0 %v1128_v5 }
 0x652   : > { %v1126_v8 = vmul.f32 0.35355338, %v1114_v7  ;;  %v2078_v9 = vpop.f32.mrf.mxu0 }
 0x654   : > { %v1131_v10 = vsel %vm666_vm5, %v1126_v8, -inf  ;;  %v757_v12 = vpop.f32.mrf.mxu0 }
 0x655   : > { %1132 = vmax.xlane.f32.xlu1 %v1131_v10  ;;  %1135 = vmax.xlane.f32.xlu0 %v1134_v11  ;;  %v768_v13 = vpack.c.bf16 %v757_v12, %v754_v6 }
 0x657   : > { %2103 = vmatprep.mubr.msk.bf16.mxu0 %vm602_vm4, %v768_v13 }
 0x658   : > { %2104 = vmatmul.mubr.msk.bf16.vlgmr.msra.gmra.mxu0 %vm602_vm4, %v769_v14 }
 0x65b   : > { %v2135_v15 = vpop.f32.mrf.mxu1 }
 0x65c   : > { %v1358_v40 = vmul.f32 0.35355338, %v2135_v15 }
 0x65d   : > { %v1342_v16 = vpop.f32.mrf.mxu1 }
 0x65e   : > { %v1356_v37 = vmul.f32 0.35355338, %v1342_v16  ;;  %v1365_v42 = vsel %vm673_vm6, %v1358_v40, -inf }
 0x65f   : > { %v2136_v17 = vpop.f32.mrf.mxu1 }
 0x660   : > { %v1359_v39 = vsel %vm666_vm5, %v1356_v37, -inf  ;;  %v1227_v17 = vld [vmem:[%s2686_s5 + $0x8] sm:$0xf] }
 0x661   : > { %v1345_v36 = vpop.f32.mrf.mxu1 }
 0x662   : > { %v1357_v38 = vmul.f32 0.35355338, %v1345_v36 }
 0x664   : > { %v1362_v41 = vsel %vm666_vm5, %v1357_v38, -inf }
 0x6da   : > { %v1130_v18 = vpop.xlane.xlu0 %1129 }
 0x6db   : > { %v1137_v19 = vsub.f32 %v1125_v62, %v1130_v18  ;;  %v1235_v18 = vsel %vm948_vm8, %v1227_v17, 0 }
 0x6dd   : > { %v1140_v20 = vmul.f32 1.442695, %v1137_v19 }
 0x6de   : > { %v1136_v21 = vpop.xlane.xlu0 %1135  ;;  %v1133_v22 = vpop.xlane.xlu1 %1132 }
 0x6df   : > { %2255 = vpow2.f32 %v1140_v20  ;;  %v1139_v23 = vsub.f32 %v1127_v4, %v1136_v21  ;;  %v1138_v24 = vsub.f32 %v1126_v8, %v1133_v22 }
 0x6e1   : > { %v1144_v25 = vmul.f32 1.442695, %v1139_v23  ;;  %v1142_v26 = vmul.f32 1.442695, %v1138_v24 }
 0x6e3   : > { %2257 = vpow2.f32 %v1144_v25 }
 0x6e4   : > { %2259 = vpow2.f32 %v1142_v26 }
 0x6ec   : > { %v2256_v27 = vpop.eup %2255 }
 0x6ed   : > { %v1146_v28 = vsel %vm666_vm5, %v2256_v27, 0.0 }
 0x6ee   : > { %1147 = vadd.xlane.f32.xlu0 %v1146_v28 }
 0x6f0   : > { %v2258_v29 = vpop.eup %2257 }
 0x6f1   : > { %v2260_v30 = vpop.eup %2259  ;;  %v1152_v31 = vsel %vm673_vm6, %v2258_v29, 0.0 }
 0x6f2   : > { %1153 = vadd.xlane.f32.xlu1 %v1152_v31  ;;  %v1149_v32 = vsel %vm666_vm5, %v2260_v30, 0.0 }
 0x6f3   : > { %1150 = vadd.xlane.f32.xlu0 %v1149_v32 }
 0x703   : > { %1163 = vrot.lane.b32.xlu1 %v2442_v60, %s2315_s23 }
 0x709   : > { %1165 = vrot.lane.b32.xlu0 %v2439_v57, %s2315_s23 }
 0x718   : > { %v2538_v33 = vpop.f32.mrf.mxu0 }
 0x71a   : > { %v2540_v34 = vpop.f32.mrf.mxu0 }
 0x71c   : > { %v2106_v35 = vpop.f32.mrf.mxu0 }
 0x71e   : > { %v1046_v19 = vpop.f32.mrf.mxu0 }
 0x727   : > { %1360 = vmax.xlane.f32.xlu1 %v1359_v39  ;;  %v1458_v39 = vld [vmem:[%s2686_s5 + $0xc] sm:$0xf] }
 0x728   : > { %1363 = vmax.xlane.f32.xlu0 %v1362_v41  ;;  %v1052_v41 = vadd.f32 %v2538_v33, %v2522_v54 }
 0x72c   : > { %1366 = vmax.xlane.f32.xlu0 %v1365_v42 }
 0x777   : > { %v1148_v43 = vpop.xlane.xlu0 %1147 }
 0x778   : > { %2261 = vrcp.f32 %v1148_v43  ;;  %v1044_v43 = vadd.f32 %v2540_v34, %v2524_v55 }
 0x77b   : > { %v1154_v44 = vpop.xlane.xlu1 %1153 }
 0x77c   : > { %v1151_v45 = vpop.xlane.xlu0 %1150  ;;  %2263 = vrcp.f32 %v1154_v44 }
 0x77d   : > { %2265 = vrcp.f32 %v1151_v45 }
 0x77f   : > { %v1164_v48 = vpop.permute.xlu1 %1163 }
 0x780   : > { %v1166_v46 = vpop.permute.xlu0 %1165 }
 0x781   : > { %v1175_v47 = vand.u32 %v1166_v46, %v2478_v49 }
 0x783   : > { %2115 = vmatprep.subr.bf16.mxu0 %v1175_v47 }
 0x784   : > { %2116 = vmatpush3.bf16.msra.mxu0 %v1175_v47 }
 0x785   : > { %2117 = vmatprep.subr.bf16.mxu0 %v1164_v48  ;;  %v2262_v50 = vpop.eup %2261 }
 0x786   : > { %v1158_v56 = vmul.f32 %v2262_v50, %v2256_v27 }
 0x788   : > { %2118 = vmatpush3.bf16.msra.mxu0 %v1164_v48 }
 0x789   : > { %v2264_v51 = vpop.eup %2263  ;;  %2187 = vmatprep.subr.msk.bf16.mxu0 %vm948_vm8, %v1227_v17 }
 0x78a   : > { %v2266_v52 = vpop.eup %2265  ;;  %v1160_v53 = vmul.f32 %v2264_v51, %v2258_v29 }
 0x78b   : > { %v1159_v59 = vmul.f32 %v2266_v52, %v2260_v30 }
 0x78c   : > { %v1162_v61 = vpack.c.bf16 %v1160_v53, %v1160_v53 }
 0x78d   : > { %v1161_v62 = vpack.c.bf16 %v1159_v59, %v1158_v56 }
 0x78f   : > { %2119 = vmatprep.mubr.msk.bf16.mxu0 %vm666_vm5, %v1161_v62 }
 0x790   : > { %2120 = vmatmul.mubr.msk.bf16.vlgmr.msra.gmra.mxu0 %vm666_vm5, %v1162_v61  ;;  %v1047_v61 = vadd.f32 %v1046_v19, %v2526_v58 }
 0x791   : > { %2124 = vmatpush3.bf16.msra.mxu0 %v1235_v18 }
 0x7b0   : > { %v1361_v3 = vpop.xlane.xlu1 %1360 }
 0x7b1   : > { %v1364_v63 = vpop.xlane.xlu0 %1363  ;;  %v1368_v6 = vsub.f32 %v1356_v37, %v1361_v3 }
 0x7b2   : > { %v1369_v4 = vsub.f32 %v1357_v38, %v1364_v63 }
 0x7b3   : > { %v1371_v9 = vmul.f32 1.442695, %v1368_v6 }
 0x7b4   : > { %v1373_v5 = vmul.f32 1.442695, %v1369_v4  ;;  %v1974_v4 = vld [vmem:[%s2687_s6] ss:$0 sm:$0xff] }
 0x7b5   : > { %v1367_v7 = vpop.xlane.xlu0 %1366 }
 0x7b6   : > { %2267 = vpow2.f32 %v1373_v5  ;;  %v1370_v8 = vsub.f32 %v1358_v40, %v1367_v7  ;;  %v1466_v40 = vsel %vm948_vm8, %v1458_v39, 0 }
 0x7b8   : > { %v1375_v10 = vmul.f32 1.442695, %v1370_v8 }
 0x7ba   : > { %2269 = vpow2.f32 %v1375_v10 }
 0x7bb   : > { %2271 = vpow2.f32 %v1371_v9 }
 0x7c3   : > { %v2268_v11 = vpop.eup %2267 }
 0x7c4   : > { %v1380_v12 = vsel %vm666_vm5, %v2268_v11, 0.0 }
 0x7c5   : > { %1381 = vadd.xlane.f32.xlu0 %v1380_v12 }
 0x7c7   : > { %v2270_v13 = vpop.eup %2269 }
 0x7c8   : > { %v1383_v14 = vsel %vm673_vm6, %v2270_v13, 0.0  ;;  %v2272_v15 = vpop.eup %2271 }
 0x7c9   : > { %1384 = vadd.xlane.f32.xlu1 %v1383_v14  ;;  %v1377_v16 = vsel %vm666_vm5, %v2272_v15, 0.0 }
 0x7cd   : > { %1378 = vadd.xlane.f32.xlu1 %v1377_v16 }
 0x7db   : > { %1396 = vrot.lane.b32.xlu0 %v2439_v57, %s2316_s29 }
 0x7de   : > { %1394 = vrot.lane.b32.xlu1 %v2442_v60, %s2316_s29 }
 0x84e   : > { %v1382_v20 = vpop.xlane.xlu0 %1381 }
 0x850   : > { %v2121_v21 = vpop.f32.mrf.mxu0 }
 0x851   : > { %v1226_v30 = vpack.c.bf16 %v2121_v21, %v2121_v21 }
 0x852   : > { %v1397_v22 = vpop.permute.xlu0 %1396  ;;  %v1211_v23 = vpop.f32.mrf.mxu0 }
 0x853   : > { %v1406_v24 = vand.u32 %v1397_v22, %v2478_v49  ;;  %v1385_v25 = vpop.xlane.xlu1 %1384 }
 0x854   : > { %v2122_v26 = vpop.f32.mrf.mxu0  ;;  %2273 = vrcp.f32 %v1385_v25 }
 0x855   : > { %2137 = vmatprep.subr.bf16.mxu0 %v1406_v24  ;;  %2275 = vrcp.f32 %v1382_v20  ;;  %v2215_v26 = vld [vmem:[%s2690_s9 + $0x8] sm:$0xff]  }
 0x856   : > { %v1214_v27 = vpop.f32.mrf.mxu0  ;;  %2151 = vmatprep.subr.bf16.mxu1 %v2215_v26 }
 0x857   : > { %v1225_v28 = vpack.c.bf16 %v1214_v27, %v1211_v23  ;;  %v1379_v29 = vpop.xlane.xlu1 %1378  ;;  %v2216_v27 = vld [vmem:[%s2690_s9] sm:$0xff]   ;;  %2152 = vmatpush3.bf16.msra.mxu1 %v2215_v26 }
 0x858   : > { %2277 = vrcp.f32 %v1379_v29  ;;  %2153 = vmatprep.subr.bf16.mxu1 %v2216_v27 }
 0x859   : > { %2125 = vmatprep.mubr.msk.bf16.mxu0 %vm602_vm4, %v1225_v28 }
 0x85a   : > { %2126 = vmatmul.mubr.msk.bf16.vlgmr.msra.gmra.mxu0 %vm602_vm4, %v1226_v30 }
 0x85b   : > { %2138 = vmatpush3.bf16.msra.mxu0 %v1406_v24  ;;  %v1395_v57 = vpop.permute.xlu1 %1394  ;;  %2154 = vmatpush3.bf16.msra.mxu1 %v2216_v27 }
 0x85c   : > { %2139 = vmatprep.subr.bf16.mxu0 %v1395_v57 }
 0x85f   : > { %2140 = vmatpush3.bf16.msra.mxu0 %v1395_v57 }
 0x860   : > { %2190 = vmatprep.subr.msk.bf16.mxu0 %vm948_vm8, %v1458_v39 }
 0x861   : > { %v2274_v60 = vpop.eup %2273 }
 0x862   : > { %v2276_v49 = vpop.eup %2275  ;;  %v1391_v32 = vmul.f32 %v2274_v60, %v2270_v13 }
 0x863   : > { %v1390_v36 = vmul.f32 %v2276_v49, %v2268_v11 }
 0x864   : > { %v1393_v38 = vpack.c.bf16 %v1391_v32, %v1391_v32 }
 0x865   : > { %v2278_v31 = vpop.eup %2277 }
 0x866   : > { %v1389_v35 = vmul.f32 %v2278_v31, %v2272_v15 }
 0x868   : > { %v1392_v37 = vpack.c.bf16 %v1390_v36, %v1389_v35 }
 0x86a   : > { %2141 = vmatprep.mubr.msk.bf16.mxu0 %vm666_vm5, %v1392_v37 }
 0x86b   : > { %2142 = vmatmul.mubr.msk.bf16.vlgmr.msra.gmra.mxu0 %vm666_vm5, %v1393_v38  ;;  %v1975_v38 = vld [vmem:[%s2688_s7] ss:$0 sm:$0xff] }
 0x86c   : > { %2146 = vmatpush3.bf16.msra.mxu0 %v1466_v40 }
 0x91a   : > { %v2127_v42 = vpop.f32.mrf.mxu0 }
 0x91b   : > { %v1287_v44 = vadd.f32 %v2127_v42, %v1052_v41  ;;  %v1976_v42 = vld [vmem:[%s2689_s8] ss:$0 sm:$0xff] }
 0x91c   : > { %v1271_v45 = vpop.f32.mrf.mxu0 }
 0x91d   : > { %v1285_v46 = vadd.f32 %v1271_v45, %v1044_v43 }
 0x91e   : > { %v2128_v47 = vpop.f32.mrf.mxu0 }
 0x920   : > { %v1274_v48 = vpop.f32.mrf.mxu0 }
 0x921   : > { %v1286_v62 = vadd.f32 %v1274_v48, %v1047_v61  ;;  %v2222_v61 = vld [vmem:[%s2692_s11 + $0x10] sm:$0xff]  }
 0x92b   : > { %v2143_v50 = vpop.f32.mrf.mxu0 }
 0x92c   : > { %v1457_v59 = vpack.c.bf16 %v2143_v50, %v2143_v50 }
 0x92d   : > { %v1442_v51 = vpop.f32.mrf.mxu0 }
 0x92f   : > { %v2144_v52 = vpop.f32.mrf.mxu0 }
 0x931   : > { %v1445_v53 = vpop.f32.mrf.mxu0 }
 0x932   : > { %v1456_v56 = vpack.c.bf16 %v1445_v53, %v1442_v51  ;;  %v2217_v53 = vld [vmem:[%s2692_s11 + $0x38] sm:$0xff]  }
 0x933   : > { %2159 = vmatprep.subr.bf16.mxu0 %v2217_v53 }
 0x934   : > { %2147 = vmatprep.mubr.msk.bf16.mxu0 %vm602_vm4, %v1456_v56  ;;  %v2218_v56 = vld [vmem:[%s2692_s11 + $0x30] sm:$0xff]  }
 0x935   : > { %2148 = vmatmul.mubr.msk.bf16.vlgmr.msra.gmra.mxu0 %vm602_vm4, %v1457_v59  ;;  %v2219_v59 = vld [vmem:[%s2692_s11 + $0x28] sm:$0xff]  }
 0x936   : > { %2160 = vmatpush3.bf16.msra.mxu0 %v2217_v53 }
 0x937   : > { %2161 = vmatprep.subr.bf16.mxu0 %v2218_v56 }
 0x93a   : > { %2162 = vmatpush3.bf16.msra.mxu0 %v2218_v56 }
 0x93b   : > { %2163 = vmatprep.subr.bf16.mxu0 %v2219_v59 }
 0x93e   : > { %2164 = vmatpush3.bf16.msra.mxu0 %v2219_v59 }
 0x9f5   : > { %v2149_v54 = vpop.f32.mrf.mxu0 }
 0x9f6   : > { %v1518_v63 = vadd.f32 %v2149_v54, %v1287_v44  ;;  %v2220_v54 = vld [vmem:[%s2692_s11 + $0x20] sm:$0xff]  }
 0x9f7   : > { %v1502_v33 = vpop.f32.mrf.mxu0  ;;  %2165 = vmatprep.subr.bf16.mxu0 %v2220_v54 }
 0x9f8   : > { %v1516_v55 = vadd.f32 %v1502_v33, %v1285_v46  ;;  %v1521_v8 = vadd.f32 %v1518_v63, %v2406_v1  ;;  %2166 = vmatpush3.bf16.msra.mxu0 %v2220_v54  ;;  %v2221_v33 = vld [vmem:[%s2692_s11 + $0x18] sm:$0xff]  }
 0x9f9   : > { %v2150_v34 = vpop.f32.mrf.mxu0  ;;  %2167 = vmatprep.subr.bf16.mxu0 %v2221_v33 }
 0x9fa   : > { %v1519_v3 = vadd.f32 %v1516_v55, %v2404_v0  ;;  %v2587_v11 = vadd.f32 %v1974_v4, %v1521_v8  ;;  %v2223_v55 = vld [vmem:[%s2692_s11 + $0x8] sm:$0xff]   ;;  %v2224_v34 = vld [vmem:[%s2692_s11] sm:$0xff]  }
 0x9fb   : > { %v1505_v5 = vpop.f32.mrf.mxu0 }
 0x9fc   : > { %v2579_v6 = vadd.f32 %v1974_v4, %v1519_v3  ;;  %v1517_v7 = vadd.f32 %v1505_v5, %v1286_v62  ;;  %v1538_v12 = vsel %vm452_vm1, %v2587_v11, 0.0  ;;  %2168 = vmatpush3.bf16.msra.mxu0 %v2221_v33  ;;  %v1977_v62 = vld [vmem:[%s2691_s10] ss:$0 sm:$0xff] }
 0x9fd   : > { %2169 = vmatprep.subr.bf16.mxu0 %v2222_v61 }
 0x9fe   : > { %v1520_v9 = vadd.f32 %v1517_v7, %v2408_v2  ;;  %v1532_v58 = vsel %vm445_vm0, %v2579_v6, 0.0 }
 0x9ff   : > { %1533 = vadd.xlane.f32.xlu1 %v1532_v58 }
 0xa00   : > { %v2585_v10 = vadd.f32 %v1974_v4, %v1520_v9  ;;  %2170 = vmatpush3.bf16.msra.mxu0 %v2222_v61 }
 0xa01   : > { %2171 = vmatprep.subr.bf16.mxu0 %v2223_v55 }
 0xa02   : > { %v1535_v0 = vsel %vm445_vm0, %v2585_v10, 0.0 }
 0xa03   : > { %1536 = vadd.xlane.f32.xlu0 %v1535_v0 }
 0xa04   : > { %2172 = vmatpush3.bf16.msra.mxu0 %v2223_v55 }
 0xa05   : > { %2173 = vmatprep.subr.bf16.mxu0 %v2224_v34 }
 0xa07   : > { %1539 = vadd.xlane.f32.xlu0 %v1538_v12 }
 0xa08   : > { %2174 = vmatpush3.bf16.msra.mxu0 %v2224_v34 }
 0xa88   : > { %v1534_v13 = vpop.xlane.xlu1 %1533 }
 0xa89   : > { %v1541_v1 = vmul.f32 0.03125, %v1534_v13 }
 0xa8b   : > { %v1544_v2 = vsub.f32 %v2579_v6, %v1541_v1 }
 0xa8c   : > { %v1537_v14 = vpop.xlane.xlu0 %1536 }
 0xa8d   : > { %v1542_v15 = vmul.f32 0.03125, %v1537_v14  ;;  %v1547_v16 = vmul.f32 %v1544_v2, %v1544_v2 }
 0xa8f   : > { %v1545_v17 = vsub.f32 %v2585_v10, %v1542_v15  ;;  %v1550_v18 = vsel %vm445_vm0, %v1547_v16, 0.0 }
 0xa90   : > { %1551 = vadd.xlane.f32.xlu1 %v1550_v18  ;;  %v1540_v19 = vpop.xlane.xlu0 %1539 }
 0xa91   : > { %v1543_v20 = vmul.f32 0.03125, %v1540_v19  ;;  %v1548_v21 = vmul.f32 %v1545_v17, %v1545_v17 }
 0xa93   : > { %v1546_v22 = vsub.f32 %v2587_v11, %v1543_v20  ;;  %v1553_v23 = vsel %vm445_vm0, %v1548_v21, 0.0 }
 0xa94   : > { %1554 = vadd.xlane.f32.xlu0 %v1553_v23 }
 0xa95   : > { %v1549_v24 = vmul.f32 %v1546_v22, %v1546_v22 }
 0xa97   : > { %v1556_v25 = vsel %vm452_vm1, %v1549_v24, 0.0 }
 0xa98   : > { %1557 = vadd.xlane.f32.xlu1 %v1556_v25 }
 0xb19   : > { %v1552_v28 = vpop.xlane.xlu1 %1551 }
 0xb1a   : > { %v1559_v29 = vmul.f32 0.03125, %v1552_v28 }
 0xb1c   : > { %v1562_v30 = vadd.f32 1e-05, %v1559_v29 }
 0xb1d   : > { %v1555_v57 = vpop.xlane.xlu0 %1554 }
 0xb1e   : > { %2279 = vrsqrt.f32 %v1562_v30  ;;  %v1560_v60 = vmul.f32 0.03125, %v1555_v57 }
 0xb20   : > { %v1563_v49 = vadd.f32 1e-05, %v1560_v60 }
 0xb21   : > { %v1558_v31 = vpop.xlane.xlu1 %1557 }
 0xb22   : > { %2281 = vrsqrt.f32 %v1563_v49  ;;  %v1561_v32 = vmul.f32 0.03125, %v1558_v31 }
 0xb24   : > { %v1564_v35 = vadd.f32 1e-05, %v1561_v32 }
 0xb26   : > { %2283 = vrsqrt.f32 %v1564_v35 }
 0xb2b   : > { %v2280_v36 = vpop.eup %2279 }
 0xb2c   : > { %v1568_v37 = vmul.f32 %v2280_v36, %v1544_v2 }
 0xb2e   : > { %v1578_v41 = vmul.f32 %v1975_v38, %v1568_v37 }
 0xb2f   : > { %v2282_v39 = vpop.eup %2281 }
 0xb30   : > { %v1569_v40 = vmul.f32 %v2282_v39, %v1545_v17  ;;  %v1588_v46 = vadd.f32 %v1976_v42, %v1578_v41 }
 0xb32   : > { %v1579_v43 = vmul.f32 %v1975_v38, %v1569_v40 }
 0xb33   : > { %v2284_v44 = vpop.eup %2283 }
 0xb34   : > { %v1570_v45 = vmul.f32 %v2284_v44, %v1546_v22  ;;  %v1589_v47 = vadd.f32 %v1976_v42, %v1579_v43 }
 0xb36   : > { %v1591_v48 = vpack.c.bf16 %v1589_v47, %v1588_v46  ;;  %v1580_v50 = vmul.f32 %v1975_v38, %v1570_v45 }
 0xb38   : > { %2155 = vmatprep.mubr.msk.bf16.mxu1 %vm445_vm0, %v1591_v48  ;;  %v1590_v51 = vadd.f32 %v1976_v42, %v1580_v50 }
 0xb3a   : > { %v1592_v52 = vpack.c.bf16 %v1590_v51, %v1590_v51 }
 0xb3c   : > { %2156 = vmatmul.mubr.msk.bf16.vlgmr.msra.gmra.mxu1 %vm445_vm0, %v1592_v52 }
 0xbfc   : > { %v2157_v63 = vpop.f32.mrf.mxu1 }
 0xbfd   : > { %v2640_v3 = vadd.f32 %v2157_v63, %v1977_v62 }
 0xbfe   : > { %v1656_v4 = vpop.f32.mrf.mxu1 }
 0xbff   : > { %v2643_v5 = vmul.f32 0.70710677, %v2640_v3  ;;  %v2645_v7 = vadd.f32 %v1977_v62, %v1656_v4  ;;  %v2317_v4 = vmov -1.0  }
 0xc00   : > { %v2158_v8 = vpop.f32.mrf.mxu1 }
 0xc01   : > { %v1684_v9 = vand.u32 2147483647, %v2643_v5  ;;  %v2649_v58 = vmul.f32 0.70710677, %v2645_v7  ;;  %vm1678_vm9 = vcmp.ge.f32.partialorder %v2643_v5, 0.0 }
 0xc02   : > { %v1659_v0 = vpop.f32.mrf.mxu1  ;;  %v1681_v8 = vsel %vm1678_vm9, 1.0, %v2317_v4 }
 0xc03   : > { %v1687_v12 = vmul.f32 0.3275911, %v1684_v9  ;;  %v1682_v13 = vand.u32 2147483647, %v2649_v58  ;;  %v2652_v1 = vadd.f32 %v1977_v62, %v1659_v0  ;;  %v1726_v20 = vsub.f32 0.0, %v1684_v9 }
 0xc04   : > { %vm1676_vm10 = vcmp.ge.f32.partialorder %v2649_v58, 0.0  ;;  %v1672_v58 = vmul.f32 0.5, %v2640_v3 }
 0xc05   : > { %v1690_v2 = vadd.f32 1.0, %v1687_v12  ;;  %v1685_v14 = vmul.f32 0.3275911, %v1682_v13  ;;  %v2655_v15 = vmul.f32 0.70710677, %v2652_v1  ;;  %v1724_v21 = vsub.f32 0.0, %v1682_v13 }
 0xc06   : > { %v1729_v22 = vmul.f32 %v1726_v20, %v1684_v9 }
 0xc07   : > { %2285 = vrcp.f32 %v1690_v2  ;;  %v1688_v16 = vadd.f32 1.0, %v1685_v14  ;;  %v1683_v17 = vand.u32 2147483647, %v2655_v15  ;;  %v1727_v24 = vmul.f32 %v1724_v21, %v1682_v13 }
 0xc08   : > { %v1734_v27 = vmul.f32 1.442695, %v1729_v22  ;;  %v1679_v2 = vsel %vm1676_vm10, 1.0, %v2317_v4  ;;  %vm1677_vm11 = vcmp.ge.f32.partialorder %v2655_v15, 0.0  ;;  %v1670_v21 = vmul.f32 0.5, %v2645_v7 }
 0xc09   : > { %2287 = vrcp.f32 %v1688_v16  ;;  %v1686_v18 = vmul.f32 0.3275911, %v1683_v17  ;;  %v1725_v25 = vsub.f32 0.0, %v1683_v17  ;;  %v1730_v57 = vmul.f32 1.442695, %v1727_v24 }
 0xc0a   : > { %v1671_v22 = vmul.f32 0.5, %v2652_v1 }
 0xc0b   : > { %v1689_v19 = vadd.f32 1.0, %v1686_v18  ;;  %v1728_v60 = vmul.f32 %v1725_v25, %v1683_v17 }
 0xc0d   : > { %2289 = vrcp.f32 %v1689_v19  ;;  %v1732_v38 = vmul.f32 1.442695, %v1728_v60  ;;  %v1680_v19 = vsel %vm1677_vm11, 1.0, %v2317_v4 }
 0xc0e   : > { %2291 = vpow2.f32 %v1734_v27 }
 0xc0f   : > { %2293 = vpow2.f32 %v1730_v57 }
 0xc10   : > { %2295 = vpow2.f32 %v1732_v38 }
 0xc14   : > { %v2286_v23 = vpop.eup %2285 }
 0xc15   : > { %v1699_v26 = vmul.f32 1.0614054, %v2286_v23 }
 0xc16   : > { %v2288_v28 = vpop.eup %2287 }
 0xc17   : > { %v1702_v29 = vadd.f32 -1.4531521, %v1699_v26  ;;  %v1697_v30 = vmul.f32 1.0614054, %v2288_v28 }
 0xc19   : > { %v1705_v49 = vmul.f32 %v2286_v23, %v1702_v29  ;;  %v1700_v31 = vadd.f32 -1.4531521, %v1697_v30  ;;  %v1990_v29 = vld [vmem:[%s2693_s12] ss:$0 sm:$0xff] }
 0xc1a   : > { %v2290_v32 = vpop.eup %2289 }
 0xc1b   : > { %v1708_v35 = vadd.f32 1.4214138, %v1705_v49  ;;  %v1703_v36 = vmul.f32 %v2288_v28, %v1700_v31  ;;  %v1698_v37 = vmul.f32 1.0614054, %v2290_v32  ;;  %v2292_v53 = vpop.eup %2291 }
 0xc1c   : > { %v2294_v55 = vpop.eup %2293 }
 0xc1d   : > { %v1711_v39 = vmul.f32 %v2286_v23, %v1708_v35  ;;  %v1706_v40 = vadd.f32 1.4214138, %v1703_v36  ;;  %v1701_v41 = vadd.f32 -1.4531521, %v1698_v37  ;;  %v2296_v12 = vpop.eup %2295 }
 0xc1f   : > { %v1714_v42 = vadd.f32 -0.28449672, %v1711_v39  ;;  %v1709_v43 = vmul.f32 %v2288_v28, %v1706_v40  ;;  %v1704_v44 = vmul.f32 %v2290_v32, %v1701_v41 }
 0xc21   : > { %v1717_v45 = vmul.f32 %v2286_v23, %v1714_v42  ;;  %v1712_v46 = vadd.f32 -0.28449672, %v1709_v43  ;;  %v1707_v47 = vadd.f32 1.4214138, %v1704_v44 }
 0xc23   : > { %v1720_v48 = vadd.f32 0.2548296, %v1717_v45  ;;  %v1715_v50 = vmul.f32 %v2288_v28, %v1712_v46  ;;  %v1710_v51 = vmul.f32 %v2290_v32, %v1707_v47 }
 0xc25   : > { %v1723_v52 = vmul.f32 %v2286_v23, %v1720_v48  ;;  %v1718_v56 = vadd.f32 0.2548296, %v1715_v50  ;;  %v1713_v59 = vadd.f32 -0.28449672, %v1710_v51 }
 0xc27   : > { %v1738_v54 = vmul.f32 %v2292_v53, %v1723_v52  ;;  %v1721_v33 = vmul.f32 %v2288_v28, %v1718_v56  ;;  %v1716_v61 = vmul.f32 %v2290_v32, %v1713_v59 }
 0xc29   : > { %v1741_v34 = vsub.f32 1.0, %v1738_v54  ;;  %v1736_v62 = vmul.f32 %v2294_v55, %v1721_v33  ;;  %v1719_v63 = vadd.f32 0.2548296, %v1716_v61 }
 0xc2b   : > { %v1739_v9 = vsub.f32 1.0, %v1736_v62  ;;  %v1722_v0 = vmul.f32 %v2290_v32, %v1719_v63  ;;  %v1744_v13 = vmul.f32 %v1741_v34, %v1681_v8 }
 0xc2d   : > { %v1742_v14 = vmul.f32 %v1739_v9, %v1679_v2  ;;  %v1737_v16 = vmul.f32 %v2296_v12, %v1722_v0  ;;  %v1747_v18 = vadd.f32 1.0, %v1744_v13 }
 0xc2f   : > { %v1740_v17 = vsub.f32 1.0, %v1737_v16  ;;  %v1745_v5 = vadd.f32 1.0, %v1742_v14  ;;  %v1750_v24 = vmul.f32 %v1747_v18, %v1672_v58 }
 0xc31   : > { %v1743_v20 = vmul.f32 %v1740_v17, %v1680_v19  ;;  %v1748_v25 = vmul.f32 %v1745_v5, %v1670_v21  ;;  %v1752_v28 = vpack.c.bf16 %v1750_v24, %v1750_v24 }
 0xc33   : > { %v1746_v23 = vadd.f32 1.0, %v1743_v20 }
 0xc35   : > { %v1749_v26 = vmul.f32 %v1746_v23, %v1671_v22 }
 0xc37   : > { %v1751_v27 = vpack.c.bf16 %v1749_v26, %v1748_v25 }
 0xc39   : > { %2175 = vmatprep.mubr.bf16.mxu0 %v1751_v27 }
 0xc3a   : > { %2176 = vmatmul.mubr.bf16.vlgmr.msra.gmra.mxu0 %v1752_v28 }
 0xcfa   : > { %v2177_v15 = vpop.f32.mrf.mxu0 }
 0xcfb   : > { %v1867_v30 = vadd.f32 %v2177_v15, %v2587_v11 }
 0xcfc   : > { %v1851_v3 = vpop.f32.mrf.mxu0 }
 0xcfd   : > { %v1877_v7 = vadd.f32 %v1990_v29, %v1867_v30  ;;  %v1865_v1 = vadd.f32 %v1851_v3, %v2579_v6 }
 0xcfe   : > { %v2178_v57 = vpop.f32.mrf.mxu0 }
 0xcff   : > { %1880 = vst.msk [vmem:[%s440_s19 + $0x10] sm:$0x1] %vm452_vm1, %v1877_v7  ;;  %v1875_v60 = vadd.f32 %v1990_v29, %v1865_v1 }
 0xd00   : > { %v1854_v49 = vpop.f32.mrf.mxu0 }
 0xd01   : > { %1878 = vst.msk [vmem:[%s440_s19] sm:$0xff] %vm445_vm0, %v1875_v60  ;;  %v1866_v31 = vadd.f32 %v1854_v49, %v2585_v10 }
 0xd03   : > { %v1876_v32 = vadd.f32 %v1990_v29, %v1866_v31 }
 0xd05   : > { %1879 = vst.msk [vmem:[%s440_s19 + $0x8] sm:$0xff] %vm445_vm0, %v1876_v32 }
 0xd06 PF: > { %s23_s25 = sadd.s32 1, %s2303_s25  }
 0xd07   : > { %p20_p4 = scmp.ge.s32.totalorder %s23_s25, 4  }
 0xd09   :  { %22 = sbr.rel (!%p20_p4) target bundleno = 1 (0x1), region = 102 }

// kernel: _lambda_.19
= control target key start
LH: loop header
LB: loop body
LE: loop exit
PB: predicated region body
PF: predicated region fallthrough
CT: control target
= control target key end

     0   :  { %s492_s9 = smov 0   ;;  %s529_s0 = inlined_call_operand.vmem [shape: bf16[2,16,64], index: 0, kind: input, shape index: {}]   ;;  %s530_s1 = inlined_call_operand.vmem [shape: bf16[4,8,16], index: 1, kind: input, shape index: {}]   ;;  %s531_s2 = inlined_call_operand.vmem [shape: bf16[2,4,8,64], index: 2, kind: output, shape index: {}]  }
   0x1 LB: > { %s400_s10 = sadd.s32 4294967295, %s473_s9   ;;  %p404_p0 = scmp.ge.s32.totalorder %s473_s9, 1  ;;  %s473_s9 = sphi %s492_s9, %s12_s9  }
   0x2   : > { %p112_p1 = scmp.lt.s32.totalorder %s473_s9, 3 }
   0x4   : > { %p113_p2 = pnand %p404_p0, %p112_p1 }
   0x5   : > { %p134_p3 = scmp.lt.s32.totalorder (!%p113_p2), %s400_s10, 1 }
   0x6   : > { %116 = sbr.rel (%p113_p2) target bundleno = 225 (0xe1), region = 28 }
   0xb   : > { %v475_v0 = vmov 0.0   ;;  %s533_s10 = smov (!%p134_p3, %s400_s10), 1  ;;  %vm476_vm0 = vmmov 0   ;;  %v147_v2 = vld [vmem:[%s530_s1] sm:$0xf]  ;;  %vm154_vm1 = vcmask 130048  }
   0xc   : > { %432 = vmatprep.subr.bf16.mxu0 %v475_v0  ;;  %438 = vmatprep.subr.bf16.mxu1 %v475_v0  ;;  %s422_s11 = sshll.u32 %s533_s10, 3  ;;  %v411_v3 = vld [vmem:[%s530_s1 + $0x4] sm:$0xf]  ;;  %v414_v4 = vld [vmem:[%s530_s1 + $0x8] sm:$0xf]  ;;  %s423_s23 = sshll.u32 %s533_s10, 4 }
   0xd   : > { %434 = vmatprep.mubr.msk.bf16.mxu0 %vm476_vm0, %v475_v0  ;;  %440 = vmatprep.mubr.msk.bf16.mxu1 %vm476_vm0, %v475_v0  ;;  %s138_s14 = scalar_lea.vmem %s529_s0, %s422_s11  ;;  %v417_v5 = vld [vmem:[%s530_s1 + $0xc] sm:$0xf]  ;;  %s143_s26 = scalar_lea.vmem %s531_s2, %s423_s23  ;;  %vm199_vm2 = vcmask 519168  }
   0xe   : > { %v466_v1 = vld [vmem:[%s138_s14] sm:$0xff]  }
   0xf   : > { %433 = vmatpush3.bf16.msra.mxu0 %v466_v1  ;;  %439 = vmatpush3.bf16.msra.mxu1 %v466_v1 }
  0x10   : > { %444 = vmatprep.subr.bf16.mxu0 %v475_v0  ;;  %450 = vmatprep.subr.bf16.mxu1 %v475_v0 }
  0x12   : > { %435 = vmatmul.mubr.msk.bf16.vlgmr.msra.gmra.mxu0 %vm154_vm1, %v147_v2  ;;  %441 = vmatmul.mubr.msk.bf16.vlgmr.msra.gmra.mxu1 %vm154_vm1, %v411_v3 }
  0x13   : > { %445 = vmatpush3.bf16.msra.mxu0 %v466_v1  ;;  %451 = vmatpush3.bf16.msra.mxu1 %v466_v1 }
  0x14   : > { %446 = vmatprep.mubr.msk.bf16.mxu0 %vm476_vm0, %v475_v0  ;;  %452 = vmatprep.mubr.msk.bf16.mxu1 %vm476_vm0, %v475_v0 }
  0x1a   : > { %447 = vmatmul.mubr.msk.bf16.vlgmr.msra.gmra.mxu0 %vm154_vm1, %v414_v4  ;;  %453 = vmatmul.mubr.msk.bf16.vlgmr.msra.gmra.mxu1 %vm154_vm1, %v417_v5 }
  0xd2   : > { %v192_v6 = vpop.f32.mrf.mxu0  ;;  %v240_v7 = vpop.f32.mrf.mxu1 }
  0xd3   : > { %v198_v8 = vpack.c.bf16 %v192_v6, %v192_v6  ;;  %v246_v9 = vpack.c.bf16 %v240_v7, %v240_v7 }
  0xd4   : > { %v436_v10 = vpop.f32.mrf.mxu0  ;;  %v442_v11 = vpop.f32.mrf.mxu1 }
  0xd5   : > { %200 = vst.msk [vmem:[%s143_s26] sm:$0xf] %vm199_vm2, %v198_v8  ;;  %413 = vst.msk [vmem:[%s143_s26 + $0x4] sm:$0xf] %vm199_vm2, %v246_v9 }
  0xd6   : > { %v195_v12 = vpop.f32.mrf.mxu0  ;;  %v243_v13 = vpop.f32.mrf.mxu1 }
  0xd8   : > { %v437_v14 = vpop.f32.mrf.mxu0  ;;  %v443_v15 = vpop.f32.mrf.mxu1 }
  0xda   : > { %v288_v16 = vpop.f32.mrf.mxu0  ;;  %v336_v17 = vpop.f32.mrf.mxu1 }
  0xdb   : > { %v294_v18 = vpack.c.bf16 %v288_v16, %v288_v16  ;;  %v342_v19 = vpack.c.bf16 %v336_v17, %v336_v17 }
  0xdc   : > { %v448_v20 = vpop.f32.mrf.mxu0  ;;  %v454_v21 = vpop.f32.mrf.mxu1 }
  0xdd   : > { %416 = vst.msk [vmem:[%s143_s26 + $0x8] sm:$0xf] %vm199_vm2, %v294_v18  ;;  %419 = vst.msk [vmem:[%s143_s26 + $0xc] sm:$0xf] %vm199_vm2, %v342_v19 }
  0xde   : > { %v291_v22 = vpop.f32.mrf.mxu0  ;;  %v339_v23 = vpop.f32.mrf.mxu1 }
  0xe0   : > { %v449_v24 = vpop.f32.mrf.mxu0  ;;  %v455_v25 = vpop.f32.mrf.mxu1 }
  0xe1 PF: > { %s12_s9 = sadd.s32 1, %s473_s9  }
  0xe2   : > { %p9_p4 = scmp.ge.s32.totalorder %s12_s9, 4  }
  0xe4   :  { %11 = sbr.rel (!%p9_p4) target bundleno = 1 (0x1), region = 64 }

// kernel: _lambda_.17
= control target key start
LH: loop header
LB: loop body
LE: loop exit
PB: predicated region body
PF: predicated region fallthrough
CT: control target
= control target key end

     0   :  { %s1196_s18 = smov 0   ;;  %s1331_s0 = inlined_call_operand.vmem [shape: bf16[2,16,82], index: 0, kind: input, shape index: {}]   ;;  %s1332_s1 = inlined_call_operand.vmem [shape: bf16[9,1,64], index: 1, kind: input, shape index: {}]   ;;  %s1333_s2 = inlined_call_operand.vmem [shape: bf16[9,16,16], index: 2, kind: input, shape index: {}]   ;;  %s1334_s3 = inlined_call_operand.vmem [shape: f32[16,1], index: 3, kind: input, shape index: {}]   ;;  %s1335_s4 = inlined_call_operand.vmem [shape: f32[16,1], index: 4, kind: input, shape index: {}]   ;;  %s1336_s5 = inlined_call_operand.vmem [shape: bf16[2,16,64], index: 5, kind: output, shape index: {}]  }
   0x1 LB: > { %s965_s19 = sadd.s32 4294967295, %s1148_s18   ;;  %p969_p0 = scmp.ge.s32.totalorder %s1148_s18, 1  ;;  %s1148_s18 = sphi %s1196_s18, %s15_s18  }
   0x2   : > { %p187_p1 = scmp.lt.s32.totalorder %s1148_s18, 3 }
   0x4   : > { %p188_p2 = pnand %p969_p0, %p187_p1 }
   0x5   : > { %p215_p3 = scmp.lt.s32.totalorder (!%p188_p2), %s965_s19, 1  ;;  %s1150_s9 = smov (!%p188_p2), 2  }
   0x6   : > { %191 = sbr.rel (%p188_p2) target bundleno = 490 (0x1ea), region = 40  ;;  %s1151_s10 = smov (!%p188_p2), 10  }
   0x7   : > { %s1152_s13 = smov (!%p188_p2), 8   ;;  %s1153_s14 = smov (!%p188_p2), 16  }
   0x8   : > { %s1156_s15 = smov (!%p188_p2), 18   ;;  %s1157_s16 = smov (!%p188_p2), 127  }
   0x9   : > { %s1158_s21 = smov (!%p188_p2), 126   ;;  %s1159_s22 = smov (!%p188_p2), 120  }
   0xa   : > { %s1160_s23 = smov (!%p188_p2), 119   ;;  %s1161_s26 = smov (!%p188_p2), 118  }
   0xb   : > { %v232_v0 = vlaneseq  ;;  %v983_v1 = vld [vmem:[%s1332_s1 + $0x2] sm:$0x1]  ;;  %v990_v2 = vld [vmem:[%s1332_s1 + $0x3] sm:$0x1]  ;;  %v1001_v4 = vld [vmem:[%s1332_s1 + $0x5] sm:$0x1] }
   0xc   : > { %v363_v3 = vpack.i.b16 %v983_v1, %v983_v1  ;;  %v1008_v5 = vld [vmem:[%s1332_s1 + $0x6] sm:$0x1]  ;;  %v442_v7 = vpack.i.b16 %v990_v2, %v990_v2  ;;  %v578_v8 = vpack.i.b16 %v1001_v4, %v1001_v4  ;;  %v1019_v10 = vld [vmem:[%s1332_s1 + $0x8] sm:$0x1]  ;;  %s1338_s19 = smov (!%p215_p3, %s965_s19), 1  ;;  %v1154_v28 = vmov 0.0  }
   0xd   : > { %v233_v6 = vshrl.u32 %v232_v0, 7  ;;  %v657_v9 = vpack.i.b16 %v1008_v5, %v1008_v5  ;;  %v793_v12 = vpack.i.b16 %v1019_v10, %v1019_v10  ;;  %s1030_s30 = sshll.u32 %s1338_s19, 3  ;;  %v228_v24 = vld [vmem:[%s1332_s1] sm:$0x1]  ;;  %1052 = vmatprep.subr.bf16.mxu0 %v1154_v28  ;;  %1058 = vmatprep.subr.bf16.mxu1 %v1154_v28  ;;  %vm1155_vm0 = vmmov 0   ;;  %v1133_v55 = vld [vmem:[%s1333_s2 + $0x8] sm:$0xff]  }
   0xe   : > { %s219_s8 = scalar_lea.vmem %s1331_s0, %s1030_s30  ;;  %v230_v27 = vpack.i.b16 %v228_v24, %v228_v24  ;;  %1054 = vmatprep.mubr.msk.bf16.mxu0 %vm1155_vm0, %v1154_v28  ;;  %1060 = vmatprep.mubr.msk.bf16.mxu1 %vm1155_vm0, %v1154_v28  ;;  %v1134_v34 = vld [vmem:[%s1333_s2] sm:$0xff]   ;;  %vm260_vm1 = vcmask 130048   ;;  %s1162_s27 = smov 112   ;;  %v1165_v58 = vmov 0   ;;  %v870_v59 = vld [vmem:[%s1334_s3 + $0x8] sm:$0xff]  ;;  %vm907_vm2 = vcmask 519168  }
   0xf   : > { %v234_v11 = vsub.s32 0, %v233_v6  ;;  %v1227_v19 = vld [vmem:[%s219_s8] sm:$0xf]  ;;  %v1229_v23 = vld [vmem:[%s219_s8 + $0x4] sm:$0xf]  ;;  %s1163_s28 = smov 111   ;;  %1130 = vset.pattern.permute.xlu1 %v1165_v58  ;;  %1131 = vset.pattern.permute.xlu0 %v1165_v58  ;;  %s224_s8 = scalar_lea.vmem %s1336_s5, %s1030_s30 }
  0x10   : > { %v978_v26 = vcombine.low %v1227_v19, %v1229_v23  ;;  %s1164_s29 = smov 110   ;;  %v869_v57 = vld [vmem:[%s1334_s3] sm:$0xff]  ;;  %v884_v61 = vld [vmem:[%s1335_s4 + $0x8] sm:$0xff]  ;;  %v1136_v6 = vld [vmem:[%s1333_s2 + $0x18] sm:$0xff]  }
  0x11   : > { %v368_v13 = vrot.slane %v363_v3, %v234_v11  ;;  %v447_v14 = vrot.slane %v442_v7, %v234_v11  ;;  %v583_v15 = vrot.slane %v578_v8, %v234_v11  ;;  %v662_v16 = vrot.slane %v657_v9, %v234_v11  ;;  %v883_v60 = vld [vmem:[%s1335_s4] sm:$0xff]  ;;  %v1135_v3 = vld [vmem:[%s1333_s2 + $0x10] sm:$0xff]   ;;  %v1138_v10 = vld [vmem:[%s1333_s2 + $0x28] sm:$0xff]  }
  0x12   : > { %v798_v22 = vrot.slane %v793_v12, %v234_v11  ;;  %v235_v29 = vrot.slane %v230_v27, %v234_v11  ;;  %v1137_v7 = vld [vmem:[%s1333_s2 + $0x20] sm:$0xff]   ;;  %v1139_v12 = vld [vmem:[%s1333_s2 + $0x30] sm:$0xff]  }
  0x13   : > { %v984_v17 = vcombine.low %v368_v13, %v368_v13  ;;  %v1002_v18 = vcombine.low %v583_v15, %v583_v15  ;;  %v991_v20 = vcombine.low %v447_v14, %v447_v14  ;;  %v1009_v21 = vcombine.low %v662_v16, %v662_v16  ;;  %v1140_v14 = vld [vmem:[%s1333_s2 + $0x38] sm:$0xff]   ;;  %v1141_v15 = vld [vmem:[%s1333_s2 + $0x40] sm:$0xff]  }
  0x14   : > { %v1020_v25 = vcombine.low %v798_v22, %v798_v22  ;;  %v974_v30 = vcombine.low %v235_v29, %v235_v29 }
  0x15   : > { %372 = vrot.lane.b32.xlu0 %v984_v17, %s1150_s9  ;;  %587 = vrot.lane.b32.xlu1 %v1002_v18, %s1151_s10 }
  0x16   : > { %v240_v31 = vmul.bf16 %v974_v30, %v1227_v19  ;;  %v241_v32 = vmul.bf16 %v974_v30, %v1229_v23 }
  0x18   : > { %v981_v33 = vcombine.low %v240_v31, %v241_v32 }
  0x19   : > { %451 = vrot.lane.b32.xlu0 %v991_v20, %s1152_s13  ;;  %666 = vrot.lane.b32.xlu1 %v1009_v21, %s1153_s14 }
  0x1a   : > { %1059 = vmatpush3.bf16.msra.mxu1 %v981_v33 }
  0x1b   : > { %1070 = vmatprep.subr.bf16.mxu1 %v1154_v28 }
  0x1d   : > { %802 = vrot.lane.b32.xlu0 %v1020_v25, %s1156_s15  ;;  %257 = vrot.lane.b32.xlu1 %v978_v26, %s1157_s16 }
  0x1e   : > { %1061 = vmatmul.mubr.msk.bf16.vlgmr.msra.gmra.mxu1 %vm260_vm1, %v1134_v34 }
  0x1f   : > { %1072 = vmatprep.mubr.msk.bf16.mxu1 %vm1155_vm0, %v1154_v28 }
  0x87   : > { %v373_v35 = vpop.permute.xlu0 %372  ;;  %v588_v36 = vpop.permute.xlu1 %587 }
  0x88   : > { %v375_v37 = vmul.bf16 %v373_v35, %v1227_v19  ;;  %v376_v38 = vmul.bf16 %v373_v35, %v1229_v23  ;;  %v590_v41 = vmul.bf16 %v588_v36, %v1227_v19  ;;  %v591_v42 = vmul.bf16 %v588_v36, %v1229_v23 }
  0x8a   : > { %v988_v39 = vcombine.low %v375_v37, %v376_v38  ;;  %v1006_v49 = vcombine.low %v590_v41, %v591_v42 }
  0x8b   : > { %v452_v40 = vpop.permute.xlu0 %451  ;;  %v667_v43 = vpop.permute.xlu1 %666 }
  0x8c   : > { %v454_v44 = vmul.bf16 %v452_v40, %v1227_v19  ;;  %v455_v45 = vmul.bf16 %v452_v40, %v1229_v23  ;;  %390 = vrot.lane.b32.xlu0 %v988_v39, %s1158_s21  ;;  %v669_v46 = vmul.bf16 %v667_v43, %v1227_v19  ;;  %v670_v47 = vmul.bf16 %v667_v43, %v1229_v23 }
  0x8e   : > { %v995_v48 = vcombine.low %v454_v44, %v455_v45  ;;  %v1013_v52 = vcombine.low %v669_v46, %v670_v47 }
  0x8f   : > { %v803_v50 = vpop.permute.xlu0 %802  ;;  %v258_v51 = vpop.permute.xlu1 %257 }
  0x90   : > { %469 = vrot.lane.b32.xlu1 %v995_v48, %s1159_s22  ;;  %526 = vrot.lane.b32.xlu0 %v978_v26, %s1160_s23  ;;  %v805_v53 = vmul.bf16 %v803_v50, %v1227_v19  ;;  %v806_v54 = vmul.bf16 %v803_v50, %v1229_v23 }
  0x91   : > { %1053 = vmatpush3.bf16.msra.mxu0 %v258_v51 }
  0x92   : > { %1064 = vmatprep.subr.bf16.mxu0 %v1154_v28  ;;  %v1024_v56 = vcombine.low %v805_v53, %v806_v54 }
  0x94   : > { %605 = vrot.lane.b32.xlu1 %v1006_v49, %s1161_s26  ;;  %684 = vrot.lane.b32.xlu0 %v1013_v52, %s1162_s27 }
  0x95   : > { %1055 = vmatmul.mubr.msk.bf16.vlgmr.msra.gmra.mxu0 %vm260_vm1, %v1133_v55 }
  0x96   : > { %1066 = vmatprep.mubr.msk.bf16.mxu0 %vm1155_vm0, %v1154_v28 }
  0x98   : > { %741 = vrot.lane.b32.xlu1 %v978_v26, %s1163_s28  ;;  %820 = vrot.lane.b32.xlu0 %v1024_v56, %s1164_s29 }
  0x9c   : > { %873 = vperm.xlu1 %1130, %v869_v57   ;;  %878 = vperm.xlu0 %1131, %v870_v59  }
  0xa0   : > { %887 = vperm.xlu1 %1130, %v883_v60  }
  0xa4   : > { %892 = vperm.xlu1 %1130, %v884_v61  }
  0xde   : > { %v353_v62 = vpop.f32.mrf.mxu1 }
  0xe0   : > { %v1062_v63 = vpop.f32.mrf.mxu1 }
  0xe2   : > { %v356_v0 = vpop.f32.mrf.mxu1 }
  0xe4   : > { %v1063_v1 = vpop.f32.mrf.mxu1 }
  0xfe   : > { %v391_v2 = vpop.permute.xlu0 %390 }
  0xff   : > { %1065 = vmatpush3.bf16.msra.mxu0 %v391_v2 }
 0x100   : > { %1076 = vmatprep.subr.bf16.mxu0 %v1154_v28 }
 0x102   : > { %1067 = vmatmul.mubr.msk.bf16.vlgmr.msra.gmra.mxu0 %vm260_vm1, %v1135_v3  ;;  %v470_v4 = vpop.permute.xlu1 %469  ;;  %v527_v5 = vpop.permute.xlu0 %526 }
 0x103   : > { %1071 = vmatpush3.bf16.msra.mxu1 %v470_v4  ;;  %1077 = vmatpush3.bf16.msra.mxu0 %v527_v5 }
 0x104   : > { %1078 = vmatprep.mubr.msk.bf16.mxu0 %vm1155_vm0, %v1154_v28  ;;  %1082 = vmatprep.subr.bf16.mxu1 %v1154_v28 }
 0x105   : > { %1088 = vmatprep.subr.bf16.mxu0 %v1154_v28 }
 0x106   : > { %1073 = vmatmul.mubr.msk.bf16.vlgmr.msra.gmra.mxu1 %vm260_vm1, %v1136_v6  ;;  %v606_v8 = vpop.permute.xlu1 %605  ;;  %v685_v9 = vpop.permute.xlu0 %684 }
 0x107   : > { %1083 = vmatpush3.bf16.msra.mxu1 %v606_v8  ;;  %1084 = vmatprep.mubr.msk.bf16.mxu1 %vm1155_vm0, %v1154_v28 }
 0x108   : > { %1094 = vmatprep.subr.bf16.mxu1 %v1154_v28 }
 0x10a   : > { %1079 = vmatmul.mubr.msk.bf16.vlgmr.msra.gmra.mxu0 %vm260_vm1, %v1137_v7  ;;  %v742_v11 = vpop.permute.xlu1 %741  ;;  %v821_v13 = vpop.permute.xlu0 %820 }
 0x10b   : > { %1089 = vmatpush3.bf16.msra.mxu0 %v685_v9  ;;  %1090 = vmatprep.mubr.msk.bf16.mxu0 %vm1155_vm0, %v1154_v28 }
 0x10c   : > { %1100 = vmatprep.subr.bf16.mxu0 %v1154_v28 }
 0x10e   : > { %1085 = vmatmul.mubr.msk.bf16.vlgmr.msra.gmra.mxu1 %vm260_vm1, %v1138_v10 }
 0x10f   : > { %1095 = vmatpush3.bf16.msra.mxu1 %v742_v11  ;;  %1096 = vmatprep.mubr.msk.bf16.mxu1 %vm1155_vm0, %v1154_v28 }
 0x112   : > { %1091 = vmatmul.mubr.msk.bf16.vlgmr.msra.gmra.mxu0 %vm260_vm1, %v1139_v12 }
 0x113   : > { %1101 = vmatpush3.bf16.msra.mxu0 %v821_v13  ;;  %1102 = vmatprep.mubr.msk.bf16.mxu0 %vm1155_vm0, %v1154_v28 }
 0x116   : > { %1097 = vmatmul.mubr.msk.bf16.vlgmr.msra.gmra.mxu1 %vm260_vm1, %v1140_v14 }
 0x117   : > { %v874_v46 = vpop.permute.xlu1 %873  ;;  %v879_v1 = vpop.permute.xlu0 %878 }
 0x11a   : > { %1103 = vmatmul.mubr.msk.bf16.vlgmr.msra.gmra.mxu0 %vm260_vm1, %v1141_v15 }
 0x11b   : > { %v888_v59 = vpop.permute.xlu1 %887 }
 0x11f   : > { %v893_v7 = vpop.permute.xlu1 %892 }
 0x155   : > { %v298_v16 = vpop.f32.mrf.mxu0 }
 0x156   : > { %v354_v30 = vadd.f32 %v353_v62, %v298_v16 }
 0x157   : > { %v1056_v17 = vpop.f32.mrf.mxu0 }
 0x159   : > { %v301_v18 = vpop.f32.mrf.mxu0 }
 0x15a   : > { %v357_v36 = vadd.f32 %v356_v0, %v301_v18 }
 0x15b   : > { %v1057_v19 = vpop.f32.mrf.mxu0 }
 0x1c2   : > { %v430_v20 = vpop.f32.mrf.mxu0 }
 0x1c3   : > { %v437_v33 = vadd.f32 %v430_v20, %v354_v30 }
 0x1c4   : > { %v1068_v21 = vpop.f32.mrf.mxu0 }
 0x1c6   : > { %v433_v22 = vpop.f32.mrf.mxu0  ;;  %v509_v23 = vpop.f32.mrf.mxu1 }
 0x1c7   : > { %v516_v37 = vadd.f32 %v509_v23, %v437_v33  ;;  %v438_v40 = vadd.f32 %v433_v22, %v357_v36 }
 0x1c8   : > { %v1069_v24 = vpop.f32.mrf.mxu0  ;;  %v1074_v25 = vpop.f32.mrf.mxu1 }
 0x1ca   : > { %v512_v26 = vpop.f32.mrf.mxu1  ;;  %v566_v27 = vpop.f32.mrf.mxu0 }
 0x1cb   : > { %v573_v41 = vadd.f32 %v566_v27, %v516_v37  ;;  %v517_v44 = vadd.f32 %v512_v26, %v438_v40 }
 0x1cc   : > { %v1075_v28 = vpop.f32.mrf.mxu1  ;;  %v1080_v29 = vpop.f32.mrf.mxu0 }
 0x1ce   : > { %v569_v31 = vpop.f32.mrf.mxu0  ;;  %v645_v32 = vpop.f32.mrf.mxu1 }
 0x1cf   : > { %v652_v45 = vadd.f32 %v645_v32, %v573_v41  ;;  %v574_v49 = vadd.f32 %v569_v31, %v517_v44 }
 0x1d0   : > { %v1081_v34 = vpop.f32.mrf.mxu0  ;;  %v1086_v35 = vpop.f32.mrf.mxu1 }
 0x1d2   : > { %v648_v38 = vpop.f32.mrf.mxu1  ;;  %v724_v39 = vpop.f32.mrf.mxu0 }
 0x1d3   : > { %v731_v50 = vadd.f32 %v724_v39, %v652_v45  ;;  %v653_v53 = vadd.f32 %v648_v38, %v574_v49 }
 0x1d4   : > { %v1087_v42 = vpop.f32.mrf.mxu1  ;;  %v1092_v43 = vpop.f32.mrf.mxu0 }
 0x1d6   : > { %v727_v47 = vpop.f32.mrf.mxu0  ;;  %v781_v48 = vpop.f32.mrf.mxu1 }
 0x1d7   : > { %v788_v54 = vadd.f32 %v781_v48, %v731_v50  ;;  %v732_v57 = vadd.f32 %v727_v47, %v653_v53 }
 0x1d8   : > { %v1093_v51 = vpop.f32.mrf.mxu0  ;;  %v1098_v52 = vpop.f32.mrf.mxu1 }
 0x1da   : > { %v784_v55 = vpop.f32.mrf.mxu1  ;;  %v860_v56 = vpop.f32.mrf.mxu0 }
 0x1db   : > { %v867_v58 = vadd.f32 %v860_v56, %v788_v54  ;;  %v789_v62 = vadd.f32 %v784_v55, %v732_v57 }
 0x1dc   : > { %v1104_v60 = vpop.f32.mrf.mxu0  ;;  %v1099_v61 = vpop.f32.mrf.mxu1 }
 0x1dd   : > { %v881_v63 = vmul.f32 %v874_v46, %v867_v58 }
 0x1de   : > { %v863_v0 = vpop.f32.mrf.mxu0 }
 0x1df   : > { %v895_v2 = vadd.f32 %v888_v59, %v881_v63  ;;  %v868_v3 = vadd.f32 %v863_v0, %v789_v62 }
 0x1e0   : > { %v1105_v4 = vpop.f32.mrf.mxu0 }
 0x1e1   : > { %v897_v5 = vmax.f32 %v895_v2, 0.0  ;;  %v882_v6 = vmul.f32 %v879_v1, %v868_v3 }
 0x1e3   : > { %v1032_v8 = vpack.c.bf16 %v897_v5, %v897_v5  ;;  %v896_v9 = vadd.f32 %v893_v7, %v882_v6 }
 0x1e5   : > { %908 = vst.msk [vmem:[%s224_s8] sm:$0xf] %vm907_vm2, %v1032_v8  ;;  %v898_v10 = vmax.f32 %v896_v9, 0.0 }
 0x1e7   : > { %v1033_v11 = vpack.c.bf16 %v898_v10, %v898_v10 }
 0x1e9   : > { %909 = vst.msk [vmem:[%s224_s8 + $0x4] sm:$0xf] %vm907_vm2, %v1033_v11 }
 0x1ea PF: > { %s15_s18 = sadd.s32 1, %s1148_s18  }
 0x1eb   : > { %p12_p4 = scmp.ge.s32.totalorder %s15_s18, 4  }
 0x1ed   :  { %14 = sbr.rel (!%p12_p4) target bundleno = 1 (0x1), region = 83 }

// kernel: _lambda_.18
= control target key start
LH: loop header
LB: loop body
LE: loop exit
PB: predicated region body
PF: predicated region fallthrough
CT: control target
= control target key end

     0   :  { %s2226_s27 = smov 0   ;;  %s2546_s0 = inlined_call_operand.vmem [shape: bf16[2,32,82], index: 0, kind: input, shape index: {}]   ;;  %s2547_s1 = inlined_call_operand.vmem [shape: bf16[9,1,64], index: 1, kind: input, shape index: {}]   ;;  %s2548_s2 = inlined_call_operand.vmem [shape: bf16[9,16,32], index: 2, kind: input, shape index: {}]   ;;  %s2549_s3 = inlined_call_operand.vmem [shape: f32[16,1], index: 3, kind: input, shape index: {}]   ;;  %s2550_s4 = inlined_call_operand.vmem [shape: f32[16,1], index: 4, kind: input, shape index: {}]   ;;  %s2551_s5 = inlined_call_operand.vmem [shape: bf16[9,16,16], index: 5, kind: input, shape index: {}]   ;;  %s2552_s6 = inlined_call_operand.vmem [shape: f32[16,1], index: 6, kind: input, shape index: {}]   ;;  %s2553_s7 = inlined_call_operand.vmem [shape: f32[16,1], index: 7, kind: input, shape index: {}]   ;;  %s2554_s8 = inlined_call_operand.vmem [shape: bf16[2,16,64], index: 8, kind: output, shape index: {}]  }
   0x1 LB: > { %s1806_s28 = sadd.s32 4294967295, %s2162_s27   ;;  %p1810_p0 = scmp.ge.s32.totalorder %s2162_s27, 1  ;;  %s2162_s27 = sphi %s2226_s27, %s18_s27  }
   0x2   : > { %p262_p1 = scmp.lt.s32.totalorder %s2162_s27, 3 }
   0x4   : > { %p263_p2 = pnand %p1810_p0, %p262_p1 }
   0x5   : > { %p296_p3 = scmp.lt.s32.totalorder (!%p263_p2), %s1806_s28, 1  ;;  %s2164_s21 = smov (!%p263_p2), 2  }
   0x6   : > { %266 = sbr.rel (%p263_p2) target bundleno = 976 (0x3d0), region = 52  ;;  %s2165_s22 = smov (!%p263_p2), 10  }
   0x7   : > { %s2166_s23 = smov (!%p263_p2), 8   ;;  %s2167_s24 = smov (!%p263_p2), 16  }
   0x8   : > { %s2168_s25 = smov (!%p263_p2), 18   ;;  %s2169_s26 = smov (!%p263_p2), 127  }
   0x9   : > { %s2172_s11 = smov (!%p263_p2), 126   ;;  %s2173_s12 = smov (!%p263_p2), 120  }
   0xa   : > { %s2174_s13 = smov (!%p263_p2), 119   ;;  %s2175_s16 = smov (!%p263_p2), 118  }
   0xb   : > { %v315_v0 = vlaneseq  ;;  %v1826_v1 = vld [vmem:[%s2547_s1 + $0x2] sm:$0x1]  ;;  %v1834_v2 = vld [vmem:[%s2547_s1 + $0x3] sm:$0x1]  ;;  %v1846_v4 = vld [vmem:[%s2547_s1 + $0x5] sm:$0x1] }
   0xc   : > { %v462_v3 = vpack.i.b16 %v1826_v1, %v1826_v1  ;;  %v1854_v5 = vld [vmem:[%s2547_s1 + $0x6] sm:$0x1]  ;;  %v551_v7 = vpack.i.b16 %v1834_v2, %v1834_v2  ;;  %v700_v8 = vpack.i.b16 %v1846_v4, %v1846_v4  ;;  %v1866_v10 = vld [vmem:[%s2547_s1 + $0x8] sm:$0x1]  ;;  %s2558_s28 = smov (!%p296_p3, %s1806_s28), 1  ;;  %v2170_v30 = vmov 0.0  }
   0xd   : > { %v316_v6 = vshrl.u32 %v315_v0, 7  ;;  %v789_v9 = vpack.i.b16 %v1854_v5, %v1854_v5  ;;  %v938_v12 = vpack.i.b16 %v1866_v10, %v1866_v10  ;;  %s1932_s17 = sshll.u32 %s2558_s28, 4  ;;  %v311_v29 = vld [vmem:[%s2547_s1] sm:$0x1]  ;;  %1983 = vmatprep.subr.bf16.mxu0 %v2170_v30  ;;  %1991 = vmatprep.subr.bf16.mxu1 %v2170_v30  ;;  %vm2171_vm0 = vmmov 0   ;;  %v2138_v1 = vld [vmem:[%s2548_s2 + $0x8] sm:$0xff]  }
   0xe   : > { %s300_s20 = scalar_lea.vmem %s2546_s0, %s1932_s17  ;;  %v313_v31 = vpack.i.b16 %v311_v29, %v311_v29  ;;  %1987 = vmatprep.mubr.msk.bf16.mxu0 %vm2171_vm0, %v2170_v30  ;;  %1995 = vmatprep.mubr.msk.bf16.mxu1 %vm2171_vm0, %v2170_v30  ;;  %v2139_v40 = vld [vmem:[%s2548_s2] sm:$0xff]   ;;  %vm353_vm1 = vcmask 261120   ;;  %s2555_s17 = smov 112   ;;  %vm1054_vm2 = vcmask 666624   ;;  %vm1069_vm3 = vcmask 592968  }
   0xf   : > { %v2249_v11 = vsub.s32 0, %v316_v6  ;;  %v2261_v19 = vld [vmem:[%s300_s20 + $0x8] sm:$0xf]  ;;  %v2263_v20 = vld [vmem:[%s300_s20 + $0xc] sm:$0xf]  ;;  %s2178_s18 = smov 111  }
  0x10   : > { %v2268_v24 = vld [vmem:[%s300_s20] sm:$0xf]  ;;  %v2270_v25 = vld [vmem:[%s300_s20 + $0x4] sm:$0xf]  ;;  %v2276_v27 = vcombine.low %v2261_v19, %v2263_v20  ;;  %s2179_s19 = smov 110   ;;  %s2180_s20 = smov 9  }
  0x11   : > { %v467_v13 = vrot.slane %v462_v3, %v2249_v11  ;;  %v556_v14 = vrot.slane %v551_v7, %v2249_v11  ;;  %v705_v15 = vrot.slane %v700_v8, %v2249_v11  ;;  %v794_v16 = vrot.slane %v789_v9, %v2249_v11 }
  0x12   : > { %v943_v23 = vrot.slane %v938_v12, %v2249_v11  ;;  %v2283_v28 = vcombine.low %v2268_v24, %v2270_v25  ;;  %v318_v32 = vrot.slane %v313_v31, %v2249_v11  ;;  %vm1106_vm4 = vcmask 130048  }
  0x13   : > { %v1827_v17 = vcombine.low %v467_v13, %v467_v13  ;;  %v1847_v18 = vcombine.low %v705_v15, %v705_v15  ;;  %v1835_v21 = vcombine.low %v556_v14, %v556_v14  ;;  %v1855_v22 = vcombine.low %v794_v16, %v794_v16 }
  0x14   : > { %v1867_v26 = vcombine.low %v943_v23, %v943_v23  ;;  %v1815_v33 = vcombine.low %v318_v32, %v318_v32  ;;  %v2177_v15 = vmov 0   ;;  %v2141_v32 = vld [vmem:[%s2548_s2 + $0x18] sm:$0xff]   ;;  %vm1748_vm5 = vcmask 519168  }
  0x15   : > { %471 = vrot.lane.b32.xlu0 %v1827_v17, %s2164_s21  ;;  %709 = vrot.lane.b32.xlu1 %v1847_v18, %s2165_s22  ;;  %v1024_v17 = vld [vmem:[%s2549_s3] sm:$0xff]  ;;  %v1025_v18 = vld [vmem:[%s2549_s3 + $0x8] sm:$0xff]  ;;  %1055 = vst.msk [vmem:[#allocation2] sm:$0xf] %vm1054_vm2, %v2177_v15  ;;  %1056 = vst.msk [vmem:[#allocation2 + $0x4] sm:$0xf] %vm1054_vm2, %v2177_v15 }
  0x16   : > { %v325_v34 = vmul.bf16 %v1815_v33, %v2261_v19  ;;  %v326_v35 = vmul.bf16 %v1815_v33, %v2263_v20  ;;  %v323_v36 = vmul.bf16 %v1815_v33, %v2268_v24  ;;  %v324_v37 = vmul.bf16 %v1815_v33, %v2270_v25  ;;  %2134 = vset.pattern.permute.xlu1 %v2177_v15 }
  0x17   : > { %2135 = vset.pattern.permute.xlu0 %v2177_v15 }
  0x18   : > { %v1824_v38 = vcombine.low %v325_v34, %v326_v35  ;;  %v1823_v39 = vcombine.low %v323_v36, %v324_v37  ;;  %v2142_v35 = vld [vmem:[%s2548_s2 + $0x20] sm:$0xff]  }
  0x19   : > { %560 = vrot.lane.b32.xlu0 %v1835_v21, %s2166_s23  ;;  %798 = vrot.lane.b32.xlu1 %v1855_v22, %s2167_s24 }
  0x1a   : > { %1992 = vmatpush3.bf16.msra.mxu1 %v1824_v38  ;;  %v2143_v38 = vld [vmem:[%s2548_s2 + $0x28] sm:$0xff]  }
  0x1b   : > { %1993 = vmatprep.subr.bf16.mxu1 %v2170_v30 }
  0x1d   : > { %947 = vrot.lane.b32.xlu0 %v1867_v26, %s2168_s25  ;;  %349 = vrot.lane.b32.xlu1 %v2276_v27, %s2169_s26 }
  0x1e   : > { %1994 = vmatpush3.bf16.msra.mxu1 %v1823_v39 }
  0x1f   : > { %2007 = vmatprep.subr.bf16.mxu1 %v2170_v30 }
  0x21   : > { %347 = vrot.lane.b32.xlu0 %v2283_v28, %s2169_s26  ;;  %1996 = vmatmul.mubr.msk.bf16.vlgmr.msra.gmra.mxu1 %vm353_vm1, %v2139_v40 }
  0x22   : > { %2011 = vmatprep.mubr.msk.bf16.mxu1 %vm2171_vm0, %v2170_v30 }
  0x87   : > { %v472_v41 = vpop.permute.xlu0 %471  ;;  %v710_v42 = vpop.permute.xlu1 %709 }
  0x88   : > { %v474_v43 = vmul.bf16 %v472_v41, %v2268_v24  ;;  %v475_v44 = vmul.bf16 %v472_v41, %v2270_v25  ;;  %v476_v45 = vmul.bf16 %v472_v41, %v2261_v19  ;;  %v477_v46 = vmul.bf16 %v472_v41, %v2263_v20  ;;  %v2144_v41 = vld [vmem:[%s2548_s2 + $0x30] sm:$0xff]  }
  0x89   : > { %v714_v58 = vmul.bf16 %v710_v42, %v2261_v19  ;;  %v715_v59 = vmul.bf16 %v710_v42, %v2263_v20  ;;  %v712_v5 = vmul.bf16 %v710_v42, %v2268_v24  ;;  %v713_v6 = vmul.bf16 %v710_v42, %v2270_v25 }
  0x8a   : > { %v1832_v47 = vcombine.low %v476_v45, %v477_v46  ;;  %v1831_v48 = vcombine.low %v474_v43, %v475_v44  ;;  %v2145_v44 = vld [vmem:[%s2548_s2 + $0x38] sm:$0xff]   ;;  %v2146_v46 = vld [vmem:[%s2548_s2 + $0x40] sm:$0xff]  }
  0x8b   : > { %v561_v49 = vpop.permute.xlu0 %560  ;;  %v799_v50 = vpop.permute.xlu1 %798  ;;  %v1852_v0 = vcombine.low %v714_v58, %v715_v59  ;;  %v1851_v10 = vcombine.low %v712_v5, %v713_v6 }
  0x8c   : > { %v565_v51 = vmul.bf16 %v561_v49, %v2261_v19  ;;  %v566_v52 = vmul.bf16 %v561_v49, %v2263_v20  ;;  %498 = vrot.lane.b32.xlu1 %v1832_v47, %s2172_s11  ;;  %496 = vrot.lane.b32.xlu0 %v1831_v48, %s2172_s11  ;;  %v563_v53 = vmul.bf16 %v561_v49, %v2268_v24 }
  0x8d   : > { %v564_v54 = vmul.bf16 %v561_v49, %v2270_v25  ;;  %v803_v60 = vmul.bf16 %v799_v50, %v2261_v19  ;;  %v804_v61 = vmul.bf16 %v799_v50, %v2263_v20  ;;  %v801_v2 = vmul.bf16 %v799_v50, %v2268_v24 }
  0x8e   : > { %v1840_v55 = vcombine.low %v565_v51, %v566_v52  ;;  %v802_v3 = vmul.bf16 %v799_v50, %v2270_v25 }
  0x8f   : > { %v948_v56 = vpop.permute.xlu0 %947  ;;  %v350_v57 = vpop.permute.xlu1 %349  ;;  %v1839_v62 = vcombine.low %v563_v53, %v564_v54  ;;  %v1860_v4 = vcombine.low %v803_v60, %v804_v61 }
  0x90   : > { %587 = vrot.lane.b32.xlu1 %v1840_v55, %s2173_s12  ;;  %647 = vrot.lane.b32.xlu0 %v2276_v27, %s2174_s13  ;;  %v952_v7 = vmul.bf16 %v948_v56, %v2261_v19  ;;  %v953_v8 = vmul.bf16 %v948_v56, %v2263_v20  ;;  %v1859_v9 = vcombine.low %v801_v2, %v802_v3  ;;  %v1038_v19 = vld [vmem:[%s2550_s4] sm:$0xff]  ;;  %v1039_v20 = vld [vmem:[%s2550_s4 + $0x8] sm:$0xff] }
  0x91   : > { %1984 = vmatpush3.bf16.msra.mxu0 %v350_v57  ;;  %v950_v12 = vmul.bf16 %v948_v56, %v2268_v24  ;;  %v951_v13 = vmul.bf16 %v948_v56, %v2270_v25 }
  0x92   : > { %1985 = vmatprep.subr.bf16.mxu0 %v2170_v30  ;;  %v1872_v14 = vcombine.low %v952_v7, %v953_v8 }
  0x93   : > { %v348_v63 = vpop.permute.xlu0 %347  ;;  %v1871_v16 = vcombine.low %v950_v12, %v951_v13 }
  0x94   : > { %585 = vrot.lane.b32.xlu1 %v1839_v62, %s2173_s12  ;;  %645 = vrot.lane.b32.xlu0 %v2283_v28, %s2174_s13 }
  0x95   : > { %1986 = vmatpush3.bf16.msra.mxu0 %v348_v63 }
  0x96   : > { %1999 = vmatprep.subr.bf16.mxu0 %v2170_v30 }
  0x98   : > { %736 = vrot.lane.b32.xlu1 %v1852_v0, %s2175_s16  ;;  %1988 = vmatmul.mubr.msk.bf16.vlgmr.msra.gmra.mxu0 %vm353_vm1, %v2138_v1 }
  0x99   : > { %825 = vrot.lane.b32.xlu0 %v1860_v4, %s2555_s17  ;;  %2003 = vmatprep.mubr.msk.bf16.mxu0 %vm2171_vm0, %v2170_v30 }
  0x9c   : > { %734 = vrot.lane.b32.xlu1 %v1851_v10, %s2175_s16 }
  0x9d   : > { %823 = vrot.lane.b32.xlu0 %v1859_v9, %s2555_s17 }
  0xa0   : > { %885 = vrot.lane.b32.xlu1 %v2276_v27, %s2178_s18 }
  0xa1   : > { %974 = vrot.lane.b32.xlu0 %v1872_v14, %s2179_s19 }
  0xa4   : > { %883 = vrot.lane.b32.xlu1 %v2283_v28, %s2178_s18  ;;  %v2140_v28 = vld [vmem:[%s2548_s2 + $0x10] sm:$0xff]  }
  0xa5   : > { %972 = vrot.lane.b32.xlu0 %v1871_v16, %s2179_s19 }
  0xa8   : > { %1028 = vperm.xlu1 %2134, %v1024_v17  }
  0xa9   : > { %1033 = vperm.xlu0 %2135, %v1025_v18  }
  0xac   : > { %1042 = vperm.xlu1 %2134, %v1038_v19  }
  0xb0   : > { %1047 = vperm.xlu1 %2134, %v1039_v20  }
  0xe1   : > { %v2369_v21 = vpop.f32.mrf.mxu1 }
  0xe3   : > { %v1997_v22 = vpop.f32.mrf.mxu1 }
  0xe5   : > { %v2371_v23 = vpop.f32.mrf.mxu1 }
  0xe7   : > { %v1998_v24 = vpop.f32.mrf.mxu1 }
  0xfe   : > { %v499_v25 = vpop.permute.xlu1 %498  ;;  %v497_v26 = vpop.permute.xlu0 %496 }
  0xff   : > { %2000 = vmatpush3.bf16.msra.mxu0 %v499_v25 }
 0x100   : > { %2001 = vmatprep.subr.bf16.mxu0 %v2170_v30 }
 0x102   : > { %v588_v27 = vpop.permute.xlu1 %587  ;;  %v648_v29 = vpop.permute.xlu0 %647 }
 0x103   : > { %2002 = vmatpush3.bf16.msra.mxu0 %v497_v26  ;;  %2008 = vmatpush3.bf16.msra.mxu1 %v588_v27 }
 0x104   : > { %2015 = vmatprep.subr.bf16.mxu0 %v2170_v30  ;;  %2009 = vmatprep.subr.bf16.mxu1 %v2170_v30 }
 0x106   : > { %v586_v31 = vpop.permute.xlu1 %585  ;;  %2004 = vmatmul.mubr.msk.bf16.vlgmr.msra.gmra.mxu0 %vm353_vm1, %v2140_v28  ;;  %v646_v33 = vpop.permute.xlu0 %645 }
 0x107   : > { %2010 = vmatpush3.bf16.msra.mxu1 %v586_v31  ;;  %2016 = vmatpush3.bf16.msra.mxu0 %v648_v29 }
 0x108   : > { %2017 = vmatprep.subr.bf16.mxu0 %v2170_v30  ;;  %2023 = vmatprep.subr.bf16.mxu1 %v2170_v30 }
 0x109   : > { %2019 = vmatprep.mubr.msk.bf16.mxu0 %vm2171_vm0, %v2170_v30 }
 0x10a   : > { %v737_v34 = vpop.permute.xlu1 %736  ;;  %2012 = vmatmul.mubr.msk.bf16.vlgmr.msra.gmra.mxu1 %vm353_vm1, %v2141_v32 }
 0x10b   : > { %v826_v36 = vpop.permute.xlu0 %825  ;;  %2018 = vmatpush3.bf16.msra.mxu0 %v646_v33  ;;  %2024 = vmatpush3.bf16.msra.mxu1 %v737_v34 }
 0x10c   : > { %2031 = vmatprep.subr.bf16.mxu0 %v2170_v30  ;;  %2025 = vmatprep.subr.bf16.mxu1 %v2170_v30 }
 0x10d   : > { %2027 = vmatprep.mubr.msk.bf16.mxu1 %vm2171_vm0, %v2170_v30 }
 0x10e   : > { %v735_v37 = vpop.permute.xlu1 %734  ;;  %2020 = vmatmul.mubr.msk.bf16.vlgmr.msra.gmra.mxu0 %vm353_vm1, %v2142_v35  ;;  %v1903_v35 = vld [vmem:[%s2547_s1 + $0x5] sm:$0x1] }
 0x10f   : > { %v824_v39 = vpop.permute.xlu0 %823  ;;  %2026 = vmatpush3.bf16.msra.mxu1 %v735_v37  ;;  %2032 = vmatpush3.bf16.msra.mxu0 %v826_v36 }
 0x110   : > { %2033 = vmatprep.subr.bf16.mxu0 %v2170_v30  ;;  %2039 = vmatprep.subr.bf16.mxu1 %v2170_v30 }
 0x111   : > { %2035 = vmatprep.mubr.msk.bf16.mxu0 %vm2171_vm0, %v2170_v30 }
 0x112   : > { %v886_v40 = vpop.permute.xlu1 %885  ;;  %2028 = vmatmul.mubr.msk.bf16.vlgmr.msra.gmra.mxu1 %vm353_vm1, %v2143_v38  ;;  %v1892_v38 = vld [vmem:[%s2547_s1 + $0x3] sm:$0x1] }
 0x113   : > { %2034 = vmatpush3.bf16.msra.mxu0 %v824_v39  ;;  %2040 = vmatpush3.bf16.msra.mxu1 %v886_v40  ;;  %v975_v42 = vpop.permute.xlu0 %974 }
 0x114   : > { %2047 = vmatprep.subr.bf16.mxu0 %v2170_v30  ;;  %2041 = vmatprep.subr.bf16.mxu1 %v2170_v30 }
 0x115   : > { %2043 = vmatprep.mubr.msk.bf16.mxu1 %vm2171_vm0, %v2170_v30 }
 0x116   : > { %v884_v43 = vpop.permute.xlu1 %883  ;;  %2036 = vmatmul.mubr.msk.bf16.vlgmr.msra.gmra.mxu0 %vm353_vm1, %v2144_v41 }
 0x117   : > { %2042 = vmatpush3.bf16.msra.mxu1 %v884_v43  ;;  %2048 = vmatpush3.bf16.msra.mxu0 %v975_v42  ;;  %v973_v45 = vpop.permute.xlu0 %972  ;;  %v1421_v43 = vpack.i.b16 %v1903_v35, %v1903_v35  ;;  %v1710_v35 = vld [vmem:[%s2552_s6] sm:$0xff] }
 0x118   : > { %2049 = vmatprep.subr.bf16.mxu0 %v2170_v30  ;;  %2051 = vmatprep.mubr.msk.bf16.mxu0 %vm2171_vm0, %v2170_v30 }
 0x119   : > { %2055 = vmatprep.subr.bf16.mxu1 %v2170_v30 }
 0x11a   : > { %2044 = vmatmul.mubr.msk.bf16.vlgmr.msra.gmra.mxu1 %vm353_vm1, %v2145_v44 }
 0x11b   : > { %2050 = vmatpush3.bf16.msra.mxu0 %v973_v45  ;;  %2057 = vmatprep.mubr.msk.bf16.mxu1 %vm2171_vm0, %v2170_v30 }
 0x11c   : > { %2061 = vmatprep.subr.bf16.mxu0 %v2170_v30 }
 0x11e   : > { %2052 = vmatmul.mubr.msk.bf16.vlgmr.msra.gmra.mxu0 %vm353_vm1, %v2146_v46  ;;  %v1286_v46 = vpack.i.b16 %v1892_v38, %v1892_v38  ;;  %v1725_v38 = vld [vmem:[%s2553_s7 + $0x8] sm:$0xff] }
 0x11f   : > { %2063 = vmatprep.mubr.msk.bf16.mxu0 %vm2171_vm0, %v2170_v30 }
 0x123   : > { %v1029_v14 = vpop.permute.xlu1 %1028 }
 0x124   : > { %v1034_v37 = vpop.permute.xlu0 %1033 }
 0x127   : > { %v1043_v26 = vpop.permute.xlu1 %1042 }
 0x158   : > { %v391_v47 = vpop.f32.mrf.mxu0 }
 0x159   : > { %v453_v61 = vadd.f32 %v2369_v21, %v391_v47  ;;  %v1048_v47 = vpop.permute.xlu1 %1047 }
 0x15a   : > { %v1989_v48 = vpop.f32.mrf.mxu0 }
 0x15b   : > { %v1921_v48 = vld [vmem:[%s2547_s1 + $0x8] sm:$0x1] }
 0x15c   : > { %v394_v49 = vpop.f32.mrf.mxu0 }
 0x15d   : > { %v456_v3 = vadd.f32 %v2371_v23, %v394_v49  ;;  %v1885_v23 = vld [vmem:[%s2547_s1 + $0x2] sm:$0x1]  ;;  %v1910_v49 = vld [vmem:[%s2547_s1 + $0x6] sm:$0x1] }
 0x15e   : > { %v1990_v50 = vpop.f32.mrf.mxu0  ;;  %v1208_v32 = vpack.i.b16 %v1885_v23, %v1885_v23 }
 0x160   : > { %v1213_v42 = vrot.slane %v1208_v32, %v2249_v11 }
 0x1c6   : > { %v539_v51 = vpop.f32.mrf.mxu0 }
 0x1c7   : > { %v546_v0 = vadd.f32 %v539_v51, %v453_v61 }
 0x1c8   : > { %v2005_v52 = vpop.f32.mrf.mxu0 }
 0x1c9   : > { %v1886_v52 = vcombine.low %v1213_v42, %v1213_v42 }
 0x1ca   : > { %v542_v53 = vpop.f32.mrf.mxu0  ;;  %v628_v54 = vpop.f32.mrf.mxu1 }
 0x1cb   : > { %v635_v4 = vadd.f32 %v628_v54, %v546_v0  ;;  %v547_v7 = vadd.f32 %v542_v53, %v456_v3  ;;  %v1426_v53 = vrot.slane %v1421_v43, %v2249_v11  ;;  %v2149_v43 = vld [vmem:[%s2551_s5 + $0x18] sm:$0xff]  }
 0x1cc   : > { %v2006_v55 = vpop.f32.mrf.mxu0  ;;  %v2013_v56 = vpop.f32.mrf.mxu1 }
 0x1cd   : > { %v1291_v55 = vrot.slane %v1286_v46, %v2249_v11  ;;  %v1634_v56 = vpack.i.b16 %v1921_v48, %v1921_v48 }
 0x1ce   : > { %v631_v57 = vpop.f32.mrf.mxu1  ;;  %v688_v58 = vpop.f32.mrf.mxu0 }
 0x1cf   : > { %v695_v8 = vadd.f32 %v688_v58, %v635_v4  ;;  %v636_v12 = vadd.f32 %v631_v57, %v547_v7  ;;  %v1499_v57 = vpack.i.b16 %v1910_v49, %v1910_v49  ;;  %v1639_v61 = vrot.slane %v1634_v56, %v2249_v11  ;;  %v2152_v49 = vld [vmem:[%s2551_s5 + $0x20] sm:$0xff]  }
 0x1d0   : > { %v2014_v59 = vpop.f32.mrf.mxu1  ;;  %v2021_v60 = vpop.f32.mrf.mxu0 }
 0x1d1   : > { %v1904_v59 = vcombine.low %v1426_v53, %v1426_v53  ;;  %v1893_v60 = vcombine.low %v1291_v55, %v1291_v55 }
 0x1d2   : > { %v691_v62 = vpop.f32.mrf.mxu0  ;;  %v777_v63 = vpop.f32.mrf.mxu1 }
 0x1d3   : > { %v784_v13 = vadd.f32 %v777_v63, %v695_v8  ;;  %v696_v17 = vadd.f32 %v691_v62, %v636_v12  ;;  %v1504_v62 = vrot.slane %v1499_v57, %v2249_v11  ;;  %v1922_v63 = vcombine.low %v1639_v61, %v1639_v61 }
 0x1d4   : > { %v2022_v1 = vpop.f32.mrf.mxu0  ;;  %v2029_v2 = vpop.f32.mrf.mxu1 }
 0x1d5   : > { %v1911_v0 = vcombine.low %v1504_v62, %v1504_v62  ;;  %v1074_v2 = vld [vmem:[%s2547_s1] sm:$0x1] }
 0x1d6   : > { %v780_v5 = vpop.f32.mrf.mxu1  ;;  %v866_v6 = vpop.f32.mrf.mxu0  ;;  %v1076_v3 = vpack.i.b16 %v1074_v2, %v1074_v2 }
 0x1d7   : > { %v873_v18 = vadd.f32 %v866_v6, %v784_v13  ;;  %v785_v21 = vadd.f32 %v780_v5, %v696_v17 }
 0x1d8   : > { %v2030_v9 = vpop.f32.mrf.mxu1  ;;  %v2037_v10 = vpop.f32.mrf.mxu0  ;;  %v1081_v5 = vrot.slane %v1076_v3, %v2249_v11 }
 0x1da   : > { %v869_v15 = vpop.f32.mrf.mxu0  ;;  %v926_v16 = vpop.f32.mrf.mxu1  ;;  %v1876_v9 = vcombine.low %v1081_v5, %v1081_v5 }
 0x1db   : > { %v933_v22 = vadd.f32 %v926_v16, %v873_v18  ;;  %v874_v27 = vadd.f32 %v869_v15, %v785_v21 }
 0x1dc   : > { %v2038_v19 = vpop.f32.mrf.mxu0  ;;  %v2045_v20 = vpop.f32.mrf.mxu1 }
 0x1de   : > { %v929_v24 = vpop.f32.mrf.mxu1  ;;  %v1015_v25 = vpop.f32.mrf.mxu0 }
 0x1df   : > { %v1022_v28 = vadd.f32 %v1015_v25, %v933_v22  ;;  %v934_v33 = vadd.f32 %v929_v24, %v874_v27  ;;  %v2147_v24 = vld [vmem:[%s2551_s5] sm:$0xff]  }
 0x1e0   : > { %v2046_v29 = vpop.f32.mrf.mxu1  ;;  %v2053_v31 = vpop.f32.mrf.mxu0 }
 0x1e1   : > { %v1036_v34 = vmul.f32 %v1029_v14, %v1022_v28 }
 0x1e2   : > { %v1018_v36 = vpop.f32.mrf.mxu0 }
 0x1e3   : > { %v1050_v39 = vadd.f32 %v1043_v26, %v1036_v34  ;;  %v1023_v40 = vadd.f32 %v1018_v36, %v934_v33  ;;  %v1711_v36 = vld [vmem:[%s2552_s6 + $0x8] sm:$0xff] }
 0x1e4   : > { %v2054_v41 = vpop.f32.mrf.mxu0 }
 0x1e5   : > { %v1037_v44 = vmul.f32 %v1034_v37, %v1023_v40  ;;  %v1052_v45 = vmax.f32 %v1050_v39, 0.0  ;;  %v1724_v37 = vld [vmem:[%s2553_s7] sm:$0xff]  ;;  %v2148_v40 = vld [vmem:[%s2551_s5 + $0x8] sm:$0xff]  }
 0x1e7   : > { %v1051_v50 = vadd.f32 %v1048_v47, %v1037_v44  ;;  %v1934_v51 = vpack.c.bf16 %v1052_v45, %v1052_v45  ;;  %v2150_v45 = vld [vmem:[%s2551_s5 + $0x10] sm:$0xff]   ;;  %v2151_v47 = vld [vmem:[%s2551_s5 + $0x28] sm:$0xff]  }
 0x1e9   : > { %v1053_v54 = vmax.f32 %v1051_v50, 0.0  ;;  %1063 = vrot.lane.b32.xlu0 %v1934_v51, %s2180_s20  ;;  %v2154_v51 = vld [vmem:[%s2551_s5 + $0x38] sm:$0xff]  }
 0x1eb   : > { %v1935_v58 = vpack.c.bf16 %v1053_v54, %v1053_v54  ;;  %v2155_v54 = vld [vmem:[%s2551_s5 + $0x40] sm:$0xff]  }
 0x1ed   : > { %1217 = vrot.lane.b32.xlu0 %v1886_v52, %s2164_s21  ;;  %1065 = vrot.lane.b32.xlu1 %v1935_v58, %s2180_s20  ;;  %v2153_v52 = vld [vmem:[%s2551_s5 + $0x30] sm:$0xff]  }
 0x1f1   : > { %1430 = vrot.lane.b32.xlu0 %v1904_v59, %s2165_s22  ;;  %1295 = vrot.lane.b32.xlu1 %v1893_v60, %s2166_s23 }
 0x1f5   : > { %1643 = vrot.lane.b32.xlu0 %v1922_v63, %s2168_s25  ;;  %1508 = vrot.lane.b32.xlu1 %v1911_v0, %s2167_s24  ;;  %s2556_s24 = smov 112  }
 0x25b   : > { %v1064_v1 = vpop.permute.xlu0 %1063 }
 0x25c   : > { %1070 = vst.msk [vmem:[#allocation2] sm:$0xf] %vm1069_vm3, %v1064_v1 }
 0x25f   : > { %v1066_v4 = vpop.permute.xlu1 %1065  ;;  %v1218_v6 = vpop.permute.xlu0 %1217 }
 0x260   : > { %1071 = vst.msk [vmem:[#allocation2 + $0x4] sm:$0xf] %vm1069_vm3, %v1066_v4 }
 0x263   : > { %v1072_v7 = vld [vmem:[#allocation2] sm:$0xf]  ;;  %v1296_v8 = vpop.permute.xlu1 %1295  ;;  %v1431_v16 = vpop.permute.xlu0 %1430 }
 0x264   : > { %v1220_v12 = vmul.bf16 %v1218_v6, %v1072_v7  ;;  %v1086_v17 = vmul.bf16 %v1876_v9, %v1072_v7  ;;  %v1298_v19 = vmul.bf16 %v1296_v8, %v1072_v7  ;;  %v1433_v25 = vmul.bf16 %v1431_v16, %v1072_v7 }
 0x267   : > { %v1073_v10 = vld [vmem:[#allocation2 + $0x4] sm:$0xf]  ;;  %v1509_v21 = vpop.permute.xlu1 %1508  ;;  %v1644_v28 = vpop.permute.xlu0 %1643 }
 0x268   : > { %v1299_v13 = vmul.bf16 %v1296_v8, %v1073_v10  ;;  %v1880_v14 = vcombine.low %v1072_v7, %v1073_v10  ;;  %v1221_v15 = vmul.bf16 %v1218_v6, %v1073_v10  ;;  %v1087_v18 = vmul.bf16 %v1876_v9, %v1073_v10 }
 0x269   : > { %v1434_v23 = vmul.bf16 %v1431_v16, %v1073_v10  ;;  %v1511_v26 = vmul.bf16 %v1509_v21, %v1072_v7  ;;  %v1512_v27 = vmul.bf16 %v1509_v21, %v1073_v10  ;;  %v1646_v31 = vmul.bf16 %v1644_v28, %v1072_v7 }
 0x26a   : > { %1103 = vrot.lane.b32.xlu1 %v1880_v14, %s2169_s26  ;;  %v1890_v20 = vcombine.low %v1220_v12, %v1221_v15  ;;  %v1883_v22 = vcombine.low %v1086_v17, %v1087_v18  ;;  %v1897_v11 = vcombine.low %v1298_v19, %v1299_v13  ;;  %v1647_v32 = vmul.bf16 %v1644_v28, %v1073_v10 }
 0x26b   : > { %v1908_v29 = vcombine.low %v1433_v25, %v1434_v23  ;;  %v1915_v33 = vcombine.low %v1511_v26, %v1512_v27 }
 0x26c   : > { %1235 = vrot.lane.b32.xlu0 %v1890_v20, %s2172_s11  ;;  %2062 = vmatpush3.bf16.msra.mxu0 %v1883_v22  ;;  %v1926_v34 = vcombine.low %v1646_v31, %v1647_v32 }
 0x26d   : > { %2073 = vmatprep.subr.bf16.mxu0 %v2170_v30 }
 0x26e   : > { %1313 = vrot.lane.b32.xlu1 %v1897_v11, %s2173_s12 }
 0x26f   : > { %2064 = vmatmul.mubr.msk.bf16.vlgmr.msra.gmra.mxu0 %vm1106_vm4, %v2147_v24 }
 0x270   : > { %1370 = vrot.lane.b32.xlu0 %v1880_v14, %s2174_s13  ;;  %2075 = vmatprep.mubr.msk.bf16.mxu0 %vm2171_vm0, %v2170_v30  ;;  %s1933_s13 = sshll.u32 %s2558_s28, 3 }
 0x271   : > { %s305_s30 = scalar_lea.vmem %s2554_s8, %s1933_s13 }
 0x272   : > { %1448 = vrot.lane.b32.xlu1 %v1908_v29, %s2175_s16 }
 0x274   : > { %1526 = vrot.lane.b32.xlu0 %v1915_v33, %s2556_s24 }
 0x276   : > { %1583 = vrot.lane.b32.xlu1 %v1880_v14, %s2178_s18 }
 0x278   : > { %1661 = vrot.lane.b32.xlu0 %v1926_v34, %s2179_s19 }
 0x27a   : > { %1714 = vperm.xlu1 %2134, %v1710_v35  }
 0x27c   : > { %1719 = vperm.xlu0 %2135, %v1711_v36  }
 0x27e   : > { %1728 = vperm.xlu1 %2134, %v1724_v37  }
 0x280   : > { %1733 = vperm.xlu0 %2135, %v1725_v38  }
 0x2dc   : > { %v1104_v39 = vpop.permute.xlu1 %1103 }
 0x2dd   : > { %2056 = vmatpush3.bf16.msra.mxu1 %v1104_v39 }
 0x2de   : > { %2067 = vmatprep.subr.bf16.mxu1 %v2170_v30  ;;  %v1236_v41 = vpop.permute.xlu0 %1235 }
 0x2e0   : > { %2058 = vmatmul.mubr.msk.bf16.vlgmr.msra.gmra.mxu1 %vm1106_vm4, %v2148_v40  ;;  %v1314_v42 = vpop.permute.xlu1 %1313 }
 0x2e1   : > { %2068 = vmatpush3.bf16.msra.mxu1 %v1236_v41  ;;  %2074 = vmatpush3.bf16.msra.mxu0 %v1314_v42 }
 0x2e2   : > { %2085 = vmatprep.subr.bf16.mxu0 %v2170_v30  ;;  %2069 = vmatprep.mubr.msk.bf16.mxu1 %vm2171_vm0, %v2170_v30  ;;  %v1371_v46 = vpop.permute.xlu0 %1370 }
 0x2e3   : > { %2079 = vmatprep.subr.bf16.mxu1 %v2170_v30 }
 0x2e4   : > { %2076 = vmatmul.mubr.msk.bf16.vlgmr.msra.gmra.mxu0 %vm1106_vm4, %v2149_v43  ;;  %v1449_v44 = vpop.permute.xlu1 %1448 }
 0x2e5   : > { %2086 = vmatpush3.bf16.msra.mxu0 %v1449_v44  ;;  %2087 = vmatprep.mubr.msk.bf16.mxu0 %vm2171_vm0, %v2170_v30 }
 0x2e6   : > { %2097 = vmatprep.subr.bf16.mxu0 %v2170_v30  ;;  %v1527_v50 = vpop.permute.xlu0 %1526 }
 0x2e8   : > { %2070 = vmatmul.mubr.msk.bf16.vlgmr.msra.gmra.mxu1 %vm1106_vm4, %v2150_v45  ;;  %v1584_v48 = vpop.permute.xlu1 %1583 }
 0x2e9   : > { %2080 = vmatpush3.bf16.msra.mxu1 %v1371_v46  ;;  %2081 = vmatprep.mubr.msk.bf16.mxu1 %vm2171_vm0, %v2170_v30 }
 0x2ea   : > { %2091 = vmatprep.subr.bf16.mxu1 %v2170_v30  ;;  %v1662_v53 = vpop.permute.xlu0 %1661 }
 0x2ec   : > { %2088 = vmatmul.mubr.msk.bf16.vlgmr.msra.gmra.mxu0 %vm1106_vm4, %v2151_v47 }
 0x2ed   : > { %2098 = vmatpush3.bf16.msra.mxu0 %v1584_v48  ;;  %2099 = vmatprep.mubr.msk.bf16.mxu0 %vm2171_vm0, %v2170_v30 }
 0x2f0   : > { %2082 = vmatmul.mubr.msk.bf16.vlgmr.msra.gmra.mxu1 %vm1106_vm4, %v2152_v49 }
 0x2f1   : > { %2092 = vmatpush3.bf16.msra.mxu1 %v1527_v50  ;;  %2093 = vmatprep.mubr.msk.bf16.mxu1 %vm2171_vm0, %v2170_v30 }
 0x2f2   : > { %2103 = vmatprep.subr.bf16.mxu1 %v2170_v30 }
 0x2f4   : > { %2100 = vmatmul.mubr.msk.bf16.vlgmr.msra.gmra.mxu0 %vm1106_vm4, %v2154_v51 }
 0x2f5   : > { %v1715_v33 = vpop.permute.xlu1 %1714 }
 0x2f7   : > { %v1720_v39 = vpop.permute.xlu0 %1719 }
 0x2f8   : > { %2094 = vmatmul.mubr.msk.bf16.vlgmr.msra.gmra.mxu1 %vm1106_vm4, %v2153_v52 }
 0x2f9   : > { %2104 = vmatpush3.bf16.msra.mxu1 %v1662_v53  ;;  %2105 = vmatprep.mubr.msk.bf16.mxu1 %vm2171_vm0, %v2170_v30  ;;  %v1729_v43 = vpop.permute.xlu1 %1728 }
 0x2fb   : > { %v1734_v50 = vpop.permute.xlu0 %1733 }
 0x300   : > { %2106 = vmatmul.mubr.msk.bf16.vlgmr.msra.gmra.mxu1 %vm1106_vm4, %v2155_v54 }
 0x32f   : > { %v1199_v55 = vpop.f32.mrf.mxu0 }
 0x331   : > { %v2065_v56 = vpop.f32.mrf.mxu0 }
 0x333   : > { %v1202_v57 = vpop.f32.mrf.mxu0 }
 0x335   : > { %v2066_v58 = vpop.f32.mrf.mxu0 }
 0x3a0   : > { %v1144_v59 = vpop.f32.mrf.mxu1 }
 0x3a1   : > { %v1200_v6 = vadd.f32 %v1199_v55, %v1144_v59 }
 0x3a2   : > { %v2059_v60 = vpop.f32.mrf.mxu1 }
 0x3a4   : > { %v1147_v61 = vpop.f32.mrf.mxu1  ;;  %v1353_v62 = vpop.f32.mrf.mxu0 }
 0x3a5   : > { %v1203_v13 = vadd.f32 %v1202_v57, %v1147_v61 }
 0x3a6   : > { %v2060_v63 = vpop.f32.mrf.mxu1  ;;  %v2077_v0 = vpop.f32.mrf.mxu0 }
 0x3a8   : > { %v1275_v1 = vpop.f32.mrf.mxu1  ;;  %v1356_v2 = vpop.f32.mrf.mxu0 }
 0x3a9   : > { %v1282_v9 = vadd.f32 %v1275_v1, %v1200_v6 }
 0x3aa   : > { %v2071_v3 = vpop.f32.mrf.mxu1  ;;  %v2078_v30 = vpop.f32.mrf.mxu0 }
 0x3ab   : > { %v1360_v16 = vadd.f32 %v1353_v62, %v1282_v9 }
 0x3ac   : > { %v1278_v4 = vpop.f32.mrf.mxu1  ;;  %v1488_v5 = vpop.f32.mrf.mxu0 }
 0x3ad   : > { %v1283_v17 = vadd.f32 %v1278_v4, %v1203_v13 }
 0x3ae   : > { %v2072_v7 = vpop.f32.mrf.mxu1  ;;  %v2089_v8 = vpop.f32.mrf.mxu0 }
 0x3af   : > { %v1361_v23 = vadd.f32 %v1356_v2, %v1283_v17 }
 0x3b0   : > { %v1410_v10 = vpop.f32.mrf.mxu1  ;;  %v1491_v12 = vpop.f32.mrf.mxu0 }
 0x3b1   : > { %v1417_v20 = vadd.f32 %v1410_v10, %v1360_v16 }
 0x3b2   : > { %v2083_v14 = vpop.f32.mrf.mxu1  ;;  %v2090_v15 = vpop.f32.mrf.mxu0 }
 0x3b3   : > { %v1495_v25 = vadd.f32 %v1488_v5, %v1417_v20 }
 0x3b4   : > { %v1413_v18 = vpop.f32.mrf.mxu1  ;;  %v1623_v19 = vpop.f32.mrf.mxu0 }
 0x3b5   : > { %v1418_v26 = vadd.f32 %v1413_v18, %v1361_v23 }
 0x3b6   : > { %v2084_v21 = vpop.f32.mrf.mxu1  ;;  %v2101_v22 = vpop.f32.mrf.mxu0 }
 0x3b7   : > { %v1496_v32 = vadd.f32 %v1491_v12, %v1418_v26 }
 0x3b8   : > { %v1566_v11 = vpop.f32.mrf.mxu1  ;;  %v1626_v24 = vpop.f32.mrf.mxu0 }
 0x3b9   : > { %v1573_v29 = vadd.f32 %v1566_v11, %v1495_v25 }
 0x3ba   : > { %v2095_v27 = vpop.f32.mrf.mxu1  ;;  %v2102_v28 = vpop.f32.mrf.mxu0 }
 0x3bb   : > { %v1630_v35 = vadd.f32 %v1623_v19, %v1573_v29 }
 0x3bc   : > { %v1569_v31 = vpop.f32.mrf.mxu1 }
 0x3bd   : > { %v1574_v36 = vadd.f32 %v1569_v31, %v1496_v32 }
 0x3be   : > { %v2096_v34 = vpop.f32.mrf.mxu1 }
 0x3bf   : > { %v1631_v41 = vadd.f32 %v1626_v24, %v1574_v36 }
 0x3c0   : > { %v1701_v37 = vpop.f32.mrf.mxu1 }
 0x3c1   : > { %v1708_v38 = vadd.f32 %v1701_v37, %v1630_v35 }
 0x3c2   : > { %v2107_v40 = vpop.f32.mrf.mxu1 }
 0x3c3   : > { %v1722_v42 = vmul.f32 %v1715_v33, %v1708_v38 }
 0x3c4   : > { %v1704_v44 = vpop.f32.mrf.mxu1 }
 0x3c5   : > { %v1736_v45 = vadd.f32 %v1729_v43, %v1722_v42  ;;  %v1709_v46 = vadd.f32 %v1704_v44, %v1631_v41 }
 0x3c6   : > { %v2108_v47 = vpop.f32.mrf.mxu1 }
 0x3c7   : > { %v1738_v48 = vmax.f32 %v1736_v45, 0.0  ;;  %v1723_v49 = vmul.f32 %v1720_v39, %v1709_v46 }
 0x3c9   : > { %v1936_v51 = vpack.c.bf16 %v1738_v48, %v1738_v48  ;;  %v1737_v52 = vadd.f32 %v1734_v50, %v1723_v49 }
 0x3cb   : > { %1749 = vst.msk [vmem:[%s305_s30] sm:$0xf] %vm1748_vm5, %v1936_v51  ;;  %v1739_v53 = vmax.f32 %v1737_v52, 0.0 }
 0x3cd   : > { %v1937_v54 = vpack.c.bf16 %v1739_v53, %v1739_v53 }
 0x3cf   : > { %1750 = vst.msk [vmem:[%s305_s30 + $0x4] sm:$0xf] %vm1748_vm5, %v1937_v54 }
 0x3d0 PF: > { %s18_s27 = sadd.s32 1, %s2162_s27  }
 0x3d1   : > { %p15_p4 = scmp.ge.s32.totalorder %s18_s27, 4  }
 0x3d3   :  { %17 = sbr.rel (!%p15_p4) target bundleno = 1 (0x1), region = 103 }

// kernel: _lambda_.20
= control target key start
LH: loop header
LB: loop body
LE: loop exit
PB: predicated region body
PF: predicated region fallthrough
CT: control target
= control target key end

     0   :  { %s2395_s27 = smov 0   ;;  %s2787_s0 = inlined_call_operand.vmem [shape: bf16[2,1,290], index: 0, kind: input, shape index: {}]   ;;  %s2788_s1 = inlined_call_operand.vmem [shape: bf16[9,1,256], index: 1, kind: input, shape index: {}]   ;;  %s2789_s2 = inlined_call_operand.vmem [shape: bf16[9,8,1], index: 2, kind: input, shape index: {}]   ;;  %s2790_s3 = inlined_call_operand.vmem [shape: f32[8,1], index: 3, kind: input, shape index: {}]   ;;  %s2791_s4 = inlined_call_operand.vmem [shape: f32[8,1], index: 4, kind: input, shape index: {}]   ;;  %s2792_s5 = inlined_call_operand.vmem [shape: bf16[9,8,8], index: 5, kind: input, shape index: {}]   ;;  %s2793_s6 = inlined_call_operand.vmem [shape: f32[8,1], index: 6, kind: input, shape index: {}]   ;;  %s2794_s7 = inlined_call_operand.vmem [shape: f32[8,1], index: 7, kind: input, shape index: {}]   ;;  %s2795_s8 = inlined_call_operand.vmem [shape: bf16[2,8,256], index: 8, kind: output, shape index: {}]  }
   0x1 LB: > { %s2186_s28 = sadd.s32 4294967295, %s2332_s27   ;;  %p2190_p0 = scmp.ge.s32.totalorder %s2332_s27, 1  ;;  %s2332_s27 = sphi %s2395_s27, %s18_s27  }
   0x2   : > { %p261_p1 = scmp.lt.s32.totalorder %s2332_s27, 3 }
   0x4   : > { %p262_p2 = pnand %p2190_p0, %p261_p1 }
   0x5   : > { %s2334_s11 = smov (!%p262_p2), 2   ;;  %s2335_s12 = smov (!%p262_p2), 18  }
   0x6   : > { %265 = sbr.rel (%p262_p2) target bundleno = 997 (0x3e5), region = 52  ;;  %p294_p3 = scmp.lt.s32.totalorder (!%p262_p2), %s2186_s28, 1 }
   0x7   : > { %s2337_s17 = smov (!%p262_p2), 16   ;;  %s2338_s18 = smov (!%p262_p2), 32  }
   0x8   : > { %s2339_s25 = smov (!%p262_p2), 34   ;;  %s2340_s26 = smov (!%p262_p2), 127  }
   0x9   : > { %s2341_s29 = smov (!%p262_p2), 111   ;;  %s2343_s14 = smov (!%p262_p2), 126  }
   0xa   : > { %s2344_s15 = smov (!%p262_p2), 112   ;;  %s2345_s16 = smov (!%p262_p2), 96  }
   0xb   : > { %v2197_v0 = vld [vmem:[%s2788_s1 + $0x4] sm:$0x3]  ;;  %v2206_v1 = vld [vmem:[%s2788_s1 + $0xa] sm:$0x3]  ;;  %v323_v2 = vlaneseq  ;;  %v2200_v3 = vld [vmem:[%s2788_s1 + $0x6] sm:$0x3] }
   0xc   : > { %475 = vrot.lane.b32.xlu0 %v2197_v0, %s2334_s11  ;;  %759 = vrot.lane.b32.xlu1 %v2206_v1, %s2335_s12  ;;  %v2209_v4 = vld [vmem:[%s2788_s1 + $0xc] sm:$0x3]  ;;  %v2336_v5 = vmov 1966171168   ;;  %s2803_s28 = smov (!%p294_p3, %s2186_s28), 1  ;;  %v2342_v16 = vmov 0  }
   0xd   : > { %v321_v6 = vunpack.c.l.s4 %v2336_v5  ;;  %v2417_v7 = vshrl.u32 %v323_v2, 7  ;;  %v2215_v9 = vld [vmem:[%s2788_s1 + $0x10] sm:$0x3]  ;;  %s2294_s21 = smul.u32 3, %s2803_s28  ;;  %1155 = vst [vmem:[#allocation2] sm:$0xff] %v2342_v16  ;;  %389 = vmatprep.mubr.bf16.mxu0 %v2342_v16  ;;  %462 = vmatprep.mubr.bf16.mxu1 %v2342_v16  ;;  %vm348_vm0 = vcmask 1040384  }
   0xe   : > { %2319 = vset.pattern.permute.xlu1 %v2342_v16  ;;  %2320 = vset.pattern.permute.xlu0 %v2342_v16  ;;  %v305_v18 = vld [vmem:[%s2788_s1] sm:$0x3]  ;;  %v2471_v23 = vsel %vm348_vm0, 65535, %v2342_v16  ;;  %vm478_vm1 = vcmask 15360   ;;  %vm762_vm2 = vcmask 146432   ;;  %vm576_vm3 = vcmask 130048  }
   0xf   : > { %v322_v8 = vunpack.c.0.s8 %v321_v6  ;;  %s2433_s24 = scalar_lea.vmem %s2787_s0, %s2294_s21  ;;  %vm860_vm4 = vcmask 261120   ;;  %v307_v39 = vld [vmem:[%s2789_s2] sm:$0xf]  ;;  %vm344_vm5 = vcmask 7168   ;;  %vm341_vm6 = vcmask 1039360   ;;  %s2346_s19 = smov 110  }
  0x10   : > { %573 = vrot.lane.b32.xlu0 %v2200_v3, %s2337_s17  ;;  %857 = vrot.lane.b32.xlu1 %v2209_v4, %s2338_s18  ;;  %v2194_v11 = vld.sshfl [vmem:[%s2433_s24] sm:$0x13 pattern:$0x75316420]  ;;  %vm1046_vm7 = vcmask 277504   ;;  %s2347_s22 = smov 95  }
  0x11   : > { %v2428_v10 = vsub.s32 %v322_v8, %v2417_v7  ;;  %v319_v13 = vcombine.high %v2194_v11, %v2194_v11  ;;  %v304_v17 = vld [vmem:[%s2433_s24] sm:$0x3]  ;;  %s2348_s23 = smov 94   ;;  %vm514_vm8 = vcmask 1031168   ;;  %vm700_vm9 = vcmask 908288   ;;  %s2349_s20 = smov 17  }
  0x12   : > { %v306_v19 = vmul.bf16 %v305_v18, %v304_v17  ;;  %v471_v28 = vld [vmem:[%s2433_s24] sm:$0x7]  ;;  %vm612_vm10 = vcmask 916480   ;;  %vm2797_vm11 = vcmask 777216   ;;  %vm798_vm12 = vcmask 900096  }
  0x13   : > { %v2438_v12 = vrot.slane %v2194_v11, %v2428_v10  ;;  %v2447_v15 = vrot.slane %v319_v13, %v2428_v10  ;;  %v755_v34 = vld [vmem:[%s2433_s24] sm:$0x7]  ;;  %vm896_vm13 = vcmask 785408   ;;  %vm2796_vm14 = vcmask 769024  }
  0x14   : > { %1043 = vrot.lane.b32.xlu0 %v2215_v9, %s2339_s25  ;;  %v405_v20 = vrot.slane %v306_v19, %v2428_v10  ;;  %v569_v37 = vld [vmem:[%s2433_s24] sm:$0x7]  ;;  %v2193_v9 = vld [vmem:[%s2789_s2 + $0x4] sm:$0xf]  ;;  %vm1156_vm15 = vcmask 273408   ;;  %vm1172_vm0 = vcmask 1043592  }
  0x15   : > { %335 = vrot.lane.b32.xlu1 %v2438_v12, %s2340_s26  ;;  %v2444_v14 = vcombine.high %v2438_v12, %v2438_v12  ;;  %v853_v41 = vld [vmem:[%s2433_s24] sm:$0x7]  ;;  %1157 = vst.msk [vmem:[#allocation2 + $0x8] sm:$0xf] %vm1156_vm15, %v2342_v16  ;;  %vm1168_vm15 = vcmask 138240  }
  0x16   : > { %v406_v21 = vcombine.high %v405_v20, %v405_v20  ;;  %v413_v24 = vrot.slane %v405_v20, %v2428_v10  ;;  %v1039_v3 = vld [vmem:[%s2433_s24] sm:$0x7] }
  0x18   : > { %339 = vrot.lane.b32.xlu0 %v2444_v14, %s2340_s26  ;;  %v420_v22 = vrot.slane %v406_v21, %v2428_v10  ;;  %v425_v31 = vand.u32 %v413_v24, %v2471_v23 }
  0x19   : > { %337 = vrot.lane.b32.xlu1 %v2447_v15, %s2340_s26 }
  0x1a   : > { %v428_v27 = vand.u32 %v420_v22, %v2471_v23 }
  0x1c   : > { %696 = vrot.lane.b32.xlu0 %v2447_v15, %s2341_s29  ;;  %444 = vmatprep.subr.bf16.mxu1 %v428_v27 }
  0x1d   : > { %698 = vrot.lane.b32.xlu1 %v2444_v14, %s2341_s29  ;;  %445 = vmatpush1.bf16.msra.mxu1 %v425_v31 }
  0x20   : > { %694 = vrot.lane.b32.xlu0 %v2438_v12, %s2341_s29  ;;  %2196 = vmatmul.mubr.msk.bf16.vlgmr.msra.gmra.mxu1 %vm344_vm5, %v307_v39 }
  0x21   : > { %656 = vmatprep.mubr.bf16.mxu1 %v2342_v16 }
  0x7e   : > { %v476_v25 = vpop.permute.xlu0 %475  ;;  %v760_v26 = vpop.permute.xlu1 %759 }
  0x7f   : > { %v477_v29 = vrot.slane %v476_v25, 7  ;;  %v761_v30 = vrot.slane %v760_v26, 7 }
  0x81   : > { %v479_v32 = vsel %vm478_vm1, %v477_v29, %v476_v25  ;;  %v763_v35 = vsel %vm762_vm2, %v761_v30, %v760_v26 }
  0x82   : > { %v481_v33 = vmul.bf16 %v479_v32, %v471_v28  ;;  %v574_v36 = vpop.permute.xlu0 %573  ;;  %v858_v38 = vpop.permute.xlu1 %857  ;;  %v765_v44 = vmul.bf16 %v763_v35, %v755_v34  ;;  %v1137_v28 = vld [vmem:[%s2790_s3] sm:$0xff] }
  0x83   : > { %v575_v40 = vrot.slane %v574_v36, 7  ;;  %v859_v42 = vrot.slane %v858_v38, 7 }
  0x84   : > { %v491_v43 = vrot.slane %v481_v33, %v2428_v10  ;;  %v775_v55 = vrot.slane %v765_v44, %v2428_v10 }
  0x85   : > { %v577_v45 = vsel %vm576_vm3, %v575_v40, %v574_v36  ;;  %v861_v46 = vsel %vm860_vm4, %v859_v42, %v858_v38 }
  0x86   : > { %v579_v47 = vmul.bf16 %v577_v45, %v569_v37  ;;  %v863_v48 = vmul.bf16 %v861_v46, %v853_v41  ;;  %v499_v49 = vrot.slane %v491_v43, %v2428_v10  ;;  %v492_v50 = vcombine.high %v491_v43, %v491_v43  ;;  %v1044_v53 = vpop.permute.xlu0 %1043 }
  0x87   : > { %v336_v54 = vpop.permute.xlu1 %335  ;;  %v1045_v59 = vrot.slane %v1044_v53, 7  ;;  %v783_v62 = vrot.slane %v775_v55, %v2428_v10  ;;  %v776_v21 = vcombine.high %v775_v55, %v775_v55  ;;  %v2201_v55 = vld [vmem:[%s2789_s2 + $0xc] sm:$0xf] }
  0x88   : > { %v589_v51 = vrot.slane %v579_v47, %v2428_v10  ;;  %v873_v52 = vrot.slane %v863_v48, %v2428_v10  ;;  %508 = vrot.lane.b32.xlu0 %v499_v49, %s2343_s14  ;;  %v506_v56 = vrot.slane %v492_v50, %v2428_v10  ;;  %v507_v6 = vcombine.high %v499_v49, %v499_v49  ;;  %v2198_v49 = vld [vmem:[%s2789_s2 + $0x8] sm:$0xf] }
  0x89   : > { %v1047_v4 = vsel %vm1046_vm7, %v1045_v59, %v1044_v53  ;;  %v791_v13 = vcombine.high %v783_v62, %v783_v62  ;;  %v790_v24 = vrot.slane %v776_v21, %v2428_v10 }
  0x8a   : > { %v597_v57 = vrot.slane %v589_v51, %v2428_v10  ;;  %v881_v58 = vrot.slane %v873_v52, %v2428_v10  ;;  %v340_v60 = vpop.permute.xlu0 %339  ;;  %v590_v8 = vcombine.high %v589_v51, %v589_v51  ;;  %v1049_v11 = vmul.bf16 %v1047_v4, %v1039_v3 }
  0x8b   : > { %v338_v61 = vpop.permute.xlu1 %337  ;;  %v874_v18 = vcombine.high %v873_v52, %v873_v52 }
  0x8c   : > { %510 = vrot.lane.b32.xlu0 %v506_v56, %s2343_s14  ;;  %606 = vrot.lane.b32.xlu1 %v597_v57, %s2344_s15  ;;  %v342_v63 = vsel %vm341_vm6, %v336_v54, %v338_v61  ;;  %v343_v0 = vsel %vm341_vm6, %v338_v61, %v340_v60  ;;  %v605_v5 = vcombine.high %v597_v57, %v597_v57  ;;  %v2203_v61 = vld [vmem:[%s2789_s2 + $0x10] sm:$0xf] }
  0x8d   : > { %v355_v1 = vand.u32 %v2471_v23, %v343_v0  ;;  %v352_v2 = vand.u32 %v2471_v23, %v342_v63  ;;  %v604_v17 = vrot.slane %v590_v8, %v2428_v10  ;;  %v1059_v19 = vrot.slane %v1049_v11, %v2428_v10 }
  0x8e   : > { %v888_v20 = vrot.slane %v874_v18, %v2428_v10  ;;  %v889_v26 = vcombine.high %v881_v58, %v881_v58  ;;  %v697_v29 = vpop.permute.xlu0 %696 }
  0x8f   : > { %371 = vmatprep.subr.bf16.mxu0 %v355_v1  ;;  %v1060_v22 = vcombine.high %v1059_v19, %v1059_v19  ;;  %v1067_v27 = vrot.slane %v1059_v19, %v2428_v10  ;;  %v699_v31 = vpop.permute.xlu1 %698 }
  0x90   : > { %890 = vrot.lane.b32.xlu0 %v881_v58, %s2345_s16  ;;  %792 = vrot.lane.b32.xlu1 %v783_v62, %s2346_s19  ;;  %v702_v39 = vsel %vm700_vm9, %v697_v29, %v699_v31 }
  0x91   : > { %372 = vmatpush1.bf16.msra.mxu0 %v352_v2  ;;  %v1074_v25 = vrot.slane %v1060_v22, %v2428_v10  ;;  %v710_v44 = vand.u32 %v702_v39, %v2471_v23  ;;  %v2212_v22 = vld [vmem:[%s2789_s2 + $0x1c] sm:$0xf] }
  0x92   : > { %v695_v30 = vpop.permute.xlu0 %694 }
  0x93   : > { %v701_v43 = vsel %vm700_vm9, %v695_v30, %v697_v29 }
  0x94   : > { %610 = vrot.lane.b32.xlu0 %v605_v5, %s2344_s15  ;;  %512 = vrot.lane.b32.xlu1 %v507_v6, %s2343_s14  ;;  %v707_v52 = vand.u32 %v701_v43, %v2471_v23  ;;  %v2207_v5 = vld [vmem:[%s2789_s2 + $0x14] sm:$0xf] }
  0x95   : > { %2195 = vmatmul.mubr.msk.bf16.vlgmr.msra.gmra.mxu0 %vm344_vm5, %v2193_v9 }
  0x96   : > { %558 = vmatprep.mubr.bf16.mxu0 %v2342_v16 }
  0x98   : > { %796 = vrot.lane.b32.xlu0 %v791_v13, %s2346_s19  ;;  %608 = vrot.lane.b32.xlu1 %v604_v17, %s2344_s15  ;;  %v2210_v17 = vld [vmem:[%s2789_s2 + $0x18] sm:$0xf] }
  0x9c   : > { %892 = vrot.lane.b32.xlu0 %v888_v20, %s2345_s16  ;;  %980 = vrot.lane.b32.xlu1 %v2447_v15, %s2347_s22  ;;  %v1075_v15 = vcombine.high %v1067_v27, %v1067_v27 }
  0xa0   : > { %982 = vrot.lane.b32.xlu0 %v2444_v14, %s2347_s22  ;;  %794 = vrot.lane.b32.xlu1 %v790_v24, %s2346_s19  ;;  %v1145_v14 = vld [vmem:[%s2791_s4] sm:$0xff] }
  0xa4   : > { %1078 = vrot.lane.b32.xlu0 %v1074_v25, %s2348_s23  ;;  %894 = vrot.lane.b32.xlu1 %v889_v26, %s2345_s16  ;;  %v2216_v26 = vld [vmem:[%s2789_s2 + $0x20] sm:$0xf] }
  0xa8   : > { %1076 = vrot.lane.b32.xlu0 %v1067_v27, %s2348_s23  ;;  %978 = vrot.lane.b32.xlu1 %v2438_v12, %s2347_s22 }
  0xac   : > { %1080 = vrot.lane.b32.xlu1 %v1075_v15, %s2348_s23  ;;  %1148 = vperm.xlu0 %2320, %v1145_v14  }
  0xb0   : > { %1140 = vperm.xlu1 %2319, %v1137_v28  }
  0xe0   : > { %v464_v27 = vpop.f32.mrf.mxu1 }
  0xe2   : > { %v466_v14 = vpop.f32.mrf.mxu1 }
  0xe4   : > { %v468_v15 = vpop.f32.mrf.mxu1 }
  0xe6   : > { %v469_v28 = vpop.f32.mrf.mxu1 }
  0xfa   : > { %v509_v32 = vpop.permute.xlu0 %508 }
  0xfe   : > { %v511_v33 = vpop.permute.xlu0 %510  ;;  %v607_v34 = vpop.permute.xlu1 %606 }
  0xff   : > { %v515_v36 = vsel %vm514_vm8, %v509_v32, %v511_v33 }
 0x100   : > { %v521_v42 = vand.u32 %v515_v36, %v2471_v23 }
 0x102   : > { %v891_v12 = vpop.permute.xlu0 %890  ;;  %v793_v35 = vpop.permute.xlu1 %792 }
 0x106   : > { %v611_v37 = vpop.permute.xlu0 %610  ;;  %v513_v38 = vpop.permute.xlu1 %512 }
 0x107   : > { %v516_v40 = vsel %vm514_vm8, %v511_v33, %v513_v38  ;;  %v2614_v38 = vsub.s32 0, %v2417_v7 }
 0x108   : > { %v524_v41 = vand.u32 %v516_v40, %v2471_v23 }
 0x10a   : > { %v797_v45 = vpop.permute.xlu0 %796  ;;  %540 = vmatprep.subr.bf16.mxu0 %v524_v41  ;;  %v609_v46 = vpop.permute.xlu1 %608 }
 0x10b   : > { %v613_v47 = vsel %vm612_vm10, %v607_v34, %v609_v46  ;;  %v614_v48 = vsel %vm612_vm10, %v609_v46, %v611_v37  ;;  %541 = vmatpush1.bf16.msra.mxu0 %v521_v42  ;;  %v2241_v34 = vld.sshfl [vmem:[%s2788_s1 + $0x6] sm:$0x11 pattern:$0x75316420] }
 0x10c   : > { %v619_v50 = vand.u32 %v613_v47, %v2471_v23  ;;  %v622_v51 = vand.u32 %v614_v48, %v2471_v23  ;;  %726 = vmatprep.subr.bf16.mxu0 %v710_v44  ;;  %v2265_v37 = vld.sshfl [vmem:[%s2788_s1 + $0xc] sm:$0x11 pattern:$0x75316420] }
 0x10d   : > { %v1799_v41 = vcombine.high %v2265_v37, %v2265_v37  ;;  %v1806_v44 = vrot.slane %v2265_v37, %v2428_v10  ;;  %v2280_v37 = vld.sshfl [vmem:[%s2788_s1 + $0x10] sm:$0x11 pattern:$0x75316420] }
 0x10e   : > { %v893_v53 = vpop.permute.xlu0 %892  ;;  %2199 = vmatmul.mubr.msk.bf16.vlgmr.msra.gmra.mxu0 %vm344_vm5, %v2198_v49  ;;  %v981_v54 = vpop.permute.xlu1 %980  ;;  %638 = vmatprep.subr.bf16.mxu1 %v622_v51 }
 0x10f   : > { %639 = vmatpush1.bf16.msra.mxu1 %v619_v50  ;;  %727 = vmatpush1.bf16.msra.mxu0 %v707_v52  ;;  %v897_v0 = vsel %vm896_vm13, %v891_v12, %v893_v53  ;;  %v1483_v12 = vcombine.high %v2241_v34, %v2241_v34  ;;  %v1815_v47 = vpack.i.b16 %v1806_v44, %v1806_v44 }
 0x110   : > { %744 = vmatprep.mubr.bf16.mxu0 %v2342_v16  ;;  %v903_v8 = vand.u32 %v897_v0, %v2471_v23 }
 0x111   : > { %v1497_v36 = vrot.slane %v1483_v12, %v2428_v10  ;;  %v1820_v49 = vrot.slane %v1815_v47, %v2614_v38 }
 0x112   : > { %v983_v56 = vpop.permute.xlu0 %982  ;;  %v795_v57 = vpop.permute.xlu1 %794  ;;  %2202 = vmatmul.mubr.msk.bf16.vlgmr.msra.gmra.mxu1 %vm344_vm5, %v2201_v55 }
 0x113   : > { %v986_v58 = vsel %vm2797_vm11, %v981_v54, %v983_v56  ;;  %v799_v59 = vsel %vm798_vm12, %v793_v35, %v795_v57  ;;  %v800_v60 = vsel %vm798_vm12, %v795_v57, %v797_v45  ;;  %842 = vmatprep.mubr.bf16.mxu1 %v2342_v16  ;;  %v1490_v35 = vrot.slane %v2241_v34, %v2428_v10 }
 0x114   : > { %v805_v62 = vand.u32 %v799_v59, %v2471_v23  ;;  %v808_v63 = vand.u32 %v800_v60, %v2471_v23  ;;  %v994_v1 = vand.u32 %v986_v58, %v2471_v23  ;;  %v1506_v40 = vpack.i.b16 %v1497_v36, %v1497_v36 }
 0x115   : > { %v1499_v39 = vpack.i.b16 %v1490_v35, %v1490_v35  ;;  %v1813_v45 = vrot.slane %v1799_v41, %v2428_v10 }
 0x116   : > { %v1079_v2 = vpop.permute.xlu0 %1078  ;;  %2205 = vmatmul.mubr.msk.bf16.vlgmr.msra.gmra.mxu0 %vm344_vm5, %v2203_v61  ;;  %v895_v3 = vpop.permute.xlu1 %894  ;;  %824 = vmatprep.subr.bf16.mxu1 %v808_v63  ;;  %v1511_v43 = vrot.slane %v1506_v40, %v2614_v38 }
 0x117   : > { %v898_v4 = vsel %vm896_vm13, %v893_v53, %v895_v3  ;;  %825 = vmatpush1.bf16.msra.mxu1 %v805_v62  ;;  %940 = vmatprep.mubr.bf16.mxu0 %v2342_v16  ;;  %v1504_v42 = vrot.slane %v1499_v39, %v2614_v38  ;;  %v1822_v48 = vpack.i.b16 %v1813_v45, %v1813_v45 }
 0x118   : > { %v906_v6 = vand.u32 %v898_v4, %v2471_v23  ;;  %1010 = vmatprep.subr.bf16.mxu1 %v994_v1 }
 0x119   : > { %v2242_v46 = vcombine.low %v1504_v42, %v1511_v43  ;;  %v1827_v7 = vrot.slane %v1822_v48, %v2614_v38  ;;  %v1992_v48 = vcombine.high %v2280_v37, %v2280_v37 }
 0x11a   : > { %922 = vmatprep.subr.bf16.mxu0 %v906_v6  ;;  %v979_v9 = vpop.permute.xlu1 %978  ;;  %2208 = vmatmul.mubr.msk.bf16.vlgmr.msra.gmra.mxu1 %vm344_vm5, %v2207_v5  ;;  %v1077_v11 = vpop.permute.xlu0 %1076 }
 0x11b   : > { %v985_v13 = vsel %vm2797_vm11, %v979_v9, %v981_v54  ;;  %923 = vmatpush1.bf16.msra.mxu0 %v903_v8  ;;  %1028 = vmatprep.mubr.bf16.mxu1 %v2342_v16  ;;  %v1083_v19 = vsel %vm2796_vm14, %v1077_v11, %v1079_v2  ;;  %v2266_v50 = vcombine.low %v1820_v49, %v1827_v7  ;;  %v2232_v9 = vld.sshfl [vmem:[%s2788_s1 + $0x4] sm:$0x11 pattern:$0x75316420] }
 0x11c   : > { %v991_v18 = vand.u32 %v985_v13, %v2471_v23  ;;  %v1089_v25 = vand.u32 %v1083_v19, %v2471_v23  ;;  %1517 = vrot.lane.b32.xlu0 %v2242_v46, %s2337_s17 }
 0x11e   : > { %2211 = vmatmul.mubr.msk.bf16.vlgmr.msra.gmra.mxu0 %vm344_vm5, %v2210_v17  ;;  %v1081_v20 = vpop.permute.xlu1 %1080  ;;  %1011 = vmatpush1.bf16.msra.mxu1 %v991_v18 }
 0x11f   : > { %v1084_v21 = vsel %vm2796_vm14, %v1079_v2, %v1081_v20  ;;  %1126 = vmatprep.mubr.bf16.mxu0 %v2342_v16  ;;  %vm1176_vm14 = vcmask 134144  }
 0x120   : > { %v1092_v24 = vand.u32 %v1084_v21, %v2471_v23  ;;  %1833 = vrot.lane.b32.xlu0 %v2266_v50, %s2338_s18  ;;  %v1360_v21 = vcombine.high %v2232_v9, %v2232_v9 }
 0x122   : > { %2214 = vmatmul.mubr.msk.bf16.vlgmr.msra.gmra.mxu1 %vm344_vm5, %v2212_v22  ;;  %1108 = vmatprep.subr.bf16.mxu0 %v1092_v24 }
 0x123   : > { %1109 = vmatpush1.bf16.msra.mxu0 %v1089_v25  ;;  %1287 = vmatprep.mubr.bf16.mxu1 %v2342_v16  ;;  %v2256_v25 = vld.sshfl [vmem:[%s2788_s1 + $0xa] sm:$0x11 pattern:$0x75316420] }
 0x124   : > { %v1683_v44 = vrot.slane %v2256_v25, %v2428_v10 }
 0x126   : > { %2217 = vmatmul.mubr.msk.bf16.vlgmr.msra.gmra.mxu0 %vm344_vm5, %v2216_v26  ;;  %vm1173_vm5 = vcmask 1047556  }
 0x127   : > { %1342 = vmatprep.mubr.bf16.mxu0 %v2342_v16  ;;  %v1149_v12 = vpop.permute.xlu0 %1148  ;;  %vm1174_vm11 = vmor %vm1173_vm5, %vm1172_vm0 }
 0x12b   : > { %v1141_v28 = vpop.permute.xlu1 %1140 }
 0x155   : > { %v391_v29 = vpop.f32.mrf.mxu0 }
 0x156   : > { %v465_v23 = vadd.f32 %v464_v27, %v391_v29 }
 0x157   : > { %v393_v30 = vpop.f32.mrf.mxu0 }
 0x158   : > { %v467_v31 = vadd.f32 %v466_v14, %v393_v30  ;;  %v1367_v30 = vrot.slane %v2232_v9, %v2428_v10 }
 0x159   : > { %v395_v32 = vpop.f32.mrf.mxu0 }
 0x15a   : > { %v1676_v32 = vcombine.high %v2256_v25, %v2256_v25  ;;  %v1376_v42 = vpack.i.b16 %v1367_v30, %v1367_v30 }
 0x15b   : > { %v396_v33 = vpop.f32.mrf.mxu0 }
 0x15c   : > { %v1690_v45 = vrot.slane %v1676_v32, %v2428_v10  ;;  %v1381_v50 = vrot.slane %v1376_v42, %v2614_v38 }
 0x1ce   : > { %v560_v51 = vpop.f32.mrf.mxu0 }
 0x1cf   : > { %v567_v63 = vadd.f32 %v560_v51, %v465_v23 }
 0x1d0   : > { %v562_v52 = vpop.f32.mrf.mxu0 }
 0x1d1   : > { %v568_v2 = vadd.f32 %v562_v52, %v467_v31  ;;  %v1374_v31 = vrot.slane %v1360_v21, %v2428_v10  ;;  %v1692_v52 = vpack.i.b16 %v1683_v44, %v1683_v44 }
 0x1d2   : > { %v564_v53 = vpop.f32.mrf.mxu0  ;;  %v658_v54 = vpop.f32.mrf.mxu1 }
 0x1d3   : > { %v665_v3 = vadd.f32 %v658_v54, %v567_v63  ;;  %v1383_v43 = vpack.i.b16 %v1374_v31, %v1374_v31  ;;  %v1699_v53 = vpack.i.b16 %v1690_v45, %v1690_v45 }
 0x1d4   : > { %v565_v55 = vpop.f32.mrf.mxu0  ;;  %v660_v56 = vpop.f32.mrf.mxu1 }
 0x1d5   : > { %v666_v6 = vadd.f32 %v660_v56, %v568_v2  ;;  %v1388_v51 = vrot.slane %v1383_v43, %v2614_v38  ;;  %v1999_v56 = vrot.slane %v2280_v37, %v2428_v10 }
 0x1d6   : > { %v662_v57 = vpop.f32.mrf.mxu1  ;;  %v746_v58 = vpop.f32.mrf.mxu0 }
 0x1d7   : > { %v753_v8 = vadd.f32 %v746_v58, %v665_v3  ;;  %v2006_v57 = vrot.slane %v1992_v48, %v2428_v10 }
 0x1d8   : > { %v663_v59 = vpop.f32.mrf.mxu1  ;;  %v748_v60 = vpop.f32.mrf.mxu0 }
 0x1d9   : > { %v754_v17 = vadd.f32 %v748_v60, %v666_v6  ;;  %v2233_v59 = vcombine.low %v1381_v50, %v1388_v51  ;;  %v1697_v60 = vrot.slane %v1692_v52, %v2614_v38  ;;  %v2015_v63 = vpack.i.b16 %v2006_v57, %v2006_v57 }
 0x1da   : > { %v750_v61 = vpop.f32.mrf.mxu0  ;;  %v844_v62 = vpop.f32.mrf.mxu1 }
 0x1db   : > { %v851_v18 = vadd.f32 %v844_v62, %v753_v8  ;;  %v1704_v61 = vrot.slane %v1699_v53, %v2614_v38  ;;  %v2008_v62 = vpack.i.b16 %v1999_v56, %v1999_v56  ;;  %v2020_v2 = vrot.slane %v2015_v63, %v2614_v38 }
 0x1dc   : > { %v751_v0 = vpop.f32.mrf.mxu0  ;;  %v846_v1 = vpop.f32.mrf.mxu1 }
 0x1dd   : > { %v852_v22 = vadd.f32 %v846_v1, %v754_v17  ;;  %v2257_v0 = vcombine.low %v1697_v60, %v1704_v61  ;;  %v2013_v1 = vrot.slane %v2008_v62, %v2614_v38 }
 0x1de   : > { %v848_v4 = vpop.f32.mrf.mxu1  ;;  %v942_v5 = vpop.f32.mrf.mxu0 }
 0x1df   : > { %v949_v24 = vadd.f32 %v942_v5, %v851_v18  ;;  %v2281_v3 = vcombine.low %v2013_v1, %v2020_v2  ;;  %v2219_v4 = vld.sshfl [vmem:[%s2788_s1] sm:$0x11 pattern:$0x75316420] }
 0x1e0   : > { %v849_v11 = vpop.f32.mrf.mxu1  ;;  %v944_v13 = vpop.f32.mrf.mxu0  ;;  %v1188_v5 = vcombine.high %v2219_v4, %v2219_v4  ;;  %v1195_v6 = vrot.slane %v2219_v4, %v2428_v10 }
 0x1e1   : > { %v950_v14 = vadd.f32 %v944_v13, %v852_v22 }
 0x1e2   : > { %v946_v19 = vpop.f32.mrf.mxu0  ;;  %v1030_v20 = vpop.f32.mrf.mxu1  ;;  %v1202_v8 = vrot.slane %v1188_v5, %v2428_v10  ;;  %v1204_v13 = vpack.i.b16 %v1195_v6, %v1195_v6 }
 0x1e3   : > { %v1037_v15 = vadd.f32 %v1030_v20, %v949_v24  ;;  %v1518_v10 = vpop.permute.xlu0 %1517 }
 0x1e4   : > { %v947_v26 = vpop.f32.mrf.mxu0  ;;  %v1032_v27 = vpop.f32.mrf.mxu1  ;;  %v1211_v17 = vpack.i.b16 %v1202_v8, %v1202_v8  ;;  %v1209_v19 = vrot.slane %v1204_v13, %v2614_v38  ;;  %v2112_v13 = vld [vmem:[%s2794_s7] sm:$0xff] }
 0x1e5   : > { %v1038_v33 = vadd.f32 %v1032_v27, %v950_v14 }
 0x1e6   : > { %v1034_v29 = vpop.f32.mrf.mxu1  ;;  %v1128_v23 = vpop.f32.mrf.mxu0  ;;  %v1216_v20 = vrot.slane %v1211_v17, %v2614_v38 }
 0x1e7   : > { %v1135_v34 = vadd.f32 %v1128_v23, %v1037_v15  ;;  %v1519_v23 = vrot.slane %v1518_v10, 4 }
 0x1e8   : > { %v1130_v35 = vpop.f32.mrf.mxu0  ;;  %v1035_v36 = vpop.f32.mrf.mxu1  ;;  %v2220_v22 = vcombine.low %v1209_v19, %v1216_v20 }
 0x1e9   : > { %v1136_v39 = vadd.f32 %v1130_v35, %v1038_v33  ;;  %v1143_v40 = vmul.f32 %v1141_v28, %v1135_v34  ;;  %v1834_v33 = vpop.permute.xlu0 %1833 }
 0x1ea   : > { %v1132_v41 = vpop.f32.mrf.mxu0  ;;  %v1835_v37 = vrot.slane %v1834_v33, 4 }
 0x1eb   : > { %v1144_v46 = vmul.f32 %v1141_v28, %v1136_v39  ;;  %v1151_v47 = vadd.f32 %v1149_v12, %v1143_v40  ;;  %v1224_v41 = vld [vmem:[%s2792_s5] sm:$0xf] }
 0x1ec   : > { %v1133_v49 = vpop.f32.mrf.mxu0 }
 0x1ed   : > { %v1152_v7 = vadd.f32 %v1149_v12, %v1144_v46  ;;  %v1153_v54 = vmax.f32 %v1151_v47, 0.0 }
 0x1ef   : > { %v1154_v55 = vmax.f32 %v1152_v7, 0.0  ;;  %v1520_v7 = vsel %vm576_vm3, %v1519_v23, %v1518_v10  ;;  %vm2800_vm3 = vcmask 769024  }
 0x1f1   : > { %v2292_v58 = vpack.c.bf16 %v1154_v55, %v1153_v54 }
 0x1f3   : > { %1165 = vrot.lane.b32.xlu1 %v2292_v58, %s2349_s20  ;;  %v1836_v58 = vsel %vm860_vm4, %v1835_v37, %v1834_v33  ;;  %vm2801_vm4 = vmmov %vm2800_vm3 }
 0x1f7   : > { %1394 = vrot.lane.b32.xlu1 %v2233_v59, %s2334_s11 }
 0x1fb   : > { %1710 = vrot.lane.b32.xlu1 %v2257_v0, %s2335_s12 }
 0x1ff   : > { %2026 = vrot.lane.b32.xlu1 %v2281_v3, %s2339_s25  ;;  %s2291_s25 = sshll.u32 %s2803_s28, 3 }
 0x265   : > { %v1166_v9 = vpop.permute.xlu1 %1165 }
 0x266   : > { %v1167_v11 = vrot.slane %v1166_v9, 4 }
 0x268   : > { %v1169_v18 = vsel %vm1168_vm15, %v1167_v11, %v1166_v9  ;;  %1177 = vst.msk [vmem:[#allocation2 + $0x8] sm:$0xf] %vm1176_vm14, %v1167_v11  ;;  %vm1244_vm14 = vcmask 64512   ;;  %v2104_v11 = vld [vmem:[%s2793_s6] sm:$0xff] }
 0x269   : > { %1175 = vst.msk [vmem:[#allocation2] sm:$0xff] %vm1174_vm11, %v1169_v18  ;;  %v1395_v26 = vpop.permute.xlu1 %1394  ;;  %vm1248_vm11 = vcmask 1043456  }
 0x26a   : > { %v1396_v38 = vrot.slane %v1395_v26, 4 }
 0x26c   : > { %v1397_v46 = vsel %vm478_vm1, %v1396_v38, %v1395_v26  ;;  %vm2798_vm1 = vcmask 777216  }
 0x26d   : > { %v1711_v34 = vpop.permute.xlu1 %1710 }
 0x26e   : > { %v1712_v39 = vrot.slane %v1711_v34, 4 }
 0x26f   : > { %v1225_v21 = vld [vmem:[#allocation2 + $0x8] sm:$0xf] }
 0x270   : > { %v2656_v24 = vld [vmem:[#allocation2] sm:$0xff]  ;;  %v1596_v25 = vld [vmem:[#allocation2 + $0x8] sm:$0xf]  ;;  %v2224_v14 = vcombine.low %v1225_v21, %v1225_v21  ;;  %v1401_v36 = vmul.bf16 %v1396_v38, %v1225_v21  ;;  %v1713_v55 = vsel %vm762_vm2, %v1712_v39, %v1711_v34  ;;  %vm2799_vm2 = vmmov %vm2798_vm1 }
 0x271   : > { %v2252_v27 = vcombine.low %v1596_v25, %v1596_v25  ;;  %v1223_v15 = vmul.bf16 %v2220_v22, %v2656_v24  ;;  %v2223_v30 = vcombine.high %v2656_v24, %v2656_v24  ;;  %v2222_v31 = vcombine.low %v2656_v24, %v2656_v24  ;;  %v1473_v32 = vld [vmem:[#allocation2 + $0x8] sm:$0xf]  ;;  %v2027_v56 = vpop.permute.xlu1 %2026 }
 0x272   : > { %1240 = vrot.lane.b32.xlu0 %v2224_v14, %s2340_s26  ;;  %v1524_v35 = vmul.bf16 %v1519_v23, %v1473_v32  ;;  %v1789_v40 = vld [vmem:[#allocation2 + $0x8] sm:$0xf]  ;;  %v1717_v43 = vmul.bf16 %v1712_v39, %v1596_v25  ;;  %v2237_v45 = vcombine.low %v1401_v36, %v1401_v36  ;;  %v1400_v47 = vmul.bf16 %v2656_v24, %v1397_v46  ;;  %v2221_v25 = vld [vmem:[%s2792_s5 + $0x4] sm:$0xf] }
 0x273   : > { %1611 = vrot.lane.b32.xlu1 %v2252_v27, %s2341_s29  ;;  %v2228_v28 = vcombine.high %v1223_v15, %v1223_v15  ;;  %v2227_v29 = vcombine.low %v1223_v15, %v1223_v15  ;;  %v1840_v42 = vmul.bf16 %v1835_v37, %v1789_v40  ;;  %v1523_v50 = vmul.bf16 %v1520_v7, %v2656_v24  ;;  %v1912_v3 = vld [vmem:[#allocation2 + $0x8] sm:$0xf]  ;;  %v2258_v7 = vld [vmem:[%s2792_s5 + $0x14] sm:$0xf] }
 0x274   : > { %v2246_v44 = vcombine.low %v1524_v35, %v1524_v35  ;;  %v2261_v49 = vcombine.low %v1717_v43, %v1717_v43  ;;  %v2235_v51 = vcombine.low %v1400_v47, %v1400_v47  ;;  %v2236_v52 = vcombine.high %v1400_v47, %v1400_v47  ;;  %v2234_v34 = vld [vmem:[%s2792_s5 + $0x8] sm:$0xf] }
 0x275   : > { %2229 = vmatprep.subr.msk.bf16.mxu0 %vm1248_vm11, %v2228_v28  ;;  %v1305_v12 = vsel %vm1248_vm11, %v2227_v29, 0  ;;  %v2270_v48 = vcombine.low %v1840_v42, %v1840_v42  ;;  %v2245_v53 = vcombine.high %v1523_v50, %v1523_v50  ;;  %v2244_v54 = vcombine.low %v1523_v50, %v1523_v50 }
 0x276   : > { %1236 = vrot.lane.b32.xlu0 %v2222_v31, %s2340_s26  ;;  %1325 = vmatpush1.bf16.msra.mxu0 %v1305_v12  ;;  %v1716_v57 = vmul.bf16 %v1713_v55, %v2656_v24  ;;  %v2028_v59 = vrot.slane %v2027_v56, 4  ;;  %v1839_v60 = vmul.bf16 %v1836_v58, %v2656_v24  ;;  %v2276_v5 = vcombine.low %v1912_v3, %v1912_v3 }
 0x277   : > { %1238 = vrot.lane.b32.xlu1 %v2223_v30, %s2340_s26 }
 0x278   : > { %v2260_v61 = vcombine.high %v1716_v57, %v1716_v57  ;;  %v2259_v62 = vcombine.low %v1716_v57, %v1716_v57  ;;  %v2029_v63 = vsel %vm1046_vm7, %v2028_v59, %v2027_v56  ;;  %v2268_v1 = vcombine.low %v1839_v60, %v1839_v60  ;;  %v2267_v56 = vld [vmem:[%s2792_s5 + $0x18] sm:$0xf] }
 0x279   : > { %2230 = vmatmul.mubr.msk.bf16.vlgmr.msra.gmra.mxu0 %vm1244_vm14, %v1224_v41  ;;  %v2032_v0 = vmul.bf16 %v2029_v63, %v2656_v24  ;;  %v2269_v2 = vcombine.high %v1839_v60, %v1839_v60  ;;  %v2033_v4 = vmul.bf16 %v2028_v59, %v1912_v3  ;;  %v2243_v41 = vld [vmem:[%s2792_s5 + $0xc] sm:$0xf]  ;;  %v2282_v3 = vld [vmem:[%s2792_s5 + $0x20] sm:$0xf] }
 0x27a   : > { %1609 = vrot.lane.b32.xlu0 %v2223_v30, %s2341_s29  ;;  %1584 = vmatprep.mubr.bf16.mxu0 %v2342_v16 }
 0x27b   : > { %1607 = vrot.lane.b32.xlu1 %v2222_v31, %s2341_s29  ;;  %v2283_v6 = vcombine.low %v2032_v0, %v2032_v0  ;;  %v2284_v8 = vcombine.high %v2032_v0, %v2032_v0  ;;  %v2285_v9 = vcombine.low %v2033_v4, %v2033_v4 }
 0x27e   : > { %1539 = vrot.lane.b32.xlu0 %v2246_v44, %s2344_s15  ;;  %v2249_v44 = vld [vmem:[%s2792_s5 + $0x10] sm:$0xf] }
 0x27f   : > { %1416 = vrot.lane.b32.xlu1 %v2237_v45, %s2343_s14 }
 0x282   : > { %1732 = vrot.lane.b32.xlu0 %v2261_v49, %s2346_s19 }
 0x283   : > { %1855 = vrot.lane.b32.xlu1 %v2270_v48, %s2345_s16 }
 0x286   : > { %1414 = vrot.lane.b32.xlu0 %v2236_v52, %s2343_s14 }
 0x287   : > { %1412 = vrot.lane.b32.xlu1 %v2235_v51, %s2343_s14  ;;  %s302_s14 = scalar_lea.vmem %s2795_s8, %s2291_s25 }
 0x28a   : > { %1535 = vrot.lane.b32.xlu0 %v2244_v54, %s2344_s15 }
 0x28b   : > { %1537 = vrot.lane.b32.xlu1 %v2245_v53, %s2344_s15 }
 0x28e   : > { %1923 = vrot.lane.b32.xlu0 %v2222_v31, %s2347_s22 }
 0x28f   : > { %1925 = vrot.lane.b32.xlu1 %v2223_v30, %s2347_s22 }
 0x292   : > { %1728 = vrot.lane.b32.xlu0 %v2259_v62, %s2346_s19 }
 0x293   : > { %1730 = vrot.lane.b32.xlu1 %v2260_v61, %s2346_s19  ;;  %v2273_v61 = vld [vmem:[%s2792_s5 + $0x1c] sm:$0xf] }
 0x296   : > { %1853 = vrot.lane.b32.xlu0 %v2269_v2, %s2345_s16 }
 0x297   : > { %1851 = vrot.lane.b32.xlu1 %v2268_v1, %s2345_s16 }
 0x29a   : > { %1927 = vrot.lane.b32.xlu0 %v2276_v5, %s2347_s22 }
 0x29b   : > { %2044 = vrot.lane.b32.xlu1 %v2283_v6, %s2348_s23 }
 0x29e   : > { %2046 = vrot.lane.b32.xlu0 %v2284_v8, %s2348_s23 }
 0x29f   : > { %2048 = vrot.lane.b32.xlu1 %v2285_v9, %s2348_s23 }
 0x2a2   : > { %2107 = vperm.xlu0 %2320, %v2104_v11  }
 0x2a3   : > { %2115 = vperm.xlu1 %2319, %v2112_v13  }
 0x2e4   : > { %v1241_v17 = vpop.permute.xlu0 %1240 }
 0x2e5   : > { %v1612_v18 = vpop.permute.xlu1 %1611 }
 0x2e8   : > { %v1237_v19 = vpop.permute.xlu0 %1236 }
 0x2e9   : > { %v1239_v20 = vpop.permute.xlu1 %1238 }
 0x2ea   : > { %v1242_v21 = vsel %vm341_vm6, %v1237_v19, %v1239_v20  ;;  %v1243_v22 = vsel %vm341_vm6, %v1239_v20, %v1241_v17 }
 0x2eb   : > { %v1250_v24 = vsel %vm1248_vm11, %v1242_v21, 0  ;;  %2225 = vmatprep.subr.msk.bf16.mxu1 %vm1248_vm11, %v1243_v22 }
 0x2ec   : > { %1270 = vmatpush1.bf16.msra.mxu1 %v1250_v24  ;;  %v1610_v10 = vpop.permute.xlu0 %1609 }
 0x2ed   : > { %v1608_v26 = vpop.permute.xlu1 %1607  ;;  %v1614_v32 = vsel %vm700_vm9, %v1610_v10, %v1612_v18 }
 0x2ee   : > { %v1613_v33 = vsel %vm700_vm9, %v1608_v26, %v1610_v10 }
 0x2ef   : > { %2226 = vmatmul.mubr.msk.bf16.vlgmr.msra.gmra.mxu1 %vm1244_vm14, %v2221_v25  ;;  %v1619_v39 = vsel %vm1248_vm11, %v1613_v33, 0 }
 0x2f0   : > { %1461 = vmatprep.mubr.bf16.mxu1 %v2342_v16  ;;  %v1540_v27 = vpop.permute.xlu0 %1539 }
 0x2f1   : > { %v1417_v14 = vpop.permute.xlu1 %1416 }
 0x2f4   : > { %v1733_v15 = vpop.permute.xlu0 %1732 }
 0x2f5   : > { %v1856_v28 = vpop.permute.xlu1 %1855 }
 0x2f8   : > { %v1415_v29 = vpop.permute.xlu0 %1414 }
 0x2f9   : > { %v1413_v23 = vpop.permute.xlu1 %1412  ;;  %v1419_v38 = vsel %vm514_vm8, %v1415_v29, %v1417_v14 }
 0x2fa   : > { %v1418_v30 = vsel %vm514_vm8, %v1413_v23, %v1415_v29  ;;  %2238 = vmatprep.subr.msk.bf16.mxu1 %vm1248_vm11, %v1419_v38 }
 0x2fb   : > { %v1424_v31 = vsel %vm1248_vm11, %v1418_v30, 0 }
 0x2fc   : > { %1444 = vmatpush1.bf16.msra.mxu1 %v1424_v31  ;;  %v1536_v12 = vpop.permute.xlu0 %1535 }
 0x2fd   : > { %2253 = vmatprep.subr.msk.bf16.mxu1 %vm1248_vm11, %v1614_v32  ;;  %v1538_v35 = vpop.permute.xlu1 %1537 }
 0x2fe   : > { %v1541_v36 = vsel %vm612_vm10, %v1536_v12, %v1538_v35  ;;  %v1542_v37 = vsel %vm612_vm10, %v1538_v35, %v1540_v27 }
 0x2ff   : > { %v1547_v40 = vsel %vm1248_vm11, %v1541_v36, 0  ;;  %2239 = vmatmul.mubr.msk.bf16.vlgmr.msra.gmra.mxu1 %vm1244_vm14, %v2234_v34  ;;  %2247 = vmatprep.subr.msk.bf16.mxu0 %vm1248_vm11, %v1542_v37 }
 0x300   : > { %1567 = vmatpush1.bf16.msra.mxu0 %v1547_v40  ;;  %1639 = vmatpush1.bf16.msra.mxu1 %v1619_v39  ;;  %v1924_v42 = vpop.permute.xlu0 %1923 }
 0x301   : > { %v1926_v43 = vpop.permute.xlu1 %1925  ;;  %1656 = vmatprep.mubr.bf16.mxu1 %v2342_v16 }
 0x302   : > { %v1929_v55 = vsel %vm2798_vm1, %v1924_v42, %v1926_v43 }
 0x303   : > { %2248 = vmatmul.mubr.msk.bf16.vlgmr.msra.gmra.mxu0 %vm1244_vm14, %v2243_v41  ;;  %v1935_v60 = vsel %vm1248_vm11, %v1929_v55, 0 }
 0x304   : > { %1777 = vmatprep.mubr.bf16.mxu0 %v2342_v16  ;;  %v1729_v45 = vpop.permute.xlu0 %1728 }
 0x305   : > { %v1731_v46 = vpop.permute.xlu1 %1730 }
 0x306   : > { %v1734_v47 = vsel %vm798_vm12, %v1729_v45, %v1731_v46  ;;  %v1735_v48 = vsel %vm798_vm12, %v1731_v46, %v1733_v15 }
 0x307   : > { %v1740_v49 = vsel %vm1248_vm11, %v1734_v47, 0  ;;  %2254 = vmatmul.mubr.msk.bf16.vlgmr.msra.gmra.mxu1 %vm1244_vm14, %v2249_v44  ;;  %2262 = vmatprep.subr.msk.bf16.mxu0 %vm1248_vm11, %v1735_v48 }
 0x308   : > { %1760 = vmatpush1.bf16.msra.mxu0 %v1740_v49  ;;  %1900 = vmatprep.mubr.bf16.mxu1 %v2342_v16  ;;  %v1854_v50 = vpop.permute.xlu0 %1853 }
 0x309   : > { %v1852_v51 = vpop.permute.xlu1 %1851  ;;  %v1858_v52 = vsel %vm896_vm13, %v1854_v50, %v1856_v28 }
 0x30a   : > { %v1857_v53 = vsel %vm896_vm13, %v1852_v51, %v1854_v50  ;;  %2271 = vmatprep.subr.msk.bf16.mxu1 %vm1248_vm11, %v1858_v52 }
 0x30b   : > { %v1863_v54 = vsel %vm1248_vm11, %v1857_v53, 0  ;;  %2263 = vmatmul.mubr.msk.bf16.vlgmr.msra.gmra.mxu0 %vm1244_vm14, %v2258_v7 }
 0x30c   : > { %1883 = vmatpush1.bf16.msra.mxu1 %v1863_v54  ;;  %1972 = vmatprep.mubr.bf16.mxu0 %v2342_v16  ;;  %v1928_v57 = vpop.permute.xlu0 %1927 }
 0x30d   : > { %v2045_v58 = vpop.permute.xlu1 %2044  ;;  %v1930_v59 = vsel %vm2799_vm2, %v1926_v43, %v1928_v57 }
 0x30e   : > { %2277 = vmatprep.subr.msk.bf16.mxu0 %vm1248_vm11, %v1930_v59 }
 0x30f   : > { %2272 = vmatmul.mubr.msk.bf16.vlgmr.msra.gmra.mxu1 %vm1244_vm14, %v2267_v56  ;;  %1955 = vmatpush1.bf16.msra.mxu0 %v1935_v60 }
 0x310   : > { %2093 = vmatprep.mubr.bf16.mxu1 %v2342_v16  ;;  %v2047_v62 = vpop.permute.xlu0 %2046 }
 0x311   : > { %v2049_v63 = vpop.permute.xlu1 %2048  ;;  %v2050_v0 = vsel %vm2800_vm3, %v2045_v58, %v2047_v62 }
 0x312   : > { %v2051_v1 = vsel %vm2801_vm4, %v2047_v62, %v2049_v63  ;;  %v2056_v2 = vsel %vm1248_vm11, %v2050_v0, 0 }
 0x313   : > { %2278 = vmatmul.mubr.msk.bf16.vlgmr.msra.gmra.mxu0 %vm1244_vm14, %v2273_v61  ;;  %2286 = vmatprep.subr.msk.bf16.mxu1 %vm1248_vm11, %v2051_v1 }
 0x314   : > { %2076 = vmatpush1.bf16.msra.mxu1 %v2056_v2 }
 0x317   : > { %2287 = vmatmul.mubr.msk.bf16.vlgmr.msra.gmra.mxu1 %vm1244_vm14, %v2282_v3 }
 0x31d   : > { %v2108_v7 = vpop.permute.xlu0 %2107 }
 0x31e   : > { %v2116_v56 = vpop.permute.xlu1 %2115 }
 0x339   : > { %v1344_v16 = vpop.f32.mrf.mxu0 }
 0x33b   : > { %v1346_v4 = vpop.f32.mrf.mxu0 }
 0x33d   : > { %v1348_v5 = vpop.f32.mrf.mxu0 }
 0x33f   : > { %v1349_v6 = vpop.f32.mrf.mxu0 }
 0x3af   : > { %v1289_v8 = vpop.f32.mrf.mxu1 }
 0x3b0   : > { %v1345_v27 = vadd.f32 %v1344_v16, %v1289_v8 }
 0x3b1   : > { %v1291_v9 = vpop.f32.mrf.mxu1 }
 0x3b2   : > { %v1347_v28 = vadd.f32 %v1346_v4, %v1291_v9 }
 0x3b3   : > { %v1293_v11 = vpop.f32.mrf.mxu1 }
 0x3b5   : > { %v1294_v13 = vpop.f32.mrf.mxu1 }
 0x3bf   : > { %v1463_v17 = vpop.f32.mrf.mxu1 }
 0x3c0   : > { %v1470_v29 = vadd.f32 %v1463_v17, %v1345_v27 }
 0x3c1   : > { %v1465_v18 = vpop.f32.mrf.mxu1 }
 0x3c2   : > { %v1471_v30 = vadd.f32 %v1465_v18, %v1347_v28 }
 0x3c3   : > { %v1467_v19 = vpop.f32.mrf.mxu1  ;;  %v1586_v20 = vpop.f32.mrf.mxu0 }
 0x3c4   : > { %v1593_v31 = vadd.f32 %v1586_v20, %v1470_v29 }
 0x3c5   : > { %v1468_v21 = vpop.f32.mrf.mxu1  ;;  %v1588_v22 = vpop.f32.mrf.mxu0 }
 0x3c6   : > { %v1594_v34 = vadd.f32 %v1588_v22, %v1471_v30 }
 0x3c7   : > { %v1590_v24 = vpop.f32.mrf.mxu0  ;;  %v1658_v25 = vpop.f32.mrf.mxu1 }
 0x3c8   : > { %v1665_v12 = vadd.f32 %v1658_v25, %v1593_v31 }
 0x3c9   : > { %v1591_v10 = vpop.f32.mrf.mxu0  ;;  %v1660_v26 = vpop.f32.mrf.mxu1 }
 0x3ca   : > { %v1666_v37 = vadd.f32 %v1660_v26, %v1594_v34 }
 0x3cb   : > { %v1662_v14 = vpop.f32.mrf.mxu1  ;;  %v1779_v15 = vpop.f32.mrf.mxu0 }
 0x3cc   : > { %v1786_v39 = vadd.f32 %v1779_v15, %v1665_v12 }
 0x3cd   : > { %v1663_v23 = vpop.f32.mrf.mxu1  ;;  %v1781_v38 = vpop.f32.mrf.mxu0 }
 0x3ce   : > { %v1787_v42 = vadd.f32 %v1781_v38, %v1666_v37 }
 0x3cf   : > { %v1783_v32 = vpop.f32.mrf.mxu0  ;;  %v1902_v33 = vpop.f32.mrf.mxu1 }
 0x3d0   : > { %v1909_v43 = vadd.f32 %v1902_v33, %v1786_v39 }
 0x3d1   : > { %v1784_v35 = vpop.f32.mrf.mxu0  ;;  %v1904_v36 = vpop.f32.mrf.mxu1 }
 0x3d2   : > { %v1910_v46 = vadd.f32 %v1904_v36, %v1787_v42 }
 0x3d3   : > { %v1906_v40 = vpop.f32.mrf.mxu1  ;;  %v1974_v41 = vpop.f32.mrf.mxu0 }
 0x3d4   : > { %v1981_v47 = vadd.f32 %v1974_v41, %v1909_v43 }
 0x3d5   : > { %v1907_v44 = vpop.f32.mrf.mxu1  ;;  %v1976_v45 = vpop.f32.mrf.mxu0 }
 0x3d6   : > { %v1982_v50 = vadd.f32 %v1976_v45, %v1910_v46 }
 0x3d7   : > { %v2095_v48 = vpop.f32.mrf.mxu1  ;;  %v1978_v49 = vpop.f32.mrf.mxu0 }
 0x3d8   : > { %v2102_v51 = vadd.f32 %v2095_v48, %v1981_v47 }
 0x3d9   : > { %v2097_v52 = vpop.f32.mrf.mxu1  ;;  %v1979_v53 = vpop.f32.mrf.mxu0 }
 0x3da   : > { %v2110_v54 = vmul.f32 %v2108_v7, %v2102_v51  ;;  %v2103_v55 = vadd.f32 %v2097_v52, %v1982_v50 }
 0x3db   : > { %v2099_v57 = vpop.f32.mrf.mxu1 }
 0x3dc   : > { %v2118_v58 = vadd.f32 %v2116_v56, %v2110_v54  ;;  %v2111_v59 = vmul.f32 %v2108_v7, %v2103_v55 }
 0x3dd   : > { %v2100_v60 = vpop.f32.mrf.mxu1 }
 0x3de   : > { %v2119_v61 = vadd.f32 %v2116_v56, %v2111_v59  ;;  %v2120_v62 = vmax.f32 %v2118_v58, 0.0 }
 0x3e0   : > { %v2121_v63 = vmax.f32 %v2119_v61, 0.0 }
 0x3e2   : > { %v2293_v0 = vpack.c.bf16 %v2121_v63, %v2120_v62 }
 0x3e4   : > { %2130 = vst [vmem:[%s302_s14] sm:$0xff] %v2293_v0 }
 0x3e5 PF: > { %s18_s27 = sadd.s32 1, %s2332_s27  }
 0x3e6   : > { %p15_p4 = scmp.ge.s32.totalorder %s18_s27, 4  }
 0x3e8   :  { %17 = sbr.rel (!%p15_p4) target bundleno = 1 (0x1), region = 103 }

// kernel: _lambda_.21
= control target key start
LH: loop header
LB: loop body
LE: loop exit
PB: predicated region body
PF: predicated region fallthrough
CT: control target
= control target key end

     0   :  { %s2717_s15 = smov 0   ;;  %s3109_s0 = inlined_call_operand.vmem [shape: bf16[2,16,290], index: 0, kind: input, shape index: {}]   ;;  %s3110_s1 = inlined_call_operand.vmem [shape: bf16[9,1,256], index: 1, kind: input, shape index: {}]   ;;  %s3111_s2 = inlined_call_operand.vmem [shape: bf16[9,8,16], index: 2, kind: input, shape index: {}]   ;;  %s3112_s3 = inlined_call_operand.vmem [shape: f32[8,1], index: 3, kind: input, shape index: {}]   ;;  %s3113_s4 = inlined_call_operand.vmem [shape: f32[8,1], index: 4, kind: input, shape index: {}]   ;;  %s3114_s5 = inlined_call_operand.vmem [shape: bf16[9,8,8], index: 5, kind: input, shape index: {}]   ;;  %s3115_s6 = inlined_call_operand.vmem [shape: f32[8,1], index: 6, kind: input, shape index: {}]   ;;  %s3116_s7 = inlined_call_operand.vmem [shape: f32[8,1], index: 7, kind: input, shape index: {}]   ;;  %s3117_s8 = inlined_call_operand.vmem [shape: bf16[1,8], index: 8, kind: input, shape index: {}]   ;;  %s3118_s9 = inlined_call_operand.<no memory space> [shape: f32[1,1], index: 9, kind: input, shape index: {}]   ;;  %s3119_s10 = inlined_call_operand.vmem [shape: f32[2,1,256], index: 10, kind: output, shape index: {}]  }
   0x1   :  { %v15_v0 = vstv %s3118_s9 }
   0x2   :  { %16 = vst [vmem:[#allocation3] sm:$0x1] %v15_v0 }
   0x3 LB: > { %s2456_s16 = sadd.s32 4294967295, %s2641_s15   ;;  %p2460_p0 = scmp.ge.s32.totalorder %s2641_s15, 1  ;;  %s2641_s15 = sphi %s2717_s15, %s22_s15  }
   0x4   : > { %p314_p1 = scmp.lt.s32.totalorder %s2641_s15, 3 }
   0x6   : > { %p315_p2 = pnand %p2460_p0, %p314_p1 }
   0x7   : > { %p351_p3 = scmp.lt.s32.totalorder (!%p315_p2), %s2456_s16, 1  ;;  %s2644_s30 = smov (!%p315_p2), 18  }
   0x8   : > { %318 = sbr.rel (%p315_p2) target bundleno = 1214 (0x4be), region = 60  ;;  %s2645_s11 = smov (!%p315_p2), 2  }
   0x9   : > { %s2646_s12 = smov (!%p315_p2), 32   ;;  %s2647_s13 = smov (!%p315_p2), 16  }
   0xa   : > { %s2648_s14 = smov (!%p315_p2), 34   ;;  %s2649_s17 = smov (!%p315_p2), 127  }
   0xb   : > { %s2650_s18 = smov (!%p315_p2), 111   ;;  %s2652_s22 = smov (!%p315_p2), 126  }
   0xc   : > { %s2653_s23 = smov (!%p315_p2), 112   ;;  %s2654_s24 = smov (!%p315_p2), 96  }
   0xd   : > { %v376_v1 = vlaneseq  ;;  %v2495_v2 = vld.sshfl [vmem:[%s3110_s1 + $0xa] sm:$0x11 pattern:$0x75316420]  ;;  %v2643_v3 = vmov 1966171168  }
   0xe   : > { %v374_v4 = vunpack.c.l.s4 %v2643_v3  ;;  %v2474_v5 = vld.sshfl [vmem:[%s3110_s1 + $0x4] sm:$0x11 pattern:$0x75316420]  ;;  %v881_v9 = vcombine.high %v2495_v2, %v2495_v2  ;;  %s3127_s16 = smov (!%p351_p3, %s2456_s16), 1  ;;  %vm584_vm0 = vcmask 15360  }
   0xf   : > { %v377_v6 = vshrl.u32 %v376_v1, 7  ;;  %v2503_v7 = vld.sshfl [vmem:[%s3110_s1 + $0xc] sm:$0x11 pattern:$0x75316420]  ;;  %v547_v10 = vcombine.high %v2474_v5, %v2474_v5  ;;  %s2598_s26 = smul.u32 24, %s3127_s16 }
  0x10   : > { %v375_v8 = vunpack.c.0.s8 %v374_v4  ;;  %v2482_v11 = vld.sshfl [vmem:[%s3110_s1 + $0x6] sm:$0x11 pattern:$0x75316420]  ;;  %v1012_v12 = vcombine.high %v2503_v7, %v2503_v7  ;;  %vm438_vm1 = vcmask 130048   ;;  %vm433_vm2 = vcmask 1039360  }
  0x11   : > { %v678_v13 = vcombine.high %v2482_v11, %v2482_v11  ;;  %v2516_v14 = vld.sshfl [vmem:[%s3110_s1 + $0x10] sm:$0x11 pattern:$0x75316420]  ;;  %v2743_v16 = vsub.s32 0, %v377_v6  ;;  %s2773_s29 = scalar_lea.vmem %s3109_s0, %s2598_s26  ;;  %vm918_vm3 = vcmask 146432  }
  0x12   : > { %v2741_v15 = vsub.s32 %v375_v8, %v377_v6  ;;  %v1215_v17 = vcombine.high %v2516_v14, %v2516_v14  ;;  %v2784_v50 = vld [vmem:[%s2773_s29] sm:$0xff]  ;;  %v2787_v51 = vld [vmem:[%s2773_s29 + $0xc] sm:$0xff]  ;;  %v410_v56 = vld [vmem:[%s2773_s29 + $0x8] sm:$0xf]  ;;  %vm1049_vm4 = vcmask 261120   ;;  %s2655_s27 = smov 110  }
  0x13   : > { %v2799_v55 = vcombine.high %v2784_v50, %v2787_v51  ;;  %v411_v57 = vld [vmem:[%s2773_s29 + $0x14] sm:$0xf]  ;;  %v2809_v59 = vcombine.low %v2784_v50, %v2787_v51  ;;  %v2812_v60 = vld [vmem:[%s2773_s29 + $0x8] sm:$0xf]  ;;  %s2656_s28 = smov 95   ;;  %vm1252_vm5 = vcmask 277504  }
  0x14   : > { %v888_v18 = vrot.slane %v2495_v2, %v2741_v15  ;;  %v895_v19 = vrot.slane %v881_v9, %v2741_v15  ;;  %v554_v20 = vrot.slane %v2474_v5, %v2741_v15  ;;  %v561_v21 = vrot.slane %v547_v10, %v2741_v15  ;;  %v2815_v61 = vld [vmem:[%s2773_s29 + $0x14] sm:$0xf]  ;;  %v2463_v63 = vld.sshfl [vmem:[%s3110_s1] sm:$0x11 pattern:$0x75316420] }
  0x15   : > { %v1019_v22 = vrot.slane %v2503_v7, %v2741_v15  ;;  %v1026_v23 = vrot.slane %v1012_v12, %v2741_v15  ;;  %v685_v24 = vrot.slane %v2482_v11, %v2741_v15  ;;  %v692_v25 = vrot.slane %v678_v13, %v2741_v15  ;;  %s2658_s20 = smov 17  }
  0x16   : > { %v897_v26 = vpack.i.b16 %v888_v18, %v888_v18  ;;  %v904_v27 = vpack.i.b16 %v895_v19, %v895_v19  ;;  %v563_v28 = vpack.i.b16 %v554_v20, %v554_v20  ;;  %v570_v29 = vpack.i.b16 %v561_v21, %v561_v21  ;;  %v409_v18 = vld [vmem:[%s3111_s2] sm:$0xf] }
  0x17   : > { %v1028_v30 = vpack.i.b16 %v1019_v22, %v1019_v22  ;;  %v1035_v31 = vpack.i.b16 %v1026_v23, %v1026_v23  ;;  %v694_v32 = vpack.i.b16 %v685_v24, %v685_v24  ;;  %v701_v33 = vpack.i.b16 %v692_v25, %v692_v25  ;;  %v665_v24 = vld [vmem:[%s2773_s29 + $0x8] sm:$0xf]  ;;  %v667_v25 = vld [vmem:[%s2773_s29 + $0x14] sm:$0xf] }
  0x18   : > { %v902_v34 = vrot.slane %v897_v26, %v2743_v16  ;;  %v909_v35 = vrot.slane %v904_v27, %v2743_v16  ;;  %v568_v36 = vrot.slane %v563_v28, %v2743_v16  ;;  %v575_v37 = vrot.slane %v570_v29, %v2743_v16 }
  0x19   : > { %v1033_v38 = vrot.slane %v1028_v30, %v2743_v16  ;;  %v1040_v39 = vrot.slane %v1035_v31, %v2743_v16  ;;  %v699_v40 = vrot.slane %v694_v32, %v2743_v16  ;;  %v706_v41 = vrot.slane %v701_v33, %v2743_v16  ;;  %v999_v30 = vld [vmem:[%s2773_s29 + $0x8] sm:$0xf]  ;;  %v1001_v31 = vld [vmem:[%s2773_s29 + $0x14] sm:$0xf] }
  0x1a   : > { %v2764_v42 = vcombine.low %v902_v34, %v909_v35  ;;  %v2766_v43 = vcombine.low %v568_v36, %v575_v37  ;;  %v1222_v44 = vrot.slane %v2516_v14, %v2741_v15  ;;  %v1229_v45 = vrot.slane %v1215_v17, %v2741_v15 }
  0x1b   : > { %v2775_v46 = vcombine.low %v1033_v38, %v1040_v39  ;;  %v2781_v47 = vcombine.low %v699_v40, %v706_v41  ;;  %v2468_v58 = vcombine.low %v410_v56, %v411_v57  ;;  %v2492_v62 = vcombine.low %v2812_v60, %v2815_v61 }
  0x1c   : > { %915 = vrot.lane.b32.xlu1 %v2764_v42, %s2644_s30  ;;  %581 = vrot.lane.b32.xlu0 %v2766_v43, %s2645_s11  ;;  %v1231_v48 = vpack.i.b16 %v1222_v44, %v1222_v44  ;;  %v1238_v49 = vpack.i.b16 %v1229_v45, %v1229_v45  ;;  %v372_v0 = vcombine.high %v2463_v63, %v2463_v63  ;;  %v2651_v9 = vmov 0  }
  0x1d   : > { %v379_v2 = vrot.slane %v2463_v63, %v2741_v15  ;;  %474 = vmatprep.mubr.bf16.mxu0 %v2651_v9  ;;  %1350 = vst [vmem:[#allocation2] sm:$0xff] %v2651_v9  ;;  %528 = vmatprep.mubr.bf16.mxu1 %v2651_v9  ;;  %v2465_v63 = vld [vmem:[%s3111_s2 + $0x4] sm:$0xf]  ;;  %vm613_vm6 = vcmask 1031168   ;;  %vm744_vm7 = vcmask 916480   ;;  %vm820_vm8 = vcmask 908288  }
  0x1e   : > { %v1236_v52 = vrot.slane %v1231_v48, %v2743_v16  ;;  %v1243_v53 = vrot.slane %v1238_v49, %v2743_v16  ;;  %v386_v3 = vrot.slane %v372_v0, %v2741_v15  ;;  %2623 = vset.pattern.permute.xlu1 %v2651_v9  ;;  %2624 = vset.pattern.permute.xlu0 %v2651_v9  ;;  %vm947_vm9 = vcmask 900096  }
  0x1f   : > { %v388_v4 = vpack.i.b16 %v379_v2, %v379_v2  ;;  %vm1078_vm10 = vcmask 785408   ;;  %vm3121_vm11 = vcmask 777216   ;;  %vm3120_vm12 = vcmask 769024  }
  0x20   : > { %1046 = vrot.lane.b32.xlu1 %v2775_v46, %s2646_s12  ;;  %712 = vrot.lane.b32.xlu0 %v2781_v47, %s2647_s13  ;;  %v2795_v54 = vcombine.low %v1236_v52, %v1243_v53  ;;  %v395_v5 = vpack.i.b16 %v386_v3, %v386_v3  ;;  %vm1351_vm13 = vcmask 273408   ;;  %vm1367_vm14 = vcmask 1043592  }
  0x21   : > { %v393_v6 = vrot.slane %v388_v4, %v2743_v16  ;;  %1352 = vst.msk [vmem:[#allocation2 + $0x8] sm:$0xf] %vm1351_vm13, %v2651_v9  ;;  %vm1368_vm15 = vcmask 1047556   ;;  %vm1363_vm13 = vcmask 138240  }
  0x22   : > { %v400_v7 = vrot.slane %v395_v5, %v2743_v16 }
  0x24   : > { %1249 = vrot.lane.b32.xlu0 %v2795_v54, %s2648_s14  ;;  %429 = vrot.lane.b32.xlu1 %v2799_v55, %s2649_s17  ;;  %v2834_v8 = vcombine.low %v393_v6, %v400_v7 }
  0x26   : > { %v407_v10 = vmul.bf16 %v2834_v8, %v2784_v50  ;;  %v408_v11 = vmul.bf16 %v2834_v8, %v2787_v51 }
  0x28   : > { %431 = vrot.lane.b32.xlu0 %v2468_v58, %s2649_s17  ;;  %427 = vrot.lane.b32.xlu1 %v2809_v59, %s2649_s17  ;;  %v2471_v12 = vcombine.high %v407_v10, %v408_v11  ;;  %v2470_v13 = vcombine.low %v407_v10, %v408_v11  ;;  %v1130_v10 = vld [vmem:[%s2773_s29 + $0x8] sm:$0xf]  ;;  %v1132_v11 = vld [vmem:[%s2773_s29 + $0x14] sm:$0xf]  ;;  %s2657_s29 = smov 94  }
  0x2a   : > { %510 = vmatprep.subr.bf16.mxu1 %v2471_v12 }
  0x2b   : > { %511 = vmatpush1.bf16.msra.mxu1 %v2470_v13  ;;  %v2513_v13 = vcombine.low %v1130_v10, %v1132_v11 }
  0x2c   : > { %816 = vrot.lane.b32.xlu0 %v2799_v55, %s2650_s18  ;;  %818 = vrot.lane.b32.xlu1 %v2492_v62, %s2650_s18 }
  0x2e   : > { %2472 = vmatmul.mubr.msk.bf16.vlgmr.msra.gmra.mxu1 %vm438_vm1, %v409_v18 }
  0x2f   : > { %784 = vmatprep.mubr.bf16.mxu1 %v2651_v9 }
  0x30   : > { %814 = vrot.lane.b32.xlu0 %v2809_v59, %s2650_s18 }
  0x8e   : > { %v916_v14 = vpop.permute.xlu1 %915  ;;  %v582_v17 = vpop.permute.xlu0 %581 }
  0x8f   : > { %v583_v19 = vrot.slane %v582_v17, 4  ;;  %v917_v49 = vrot.slane %v916_v14, 4 }
  0x91   : > { %v589_v20 = vmul.bf16 %v583_v19, %v410_v56  ;;  %v591_v21 = vmul.bf16 %v583_v19, %v411_v57  ;;  %v585_v26 = vsel %vm584_vm0, %v583_v19, %v582_v17  ;;  %v919_v0 = vsel %vm918_vm3, %v917_v49, %v916_v14 }
  0x92   : > { %v1047_v22 = vpop.permute.xlu1 %1046  ;;  %v713_v23 = vpop.permute.xlu0 %712  ;;  %v588_v34 = vmul.bf16 %v585_v26, %v2784_v50  ;;  %v590_v38 = vmul.bf16 %v585_v26, %v2787_v51  ;;  %v923_v3 = vmul.bf16 %v917_v49, %v2812_v60  ;;  %v925_v4 = vmul.bf16 %v917_v49, %v2815_v61 }
  0x93   : > { %v1048_v27 = vrot.slane %v1047_v22, 4  ;;  %v714_v28 = vrot.slane %v713_v23, 4  ;;  %v2479_v29 = vcombine.low %v589_v20, %v591_v21  ;;  %v922_v5 = vmul.bf16 %v919_v0, %v2784_v50 }
  0x94   : > { %v2478_v56 = vcombine.high %v588_v34, %v590_v38  ;;  %v2477_v2 = vcombine.low %v588_v34, %v590_v38  ;;  %v924_v6 = vmul.bf16 %v919_v0, %v2787_v51  ;;  %v2500_v12 = vcombine.low %v923_v3, %v925_v4 }
  0x95   : > { %611 = vrot.lane.b32.xlu1 %v2479_v29, %s2652_s22  ;;  %v720_v32 = vmul.bf16 %v714_v28, %v665_v24  ;;  %v722_v33 = vmul.bf16 %v714_v28, %v667_v25  ;;  %v716_v35 = vsel %vm438_vm1, %v714_v28, %v713_v23  ;;  %v1054_v40 = vmul.bf16 %v1048_v27, %v999_v30 }
  0x96   : > { %v1250_v36 = vpop.permute.xlu0 %1249  ;;  %v430_v37 = vpop.permute.xlu1 %429  ;;  %v1056_v41 = vmul.bf16 %v1048_v27, %v1001_v31  ;;  %v719_v44 = vmul.bf16 %v716_v35, %v2784_v50  ;;  %v721_v45 = vmul.bf16 %v716_v35, %v2787_v51  ;;  %v1050_v60 = vsel %vm1049_vm4, %v1048_v27, %v1047_v22 }
  0x97   : > { %v2487_v39 = vcombine.low %v720_v32, %v722_v33  ;;  %v2499_v61 = vcombine.high %v922_v5, %v924_v6  ;;  %v1053_v14 = vmul.bf16 %v1050_v60, %v2784_v50  ;;  %v1055_v17 = vmul.bf16 %v1050_v60, %v2787_v51 }
  0x98   : > { %v2508_v48 = vcombine.low %v1054_v40, %v1056_v41  ;;  %v2486_v62 = vcombine.high %v719_v44, %v721_v45  ;;  %v2485_v7 = vcombine.low %v719_v44, %v721_v45  ;;  %v1251_v18 = vrot.slane %v1250_v36, 4  ;;  %v2476_v40 = vld [vmem:[%s3111_s2 + $0x8] sm:$0xf]  ;;  %v2484_v45 = vld [vmem:[%s3111_s2 + $0xc] sm:$0xf] }
  0x99   : > { %742 = vrot.lane.b32.xlu0 %v2487_v39, %s2653_s23  ;;  %v2498_v19 = vcombine.low %v922_v5, %v924_v6  ;;  %v2507_v20 = vcombine.high %v1053_v14, %v1055_v17  ;;  %v2506_v22 = vcombine.low %v1053_v14, %v1055_v17  ;;  %v2518_v17 = vld [vmem:[%s3111_s2 + $0x20] sm:$0xf] }
  0x9a   : > { %v432_v52 = vpop.permute.xlu0 %431  ;;  %v428_v53 = vpop.permute.xlu1 %427  ;;  %1076 = vrot.lane.b32.xlu1 %v2508_v48, %s2654_s24  ;;  %v1253_v21 = vsel %vm1252_vm5, %v1251_v18, %v1250_v36  ;;  %v1257_v25 = vmul.bf16 %v1251_v18, %v1130_v10  ;;  %v1259_v26 = vmul.bf16 %v1251_v18, %v1132_v11 }
  0x9b   : > { %v435_v57 = vsel %vm433_vm2, %v430_v37, %v432_v52  ;;  %v434_v58 = vsel %vm433_vm2, %v428_v53, %v430_v37  ;;  %v1256_v23 = vmul.bf16 %v1253_v21, %v2784_v50  ;;  %v1258_v24 = vmul.bf16 %v1253_v21, %v2787_v51  ;;  %v1332_v51 = vld [vmem:[%s3112_s3] sm:$0xff] }
  0x9c   : > { %456 = vmatprep.subr.bf16.mxu0 %v435_v57  ;;  %v2521_v28 = vcombine.low %v1257_v25, %v1259_v26  ;;  %v2489_v57 = vld [vmem:[%s3111_s2 + $0x10] sm:$0xf] }
  0x9d   : > { %609 = vrot.lane.b32.xlu0 %v2478_v56, %s2652_s22  ;;  %457 = vmatpush1.bf16.msra.mxu0 %v434_v58  ;;  %v2520_v27 = vcombine.high %v1256_v23, %v1258_v24  ;;  %v2519_v50 = vcombine.low %v1256_v23, %v1258_v24 }
  0x9e   : > { %740 = vrot.lane.b32.xlu1 %v2486_v62, %s2653_s23  ;;  %v819_v29 = vpop.permute.xlu1 %818 }
  0xa0   : > { %2469 = vmatmul.mubr.msk.bf16.vlgmr.msra.gmra.mxu0 %vm438_vm1, %v2465_v63  ;;  %v2497_v63 = vld [vmem:[%s3111_s2 + $0x14] sm:$0xf] }
  0xa1   : > { %607 = vrot.lane.b32.xlu0 %v2477_v2, %s2652_s22  ;;  %653 = vmatprep.mubr.bf16.mxu0 %v2651_v9 }
  0xa2   : > { %738 = vrot.lane.b32.xlu1 %v2485_v7, %s2653_s23  ;;  %v2505_v7 = vld [vmem:[%s3111_s2 + $0x18] sm:$0xf] }
  0xa5   : > { %945 = vrot.lane.b32.xlu0 %v2500_v12, %s2655_s27  ;;  %v2510_v12 = vld [vmem:[%s3111_s2 + $0x1c] sm:$0xf] }
  0xa6   : > { %943 = vrot.lane.b32.xlu1 %v2499_v61, %s2655_s27 }
  0xa9   : > { %1152 = vrot.lane.b32.xlu0 %v2513_v13, %s2656_s28 }
  0xaa   : > { %941 = vrot.lane.b32.xlu1 %v2498_v19, %s2655_s27 }
  0xad   : > { %1074 = vrot.lane.b32.xlu0 %v2507_v20, %s2654_s24 }
  0xae   : > { %1150 = vrot.lane.b32.xlu1 %v2799_v55, %s2656_s28  ;;  %v1340_v55 = vld [vmem:[%s3113_s4] sm:$0xff] }
  0xb1   : > { %1072 = vrot.lane.b32.xlu0 %v2506_v22, %s2654_s24 }
  0xb2   : > { %1148 = vrot.lane.b32.xlu1 %v2809_v59, %s2656_s28  ;;  %v817_v59 = vpop.permute.xlu0 %816 }
  0xb3   : > { %v822_v39 = vsel %vm820_vm8, %v817_v59, %v819_v29 }
  0xb5   : > { %1277 = vrot.lane.b32.xlu0 %v2520_v27, %s2657_s29 }
  0xb6   : > { %1279 = vrot.lane.b32.xlu1 %v2521_v28, %s2657_s29  ;;  %v815_v30 = vpop.permute.xlu0 %814 }
  0xb7   : > { %v821_v48 = vsel %vm820_vm8, %v815_v30, %v817_v59 }
  0xb9   : > { %1275 = vrot.lane.b32.xlu0 %v2519_v50, %s2657_s29 }
  0xba   : > { %1335 = vperm.xlu1 %2623, %v1332_v51  }
  0xbd   : > { %1343 = vperm.xlu0 %2624, %v1340_v55  }
  0xc1   : > { %1712 = vrot.lane.b32.xlu0 %v2781_v47, %s2647_s13 }
  0xc5   : > { %2028 = vrot.lane.b32.xlu0 %v2775_v46, %s2646_s12 }
  0xee   : > { %v530_v18 = vpop.f32.mrf.mxu1 }
  0xf0   : > { %v532_v19 = vpop.f32.mrf.mxu1 }
  0xf2   : > { %v534_v20 = vpop.f32.mrf.mxu1 }
  0xf4   : > { %v535_v21 = vpop.f32.mrf.mxu1 }
 0x107   : > { %v612_v31 = vpop.permute.xlu1 %611 }
 0x10b   : > { %v743_v32 = vpop.permute.xlu0 %742 }
 0x10c   : > { %v1077_v33 = vpop.permute.xlu1 %1076 }
 0x10f   : > { %v610_v34 = vpop.permute.xlu0 %609 }
 0x110   : > { %v615_v35 = vsel %vm613_vm6, %v610_v34, %v612_v31  ;;  %v741_v36 = vpop.permute.xlu1 %740 }
 0x111   : > { %635 = vmatprep.subr.bf16.mxu0 %v615_v35  ;;  %v746_v37 = vsel %vm744_vm7, %v741_v36, %v743_v32 }
 0x112   : > { %766 = vmatprep.subr.bf16.mxu1 %v746_v37 }
 0x113   : > { %v608_v47 = vpop.permute.xlu0 %607 }
 0x114   : > { %v614_v46 = vsel %vm613_vm6, %v608_v47, %v610_v34  ;;  %v739_v38 = vpop.permute.xlu1 %738 }
 0x115   : > { %636 = vmatpush1.bf16.msra.mxu0 %v614_v46  ;;  %v745_v41 = vsel %vm744_vm7, %v739_v38, %v741_v36 }
 0x116   : > { %842 = vmatprep.subr.bf16.mxu0 %v822_v39  ;;  %767 = vmatpush1.bf16.msra.mxu1 %v745_v41 }
 0x117   : > { %v946_v44 = vpop.permute.xlu0 %945 }
 0x118   : > { %2480 = vmatmul.mubr.msk.bf16.vlgmr.msra.gmra.mxu0 %vm438_vm1, %v2476_v40  ;;  %v944_v49 = vpop.permute.xlu1 %943 }
 0x119   : > { %843 = vmatpush1.bf16.msra.mxu0 %v821_v48  ;;  %860 = vmatprep.mubr.bf16.mxu0 %v2651_v9  ;;  %v949_v52 = vsel %vm947_vm9, %v944_v49, %v946_v44 }
 0x11a   : > { %2488 = vmatmul.mubr.msk.bf16.vlgmr.msra.gmra.mxu1 %vm438_vm1, %v2484_v45  ;;  %969 = vmatprep.subr.bf16.mxu1 %v949_v52 }
 0x11b   : > { %v1153_v53 = vpop.permute.xlu0 %1152  ;;  %987 = vmatprep.mubr.bf16.mxu1 %v2651_v9 }
 0x11c   : > { %v942_v56 = vpop.permute.xlu1 %941 }
 0x11d   : > { %v948_v58 = vsel %vm947_vm9, %v942_v56, %v944_v49 }
 0x11e   : > { %970 = vmatpush1.bf16.msra.mxu1 %v948_v58 }
 0x11f   : > { %v1075_v62 = vpop.permute.xlu0 %1074 }
 0x120   : > { %2493 = vmatmul.mubr.msk.bf16.vlgmr.msra.gmra.mxu0 %vm438_vm1, %v2489_v57  ;;  %v1080_v0 = vsel %vm1078_vm10, %v1075_v62, %v1077_v33  ;;  %v1151_v2 = vpop.permute.xlu1 %1150 }
 0x121   : > { %1100 = vmatprep.subr.bf16.mxu0 %v1080_v0  ;;  %1118 = vmatprep.mubr.bf16.mxu0 %v2651_v9  ;;  %v1156_v3 = vsel %vm3121_vm11, %v1151_v2, %v1153_v53 }
 0x122   : > { %2501 = vmatmul.mubr.msk.bf16.vlgmr.msra.gmra.mxu1 %vm438_vm1, %v2497_v63  ;;  %1176 = vmatprep.subr.bf16.mxu1 %v1156_v3 }
 0x123   : > { %v1073_v4 = vpop.permute.xlu0 %1072  ;;  %1194 = vmatprep.mubr.bf16.mxu1 %v2651_v9 }
 0x124   : > { %v1079_v5 = vsel %vm1078_vm10, %v1073_v4, %v1075_v62  ;;  %v1149_v6 = vpop.permute.xlu1 %1148 }
 0x125   : > { %1101 = vmatpush1.bf16.msra.mxu0 %v1079_v5  ;;  %v1155_v10 = vsel %vm3121_vm11, %v1149_v6, %v1151_v2  ;;  %vm1369_vm11 = vmor %vm1368_vm15, %vm1367_vm14  ;;  %vm1443_vm14 = vcmask 1043456  }
 0x126   : > { %1177 = vmatpush1.bf16.msra.mxu1 %v1155_v10 }
 0x127   : > { %v1278_v11 = vpop.permute.xlu0 %1277 }
 0x128   : > { %2509 = vmatmul.mubr.msk.bf16.vlgmr.msra.gmra.mxu0 %vm438_vm1, %v2505_v7  ;;  %v1280_v60 = vpop.permute.xlu1 %1279 }
 0x129   : > { %1321 = vmatprep.mubr.bf16.mxu0 %v2651_v9  ;;  %v1283_v61 = vsel %vm3120_vm12, %v1278_v11, %v1280_v60 }
 0x12a   : > { %2514 = vmatmul.mubr.msk.bf16.vlgmr.msra.gmra.mxu1 %vm438_vm1, %v2510_v12  ;;  %1303 = vmatprep.subr.bf16.mxu0 %v1283_v61 }
 0x12b   : > { %v1276_v13 = vpop.permute.xlu0 %1275  ;;  %1482 = vmatprep.mubr.bf16.mxu1 %v2651_v9 }
 0x12c   : > { %v1282_v14 = vsel %vm3120_vm12, %v1276_v13, %v1278_v11  ;;  %vm1371_vm12 = vcmask 134144  }
 0x12d   : > { %1304 = vmatpush1.bf16.msra.mxu0 %v1282_v14 }
 0x130   : > { %2522 = vmatmul.mubr.msk.bf16.vlgmr.msra.gmra.mxu0 %vm438_vm1, %v2518_v17 }
 0x131   : > { %1537 = vmatprep.mubr.bf16.mxu0 %v2651_v9 }
 0x135   : > { %v1336_v4 = vpop.permute.xlu1 %1335 }
 0x138   : > { %v1344_v12 = vpop.permute.xlu0 %1343 }
 0x160   : > { %v476_v22 = vpop.f32.mrf.mxu0 }
 0x161   : > { %v531_v23 = vadd.f32 %v530_v18, %v476_v22 }
 0x162   : > { %v478_v24 = vpop.f32.mrf.mxu0 }
 0x163   : > { %v533_v25 = vadd.f32 %v532_v19, %v478_v24 }
 0x164   : > { %v480_v26 = vpop.f32.mrf.mxu0 }
 0x166   : > { %v481_v27 = vpop.f32.mrf.mxu0 }
 0x1d8   : > { %v655_v28 = vpop.f32.mrf.mxu0 }
 0x1d9   : > { %v662_v31 = vadd.f32 %v655_v28, %v531_v23  ;;  %v1713_v28 = vpop.permute.xlu0 %1712 }
 0x1da   : > { %v786_v50 = vpop.f32.mrf.mxu1  ;;  %v657_v51 = vpop.f32.mrf.mxu0 }
 0x1db   : > { %v663_v34 = vadd.f32 %v657_v51, %v533_v25  ;;  %v793_v37 = vadd.f32 %v786_v50, %v662_v31 }
 0x1dc   : > { %v788_v55 = vpop.f32.mrf.mxu1  ;;  %v659_v59 = vpop.f32.mrf.mxu0 }
 0x1dd   : > { %v794_v38 = vadd.f32 %v788_v55, %v663_v34  ;;  %v2029_v34 = vpop.permute.xlu0 %2028 }
 0x1de   : > { %v790_v29 = vpop.f32.mrf.mxu1  ;;  %v660_v30 = vpop.f32.mrf.mxu0 }
 0x1df   : > { %v1714_v29 = vrot.slane %v1713_v28, 4 }
 0x1e0   : > { %v791_v32 = vpop.f32.mrf.mxu1  ;;  %v862_v33 = vpop.f32.mrf.mxu0 }
 0x1e1   : > { %v869_v39 = vadd.f32 %v862_v33, %v793_v37 }
 0x1e2   : > { %v989_v35 = vpop.f32.mrf.mxu1  ;;  %v864_v36 = vpop.f32.mrf.mxu0 }
 0x1e3   : > { %v870_v44 = vadd.f32 %v864_v36, %v794_v38  ;;  %v996_v49 = vadd.f32 %v989_v35, %v869_v39  ;;  %v1419_v38 = vld [vmem:[%s3114_s5] sm:$0xf] }
 0x1e4   : > { %v991_v47 = vpop.f32.mrf.mxu1  ;;  %v866_v46 = vpop.f32.mrf.mxu0 }
 0x1e5   : > { %v997_v56 = vadd.f32 %v991_v47, %v870_v44  ;;  %v2030_v47 = vrot.slane %v2029_v34, 4 }
 0x1e6   : > { %v993_v40 = vpop.f32.mrf.mxu1  ;;  %v867_v41 = vpop.f32.mrf.mxu0 }
 0x1e8   : > { %v994_v45 = vpop.f32.mrf.mxu1  ;;  %v1120_v48 = vpop.f32.mrf.mxu0 }
 0x1e9   : > { %v1127_v57 = vadd.f32 %v1120_v48, %v996_v49 }
 0x1ea   : > { %v1196_v52 = vpop.f32.mrf.mxu1  ;;  %v1122_v53 = vpop.f32.mrf.mxu0 }
 0x1eb   : > { %v1128_v63 = vadd.f32 %v1122_v53, %v997_v56  ;;  %v1203_v3 = vadd.f32 %v1196_v52, %v1127_v57  ;;  %v1715_v56 = vsel %vm438_vm1, %v1714_v29, %v1713_v28 }
 0x1ec   : > { %v1198_v58 = vpop.f32.mrf.mxu1  ;;  %v1124_v62 = vpop.f32.mrf.mxu0 }
 0x1ed   : > { %v1204_v7 = vadd.f32 %v1198_v58, %v1128_v63 }
 0x1ee   : > { %v1200_v0 = vpop.f32.mrf.mxu1  ;;  %v1125_v2 = vpop.f32.mrf.mxu0 }
 0x1f0   : > { %v1201_v5 = vpop.f32.mrf.mxu1  ;;  %v1323_v6 = vpop.f32.mrf.mxu0 }
 0x1f1   : > { %v1330_v10 = vadd.f32 %v1323_v6, %v1203_v3  ;;  %v2031_v5 = vsel %vm1049_vm4, %v2030_v47, %v2029_v34  ;;  %vm2400_vm4 = vcmp.lt.s32.totalorder %v376_v1, 256 }
 0x1f2   : > { %v1325_v11 = vpop.f32.mrf.mxu0 }
 0x1f3   : > { %v1331_v60 = vadd.f32 %v1325_v11, %v1204_v7  ;;  %v1338_v61 = vmul.f32 %v1336_v4, %v1330_v10 }
 0x1f4   : > { %v1327_v13 = vpop.f32.mrf.mxu0 }
 0x1f5   : > { %v1339_v14 = vmul.f32 %v1336_v4, %v1331_v60  ;;  %v1346_v17 = vadd.f32 %v1344_v12, %v1338_v61 }
 0x1f6   : > { %v1328_v18 = vpop.f32.mrf.mxu0 }
 0x1f7   : > { %v1347_v19 = vadd.f32 %v1344_v12, %v1339_v14  ;;  %v1348_v20 = vmax.f32 %v1346_v17, 0.0 }
 0x1f9   : > { %v1349_v21 = vmax.f32 %v1347_v19, 0.0 }
 0x1fb   : > { %v2597_v22 = vpack.c.bf16 %v1349_v21, %v1348_v20 }
 0x1fd   : > { %1360 = vrot.lane.b32.xlu1 %v2597_v22, %s2658_s20  ;;  %v2299_v22 = vld [vmem:[%s3115_s6] sm:$0xff] }
 0x201   : > { %1589 = vrot.lane.b32.xlu1 %v2766_v43, %s2645_s11 }
 0x205   : > { %1905 = vrot.lane.b32.xlu1 %v2764_v42, %s2644_s30 }
 0x209   : > { %2221 = vrot.lane.b32.xlu1 %v2795_v54, %s2648_s14 }
 0x26f   : > { %v1361_v23 = vpop.permute.xlu1 %1360 }
 0x270   : > { %v1362_v24 = vrot.slane %v1361_v23, 4 }
 0x272   : > { %v1364_v25 = vsel %vm1363_vm13, %v1362_v24, %v1361_v23  ;;  %1372 = vst.msk [vmem:[#allocation2 + $0x8] sm:$0xf] %vm1371_vm12, %v1362_v24  ;;  %v2307_v23 = vld [vmem:[%s3116_s7] sm:$0xff]  ;;  %v2320_v24 = vld [vmem:[#allocation3] sm:$0x1] }
 0x273   : > { %1370 = vst.msk [vmem:[#allocation2] sm:$0xff] %vm1369_vm11, %v1364_v25  ;;  %v1590_v50 = vpop.permute.xlu1 %1589  ;;  %vm1439_vm11 = vcmask 64512  }
 0x274   : > { %v1591_v30 = vrot.slane %v1590_v50, 4 }
 0x276   : > { %v1592_v48 = vsel %vm584_vm0, %v1591_v30, %v1590_v50  ;;  %vm3122_vm0 = vcmask 777216  }
 0x277   : > { %v1906_v35 = vpop.permute.xlu1 %1905  ;;  %vm3123_vm1 = vmmov %vm3122_vm0 }
 0x278   : > { %v1907_v46 = vrot.slane %v1906_v35, 4 }
 0x279   : > { %v1420_v26 = vld [vmem:[#allocation2 + $0x8] sm:$0xf] }
 0x27a   : > { %v2966_v27 = vld [vmem:[#allocation2] sm:$0xff]  ;;  %v1791_v43 = vld [vmem:[#allocation2 + $0x8] sm:$0xf]  ;;  %v2529_v51 = vcombine.low %v1420_v26, %v1420_v26  ;;  %v1596_v37 = vmul.bf16 %v1591_v30, %v1420_v26  ;;  %v1908_v2 = vsel %vm918_vm3, %v1907_v46, %v1906_v35 }
 0x27b   : > { %v2557_v42 = vcombine.low %v1791_v43, %v1791_v43  ;;  %v1418_v54 = vmul.bf16 %v2834_v8, %v2966_v27  ;;  %v2528_v31 = vcombine.high %v2966_v27, %v2966_v27  ;;  %v2527_v32 = vcombine.low %v2966_v27, %v2966_v27  ;;  %v1668_v33 = vld [vmem:[#allocation2 + $0x8] sm:$0xf]  ;;  %v2222_v3 = vpop.permute.xlu1 %2221 }
 0x27c   : > { %1435 = vrot.lane.b32.xlu0 %v2529_v51, %s2649_s17  ;;  %v1719_v36 = vmul.bf16 %v1714_v29, %v1668_v33  ;;  %v1984_v39 = vld [vmem:[#allocation2 + $0x8] sm:$0xf]  ;;  %v1912_v41 = vmul.bf16 %v1907_v46, %v1791_v43  ;;  %v2542_v45 = vcombine.low %v1596_v37, %v1596_v37  ;;  %v1595_v49 = vmul.bf16 %v2966_v27, %v1592_v48  ;;  %v2526_v51 = vld [vmem:[%s3114_s5 + $0x4] sm:$0xf] }
 0x27d   : > { %1806 = vrot.lane.b32.xlu1 %v2557_v42, %s2650_s18  ;;  %v2533_v55 = vcombine.high %v1418_v54, %v1418_v54  ;;  %v2532_v59 = vcombine.low %v1418_v54, %v1418_v54  ;;  %v2035_v40 = vmul.bf16 %v2030_v47, %v1984_v39  ;;  %v1718_v57 = vmul.bf16 %v1715_v56, %v2966_v27  ;;  %v2107_v14 = vld [vmem:[#allocation2 + $0x8] sm:$0xf] }
 0x27e   : > { %v2551_v44 = vcombine.low %v1719_v36, %v1719_v36  ;;  %v2566_v53 = vcombine.low %v1912_v41, %v1912_v41  ;;  %v2540_v58 = vcombine.low %v1595_v49, %v1595_v49  ;;  %v2541_v62 = vcombine.high %v1595_v49, %v1595_v49  ;;  %v2539_v47 = vld [vmem:[%s3114_s5 + $0x8] sm:$0xf] }
 0x27f   : > { %2534 = vmatprep.subr.msk.bf16.mxu0 %vm1443_vm14, %v2533_v55  ;;  %v1500_v8 = vsel %vm1443_vm14, %v2532_v59, 0  ;;  %v2575_v52 = vcombine.low %v2035_v40, %v2035_v40  ;;  %v2550_v63 = vcombine.high %v1718_v57, %v1718_v57  ;;  %v2549_v0 = vcombine.low %v1718_v57, %v1718_v57 }
 0x280   : > { %1431 = vrot.lane.b32.xlu0 %v2527_v32, %s2649_s17  ;;  %1520 = vmatpush1.bf16.msra.mxu0 %v1500_v8  ;;  %v1911_v4 = vmul.bf16 %v1908_v2, %v2966_v27  ;;  %v2223_v6 = vrot.slane %v2222_v3, 4  ;;  %v2034_v7 = vmul.bf16 %v2031_v5, %v2966_v27  ;;  %v2581_v18 = vcombine.low %v2107_v14, %v2107_v14 }
 0x281   : > { %1433 = vrot.lane.b32.xlu1 %v2528_v31, %s2649_s17 }
 0x282   : > { %v2565_v10 = vcombine.high %v1911_v4, %v1911_v4  ;;  %v2564_v11 = vcombine.low %v1911_v4, %v1911_v4  ;;  %v2224_v12 = vsel %vm1252_vm5, %v2223_v6, %v2222_v3  ;;  %v2573_v61 = vcombine.low %v2034_v7, %v2034_v7 }
 0x283   : > { %2535 = vmatmul.mubr.msk.bf16.vlgmr.msra.gmra.mxu0 %vm1439_vm11, %v1419_v38  ;;  %v2227_v60 = vmul.bf16 %v2224_v12, %v2966_v27  ;;  %v2574_v13 = vcombine.high %v2034_v7, %v2034_v7  ;;  %v2228_v17 = vmul.bf16 %v2223_v6, %v2107_v14  ;;  %v2572_v7 = vld [vmem:[%s3114_s5 + $0x18] sm:$0xf] }
 0x284   : > { %1804 = vrot.lane.b32.xlu0 %v2528_v31, %s2650_s18  ;;  %1779 = vmatprep.mubr.bf16.mxu0 %v2651_v9 }
 0x285   : > { %1802 = vrot.lane.b32.xlu1 %v2527_v32, %s2650_s18  ;;  %v2588_v19 = vcombine.low %v2227_v60, %v2227_v60  ;;  %v2589_v20 = vcombine.high %v2227_v60, %v2227_v60  ;;  %v2590_v21 = vcombine.low %v2228_v17, %v2228_v17 }
 0x288   : > { %1734 = vrot.lane.b32.xlu0 %v2551_v44, %s2653_s23 }
 0x289   : > { %1611 = vrot.lane.b32.xlu1 %v2542_v45, %s2652_s22  ;;  %v2548_v45 = vld [vmem:[%s3114_s5 + $0xc] sm:$0xf] }
 0x28c   : > { %1927 = vrot.lane.b32.xlu0 %v2566_v53, %s2655_s27 }
 0x28d   : > { %2050 = vrot.lane.b32.xlu1 %v2575_v52, %s2654_s24  ;;  %v2554_v52 = vld [vmem:[%s3114_s5 + $0x10] sm:$0xf] }
 0x290   : > { %1609 = vrot.lane.b32.xlu0 %v2541_v62, %s2652_s22 }
 0x291   : > { %1607 = vrot.lane.b32.xlu1 %v2540_v58, %s2652_s22  ;;  %s2462_s22 = sshll.u32 %s3127_s16, 1 }
 0x294   : > { %1730 = vrot.lane.b32.xlu0 %v2549_v0, %s2653_s23 }
 0x295   : > { %1732 = vrot.lane.b32.xlu1 %v2550_v63, %s2653_s23  ;;  %v2563_v63 = vld [vmem:[%s3114_s5 + $0x14] sm:$0xf] }
 0x298   : > { %2118 = vrot.lane.b32.xlu0 %v2527_v32, %s2656_s28 }
 0x299   : > { %2120 = vrot.lane.b32.xlu1 %v2528_v31, %s2656_s28 }
 0x29c   : > { %1923 = vrot.lane.b32.xlu0 %v2564_v11, %s2655_s27 }
 0x29d   : > { %1925 = vrot.lane.b32.xlu1 %v2565_v10, %s2655_s27  ;;  %s359_s27 = scalar_lea.vmem %s3119_s10, %s2462_s22 }
 0x2a0   : > { %2048 = vrot.lane.b32.xlu0 %v2574_v13, %s2654_s24 }
 0x2a1   : > { %2046 = vrot.lane.b32.xlu1 %v2573_v61, %s2654_s24  ;;  %v2578_v61 = vld [vmem:[%s3114_s5 + $0x1c] sm:$0xf] }
 0x2a4   : > { %2122 = vrot.lane.b32.xlu0 %v2581_v18, %s2656_s28 }
 0x2a5   : > { %2239 = vrot.lane.b32.xlu1 %v2588_v19, %s2657_s29 }
 0x2a8   : > { %2241 = vrot.lane.b32.xlu0 %v2589_v20, %s2657_s29  ;;  %v2587_v20 = vld [vmem:[%s3114_s5 + $0x20] sm:$0xf] }
 0x2a9   : > { %2243 = vrot.lane.b32.xlu1 %v2590_v21, %s2657_s29 }
 0x2ac   : > { %2302 = vperm.xlu0 %2624, %v2299_v22  }
 0x2ad   : > { %2310 = vperm.xlu1 %2623, %v2307_v23  }
 0x2b0   : > { %2323 = vperm.xlu0 %2624, %v2320_v24  }
 0x2ee   : > { %v1436_v25 = vpop.permute.xlu0 %1435 }
 0x2ef   : > { %v1807_v26 = vpop.permute.xlu1 %1806 }
 0x2f2   : > { %v1432_v27 = vpop.permute.xlu0 %1431 }
 0x2f3   : > { %v1434_v43 = vpop.permute.xlu1 %1433 }
 0x2f4   : > { %v1437_v28 = vsel %vm433_vm2, %v1432_v27, %v1434_v43  ;;  %v1438_v50 = vsel %vm433_vm2, %v1434_v43, %v1436_v25  ;;  %vm3124_vm2 = vcmask 769024  }
 0x2f5   : > { %v1445_v42 = vsel %vm1443_vm14, %v1437_v28, 0  ;;  %2530 = vmatprep.subr.msk.bf16.mxu1 %vm1443_vm14, %v1438_v50  ;;  %vm3125_vm3 = vmmov %vm3124_vm2 }
 0x2f6   : > { %1465 = vmatpush1.bf16.msra.mxu1 %v1445_v42  ;;  %v1805_v54 = vpop.permute.xlu0 %1804 }
 0x2f7   : > { %v1803_v55 = vpop.permute.xlu1 %1802  ;;  %v1809_v36 = vsel %vm820_vm8, %v1805_v54, %v1807_v26 }
 0x2f8   : > { %v1808_v37 = vsel %vm820_vm8, %v1803_v55, %v1805_v54 }
 0x2f9   : > { %2531 = vmatmul.mubr.msk.bf16.vlgmr.msra.gmra.mxu1 %vm1439_vm11, %v2526_v51  ;;  %v1814_v41 = vsel %vm1443_vm14, %v1808_v37, 0 }
 0x2fa   : > { %1656 = vmatprep.mubr.bf16.mxu1 %v2651_v9  ;;  %v1735_v59 = vpop.permute.xlu0 %1734 }
 0x2fb   : > { %v1612_v29 = vpop.permute.xlu1 %1611 }
 0x2fe   : > { %v1928_v30 = vpop.permute.xlu0 %1927 }
 0x2ff   : > { %v2051_v31 = vpop.permute.xlu1 %2050 }
 0x302   : > { %v1610_v32 = vpop.permute.xlu0 %1609 }
 0x303   : > { %v1608_v33 = vpop.permute.xlu1 %1607  ;;  %v1614_v34 = vsel %vm613_vm6, %v1610_v32, %v1612_v29 }
 0x304   : > { %v1613_v35 = vsel %vm613_vm6, %v1608_v33, %v1610_v32  ;;  %2543 = vmatprep.subr.msk.bf16.mxu1 %vm1443_vm14, %v1614_v34 }
 0x305   : > { %v1619_v8 = vsel %vm1443_vm14, %v1613_v35, 0 }
 0x306   : > { %1639 = vmatpush1.bf16.msra.mxu1 %v1619_v8  ;;  %v1731_v46 = vpop.permute.xlu0 %1730 }
 0x307   : > { %2558 = vmatprep.subr.msk.bf16.mxu1 %vm1443_vm14, %v1809_v36  ;;  %v1733_v38 = vpop.permute.xlu1 %1732 }
 0x308   : > { %v1736_v39 = vsel %vm744_vm7, %v1731_v46, %v1733_v38  ;;  %v1737_v40 = vsel %vm744_vm7, %v1733_v38, %v1735_v59 }
 0x309   : > { %v1742_v44 = vsel %vm1443_vm14, %v1736_v39, 0  ;;  %2544 = vmatmul.mubr.msk.bf16.vlgmr.msra.gmra.mxu1 %vm1439_vm11, %v2539_v47  ;;  %2552 = vmatprep.subr.msk.bf16.mxu0 %vm1443_vm14, %v1737_v40 }
 0x30a   : > { %1762 = vmatpush1.bf16.msra.mxu0 %v1742_v44  ;;  %1834 = vmatpush1.bf16.msra.mxu1 %v1814_v41  ;;  %v2119_v48 = vpop.permute.xlu0 %2118 }
 0x30b   : > { %v2121_v49 = vpop.permute.xlu1 %2120  ;;  %1851 = vmatprep.mubr.bf16.mxu1 %v2651_v9 }
 0x30c   : > { %v2124_v6 = vsel %vm3122_vm0, %v2119_v48, %v2121_v49 }
 0x30d   : > { %2553 = vmatmul.mubr.msk.bf16.vlgmr.msra.gmra.mxu0 %vm1439_vm11, %v2548_v45  ;;  %v2130_v60 = vsel %vm1443_vm14, %v2124_v6, 0 }
 0x30e   : > { %1972 = vmatprep.mubr.bf16.mxu0 %v2651_v9  ;;  %v1924_v53 = vpop.permute.xlu0 %1923 }
 0x30f   : > { %v1926_v56 = vpop.permute.xlu1 %1925 }
 0x310   : > { %v1929_v57 = vsel %vm947_vm9, %v1924_v53, %v1926_v56  ;;  %v1930_v58 = vsel %vm947_vm9, %v1926_v56, %v1928_v30 }
 0x311   : > { %v1935_v62 = vsel %vm1443_vm14, %v1929_v57, 0  ;;  %2559 = vmatmul.mubr.msk.bf16.vlgmr.msra.gmra.mxu1 %vm1439_vm11, %v2554_v52  ;;  %2567 = vmatprep.subr.msk.bf16.mxu0 %vm1443_vm14, %v1930_v58 }
 0x312   : > { %1955 = vmatpush1.bf16.msra.mxu0 %v1935_v62  ;;  %2095 = vmatprep.mubr.bf16.mxu1 %v2651_v9  ;;  %v2049_v0 = vpop.permute.xlu0 %2048 }
 0x313   : > { %v2047_v2 = vpop.permute.xlu1 %2046  ;;  %v2053_v3 = vsel %vm1078_vm10, %v2049_v0, %v2051_v31 }
 0x314   : > { %v2052_v4 = vsel %vm1078_vm10, %v2047_v2, %v2049_v0  ;;  %2576 = vmatprep.subr.msk.bf16.mxu1 %vm1443_vm14, %v2053_v3 }
 0x315   : > { %v2058_v5 = vsel %vm1443_vm14, %v2052_v4, 0  ;;  %2568 = vmatmul.mubr.msk.bf16.vlgmr.msra.gmra.mxu0 %vm1439_vm11, %v2563_v63 }
 0x316   : > { %2078 = vmatpush1.bf16.msra.mxu1 %v2058_v5  ;;  %2167 = vmatprep.mubr.bf16.mxu0 %v2651_v9  ;;  %v2123_v10 = vpop.permute.xlu0 %2122 }
 0x317   : > { %v2240_v11 = vpop.permute.xlu1 %2239  ;;  %v2125_v12 = vsel %vm3123_vm1, %v2121_v49, %v2123_v10 }
 0x318   : > { %2582 = vmatprep.subr.msk.bf16.mxu0 %vm1443_vm14, %v2125_v12 }
 0x319   : > { %2577 = vmatmul.mubr.msk.bf16.vlgmr.msra.gmra.mxu1 %vm1439_vm11, %v2572_v7  ;;  %2150 = vmatpush1.bf16.msra.mxu0 %v2130_v60 }
 0x31a   : > { %2288 = vmatprep.mubr.bf16.mxu1 %v2651_v9  ;;  %v2242_v13 = vpop.permute.xlu0 %2241 }
 0x31b   : > { %v2244_v14 = vpop.permute.xlu1 %2243  ;;  %v2245_v17 = vsel %vm3124_vm2, %v2240_v11, %v2242_v13 }
 0x31c   : > { %v2246_v18 = vsel %vm3125_vm3, %v2242_v13, %v2244_v14  ;;  %v2251_v19 = vsel %vm1443_vm14, %v2245_v17, 0 }
 0x31d   : > { %2583 = vmatmul.mubr.msk.bf16.vlgmr.msra.gmra.mxu0 %vm1439_vm11, %v2578_v61  ;;  %2591 = vmatprep.subr.msk.bf16.mxu1 %vm1443_vm14, %v2246_v18 }
 0x31e   : > { %2271 = vmatpush1.bf16.msra.mxu1 %v2251_v19  ;;  %2371 = vmatprep.mubr.bf16.mxu0 %v2651_v9 }
 0x321   : > { %2592 = vmatmul.mubr.msk.bf16.vlgmr.msra.gmra.mxu1 %vm1439_vm11, %v2587_v20 }
 0x327   : > { %v2303_v3 = vpop.permute.xlu0 %2302 }
 0x328   : > { %v2311_v12 = vpop.permute.xlu1 %2310 }
 0x343   : > { %v1539_v21 = vpop.f32.mrf.mxu0 }
 0x345   : > { %v1541_v22 = vpop.f32.mrf.mxu0 }
 0x347   : > { %v1543_v23 = vpop.f32.mrf.mxu0 }
 0x348   : > { %v2317_v23 = vld [vmem:[%s3117_s8] sm:$0x1] }
 0x349   : > { %v1544_v24 = vpop.f32.mrf.mxu0 }
 0x34a   : > { %v2324_v24 = vpop.permute.xlu0 %2323 }
 0x3b9   : > { %v1484_v25 = vpop.f32.mrf.mxu1 }
 0x3ba   : > { %v1540_v31 = vadd.f32 %v1539_v21, %v1484_v25 }
 0x3bb   : > { %v1486_v26 = vpop.f32.mrf.mxu1 }
 0x3bc   : > { %v1542_v34 = vadd.f32 %v1541_v22, %v1486_v26  ;;  %v2329_v26 = vrot.slane %v2324_v24, %v2743_v16 }
 0x3bd   : > { %v1488_v27 = vpop.f32.mrf.mxu1 }
 0x3bf   : > { %v1489_v43 = vpop.f32.mrf.mxu1 }
 0x3c9   : > { %v1658_v28 = vpop.f32.mrf.mxu1 }
 0x3ca   : > { %v1665_v35 = vadd.f32 %v1658_v28, %v1540_v31 }
 0x3cb   : > { %v1660_v50 = vpop.f32.mrf.mxu1 }
 0x3cc   : > { %v1666_v37 = vadd.f32 %v1660_v50, %v1542_v34 }
 0x3cd   : > { %v1662_v42 = vpop.f32.mrf.mxu1  ;;  %v1781_v51 = vpop.f32.mrf.mxu0 }
 0x3ce   : > { %v1788_v47 = vadd.f32 %v1781_v51, %v1665_v35 }
 0x3cf   : > { %v1663_v54 = vpop.f32.mrf.mxu1  ;;  %v1783_v55 = vpop.f32.mrf.mxu0 }
 0x3d0   : > { %v1789_v39 = vadd.f32 %v1783_v55, %v1666_v37 }
 0x3d1   : > { %v1785_v59 = vpop.f32.mrf.mxu0  ;;  %v1853_v29 = vpop.f32.mrf.mxu1 }
 0x3d2   : > { %v1860_v40 = vadd.f32 %v1853_v29, %v1788_v47 }
 0x3d3   : > { %v1786_v30 = vpop.f32.mrf.mxu0  ;;  %v1855_v9 = vpop.f32.mrf.mxu1 }
 0x3d4   : > { %v1861_v45 = vadd.f32 %v1855_v9, %v1789_v39 }
 0x3d5   : > { %v1857_v32 = vpop.f32.mrf.mxu1  ;;  %v1974_v33 = vpop.f32.mrf.mxu0 }
 0x3d6   : > { %v1981_v48 = vadd.f32 %v1974_v33, %v1860_v40 }
 0x3d7   : > { %v1858_v8 = vpop.f32.mrf.mxu1  ;;  %v1976_v36 = vpop.f32.mrf.mxu0 }
 0x3d8   : > { %v1982_v53 = vadd.f32 %v1976_v36, %v1861_v45 }
 0x3d9   : > { %v1978_v46 = vpop.f32.mrf.mxu0  ;;  %v2097_v38 = vpop.f32.mrf.mxu1 }
 0x3da   : > { %v2104_v56 = vadd.f32 %v2097_v38, %v1981_v48 }
 0x3db   : > { %v1979_v41 = vpop.f32.mrf.mxu0  ;;  %v2099_v44 = vpop.f32.mrf.mxu1 }
 0x3dc   : > { %v2105_v62 = vadd.f32 %v2099_v44, %v1982_v53 }
 0x3dd   : > { %v2101_v49 = vpop.f32.mrf.mxu1  ;;  %v2169_v52 = vpop.f32.mrf.mxu0 }
 0x3de   : > { %v2176_v63 = vadd.f32 %v2169_v52, %v2104_v56 }
 0x3df   : > { %v2102_v57 = vpop.f32.mrf.mxu1  ;;  %v2171_v58 = vpop.f32.mrf.mxu0 }
 0x3e0   : > { %v2177_v4 = vadd.f32 %v2171_v58, %v2105_v62 }
 0x3e1   : > { %v2173_v0 = vpop.f32.mrf.mxu0  ;;  %v2290_v2 = vpop.f32.mrf.mxu1 }
 0x3e2   : > { %v2297_v5 = vadd.f32 %v2290_v2, %v2176_v63 }
 0x3e3   : > { %v2174_v6 = vpop.f32.mrf.mxu0  ;;  %v2292_v7 = vpop.f32.mrf.mxu1 }
 0x3e4   : > { %v2305_v10 = vmul.f32 %v2303_v3, %v2297_v5  ;;  %v2298_v11 = vadd.f32 %v2292_v7, %v2177_v4 }
 0x3e5   : > { %v2294_v60 = vpop.f32.mrf.mxu1 }
 0x3e6   : > { %v2313_v61 = vadd.f32 %v2311_v12, %v2305_v10  ;;  %v2306_v13 = vmul.f32 %v2303_v3, %v2298_v11 }
 0x3e7   : > { %v2295_v14 = vpop.f32.mrf.mxu1 }
 0x3e8   : > { %v2315_v17 = vmax.f32 %v2313_v61, 0.0  ;;  %v2314_v18 = vadd.f32 %v2311_v12, %v2306_v13 }
 0x3ea   : > { %v2316_v19 = vmax.f32 %v2314_v18, 0.0  ;;  %v2318_v20 = vpack.c.bf16 %v2315_v17, %v2315_v17 }
 0x3ec   : > { %v2319_v21 = vpack.c.bf16 %v2316_v19, %v2316_v19  ;;  %v2334_v22 = vsel %vm1443_vm14, %v2318_v20, 0 }
 0x3ee   : > { %2593 = vmatprep.subr.msk.bf16.mxu0 %vm1443_vm14, %v2319_v21 }
 0x3ef   : > { %2354 = vmatpush1.bf16.msra.mxu0 %v2334_v22 }
 0x3f2   : > { %2594 = vmatmul.mubr.msk.bf16.vlgmr.msra.gmra.mxu0 %vm1439_vm11, %v2317_v23 }
 0x4b2   : > { %v2373_v25 = vpop.f32.mrf.mxu0 }
 0x4b3   : > { %v2374_v43 = vadd.f32 %v2373_v25, %v2329_v26 }
 0x4b4   : > { %v2375_v27 = vpop.f32.mrf.mxu0 }
 0x4b5   : > { %v2376_v28 = vadd.f32 %v2375_v27, %v2329_v26 }
 0x4b6   : > { %v2377_v50 = vpop.f32.mrf.mxu0 }
 0x4b7   : > { %v2382_v42 = vcombine.low %v2374_v43, %v2376_v28 }
 0x4b8   : > { %v2378_v51 = vpop.f32.mrf.mxu0 }
 0x4b9   : > { %v2389_v54 = vrot.slane %v2382_v42, %v2741_v15 }
 0x4bb   : > { %v2396_v55 = vrot.slane %v2389_v54, %v2741_v15 }
 0x4bd   : > { %2402 = vst.msk [vmem:[%s359_s27] sm:$0x3] %vm2400_vm4, %v2396_v55 }
 0x4be PF: > { %s22_s15 = sadd.s32 1, %s2641_s15  }
 0x4bf   : > { %p19_p4 = scmp.ge.s32.totalorder %s22_s15, 4  }
 0x4c1   :  { %21 = sbr.rel (!%p19_p4) target bundleno = 3 (0x3), region = 111 }

</bundles_post_ra>
